<compile_context>
chip_gen: v7x
topology: tpu7x:2x2x1
jax: 0.10.0
libtpu: 0.0.40
codegen_flags: <defaults>
</compile_context>

<pallas_src>
import jax
import jax.numpy as jnp
from jax.experimental import pallas as pl
from jax.experimental.pallas import tpu as pltpu


# --------------------------------------------------------------------------
# Kernel 1: char-CNN encoder.  Single grid step.
#   x : ((C+2)*BT, Ec) bf16   char-major rows (padded char index major,
#                             word index minor)
#   w : (3*Ec, Hc) bf16, b : (1, Hc) f32
#   o : (BT, Hc) f32 = max_c relu(sum_k x[(c+k)*BT:(c+k+1)*BT] @ W_k + b)
# The k=3 conv is three shifted matmuls accumulated in f32 (no window
# duplication); max-pool over chars uses static sublane slices.
# --------------------------------------------------------------------------
def char_cnn_kernel(x_ref, w_ref, b_ref, o_ref):
    bt = o_ref.shape[0]
    ec = x_ref.shape[1]
    n_char = x_ref.shape[0] // bt - 2
    y = jnp.dot(x_ref[0:n_char * bt, :], w_ref[0:ec, :],
                preferred_element_type=jnp.float32)
    y = y + jnp.dot(x_ref[bt:(n_char + 1) * bt, :], w_ref[ec:2 * ec, :],
                    preferred_element_type=jnp.float32)
    y = y + jnp.dot(x_ref[2 * bt:(n_char + 2) * bt, :], w_ref[2 * ec:3 * ec, :],
                    preferred_element_type=jnp.float32)
    y = jnp.maximum(y + b_ref[...], 0.0)                            # ReLU
    acc = y[0:bt, :]
    for c in range(1, n_char):                                      # static unroll
        acc = jnp.maximum(acc, y[c * bt:(c + 1) * bt, :])
    # TODO(synk): Hc=16 keeps this store lane-sparse; pad toward 128 at scale.
    o_ref[...] = acc


def char_encoder(x_cm, w, b, num_words):
    rows, ec = x_cm.shape
    hc = w.shape[1]
    return pl.pallas_call(
        char_cnn_kernel,
        out_shape=jax.ShapeDtypeStruct((num_words, hc), jnp.float32),
        grid=(1,),
        in_specs=[pl.BlockSpec((rows, ec), lambda i: (0, 0)),
                  pl.BlockSpec((3 * ec, hc), lambda i: (0, 0)),
                  pl.BlockSpec((1, hc), lambda i: (0, 0))],
        out_specs=pl.BlockSpec((num_words, hc), lambda i: (0, 0)),
        compiler_params=pltpu.CompilerParams(dimension_semantics=("arbitrary",)),
    )(x_cm, w, b)


# --------------------------------------------------------------------------
# Kernel 2: matmul + bias, row-tiled (hoisted LSTM input projection of BOTH
# directions at once: (T*B, Din) @ (Din, 8H) + b).
# --------------------------------------------------------------------------
def linear_kernel(x_ref, w_ref, b_ref, o_ref):
    o_ref[...] = (jnp.dot(x_ref[...], w_ref[...],
                          preferred_element_type=jnp.float32) + b_ref[...])


def linear(x, w, b, block_m=512):
    m, k = x.shape
    n = w.shape[1]
    bm = m if m <= block_m else block_m          # row tiling at production sizes
    return pl.pallas_call(
        linear_kernel,
        out_shape=jax.ShapeDtypeStruct((m, n), jnp.float32),
        grid=(pl.cdiv(m, bm),),
        in_specs=[pl.BlockSpec((bm, k), lambda i: (i, 0)),
                  pl.BlockSpec((k, n), lambda i: (0, 0)),
                  pl.BlockSpec((1, n), lambda i: (0, 0))],
        out_specs=pl.BlockSpec((bm, n), lambda i: (i, 0)),
        compiler_params=pltpu.CompilerParams(
            dimension_semantics=("parallel",),
            vmem_limit_bytes=64 * 1024 * 1024),
    )(x, w, b)


# --------------------------------------------------------------------------
# Kernel 3: fused bidirectional LSTM recurrence (single grid step, single
# time loop for BOTH directions -> the two serial chains overlap on every
# chip generation, instead of running back-to-back on single-TC v5e/v6e).
#   gx  : (T, B, 8H) f32  precomputed x@W_ih + b, cols = [fwd i,f,g,o | bwd]
#   m   : (T, B, 1)  f32  mask
#   whh : (2H, 8H)   bf16 block-diagonal [[whh_f, 0], [0, whh_b]]
#   out : (T, B, 2H) f32  cols = [fwd h | bwd h]  (written in-kernel, no
#                          per-layer concat glue)
# PyTorch gate order i, f, g, o.  Mask gating reproduces pack_padded_sequence
# behaviour (zero output, frozen state on padded steps).
# --------------------------------------------------------------------------
def bilstm_kernel(gx_ref, m_ref, whh_ref, o_ref):
    n_steps = gx_ref.shape[0]
    batch = gx_ref.shape[1]
    hid = o_ref.shape[2] // 2
    whh = whh_ref[...]                            # loop-invariant load hoisted

    def cell(gates, c_prev):
        i_g = jax.nn.sigmoid(gates[:, 0:hid])
        f_g = jax.nn.sigmoid(gates[:, hid:2 * hid])
        g_g = jnp.tanh(gates[:, 2 * hid:3 * hid])
        o_g = jax.nn.sigmoid(gates[:, 3 * hid:4 * hid])
        c_new = f_g * c_prev + i_g * g_g
        h_new = o_g * jnp.tanh(c_new)
        return h_new, c_new

    def body(i, carry):
        h, c = carry                              # (B, 2H) each: [fwd | bwd]
        tb = n_steps - 1 - i
        # one block-diagonal MXU dot = recurrent matmul for BOTH directions
        hh = jnp.dot(h.astype(whh.dtype), whh,
                     preferred_element_type=jnp.float32)            # (B, 8H)
        gx_i = gx_ref[i]                          # fwd gates live at time i
        gx_t = gx_ref[tb]                         # bwd gates live at time T-1-i
        gates_f = gx_i[:, 0:4 * hid] + hh[:, 0:4 * hid]
        gates_b = gx_t[:, 4 * hid:8 * hid] + hh[:, 4 * hid:8 * hid]
        h_f, c_f = cell(gates_f, c[:, 0:hid])
        h_b, c_b = cell(gates_b, c[:, hid:2 * hid])
        m_f = m_ref[i] > 0.0                      # (B, 1)
        m_b = m_ref[tb] > 0.0
        # padded steps: output zero, keep previous state (select, not blend)
        o_ref[i, :, 0:hid] = jnp.where(m_f, h_f, 0.0)
        o_ref[tb, :, hid:2 * hid] = jnp.where(m_b, h_b, 0.0)
        h_next = jnp.concatenate(
            [jnp.where(m_f, h_f, h[:, 0:hid]),
             jnp.where(m_b, h_b, h[:, hid:2 * hid])], axis=-1)
        c_next = jnp.concatenate(
            [jnp.where(m_f, c_f, c[:, 0:hid]),
             jnp.where(m_b, c_b, c[:, hid:2 * hid])], axis=-1)
        return h_next, c_next

    h0 = jnp.zeros((batch, 2 * hid), jnp.float32)
    c0 = jnp.zeros((batch, 2 * hid), jnp.float32)
    jax.lax.fori_loop(0, n_steps, body, (h0, c0),
                      unroll=min(n_steps, 8))     # capped unroll


def bilstm(gx_tm, mask_tm, whh_bd):
    T, B, G8 = gx_tm.shape
    H2 = whh_bd.shape[0]
    # TODO(synk): at production T, block the time axis (emit_pipeline with
    #             h/c carried in scratch) so gx need not be fully VMEM-resident.
    return pl.pallas_call(
        bilstm_kernel,
        out_shape=jax.ShapeDtypeStruct((T, B, H2), jnp.float32),
        grid=(1,),
        in_specs=[pl.BlockSpec((T, B, G8), lambda i: (0, 0, 0)),
                  pl.BlockSpec((T, B, 1), lambda i: (0, 0, 0)),
                  pl.BlockSpec((H2, G8), lambda i: (0, 0))],
        out_specs=pl.BlockSpec((T, B, H2), lambda i: (0, 0, 0)),
        compiler_params=pltpu.CompilerParams(
            dimension_semantics=("arbitrary",),
            vmem_limit_bytes=64 * 1024 * 1024),
    )(gx_tm, mask_tm, whh_bd)


# --------------------------------------------------------------------------
# Kernel 4: fused hidden2pos linear + CRF Viterbi forward recurrence
# (mask=None).  The hidden2pos dots are hoisted OUT of the recurrence: all T
# emission matmuls are issued back-to-back before the loop (independent, so
# they pipeline in the MXU and stay off the serial Viterbi chain) into a VMEM
# scratch -- the lane-sparse (T,B,P) emissions never touch HBM.
#   transT[j, i] = transitions[i -> j]
# Outputs: backpointers (T, B, P) int32 and final (end-augmented) scores (B,P).
# --------------------------------------------------------------------------
def viterbi_kernel(rnn_ref, w_ref, b_ref, start_ref, end_ref, transT_ref,
                   bp_ref, score_ref, emit_ref):
    n_steps = rnn_ref.shape[0]
    batch = rnn_ref.shape[1]
    n_tags = transT_ref.shape[0]

    w = w_ref[...]                                 # loop-invariant loads hoisted
    bias = b_ref[...]
    for t in range(n_steps):                       # static, independent dots
        emit_ref[t] = (jnp.dot(rnn_ref[t], w,
                               preferred_element_type=jnp.float32) + bias)
    # TODO(synk): at large T*B collapse the loop above into one (T*B,F)@(F,P) dot.

    bp_ref[0] = jnp.zeros((batch, n_tags), jnp.int32)
    score0 = start_ref[...] + emit_ref[0]                           # (B, P)

    trans_b = transT_ref[...][None, :, :]          # hoisted load + broadcast
    col_idx = jax.lax.broadcasted_iota(jnp.int32, (batch, n_tags, n_tags), 2)

    def body(t, score):
        # cand[b, j, i] = score[b, i] + transitions[i -> j]
        cand = score[:, None, :] + trans_b
        best = jnp.max(cand, axis=-1)                               # (B, P)
        # first-max index (same tie-break as argmax), single extra reduction
        is_max = cand == best[:, :, None]
        idx = jnp.min(jnp.where(is_max, col_idx, n_tags), axis=-1)
        bp_ref[t] = idx.astype(jnp.int32)
        return best + emit_ref[t]

    score = jax.lax.fori_loop(1, n_steps, body, score0,
                              unroll=min(n_steps - 1, 8))           # capped
    score_ref[...] = score + end_ref[...]                           # written once


def viterbi_forward(rnn_tm, w, b, start, end, transT):
    T, B, F = rnn_tm.shape
    P = transT.shape[0]
    bp, score = pl.pallas_call(
        viterbi_kernel,
        out_shape=(jax.ShapeDtypeStruct((T, B, P), jnp.int32),
                   jax.ShapeDtypeStruct((B, P), jnp.float32)),
        grid=(1,),
        in_specs=[pl.BlockSpec((T, B, F), lambda i: (0, 0, 0)),
                  pl.BlockSpec((F, P), lambda i: (0, 0)),
                  pl.BlockSpec((1, P), lambda i: (0, 0)),
                  pl.BlockSpec((1, P), lambda i: (0, 0)),
                  pl.BlockSpec((1, P), lambda i: (0, 0)),
                  pl.BlockSpec((P, P), lambda i: (0, 0))],
        out_specs=(pl.BlockSpec((T, B, P), lambda i: (0, 0, 0)),
                   pl.BlockSpec((B, P), lambda i: (0, 0))),
        scratch_shapes=[pltpu.VMEM((T, B, P), jnp.float32)],
        compiler_params=pltpu.CompilerParams(
            dimension_semantics=("arbitrary",),
            vmem_limit_bytes=64 * 1024 * 1024),
    )(rnn_tm, w, b, start, end, transT)
    return bp, score


def viterbi_backtrack(bp, score):
    # data-dependent gather -> plain JAX glue
    best_last = jnp.argmax(score, axis=-1).astype(jnp.int32)        # (B,)

    def step(tag, bp_t):
        prev = jnp.take_along_axis(bp_t, tag[:, None], axis=-1)[:, 0]
        return prev, prev

    bps_rev = bp[1:][::-1]                                          # bp[T-1] .. bp[1]
    _, prev_tags = jax.lax.scan(step, best_last, bps_rev)           # tags T-2 .. 0
    tags_tm = jnp.concatenate([prev_tags[::-1], best_last[None, :]], axis=0)
    return tags_tm.T.astype(jnp.int32)                              # (B, T)


# --------------------------------------------------------------------------
# Full forward pass (== POSTagger.forward in eval mode)
# --------------------------------------------------------------------------
def pos_tagger_forward(params, inputs, chars, mask):
    B, T = inputs.shape
    C = chars.shape[2]

    # embeddings (table lookups are glue)
    wd_embed = params["wd_embedding"][inputs]                       # (B, T, Ew)
    ch_embed = params["char_embedding"][chars]                      # (B, T, C, Ec)
    Ec = ch_embed.shape[-1]

    # char path: one pad + char-major permute; the conv windows themselves
    # are built inside the kernel (three shifted matmuls) -> no 3x duplicate.
    ce_pad = jnp.pad(ch_embed, ((0, 0), (0, 0), (1, 1), (0, 0)))    # (B,T,C+2,Ec)
    x_cm = jnp.transpose(ce_pad, (2, 0, 1, 3)).reshape((C + 2) * B * T, Ec)
    char_repr = char_encoder(x_cm.astype(jnp.bfloat16),
                             params["char_w"], params["char_b"], B * T)
    char_repr = char_repr.reshape(B, T, -1)                         # (B, T, Hc)

    embed = jnp.concatenate([char_repr, wd_embed], axis=2)          # (B, T, Hc+Ew)
    # eval mode: embed_dropout / linear_dropout are identity

    # BiLSTM encoder (time-major)
    x_tm = jnp.transpose(embed, (1, 0, 2))                          # (T, B, F)
    mask_tm = jnp.transpose(mask.astype(jnp.float32), (1, 0))[:, :, None]

    layer_in = x_tm
    for p in params["lstm"]:
        Tt, Bb, Din = layer_in.shape
        H = p["whh_bd"].shape[0] // 2
        # hoisted input projection for both directions in one matmul; the
        # (T*B, 8H) -> (T, B, 8H) reshape is layout-free (no slice/stack).
        gx = linear(layer_in.reshape(Tt * Bb, Din).astype(jnp.bfloat16),
                    p["wih_fb"], p["b_fb"])                         # (T*B, 8H) f32
        gx_tm = gx.reshape(Tt, Bb, 8 * H)
        layer_in = bilstm(gx_tm, mask_tm, p["whh_bd"])              # (T, B, 2H)
    rnn_out_tm = layer_in

    # fused hidden2pos + CRF Viterbi decode (mask=None, as in reference forward)
    bp, final_score = viterbi_forward(rnn_out_tm, params["h2p_w"],
                                      params["h2p_b"], params["crf_start"],
                                      params["crf_end"], params["crf_transT"])
    return viterbi_backtrack(bp, final_score)                       # (B, T) int32


# --------------------------------------------------------------------------
# Deterministic synthetic parameter initialization
# --------------------------------------------------------------------------
def init_params(key, vocab_size, char_vocab, Ew, Ec, Hc, H, nb_layers, P):
    ks = jax.random.split(key, 10)

    def n(k, shape, s=0.1, dtype=jnp.float32):
        return (s * jax.random.normal(k, shape, jnp.float32)).astype(dtype)

    params = dict(
        wd_embedding=n(ks[0], (vocab_size, Ew), 0.5),
        char_embedding=n(ks[1], (char_vocab, Ec), 0.5),
        char_w=n(ks[2], (3 * Ec, Hc), dtype=jnp.bfloat16),
        char_b=n(ks[3], (1, Hc)),
        h2p_w=n(ks[4], (2 * H, P)),
        h2p_b=n(ks[5], (1, P)),
        crf_start=n(ks[6], (1, P)),
        crf_end=n(ks[7], (1, P)),
        crf_transT=n(ks[8], (P, P)),   # transposed transition matrix [next, prev]
    )
    lstm = []
    kk = jax.random.split(ks[9], nb_layers * 6)
    din = Ew + Hc
    for l in range(nb_layers):
        wih_f = n(kk[6 * l + 0], (din, 4 * H))
        whh_f = n(kk[6 * l + 1], (H, 4 * H))
        b_f = n(kk[6 * l + 2], (1, 4 * H))
        wih_b = n(kk[6 * l + 3], (din, 4 * H))
        whh_b = n(kk[6 * l + 4], (H, 4 * H))
        b_b = n(kk[6 * l + 5], (1, 4 * H))
        # block-diagonal recurrent weight: rows 0:H (fwd h) feed cols 0:4H
        # (fwd gates), rows H:2H (bwd h) feed cols 4H:8H (bwd gates)
        z = jnp.zeros((H, 4 * H), jnp.float32)
        whh_bd = jnp.concatenate(
            [jnp.concatenate([whh_f, z], axis=1),
             jnp.concatenate([z, whh_b], axis=1)], axis=0)          # (2H, 8H)
        lstm.append(dict(
            wih_fb=jnp.concatenate([wih_f, wih_b], axis=1).astype(jnp.bfloat16),
            b_fb=jnp.concatenate([b_f, b_b], axis=1),               # (1, 8H) f32
            whh_bd=whh_bd.astype(jnp.bfloat16),
        ))
        din = 2 * H
    params["lstm"] = lstm
    return params


if __name__ == "__main__":
    # small, module-consistent shapes
    B, T, C = 2, 8, 8                      # batch, seq len, max chars per word
    vocab_size, char_vocab = 50, 30
    Ew, Ec, Hc = 32, 16, 16                # word embed, char embed, char_hidden_size
    H, nb_layers, P = 32, 1, 8             # hidden_size, nb_layers, pos_size

    key = jax.random.PRNGKey(0)
    kp, ki, kc = jax.random.split(key, 3)
    params = init_params(kp, vocab_size, char_vocab, Ew, Ec, Hc, H, nb_layers, P)

    inputs = jax.random.randint(ki, (B, T), 0, vocab_size, dtype=jnp.int32)
    chars = jax.random.randint(kc, (B, T, C), 0, char_vocab, dtype=jnp.int32)
    mask = jnp.array([[1.0] * T, [1.0] * 6 + [0.0] * 2], dtype=jnp.float32)

    best_tag_seq = jax.jit(pos_tagger_forward)(params, inputs, chars, mask)
    best_tag_seq = jax.block_until_ready(best_tag_seq)
    assert best_tag_seq.shape == (B, T) and best_tag_seq.dtype == jnp.int32
    print("KERNEL_OK")
</pallas_src>

<mosaic_0001>
module attributes {stable_mosaic.version = 11 : i64} {
  func.func @char_cnn_kernel(%arg0: i32, %arg1: memref<160x16xbf16, #tpu.memory_space<vmem>>, %arg2: memref<48x16xbf16, #tpu.memory_space<vmem>>, %arg3: memref<1x16xf32, #tpu.memory_space<vmem>>, %arg4: memref<16x16xf32, #tpu.memory_space<vmem>>) attributes {dimension_semantics = [#tpu.dimension_semantics<arbitrary>], iteration_bounds = array<i64: 1>, scalar_prefetch = 0 : i64, scratch_operands = 0 : i64, tpu.core_type = #tpu.core_type<tc>, window_params = [{pipeline_mode = #tpu.pipeline_mode<synchronous>, transform_indices = @transform_0, window_bounds = array<i64: 160, 16>}, {pipeline_mode = #tpu.pipeline_mode<synchronous>, transform_indices = @transform_1, window_bounds = array<i64: 48, 16>}, {pipeline_mode = #tpu.pipeline_mode<synchronous>, transform_indices = @transform_2, window_bounds = array<i64: 1, 16>}, {pipeline_mode = #tpu.pipeline_mode<synchronous>, transform_indices = @transform_3, window_bounds = array<i64: 16, 16>}]} {
    %c0 = arith.constant 0 : index
    %c0_0 = arith.constant 0 : index
    %0 = vector.load %arg1[%c0, %c0_0] : memref<160x16xbf16, #tpu.memory_space<vmem>>, vector<128x16xbf16>
    %c0_1 = arith.constant 0 : index
    %c0_2 = arith.constant 0 : index
    %1 = vector.load %arg2[%c0_1, %c0_2] : memref<48x16xbf16, #tpu.memory_space<vmem>>, vector<16x16xbf16>
    %cst = arith.constant dense<0.000000e+00> : vector<128x16xf32>
    %2 = tpu.matmul %0, %1, %cst {dimension_numbers = #tpu.dot_dimension_numbers<[1], [0], [0], [1], [0, 0, 1, 1], [], []>} : vector<128x16xbf16>, vector<16x16xbf16>, vector<128x16xf32> -> vector<128x16xf32>
    %c16 = arith.constant 16 : index
    %c0_3 = arith.constant 0 : index
    %3 = vector.load %arg1[%c16, %c0_3] : memref<160x16xbf16, #tpu.memory_space<vmem>>, vector<128x16xbf16>
    %c16_4 = arith.constant 16 : index
    %c0_5 = arith.constant 0 : index
    %4 = vector.load %arg2[%c16_4, %c0_5] : memref<48x16xbf16, #tpu.memory_space<vmem>>, vector<16x16xbf16>
    %cst_6 = arith.constant dense<0.000000e+00> : vector<128x16xf32>
    %5 = tpu.matmul %3, %4, %cst_6 {dimension_numbers = #tpu.dot_dimension_numbers<[1], [0], [0], [1], [0, 0, 1, 1], [], []>} : vector<128x16xbf16>, vector<16x16xbf16>, vector<128x16xf32> -> vector<128x16xf32>
    %6 = arith.addf %2, %5 : vector<128x16xf32>
    %c32 = arith.constant 32 : index
    %c0_7 = arith.constant 0 : index
    %7 = vector.load %arg1[%c32, %c0_7] : memref<160x16xbf16, #tpu.memory_space<vmem>>, vector<128x16xbf16>
    %c32_8 = arith.constant 32 : index
    %c0_9 = arith.constant 0 : index
    %8 = vector.load %arg2[%c32_8, %c0_9] : memref<48x16xbf16, #tpu.memory_space<vmem>>, vector<16x16xbf16>
    %cst_10 = arith.constant dense<0.000000e+00> : vector<128x16xf32>
    %9 = tpu.matmul %7, %8, %cst_10 {dimension_numbers = #tpu.dot_dimension_numbers<[1], [0], [0], [1], [0, 0, 1, 1], [], []>} : vector<128x16xbf16>, vector<16x16xbf16>, vector<128x16xf32> -> vector<128x16xf32>
    %10 = arith.addf %6, %9 : vector<128x16xf32>
    %c0_11 = arith.constant 0 : index
    %c0_12 = arith.constant 0 : index
    %11 = vector.load %arg3[%c0_11, %c0_12] : memref<1x16xf32, #tpu.memory_space<vmem>>, vector<1x16xf32>
    %12 = vector.broadcast %11 : vector<1x16xf32> to vector<128x16xf32>
    %13 = arith.addf %10, %12 : vector<128x16xf32>
    %cst_13 = arith.constant 0.000000e+00 : f32
    %14 = vector.broadcast %cst_13 : f32 to vector<128x16xf32>
    %15 = arith.maximumf %13, %14 : vector<128x16xf32>
    %16 = vector.extract_strided_slice %15 {offsets = [0, 0], sizes = [16, 16], strides = [1, 1]} : vector<128x16xf32> to vector<16x16xf32>
    %17 = vector.extract_strided_slice %15 {offsets = [16, 0], sizes = [16, 16], strides = [1, 1]} : vector<128x16xf32> to vector<16x16xf32>
    %18 = arith.maximumf %16, %17 : vector<16x16xf32>
    %19 = vector.extract_strided_slice %15 {offsets = [32, 0], sizes = [16, 16], strides = [1, 1]} : vector<128x16xf32> to vector<16x16xf32>
    %20 = arith.maximumf %18, %19 : vector<16x16xf32>
    %21 = vector.extract_strided_slice %15 {offsets = [48, 0], sizes = [16, 16], strides = [1, 1]} : vector<128x16xf32> to vector<16x16xf32>
    %22 = arith.maximumf %20, %21 : vector<16x16xf32>
    %23 = vector.extract_strided_slice %15 {offsets = [64, 0], sizes = [16, 16], strides = [1, 1]} : vector<128x16xf32> to vector<16x16xf32>
    %24 = arith.maximumf %22, %23 : vector<16x16xf32>
    %25 = vector.extract_strided_slice %15 {offsets = [80, 0], sizes = [16, 16], strides = [1, 1]} : vector<128x16xf32> to vector<16x16xf32>
    %26 = arith.maximumf %24, %25 : vector<16x16xf32>
    %27 = vector.extract_strided_slice %15 {offsets = [96, 0], sizes = [16, 16], strides = [1, 1]} : vector<128x16xf32> to vector<16x16xf32>
    %28 = arith.maximumf %26, %27 : vector<16x16xf32>
    %29 = vector.extract_strided_slice %15 {offsets = [112, 0], sizes = [16, 16], strides = [1, 1]} : vector<128x16xf32> to vector<16x16xf32>
    %30 = arith.maximumf %28, %29 : vector<16x16xf32>
    %c0_14 = arith.constant 0 : index
    %c0_15 = arith.constant 0 : index
    %31 = vector.load %arg4[%c0_14, %c0_15] : memref<16x16xf32, #tpu.memory_space<vmem>>, vector<16x16xf32>
    tpu.vector_store %arg4[%c0_14, %c0_15], %30 {strides = array<i32>} : memref<16x16xf32, #tpu.memory_space<vmem>>, vector<16x16xf32>,
    return
  }
  func.func @transform_0(%arg0: i32) -> (i32, i32) {
    %c0_i32 = arith.constant 0 : i32
    %c0_i32_0 = arith.constant 0 : i32
    %c0_i32_1 = arith.constant 0 : i32
    return %c0_i32, %c0_i32_0 : i32, i32
  }
  func.func @transform_1(%arg0: i32) -> (i32, i32) {
    %c0_i32 = arith.constant 0 : i32
    %c0_i32_0 = arith.constant 0 : i32
    %c0_i32_1 = arith.constant 0 : i32
    return %c0_i32, %c0_i32_0 : i32, i32
  }
  func.func @transform_2(%arg0: i32) -> (i32, i32) {
    %c0_i32 = arith.constant 0 : i32
    %c0_i32_0 = arith.constant 0 : i32
    %c0_i32_1 = arith.constant 0 : i32
    return %c0_i32, %c0_i32_0 : i32, i32
  }
  func.func @transform_3(%arg0: i32) -> (i32, i32) {
    %c0_i32 = arith.constant 0 : i32
    %c0_i32_0 = arith.constant 0 : i32
    %c0_i32_1 = arith.constant 0 : i32
    return %c0_i32, %c0_i32_0 : i32, i32
  }
}

module attributes {stable_mosaic.version = 11 : i64} {
  func.func @linear_kernel(%arg0: i32, %arg1: memref<16x48xbf16, #tpu.memory_space<vmem>>, %arg2: memref<48x256xbf16, #tpu.memory_space<vmem>>, %arg3: memref<1x256xf32, #tpu.memory_space<vmem>>, %arg4: memref<16x256xf32, #tpu.memory_space<vmem>>) attributes {dimension_semantics = [#tpu.dimension_semantics<parallel>], iteration_bounds = array<i64: 1>, scalar_prefetch = 0 : i64, scratch_operands = 0 : i64, tpu.core_type = #tpu.core_type<tc>, window_params = [{transform_indices = @transform_0, window_bounds = array<i64: 16, 48>}, {pipeline_mode = #tpu.pipeline_mode<synchronous>, transform_indices = @transform_1, window_bounds = array<i64: 48, 256>}, {pipeline_mode = #tpu.pipeline_mode<synchronous>, transform_indices = @transform_2, window_bounds = array<i64: 1, 256>}, {transform_indices = @transform_3, window_bounds = array<i64: 16, 256>}]} {
    %c0 = arith.constant 0 : index
    %c0_0 = arith.constant 0 : index
    %0 = vector.load %arg1[%c0, %c0_0] : memref<16x48xbf16, #tpu.memory_space<vmem>>, vector<16x48xbf16>
    %c0_1 = arith.constant 0 : index
    %c0_2 = arith.constant 0 : index
    %1 = vector.load %arg2[%c0_1, %c0_2] : memref<48x256xbf16, #tpu.memory_space<vmem>>, vector<48x256xbf16>
    %cst = arith.constant dense<0.000000e+00> : vector<16x256xf32>
    %2 = tpu.matmul %0, %1, %cst {dimension_numbers = #tpu.dot_dimension_numbers<[1], [0], [0], [1], [0, 0, 1, 1], [], []>} : vector<16x48xbf16>, vector<48x256xbf16>, vector<16x256xf32> -> vector<16x256xf32>
    %c0_3 = arith.constant 0 : index
    %c0_4 = arith.constant 0 : index
    %3 = vector.load %arg3[%c0_3, %c0_4] : memref<1x256xf32, #tpu.memory_space<vmem>>, vector<1x256xf32>
    %4 = vector.broadcast %3 : vector<1x256xf32> to vector<16x256xf32>
    %5 = arith.addf %2, %4 : vector<16x256xf32>
    %c0_5 = arith.constant 0 : index
    %c0_6 = arith.constant 0 : index
    %6 = vector.load %arg4[%c0_5, %c0_6] : memref<16x256xf32, #tpu.memory_space<vmem>>, vector<16x256xf32>
    tpu.vector_store %arg4[%c0_5, %c0_6], %5 {strides = array<i32>} : memref<16x256xf32, #tpu.memory_space<vmem>>, vector<16x256xf32>,
    return
  }
  func.func @transform_0(%arg0: i32) -> (i32, i32) {
    %c0_i32 = arith.constant 0 : i32
    %c0_i32_0 = arith.constant 0 : i32
    return %arg0, %c0_i32 : i32, i32
  }
  func.func @transform_1(%arg0: i32) -> (i32, i32) {
    %c0_i32 = arith.constant 0 : i32
    %c0_i32_0 = arith.constant 0 : i32
    %c0_i32_1 = arith.constant 0 : i32
    return %c0_i32, %c0_i32_0 : i32, i32
  }
  func.func @transform_2(%arg0: i32) -> (i32, i32) {
    %c0_i32 = arith.constant 0 : i32
    %c0_i32_0 = arith.constant 0 : i32
    %c0_i32_1 = arith.constant 0 : i32
    return %c0_i32, %c0_i32_0 : i32, i32
  }
  func.func @transform_3(%arg0: i32) -> (i32, i32) {
    %c0_i32 = arith.constant 0 : i32
    %c0_i32_0 = arith.constant 0 : i32
    return %arg0, %c0_i32 : i32, i32
  }
}

module attributes {stable_mosaic.version = 11 : i64} {
  func.func @bilstm_kernel(%arg0: i32, %arg1: memref<8x2x256xf32, #tpu.memory_space<vmem>>, %arg2: memref<8x2x1xf32, #tpu.memory_space<vmem>>, %arg3: memref<64x256xbf16, #tpu.memory_space<vmem>>, %arg4: memref<8x2x64xf32, #tpu.memory_space<vmem>>) attributes {dimension_semantics = [#tpu.dimension_semantics<arbitrary>], iteration_bounds = array<i64: 1>, scalar_prefetch = 0 : i64, scratch_operands = 0 : i64, tpu.core_type = #tpu.core_type<tc>, window_params = [{pipeline_mode = #tpu.pipeline_mode<synchronous>, transform_indices = @transform_0, window_bounds = array<i64: 8, 2, 256>}, {pipeline_mode = #tpu.pipeline_mode<synchronous>, transform_indices = @transform_1, window_bounds = array<i64: 8, 2, 1>}, {pipeline_mode = #tpu.pipeline_mode<synchronous>, transform_indices = @transform_2, window_bounds = array<i64: 64, 256>}, {pipeline_mode = #tpu.pipeline_mode<synchronous>, transform_indices = @transform_3, window_bounds = array<i64: 8, 2, 64>}]} {
    %c0 = arith.constant 0 : index
    %c0_0 = arith.constant 0 : index
    %0 = vector.load %arg3[%c0, %c0_0] : memref<64x256xbf16, #tpu.memory_space<vmem>>, vector<64x256xbf16>
    %cst = arith.constant 0.000000e+00 : f32
    %1 = vector.broadcast %cst : f32 to vector<2x64xf32>
    %cst_1 = arith.constant 0.000000e+00 : f32
    %2 = vector.broadcast %cst_1 : f32 to vector<2x64xf32>
    %c0_i32 = arith.constant 0 : i32
    %c7_i32 = arith.constant 7 : i32
    %3 = arith.subi %c7_i32, %c0_i32 : i32
    %4 = arith.truncf %1 : vector<2x64xf32> to vector<2x64xbf16>
    %cst_2 = arith.constant dense<0.000000e+00> : vector<2x256xf32>
    %5 = tpu.matmul %4, %0, %cst_2 {dimension_numbers = #tpu.dot_dimension_numbers<[1], [0], [0], [1], [0, 0, 1, 1], [], []>} : vector<2x64xbf16>, vector<64x256xbf16>, vector<2x256xf32> -> vector<2x256xf32>
    %6 = arith.index_cast %c0_i32 : i32 to index
    %c0_3 = arith.constant 0 : index
    %c0_4 = arith.constant 0 : index
    %7 = vector.load %arg1[%6, %c0_3, %c0_4] : memref<8x2x256xf32, #tpu.memory_space<vmem>>, vector<1x2x256xf32>
    %8 = vector.shape_cast %7 : vector<1x2x256xf32> to vector<2x256xf32>
    %9 = arith.index_cast %3 : i32 to index
    %c0_5 = arith.constant 0 : index
    %c0_6 = arith.constant 0 : index
    %10 = vector.load %arg1[%9, %c0_5, %c0_6] : memref<8x2x256xf32, #tpu.memory_space<vmem>>, vector<1x2x256xf32>
    %11 = vector.shape_cast %10 : vector<1x2x256xf32> to vector<2x256xf32>
    %12 = vector.extract_strided_slice %8 {offsets = [0, 0], sizes = [2, 128], strides = [1, 1]} : vector<2x256xf32> to vector<2x128xf32>
    %13 = vector.extract_strided_slice %5 {offsets = [0, 0], sizes = [2, 128], strides = [1, 1]} : vector<2x256xf32> to vector<2x128xf32>
    %14 = arith.addf %12, %13 : vector<2x128xf32>
    %15 = vector.extract_strided_slice %11 {offsets = [0, 128], sizes = [2, 128], strides = [1, 1]} : vector<2x256xf32> to vector<2x128xf32>
    %16 = vector.extract_strided_slice %5 {offsets = [0, 128], sizes = [2, 128], strides = [1, 1]} : vector<2x256xf32> to vector<2x128xf32>
    %17 = arith.addf %15, %16 : vector<2x128xf32>
    %18 = vector.extract_strided_slice %2 {offsets = [0, 0], sizes = [2, 32], strides = [1, 1]} : vector<2x64xf32> to vector<2x32xf32>
    %19 = vector.extract_strided_slice %14 {offsets = [0, 0], sizes = [2, 32], strides = [1, 1]} : vector<2x128xf32> to vector<2x32xf32>
    %20 = arith.negf %19 : vector<2x32xf32>
    %21 = math.exp %20 : vector<2x32xf32>
    %cst_7 = arith.constant 1.000000e+00 : f32
    %22 = vector.broadcast %cst_7 : f32 to vector<2x32xf32>
    %23 = arith.addf %22, %21 : vector<2x32xf32>
    %24 = arith.divf %22, %23 : vector<2x32xf32>
    %25 = vector.extract_strided_slice %14 {offsets = [0, 32], sizes = [2, 32], strides = [1, 1]} : vector<2x128xf32> to vector<2x32xf32>
    %26 = arith.negf %25 : vector<2x32xf32>
    %27 = math.exp %26 : vector<2x32xf32>
    %cst_8 = arith.constant 1.000000e+00 : f32
    %28 = vector.broadcast %cst_8 : f32 to vector<2x32xf32>
    %29 = arith.addf %28, %27 : vector<2x32xf32>
    %30 = arith.divf %28, %29 : vector<2x32xf32>
    %31 = vector.extract_strided_slice %14 {offsets = [0, 64], sizes = [2, 32], strides = [1, 1]} : vector<2x128xf32> to vector<2x32xf32>
    %32 = math.tanh %31 : vector<2x32xf32>
    %33 = vector.extract_strided_slice %14 {offsets = [0, 96], sizes = [2, 32], strides = [1, 1]} : vector<2x128xf32> to vector<2x32xf32>
    %34 = arith.negf %33 : vector<2x32xf32>
    %35 = math.exp %34 : vector<2x32xf32>
    %cst_9 = arith.constant 1.000000e+00 : f32
    %36 = vector.broadcast %cst_9 : f32 to vector<2x32xf32>
    %37 = arith.addf %36, %35 : vector<2x32xf32>
    %38 = arith.divf %36, %37 : vector<2x32xf32>
    %39 = arith.mulf %30, %18 : vector<2x32xf32>
    %40 = arith.mulf %24, %32 : vector<2x32xf32>
    %41 = arith.addf %39, %40 : vector<2x32xf32>
    %42 = math.tanh %41 : vector<2x32xf32>
    %43 = arith.mulf %38, %42 : vector<2x32xf32>
    %44 = vector.extract_strided_slice %2 {offsets = [0, 32], sizes = [2, 32], strides = [1, 1]} : vector<2x64xf32> to vector<2x32xf32>
    %45 = vector.extract_strided_slice %17 {offsets = [0, 0], sizes = [2, 32], strides = [1, 1]} : vector<2x128xf32> to vector<2x32xf32>
    %46 = arith.negf %45 : vector<2x32xf32>
    %47 = math.exp %46 : vector<2x32xf32>
    %cst_10 = arith.constant 1.000000e+00 : f32
    %48 = vector.broadcast %cst_10 : f32 to vector<2x32xf32>
    %49 = arith.addf %48, %47 : vector<2x32xf32>
    %50 = arith.divf %48, %49 : vector<2x32xf32>
    %51 = vector.extract_strided_slice %17 {offsets = [0, 32], sizes = [2, 32], strides = [1, 1]} : vector<2x128xf32> to vector<2x32xf32>
    %52 = arith.negf %51 : vector<2x32xf32>
    %53 = math.exp %52 : vector<2x32xf32>
    %cst_11 = arith.constant 1.000000e+00 : f32
    %54 = vector.broadcast %cst_11 : f32 to vector<2x32xf32>
    %55 = arith.addf %54, %53 : vector<2x32xf32>
    %56 = arith.divf %54, %55 : vector<2x32xf32>
    %57 = vector.extract_strided_slice %17 {offsets = [0, 64], sizes = [2, 32], strides = [1, 1]} : vector<2x128xf32> to vector<2x32xf32>
    %58 = math.tanh %57 : vector<2x32xf32>
    %59 = vector.extract_strided_slice %17 {offsets = [0, 96], sizes = [2, 32], strides = [1, 1]} : vector<2x128xf32> to vector<2x32xf32>
    %60 = arith.negf %59 : vector<2x32xf32>
    %61 = math.exp %60 : vector<2x32xf32>
    %cst_12 = arith.constant 1.000000e+00 : f32
    %62 = vector.broadcast %cst_12 : f32 to vector<2x32xf32>
    %63 = arith.addf %62, %61 : vector<2x32xf32>
    %64 = arith.divf %62, %63 : vector<2x32xf32>
    %65 = arith.mulf %56, %44 : vector<2x32xf32>
    %66 = arith.mulf %50, %58 : vector<2x32xf32>
    %67 = arith.addf %65, %66 : vector<2x32xf32>
    %68 = math.tanh %67 : vector<2x32xf32>
    %69 = arith.mulf %64, %68 : vector<2x32xf32>
    %70 = arith.index_cast %c0_i32 : i32 to index
    %c0_13 = arith.constant 0 : index
    %c0_14 = arith.constant 0 : index
    %71 = vector.load %arg2[%70, %c0_13, %c0_14] : memref<8x2x1xf32, #tpu.memory_space<vmem>>, vector<1x2x1xf32>
    %72 = vector.shape_cast %71 : vector<1x2x1xf32> to vector<2x1xf32>
    %cst_15 = arith.constant 0.000000e+00 : f32
    %73 = vector.broadcast %cst_15 : f32 to vector<2x1xf32>
    %74 = arith.cmpf ogt, %72, %73 : vector<2x1xf32>
    %75 = arith.index_cast %3 : i32 to index
    %c0_16 = arith.constant 0 : index
    %c0_17 = arith.constant 0 : index
    %76 = vector.load %arg2[%75, %c0_16, %c0_17] : memref<8x2x1xf32, #tpu.memory_space<vmem>>, vector<1x2x1xf32>
    %77 = vector.shape_cast %76 : vector<1x2x1xf32> to vector<2x1xf32>
    %cst_18 = arith.constant 0.000000e+00 : f32
    %78 = vector.broadcast %cst_18 : f32 to vector<2x1xf32>
    %79 = arith.cmpf ogt, %77, %78 : vector<2x1xf32>
    %cst_19 = arith.constant 0.000000e+00 : f32
    %80 = vector.shape_cast %74 : vector<2x1xi1> to vector<2x1xi1>
    %81 = vector.broadcast %80 : vector<2x1xi1> to vector<2x32xi1>
    %82 = vector.broadcast %cst_19 : f32 to vector<2x32xf32>
    %83 = arith.select %81, %43, %82 : vector<2x32xi1>, vector<2x32xf32>
    %84 = arith.index_cast %c0_i32 : i32 to index
    %c0_20 = arith.constant 0 : index
    %c0_21 = arith.constant 0 : index
    %85 = vector.load %arg4[%84, %c0_20, %c0_21] : memref<8x2x64xf32, #tpu.memory_space<vmem>>, vector<1x2x32xf32>
    %86 = vector.shape_cast %85 : vector<1x2x32xf32> to vector<2x32xf32>
    %87 = vector.shape_cast %83 : vector<2x32xf32> to vector<1x2x32xf32>
    tpu.vector_store %arg4[%84, %c0_20, %c0_21], %87 {strides = array<i32>} : memref<8x2x64xf32, #tpu.memory_space<vmem>>, vector<1x2x32xf32>,
    %cst_22 = arith.constant 0.000000e+00 : f32
    %88 = vector.shape_cast %79 : vector<2x1xi1> to vector<2x1xi1>
    %89 = vector.broadcast %88 : vector<2x1xi1> to vector<2x32xi1>
    %90 = vector.broadcast %cst_22 : f32 to vector<2x32xf32>
    %91 = arith.select %89, %69, %90 : vector<2x32xi1>, vector<2x32xf32>
    %92 = arith.index_cast %3 : i32 to index
    %c0_23 = arith.constant 0 : index
    %c32 = arith.constant 32 : index
    %93 = vector.load %arg4[%92, %c0_23, %c32] : memref<8x2x64xf32, #tpu.memory_space<vmem>>, vector<1x2x32xf32>
    %94 = vector.shape_cast %93 : vector<1x2x32xf32> to vector<2x32xf32>
    %95 = vector.shape_cast %91 : vector<2x32xf32> to vector<1x2x32xf32>
    tpu.vector_store %arg4[%92, %c0_23, %c32], %95 {strides = array<i32>} : memref<8x2x64xf32, #tpu.memory_space<vmem>>, vector<1x2x32xf32>,
    %96 = vector.extract_strided_slice %1 {offsets = [0, 0], sizes = [2, 32], strides = [1, 1]} : vector<2x64xf32> to vector<2x32xf32>
    %97 = vector.shape_cast %74 : vector<2x1xi1> to vector<2x1xi1>
    %98 = vector.broadcast %97 : vector<2x1xi1> to vector<2x32xi1>
    %99 = arith.select %98, %43, %96 : vector<2x32xi1>, vector<2x32xf32>
    %100 = vector.extract_strided_slice %1 {offsets = [0, 32], sizes = [2, 32], strides = [1, 1]} : vector<2x64xf32> to vector<2x32xf32>
    %101 = vector.shape_cast %79 : vector<2x1xi1> to vector<2x1xi1>
    %102 = vector.broadcast %101 : vector<2x1xi1> to vector<2x32xi1>
    %103 = arith.select %102, %69, %100 : vector<2x32xi1>, vector<2x32xf32>
    %104 = tpu.concatenate %99, %103 in 1 : vector<2x32xf32>, vector<2x32xf32> -> vector<2x64xf32>
    %105 = vector.extract_strided_slice %2 {offsets = [0, 0], sizes = [2, 32], strides = [1, 1]} : vector<2x64xf32> to vector<2x32xf32>
    %106 = vector.shape_cast %74 : vector<2x1xi1> to vector<2x1xi1>
    %107 = vector.broadcast %106 : vector<2x1xi1> to vector<2x32xi1>
    %108 = arith.select %107, %41, %105 : vector<2x32xi1>, vector<2x32xf32>
    %109 = vector.extract_strided_slice %2 {offsets = [0, 32], sizes = [2, 32], strides = [1, 1]} : vector<2x64xf32> to vector<2x32xf32>
    %110 = vector.shape_cast %79 : vector<2x1xi1> to vector<2x1xi1>
    %111 = vector.broadcast %110 : vector<2x1xi1> to vector<2x32xi1>
    %112 = arith.select %111, %67, %109 : vector<2x32xi1>, vector<2x32xf32>
    %113 = tpu.concatenate %108, %112 in 1 : vector<2x32xf32>, vector<2x32xf32> -> vector<2x64xf32>
    %c1_i32 = arith.constant 1 : i32
    %c7_i32_24 = arith.constant 7 : i32
    %114 = arith.subi %c7_i32_24, %c1_i32 : i32
    %115 = arith.truncf %104 : vector<2x64xf32> to vector<2x64xbf16>
    %cst_25 = arith.constant dense<0.000000e+00> : vector<2x256xf32>
    %116 = tpu.matmul %115, %0, %cst_25 {dimension_numbers = #tpu.dot_dimension_numbers<[1], [0], [0], [1], [0, 0, 1, 1], [], []>} : vector<2x64xbf16>, vector<64x256xbf16>, vector<2x256xf32> -> vector<2x256xf32>
    %117 = arith.index_cast %c1_i32 : i32 to index
    %c0_26 = arith.constant 0 : index
    %c0_27 = arith.constant 0 : index
    %118 = vector.load %arg1[%117, %c0_26, %c0_27] : memref<8x2x256xf32, #tpu.memory_space<vmem>>, vector<1x2x256xf32>
    %119 = vector.shape_cast %118 : vector<1x2x256xf32> to vector<2x256xf32>
    %120 = arith.index_cast %114 : i32 to index
    %c0_28 = arith.constant 0 : index
    %c0_29 = arith.constant 0 : index
    %121 = vector.load %arg1[%120, %c0_28, %c0_29] : memref<8x2x256xf32, #tpu.memory_space<vmem>>, vector<1x2x256xf32>
    %122 = vector.shape_cast %121 : vector<1x2x256xf32> to vector<2x256xf32>
    %123 = vector.extract_strided_slice %119 {offsets = [0, 0], sizes = [2, 128], strides = [1, 1]} : vector<2x256xf32> to vector<2x128xf32>
    %124 = vector.extract_strided_slice %116 {offsets = [0, 0], sizes = [2, 128], strides = [1, 1]} : vector<2x256xf32> to vector<2x128xf32>
    %125 = arith.addf %123, %124 : vector<2x128xf32>
    %126 = vector.extract_strided_slice %122 {offsets = [0, 128], sizes = [2, 128], strides = [1, 1]} : vector<2x256xf32> to vector<2x128xf32>
    %127 = vector.extract_strided_slice %116 {offsets = [0, 128], sizes = [2, 128], strides = [1, 1]} : vector<2x256xf32> to vector<2x128xf32>
    %128 = arith.addf %126, %127 : vector<2x128xf32>
    %129 = vector.extract_strided_slice %113 {offsets = [0, 0], sizes = [2, 32], strides = [1, 1]} : vector<2x64xf32> to vector<2x32xf32>
    %130 = vector.extract_strided_slice %125 {offsets = [0, 0], sizes = [2, 32], strides = [1, 1]} : vector<2x128xf32> to vector<2x32xf32>
    %131 = arith.negf %130 : vector<2x32xf32>
    %132 = math.exp %131 : vector<2x32xf32>
    %cst_30 = arith.constant 1.000000e+00 : f32
    %133 = vector.broadcast %cst_30 : f32 to vector<2x32xf32>
    %134 = arith.addf %133, %132 : vector<2x32xf32>
    %135 = arith.divf %133, %134 : vector<2x32xf32>
    %136 = vector.extract_strided_slice %125 {offsets = [0, 32], sizes = [2, 32], strides = [1, 1]} : vector<2x128xf32> to vector<2x32xf32>
    %137 = arith.negf %136 : vector<2x32xf32>
    %138 = math.exp %137 : vector<2x32xf32>
    %cst_31 = arith.constant 1.000000e+00 : f32
    %139 = vector.broadcast %cst_31 : f32 to vector<2x32xf32>
    %140 = arith.addf %139, %138 : vector<2x32xf32>
    %141 = arith.divf %139, %140 : vector<2x32xf32>
    %142 = vector.extract_strided_slice %125 {offsets = [0, 64], sizes = [2, 32], strides = [1, 1]} : vector<2x128xf32> to vector<2x32xf32>
    %143 = math.tanh %142 : vector<2x32xf32>
    %144 = vector.extract_strided_slice %125 {offsets = [0, 96], sizes = [2, 32], strides = [1, 1]} : vector<2x128xf32> to vector<2x32xf32>
    %145 = arith.negf %144 : vector<2x32xf32>
    %146 = math.exp %145 : vector<2x32xf32>
    %cst_32 = arith.constant 1.000000e+00 : f32
    %147 = vector.broadcast %cst_32 : f32 to vector<2x32xf32>
    %148 = arith.addf %147, %146 : vector<2x32xf32>
    %149 = arith.divf %147, %148 : vector<2x32xf32>
    %150 = arith.mulf %141, %129 : vector<2x32xf32>
    %151 = arith.mulf %135, %143 : vector<2x32xf32>
    %152 = arith.addf %150, %151 : vector<2x32xf32>
    %153 = math.tanh %152 : vector<2x32xf32>
    %154 = arith.mulf %149, %153 : vector<2x32xf32>
    %155 = vector.extract_strided_slice %113 {offsets = [0, 32], sizes = [2, 32], strides = [1, 1]} : vector<2x64xf32> to vector<2x32xf32>
    %156 = vector.extract_strided_slice %128 {offsets = [0, 0], sizes = [2, 32], strides = [1, 1]} : vector<2x128xf32> to vector<2x32xf32>
    %157 = arith.negf %156 : vector<2x32xf32>
    %158 = math.exp %157 : vector<2x32xf32>
    %cst_33 = arith.constant 1.000000e+00 : f32
    %159 = vector.broadcast %cst_33 : f32 to vector<2x32xf32>
    %160 = arith.addf %159, %158 : vector<2x32xf32>
    %161 = arith.divf %159, %160 : vector<2x32xf32>
    %162 = vector.extract_strided_slice %128 {offsets = [0, 32], sizes = [2, 32], strides = [1, 1]} : vector<2x128xf32> to vector<2x32xf32>
    %163 = arith.negf %162 : vector<2x32xf32>
    %164 = math.exp %163 : vector<2x32xf32>
    %cst_34 = arith.constant 1.000000e+00 : f32
    %165 = vector.broadcast %cst_34 : f32 to vector<2x32xf32>
    %166 = arith.addf %165, %164 : vector<2x32xf32>
    %167 = arith.divf %165, %166 : vector<2x32xf32>
    %168 = vector.extract_strided_slice %128 {offsets = [0, 64], sizes = [2, 32], strides = [1, 1]} : vector<2x128xf32> to vector<2x32xf32>
    %169 = math.tanh %168 : vector<2x32xf32>
    %170 = vector.extract_strided_slice %128 {offsets = [0, 96], sizes = [2, 32], strides = [1, 1]} : vector<2x128xf32> to vector<2x32xf32>
    %171 = arith.negf %170 : vector<2x32xf32>
    %172 = math.exp %171 : vector<2x32xf32>
    %cst_35 = arith.constant 1.000000e+00 : f32
    %173 = vector.broadcast %cst_35 : f32 to vector<2x32xf32>
    %174 = arith.addf %173, %172 : vector<2x32xf32>
    %175 = arith.divf %173, %174 : vector<2x32xf32>
    %176 = arith.mulf %167, %155 : vector<2x32xf32>
    %177 = arith.mulf %161, %169 : vector<2x32xf32>
    %178 = arith.addf %176, %177 : vector<2x32xf32>
    %179 = math.tanh %178 : vector<2x32xf32>
    %180 = arith.mulf %175, %179 : vector<2x32xf32>
    %181 = arith.index_cast %c1_i32 : i32 to index
    %c0_36 = arith.constant 0 : index
    %c0_37 = arith.constant 0 : index
    %182 = vector.load %arg2[%181, %c0_36, %c0_37] : memref<8x2x1xf32, #tpu.memory_space<vmem>>, vector<1x2x1xf32>
    %183 = vector.shape_cast %182 : vector<1x2x1xf32> to vector<2x1xf32>
    %cst_38 = arith.constant 0.000000e+00 : f32
    %184 = vector.broadcast %cst_38 : f32 to vector<2x1xf32>
    %185 = arith.cmpf ogt, %183, %184 : vector<2x1xf32>
    %186 = arith.index_cast %114 : i32 to index
    %c0_39 = arith.constant 0 : index
    %c0_40 = arith.constant 0 : index
    %187 = vector.load %arg2[%186, %c0_39, %c0_40] : memref<8x2x1xf32, #tpu.memory_space<vmem>>, vector<1x2x1xf32>
    %188 = vector.shape_cast %187 : vector<1x2x1xf32> to vector<2x1xf32>
    %cst_41 = arith.constant 0.000000e+00 : f32
    %189 = vector.broadcast %cst_41 : f32 to vector<2x1xf32>
    %190 = arith.cmpf ogt, %188, %189 : vector<2x1xf32>
    %cst_42 = arith.constant 0.000000e+00 : f32
    %191 = vector.shape_cast %185 : vector<2x1xi1> to vector<2x1xi1>
    %192 = vector.broadcast %191 : vector<2x1xi1> to vector<2x32xi1>
    %193 = vector.broadcast %cst_42 : f32 to vector<2x32xf32>
    %194 = arith.select %192, %154, %193 : vector<2x32xi1>, vector<2x32xf32>
    %195 = arith.index_cast %c1_i32 : i32 to index
    %c0_43 = arith.constant 0 : index
    %c0_44 = arith.constant 0 : index
    %196 = vector.load %arg4[%195, %c0_43, %c0_44] : memref<8x2x64xf32, #tpu.memory_space<vmem>>, vector<1x2x32xf32>
    %197 = vector.shape_cast %196 : vector<1x2x32xf32> to vector<2x32xf32>
    %198 = vector.shape_cast %194 : vector<2x32xf32> to vector<1x2x32xf32>
    tpu.vector_store %arg4[%195, %c0_43, %c0_44], %198 {strides = array<i32>} : memref<8x2x64xf32, #tpu.memory_space<vmem>>, vector<1x2x32xf32>,
    %cst_45 = arith.constant 0.000000e+00 : f32
    %199 = vector.shape_cast %190 : vector<2x1xi1> to vector<2x1xi1>
    %200 = vector.broadcast %199 : vector<2x1xi1> to vector<2x32xi1>
    %201 = vector.broadcast %cst_45 : f32 to vector<2x32xf32>
    %202 = arith.select %200, %180, %201 : vector<2x32xi1>, vector<2x32xf32>
    %203 = arith.index_cast %114 : i32 to index
    %c0_46 = arith.constant 0 : index
    %c32_47 = arith.constant 32 : index
    %204 = vector.load %arg4[%203, %c0_46, %c32_47] : memref<8x2x64xf32, #tpu.memory_space<vmem>>, vector<1x2x32xf32>
    %205 = vector.shape_cast %204 : vector<1x2x32xf32> to vector<2x32xf32>
    %206 = vector.shape_cast %202 : vector<2x32xf32> to vector<1x2x32xf32>
    tpu.vector_store %arg4[%203, %c0_46, %c32_47], %206 {strides = array<i32>} : memref<8x2x64xf32, #tpu.memory_space<vmem>>, vector<1x2x32xf32>,
    %207 = vector.extract_strided_slice %104 {offsets = [0, 0], sizes = [2, 32], strides = [1, 1]} : vector<2x64xf32> to vector<2x32xf32>
    %208 = vector.shape_cast %185 : vector<2x1xi1> to vector<2x1xi1>
    %209 = vector.broadcast %208 : vector<2x1xi1> to vector<2x32xi1>
    %210 = arith.select %209, %154, %207 : vector<2x32xi1>, vector<2x32xf32>
    %211 = vector.extract_strided_slice %104 {offsets = [0, 32], sizes = [2, 32], strides = [1, 1]} : vector<2x64xf32> to vector<2x32xf32>
    %212 = vector.shape_cast %190 : vector<2x1xi1> to vector<2x1xi1>
    %213 = vector.broadcast %212 : vector<2x1xi1> to vector<2x32xi1>
    %214 = arith.select %213, %180, %211 : vector<2x32xi1>, vector<2x32xf32>
    %215 = tpu.concatenate %210, %214 in 1 : vector<2x32xf32>, vector<2x32xf32> -> vector<2x64xf32>
    %216 = vector.extract_strided_slice %113 {offsets = [0, 0], sizes = [2, 32], strides = [1, 1]} : vector<2x64xf32> to vector<2x32xf32>
    %217 = vector.shape_cast %185 : vector<2x1xi1> to vector<2x1xi1>
    %218 = vector.broadcast %217 : vector<2x1xi1> to vector<2x32xi1>
    %219 = arith.select %218, %152, %216 : vector<2x32xi1>, vector<2x32xf32>
    %220 = vector.extract_strided_slice %113 {offsets = [0, 32], sizes = [2, 32], strides = [1, 1]} : vector<2x64xf32> to vector<2x32xf32>
    %221 = vector.shape_cast %190 : vector<2x1xi1> to vector<2x1xi1>
    %222 = vector.broadcast %221 : vector<2x1xi1> to vector<2x32xi1>
    %223 = arith.select %222, %178, %220 : vector<2x32xi1>, vector<2x32xf32>
    %224 = tpu.concatenate %219, %223 in 1 : vector<2x32xf32>, vector<2x32xf32> -> vector<2x64xf32>
    %c2_i32 = arith.constant 2 : i32
    %c7_i32_48 = arith.constant 7 : i32
    %225 = arith.subi %c7_i32_48, %c2_i32 : i32
    %226 = arith.truncf %215 : vector<2x64xf32> to vector<2x64xbf16>
    %cst_49 = arith.constant dense<0.000000e+00> : vector<2x256xf32>
    %227 = tpu.matmul %226, %0, %cst_49 {dimension_numbers = #tpu.dot_dimension_numbers<[1], [0], [0], [1], [0, 0, 1, 1], [], []>} : vector<2x64xbf16>, vector<64x256xbf16>, vector<2x256xf32> -> vector<2x256xf32>
    %228 = arith.index_cast %c2_i32 : i32 to index
    %c0_50 = arith.constant 0 : index
    %c0_51 = arith.constant 0 : index
    %229 = vector.load %arg1[%228, %c0_50, %c0_51] : memref<8x2x256xf32, #tpu.memory_space<vmem>>, vector<1x2x256xf32>
    %230 = vector.shape_cast %229 : vector<1x2x256xf32> to vector<2x256xf32>
    %231 = arith.index_cast %225 : i32 to index
    %c0_52 = arith.constant 0 : index
    %c0_53 = arith.constant 0 : index
    %232 = vector.load %arg1[%231, %c0_52, %c0_53] : memref<8x2x256xf32, #tpu.memory_space<vmem>>, vector<1x2x256xf32>
    %233 = vector.shape_cast %232 : vector<1x2x256xf32> to vector<2x256xf32>
    %234 = vector.extract_strided_slice %230 {offsets = [0, 0], sizes = [2, 128], strides = [1, 1]} : vector<2x256xf32> to vector<2x128xf32>
    %235 = vector.extract_strided_slice %227 {offsets = [0, 0], sizes = [2, 128], strides = [1, 1]} : vector<2x256xf32> to vector<2x128xf32>
    %236 = arith.addf %234, %235 : vector<2x128xf32>
    %237 = vector.extract_strided_slice %233 {offsets = [0, 128], sizes = [2, 128], strides = [1, 1]} : vector<2x256xf32> to vector<2x128xf32>
    %238 = vector.extract_strided_slice %227 {offsets = [0, 128], sizes = [2, 128], strides = [1, 1]} : vector<2x256xf32> to vector<2x128xf32>
    %239 = arith.addf %237, %238 : vector<2x128xf32>
    %240 = vector.extract_strided_slice %224 {offsets = [0, 0], sizes = [2, 32], strides = [1, 1]} : vector<2x64xf32> to vector<2x32xf32>
    %241 = vector.extract_strided_slice %236 {offsets = [0, 0], sizes = [2, 32], strides = [1, 1]} : vector<2x128xf32> to vector<2x32xf32>
    %242 = arith.negf %241 : vector<2x32xf32>
    %243 = math.exp %242 : vector<2x32xf32>
    %cst_54 = arith.constant 1.000000e+00 : f32
    %244 = vector.broadcast %cst_54 : f32 to vector<2x32xf32>
    %245 = arith.addf %244, %243 : vector<2x32xf32>
    %246 = arith.divf %244, %245 : vector<2x32xf32>
    %247 = vector.extract_strided_slice %236 {offsets = [0, 32], sizes = [2, 32], strides = [1, 1]} : vector<2x128xf32> to vector<2x32xf32>
    %248 = arith.negf %247 : vector<2x32xf32>
    %249 = math.exp %248 : vector<2x32xf32>
    %cst_55 = arith.constant 1.000000e+00 : f32
    %250 = vector.broadcast %cst_55 : f32 to vector<2x32xf32>
    %251 = arith.addf %250, %249 : vector<2x32xf32>
    %252 = arith.divf %250, %251 : vector<2x32xf32>
    %253 = vector.extract_strided_slice %236 {offsets = [0, 64], sizes = [2, 32], strides = [1, 1]} : vector<2x128xf32> to vector<2x32xf32>
    %254 = math.tanh %253 : vector<2x32xf32>
    %255 = vector.extract_strided_slice %236 {offsets = [0, 96], sizes = [2, 32], strides = [1, 1]} : vector<2x128xf32> to vector<2x32xf32>
    %256 = arith.negf %255 : vector<2x32xf32>
    %257 = math.exp %256 : vector<2x32xf32>
    %cst_56 = arith.constant 1.000000e+00 : f32
    %258 = vector.broadcast %cst_56 : f32 to vector<2x32xf32>
    %259 = arith.addf %258, %257 : vector<2x32xf32>
    %260 = arith.divf %258, %259 : vector<2x32xf32>
    %261 = arith.mulf %252, %240 : vector<2x32xf32>
    %262 = arith.mulf %246, %254 : vector<2x32xf32>
    %263 = arith.addf %261, %262 : vector<2x32xf32>
    %264 = math.tanh %263 : vector<2x32xf32>
    %265 = arith.mulf %260, %264 : vector<2x32xf32>
    %266 = vector.extract_strided_slice %224 {offsets = [0, 32], sizes = [2, 32], strides = [1, 1]} : vector<2x64xf32> to vector<2x32xf32>
    %267 = vector.extract_strided_slice %239 {offsets = [0, 0], sizes = [2, 32], strides = [1, 1]} : vector<2x128xf32> to vector<2x32xf32>
    %268 = arith.negf %267 : vector<2x32xf32>
    %269 = math.exp %268 : vector<2x32xf32>
    %cst_57 = arith.constant 1.000000e+00 : f32
    %270 = vector.broadcast %cst_57 : f32 to vector<2x32xf32>
    %271 = arith.addf %270, %269 : vector<2x32xf32>
    %272 = arith.divf %270, %271 : vector<2x32xf32>
    %273 = vector.extract_strided_slice %239 {offsets = [0, 32], sizes = [2, 32], strides = [1, 1]} : vector<2x128xf32> to vector<2x32xf32>
    %274 = arith.negf %273 : vector<2x32xf32>
    %275 = math.exp %274 : vector<2x32xf32>
    %cst_58 = arith.constant 1.000000e+00 : f32
    %276 = vector.broadcast %cst_58 : f32 to vector<2x32xf32>
    %277 = arith.addf %276, %275 : vector<2x32xf32>
    %278 = arith.divf %276, %277 : vector<2x32xf32>
    %279 = vector.extract_strided_slice %239 {offsets = [0, 64], sizes = [2, 32], strides = [1, 1]} : vector<2x128xf32> to vector<2x32xf32>
    %280 = math.tanh %279 : vector<2x32xf32>
    %281 = vector.extract_strided_slice %239 {offsets = [0, 96], sizes = [2, 32], strides = [1, 1]} : vector<2x128xf32> to vector<2x32xf32>
    %282 = arith.negf %281 : vector<2x32xf32>
    %283 = math.exp %282 : vector<2x32xf32>
    %cst_59 = arith.constant 1.000000e+00 : f32
    %284 = vector.broadcast %cst_59 : f32 to vector<2x32xf32>
    %285 = arith.addf %284, %283 : vector<2x32xf32>
    %286 = arith.divf %284, %285 : vector<2x32xf32>
    %287 = arith.mulf %278, %266 : vector<2x32xf32>
    %288 = arith.mulf %272, %280 : vector<2x32xf32>
    %289 = arith.addf %287, %288 : vector<2x32xf32>
    %290 = math.tanh %289 : vector<2x32xf32>
    %291 = arith.mulf %286, %290 : vector<2x32xf32>
    %292 = arith.index_cast %c2_i32 : i32 to index
    %c0_60 = arith.constant 0 : index
    %c0_61 = arith.constant 0 : index
    %293 = vector.load %arg2[%292, %c0_60, %c0_61] : memref<8x2x1xf32, #tpu.memory_space<vmem>>, vector<1x2x1xf32>
    %294 = vector.shape_cast %293 : vector<1x2x1xf32> to vector<2x1xf32>
    %cst_62 = arith.constant 0.000000e+00 : f32
    %295 = vector.broadcast %cst_62 : f32 to vector<2x1xf32>
    %296 = arith.cmpf ogt, %294, %295 : vector<2x1xf32>
    %297 = arith.index_cast %225 : i32 to index
    %c0_63 = arith.constant 0 : index
    %c0_64 = arith.constant 0 : index
    %298 = vector.load %arg2[%297, %c0_63, %c0_64] : memref<8x2x1xf32, #tpu.memory_space<vmem>>, vector<1x2x1xf32>
    %299 = vector.shape_cast %298 : vector<1x2x1xf32> to vector<2x1xf32>
    %cst_65 = arith.constant 0.000000e+00 : f32
    %300 = vector.broadcast %cst_65 : f32 to vector<2x1xf32>
    %301 = arith.cmpf ogt, %299, %300 : vector<2x1xf32>
    %cst_66 = arith.constant 0.000000e+00 : f32
    %302 = vector.shape_cast %296 : vector<2x1xi1> to vector<2x1xi1>
    %303 = vector.broadcast %302 : vector<2x1xi1> to vector<2x32xi1>
    %304 = vector.broadcast %cst_66 : f32 to vector<2x32xf32>
    %305 = arith.select %303, %265, %304 : vector<2x32xi1>, vector<2x32xf32>
    %306 = arith.index_cast %c2_i32 : i32 to index
    %c0_67 = arith.constant 0 : index
    %c0_68 = arith.constant 0 : index
    %307 = vector.load %arg4[%306, %c0_67, %c0_68] : memref<8x2x64xf32, #tpu.memory_space<vmem>>, vector<1x2x32xf32>
    %308 = vector.shape_cast %307 : vector<1x2x32xf32> to vector<2x32xf32>
    %309 = vector.shape_cast %305 : vector<2x32xf32> to vector<1x2x32xf32>
    tpu.vector_store %arg4[%306, %c0_67, %c0_68], %309 {strides = array<i32>} : memref<8x2x64xf32, #tpu.memory_space<vmem>>, vector<1x2x32xf32>,
    %cst_69 = arith.constant 0.000000e+00 : f32
    %310 = vector.shape_cast %301 : vector<2x1xi1> to vector<2x1xi1>
    %311 = vector.broadcast %310 : vector<2x1xi1> to vector<2x32xi1>
    %312 = vector.broadcast %cst_69 : f32 to vector<2x32xf32>
    %313 = arith.select %311, %291, %312 : vector<2x32xi1>, vector<2x32xf32>
    %314 = arith.index_cast %225 : i32 to index
    %c0_70 = arith.constant 0 : index
    %c32_71 = arith.constant 32 : index
    %315 = vector.load %arg4[%314, %c0_70, %c32_71] : memref<8x2x64xf32, #tpu.memory_space<vmem>>, vector<1x2x32xf32>
    %316 = vector.shape_cast %315 : vector<1x2x32xf32> to vector<2x32xf32>
    %317 = vector.shape_cast %313 : vector<2x32xf32> to vector<1x2x32xf32>
    tpu.vector_store %arg4[%314, %c0_70, %c32_71], %317 {strides = array<i32>} : memref<8x2x64xf32, #tpu.memory_space<vmem>>, vector<1x2x32xf32>,
    %318 = vector.extract_strided_slice %215 {offsets = [0, 0], sizes = [2, 32], strides = [1, 1]} : vector<2x64xf32> to vector<2x32xf32>
    %319 = vector.shape_cast %296 : vector<2x1xi1> to vector<2x1xi1>
    %320 = vector.broadcast %319 : vector<2x1xi1> to vector<2x32xi1>
    %321 = arith.select %320, %265, %318 : vector<2x32xi1>, vector<2x32xf32>
    %322 = vector.extract_strided_slice %215 {offsets = [0, 32], sizes = [2, 32], strides = [1, 1]} : vector<2x64xf32> to vector<2x32xf32>
    %323 = vector.shape_cast %301 : vector<2x1xi1> to vector<2x1xi1>
    %324 = vector.broadcast %323 : vector<2x1xi1> to vector<2x32xi1>
    %325 = arith.select %324, %291, %322 : vector<2x32xi1>, vector<2x32xf32>
    %326 = tpu.concatenate %321, %325 in 1 : vector<2x32xf32>, vector<2x32xf32> -> vector<2x64xf32>
    %327 = vector.extract_strided_slice %224 {offsets = [0, 0], sizes = [2, 32], strides = [1, 1]} : vector<2x64xf32> to vector<2x32xf32>
    %328 = vector.shape_cast %296 : vector<2x1xi1> to vector<2x1xi1>
    %329 = vector.broadcast %328 : vector<2x1xi1> to vector<2x32xi1>
    %330 = arith.select %329, %263, %327 : vector<2x32xi1>, vector<2x32xf32>
    %331 = vector.extract_strided_slice %224 {offsets = [0, 32], sizes = [2, 32], strides = [1, 1]} : vector<2x64xf32> to vector<2x32xf32>
    %332 = vector.shape_cast %301 : vector<2x1xi1> to vector<2x1xi1>
    %333 = vector.broadcast %332 : vector<2x1xi1> to vector<2x32xi1>
    %334 = arith.select %333, %289, %331 : vector<2x32xi1>, vector<2x32xf32>
    %335 = tpu.concatenate %330, %334 in 1 : vector<2x32xf32>, vector<2x32xf32> -> vector<2x64xf32>
    %c3_i32 = arith.constant 3 : i32
    %c7_i32_72 = arith.constant 7 : i32
    %336 = arith.subi %c7_i32_72, %c3_i32 : i32
    %337 = arith.truncf %326 : vector<2x64xf32> to vector<2x64xbf16>
    %cst_73 = arith.constant dense<0.000000e+00> : vector<2x256xf32>
    %338 = tpu.matmul %337, %0, %cst_73 {dimension_numbers = #tpu.dot_dimension_numbers<[1], [0], [0], [1], [0, 0, 1, 1], [], []>} : vector<2x64xbf16>, vector<64x256xbf16>, vector<2x256xf32> -> vector<2x256xf32>
    %339 = arith.index_cast %c3_i32 : i32 to index
    %c0_74 = arith.constant 0 : index
    %c0_75 = arith.constant 0 : index
    %340 = vector.load %arg1[%339, %c0_74, %c0_75] : memref<8x2x256xf32, #tpu.memory_space<vmem>>, vector<1x2x256xf32>
    %341 = vector.shape_cast %340 : vector<1x2x256xf32> to vector<2x256xf32>
    %342 = arith.index_cast %336 : i32 to index
    %c0_76 = arith.constant 0 : index
    %c0_77 = arith.constant 0 : index
    %343 = vector.load %arg1[%342, %c0_76, %c0_77] : memref<8x2x256xf32, #tpu.memory_space<vmem>>, vector<1x2x256xf32>
    %344 = vector.shape_cast %343 : vector<1x2x256xf32> to vector<2x256xf32>
    %345 = vector.extract_strided_slice %341 {offsets = [0, 0], sizes = [2, 128], strides = [1, 1]} : vector<2x256xf32> to vector<2x128xf32>
    %346 = vector.extract_strided_slice %338 {offsets = [0, 0], sizes = [2, 128], strides = [1, 1]} : vector<2x256xf32> to vector<2x128xf32>
    %347 = arith.addf %345, %346 : vector<2x128xf32>
    %348 = vector.extract_strided_slice %344 {offsets = [0, 128], sizes = [2, 128], strides = [1, 1]} : vector<2x256xf32> to vector<2x128xf32>
    %349 = vector.extract_strided_slice %338 {offsets = [0, 128], sizes = [2, 128], strides = [1, 1]} : vector<2x256xf32> to vector<2x128xf32>
    %350 = arith.addf %348, %349 : vector<2x128xf32>
    %351 = vector.extract_strided_slice %335 {offsets = [0, 0], sizes = [2, 32], strides = [1, 1]} : vector<2x64xf32> to vector<2x32xf32>
    %352 = vector.extract_strided_slice %347 {offsets = [0, 0], sizes = [2, 32], strides = [1, 1]} : vector<2x128xf32> to vector<2x32xf32>
    %353 = arith.negf %352 : vector<2x32xf32>
    %354 = math.exp %353 : vector<2x32xf32>
    %cst_78 = arith.constant 1.000000e+00 : f32
    %355 = vector.broadcast %cst_78 : f32 to vector<2x32xf32>
    %356 = arith.addf %355, %354 : vector<2x32xf32>
    %357 = arith.divf %355, %356 : vector<2x32xf32>
    %358 = vector.extract_strided_slice %347 {offsets = [0, 32], sizes = [2, 32], strides = [1, 1]} : vector<2x128xf32> to vector<2x32xf32>
    %359 = arith.negf %358 : vector<2x32xf32>
    %360 = math.exp %359 : vector<2x32xf32>
    %cst_79 = arith.constant 1.000000e+00 : f32
    %361 = vector.broadcast %cst_79 : f32 to vector<2x32xf32>
    %362 = arith.addf %361, %360 : vector<2x32xf32>
    %363 = arith.divf %361, %362 : vector<2x32xf32>
    %364 = vector.extract_strided_slice %347 {offsets = [0, 64], sizes = [2, 32], strides = [1, 1]} : vector<2x128xf32> to vector<2x32xf32>
    %365 = math.tanh %364 : vector<2x32xf32>
    %366 = vector.extract_strided_slice %347 {offsets = [0, 96], sizes = [2, 32], strides = [1, 1]} : vector<2x128xf32> to vector<2x32xf32>
    %367 = arith.negf %366 : vector<2x32xf32>
    %368 = math.exp %367 : vector<2x32xf32>
    %cst_80 = arith.constant 1.000000e+00 : f32
    %369 = vector.broadcast %cst_80 : f32 to vector<2x32xf32>
    %370 = arith.addf %369, %368 : vector<2x32xf32>
    %371 = arith.divf %369, %370 : vector<2x32xf32>
    %372 = arith.mulf %363, %351 : vector<2x32xf32>
    %373 = arith.mulf %357, %365 : vector<2x32xf32>
    %374 = arith.addf %372, %373 : vector<2x32xf32>
    %375 = math.tanh %374 : vector<2x32xf32>
    %376 = arith.mulf %371, %375 : vector<2x32xf32>
    %377 = vector.extract_strided_slice %335 {offsets = [0, 32], sizes = [2, 32], strides = [1, 1]} : vector<2x64xf32> to vector<2x32xf32>
    %378 = vector.extract_strided_slice %350 {offsets = [0, 0], sizes = [2, 32], strides = [1, 1]} : vector<2x128xf32> to vector<2x32xf32>
    %379 = arith.negf %378 : vector<2x32xf32>
    %380 = math.exp %379 : vector<2x32xf32>
    %cst_81 = arith.constant 1.000000e+00 : f32
    %381 = vector.broadcast %cst_81 : f32 to vector<2x32xf32>
    %382 = arith.addf %381, %380 : vector<2x32xf32>
    %383 = arith.divf %381, %382 : vector<2x32xf32>
    %384 = vector.extract_strided_slice %350 {offsets = [0, 32], sizes = [2, 32], strides = [1, 1]} : vector<2x128xf32> to vector<2x32xf32>
    %385 = arith.negf %384 : vector<2x32xf32>
    %386 = math.exp %385 : vector<2x32xf32>
    %cst_82 = arith.constant 1.000000e+00 : f32
    %387 = vector.broadcast %cst_82 : f32 to vector<2x32xf32>
    %388 = arith.addf %387, %386 : vector<2x32xf32>
    %389 = arith.divf %387, %388 : vector<2x32xf32>
    %390 = vector.extract_strided_slice %350 {offsets = [0, 64], sizes = [2, 32], strides = [1, 1]} : vector<2x128xf32> to vector<2x32xf32>
    %391 = math.tanh %390 : vector<2x32xf32>
    %392 = vector.extract_strided_slice %350 {offsets = [0, 96], sizes = [2, 32], strides = [1, 1]} : vector<2x128xf32> to vector<2x32xf32>
    %393 = arith.negf %392 : vector<2x32xf32>
    %394 = math.exp %393 : vector<2x32xf32>
    %cst_83 = arith.constant 1.000000e+00 : f32
    %395 = vector.broadcast %cst_83 : f32 to vector<2x32xf32>
    %396 = arith.addf %395, %394 : vector<2x32xf32>
    %397 = arith.divf %395, %396 : vector<2x32xf32>
    %398 = arith.mulf %389, %377 : vector<2x32xf32>
    %399 = arith.mulf %383, %391 : vector<2x32xf32>
    %400 = arith.addf %398, %399 : vector<2x32xf32>
    %401 = math.tanh %400 : vector<2x32xf32>
    %402 = arith.mulf %397, %401 : vector<2x32xf32>
    %403 = arith.index_cast %c3_i32 : i32 to index
    %c0_84 = arith.constant 0 : index
    %c0_85 = arith.constant 0 : index
    %404 = vector.load %arg2[%403, %c0_84, %c0_85] : memref<8x2x1xf32, #tpu.memory_space<vmem>>, vector<1x2x1xf32>
    %405 = vector.shape_cast %404 : vector<1x2x1xf32> to vector<2x1xf32>
    %cst_86 = arith.constant 0.000000e+00 : f32
    %406 = vector.broadcast %cst_86 : f32 to vector<2x1xf32>
    %407 = arith.cmpf ogt, %405, %406 : vector<2x1xf32>
    %408 = arith.index_cast %336 : i32 to index
    %c0_87 = arith.constant 0 : index
    %c0_88 = arith.constant 0 : index
    %409 = vector.load %arg2[%408, %c0_87, %c0_88] : memref<8x2x1xf32, #tpu.memory_space<vmem>>, vector<1x2x1xf32>
    %410 = vector.shape_cast %409 : vector<1x2x1xf32> to vector<2x1xf32>
    %cst_89 = arith.constant 0.000000e+00 : f32
    %411 = vector.broadcast %cst_89 : f32 to vector<2x1xf32>
    %412 = arith.cmpf ogt, %410, %411 : vector<2x1xf32>
    %cst_90 = arith.constant 0.000000e+00 : f32
    %413 = vector.shape_cast %407 : vector<2x1xi1> to vector<2x1xi1>
    %414 = vector.broadcast %413 : vector<2x1xi1> to vector<2x32xi1>
    %415 = vector.broadcast %cst_90 : f32 to vector<2x32xf32>
    %416 = arith.select %414, %376, %415 : vector<2x32xi1>, vector<2x32xf32>
    %417 = arith.index_cast %c3_i32 : i32 to index
    %c0_91 = arith.constant 0 : index
    %c0_92 = arith.constant 0 : index
    %418 = vector.load %arg4[%417, %c0_91, %c0_92] : memref<8x2x64xf32, #tpu.memory_space<vmem>>, vector<1x2x32xf32>
    %419 = vector.shape_cast %418 : vector<1x2x32xf32> to vector<2x32xf32>
    %420 = vector.shape_cast %416 : vector<2x32xf32> to vector<1x2x32xf32>
    tpu.vector_store %arg4[%417, %c0_91, %c0_92], %420 {strides = array<i32>} : memref<8x2x64xf32, #tpu.memory_space<vmem>>, vector<1x2x32xf32>,
    %cst_93 = arith.constant 0.000000e+00 : f32
    %421 = vector.shape_cast %412 : vector<2x1xi1> to vector<2x1xi1>
    %422 = vector.broadcast %421 : vector<2x1xi1> to vector<2x32xi1>
    %423 = vector.broadcast %cst_93 : f32 to vector<2x32xf32>
    %424 = arith.select %422, %402, %423 : vector<2x32xi1>, vector<2x32xf32>
    %425 = arith.index_cast %336 : i32 to index
    %c0_94 = arith.constant 0 : index
    %c32_95 = arith.constant 32 : index
    %426 = vector.load %arg4[%425, %c0_94, %c32_95] : memref<8x2x64xf32, #tpu.memory_space<vmem>>, vector<1x2x32xf32>
    %427 = vector.shape_cast %426 : vector<1x2x32xf32> to vector<2x32xf32>
    %428 = vector.shape_cast %424 : vector<2x32xf32> to vector<1x2x32xf32>
    tpu.vector_store %arg4[%425, %c0_94, %c32_95], %428 {strides = array<i32>} : memref<8x2x64xf32, #tpu.memory_space<vmem>>, vector<1x2x32xf32>,
    %429 = vector.extract_strided_slice %326 {offsets = [0, 0], sizes = [2, 32], strides = [1, 1]} : vector<2x64xf32> to vector<2x32xf32>
    %430 = vector.shape_cast %407 : vector<2x1xi1> to vector<2x1xi1>
    %431 = vector.broadcast %430 : vector<2x1xi1> to vector<2x32xi1>
    %432 = arith.select %431, %376, %429 : vector<2x32xi1>, vector<2x32xf32>
    %433 = vector.extract_strided_slice %326 {offsets = [0, 32], sizes = [2, 32], strides = [1, 1]} : vector<2x64xf32> to vector<2x32xf32>
    %434 = vector.shape_cast %412 : vector<2x1xi1> to vector<2x1xi1>
    %435 = vector.broadcast %434 : vector<2x1xi1> to vector<2x32xi1>
    %436 = arith.select %435, %402, %433 : vector<2x32xi1>, vector<2x32xf32>
    %437 = tpu.concatenate %432, %436 in 1 : vector<2x32xf32>, vector<2x32xf32> -> vector<2x64xf32>
    %438 = vector.extract_strided_slice %335 {offsets = [0, 0], sizes = [2, 32], strides = [1, 1]} : vector<2x64xf32> to vector<2x32xf32>
    %439 = vector.shape_cast %407 : vector<2x1xi1> to vector<2x1xi1>
    %440 = vector.broadcast %439 : vector<2x1xi1> to vector<2x32xi1>
    %441 = arith.select %440, %374, %438 : vector<2x32xi1>, vector<2x32xf32>
    %442 = vector.extract_strided_slice %335 {offsets = [0, 32], sizes = [2, 32], strides = [1, 1]} : vector<2x64xf32> to vector<2x32xf32>
    %443 = vector.shape_cast %412 : vector<2x1xi1> to vector<2x1xi1>
    %444 = vector.broadcast %443 : vector<2x1xi1> to vector<2x32xi1>
    %445 = arith.select %444, %400, %442 : vector<2x32xi1>, vector<2x32xf32>
    %446 = tpu.concatenate %441, %445 in 1 : vector<2x32xf32>, vector<2x32xf32> -> vector<2x64xf32>
    %c4_i32 = arith.constant 4 : i32
    %c7_i32_96 = arith.constant 7 : i32
    %447 = arith.subi %c7_i32_96, %c4_i32 : i32
    %448 = arith.truncf %437 : vector<2x64xf32> to vector<2x64xbf16>
    %cst_97 = arith.constant dense<0.000000e+00> : vector<2x256xf32>
    %449 = tpu.matmul %448, %0, %cst_97 {dimension_numbers = #tpu.dot_dimension_numbers<[1], [0], [0], [1], [0, 0, 1, 1], [], []>} : vector<2x64xbf16>, vector<64x256xbf16>, vector<2x256xf32> -> vector<2x256xf32>
    %450 = arith.index_cast %c4_i32 : i32 to index
    %c0_98 = arith.constant 0 : index
    %c0_99 = arith.constant 0 : index
    %451 = vector.load %arg1[%450, %c0_98, %c0_99] : memref<8x2x256xf32, #tpu.memory_space<vmem>>, vector<1x2x256xf32>
    %452 = vector.shape_cast %451 : vector<1x2x256xf32> to vector<2x256xf32>
    %453 = arith.index_cast %447 : i32 to index
    %c0_100 = arith.constant 0 : index
    %c0_101 = arith.constant 0 : index
    %454 = vector.load %arg1[%453, %c0_100, %c0_101] : memref<8x2x256xf32, #tpu.memory_space<vmem>>, vector<1x2x256xf32>
    %455 = vector.shape_cast %454 : vector<1x2x256xf32> to vector<2x256xf32>
    %456 = vector.extract_strided_slice %452 {offsets = [0, 0], sizes = [2, 128], strides = [1, 1]} : vector<2x256xf32> to vector<2x128xf32>
    %457 = vector.extract_strided_slice %449 {offsets = [0, 0], sizes = [2, 128], strides = [1, 1]} : vector<2x256xf32> to vector<2x128xf32>
    %458 = arith.addf %456, %457 : vector<2x128xf32>
    %459 = vector.extract_strided_slice %455 {offsets = [0, 128], sizes = [2, 128], strides = [1, 1]} : vector<2x256xf32> to vector<2x128xf32>
    %460 = vector.extract_strided_slice %449 {offsets = [0, 128], sizes = [2, 128], strides = [1, 1]} : vector<2x256xf32> to vector<2x128xf32>
    %461 = arith.addf %459, %460 : vector<2x128xf32>
    %462 = vector.extract_strided_slice %446 {offsets = [0, 0], sizes = [2, 32], strides = [1, 1]} : vector<2x64xf32> to vector<2x32xf32>
    %463 = vector.extract_strided_slice %458 {offsets = [0, 0], sizes = [2, 32], strides = [1, 1]} : vector<2x128xf32> to vector<2x32xf32>
    %464 = arith.negf %463 : vector<2x32xf32>
    %465 = math.exp %464 : vector<2x32xf32>
    %cst_102 = arith.constant 1.000000e+00 : f32
    %466 = vector.broadcast %cst_102 : f32 to vector<2x32xf32>
    %467 = arith.addf %466, %465 : vector<2x32xf32>
    %468 = arith.divf %466, %467 : vector<2x32xf32>
    %469 = vector.extract_strided_slice %458 {offsets = [0, 32], sizes = [2, 32], strides = [1, 1]} : vector<2x128xf32> to vector<2x32xf32>
    %470 = arith.negf %469 : vector<2x32xf32>
    %471 = math.exp %470 : vector<2x32xf32>
    %cst_103 = arith.constant 1.000000e+00 : f32
    %472 = vector.broadcast %cst_103 : f32 to vector<2x32xf32>
    %473 = arith.addf %472, %471 : vector<2x32xf32>
    %474 = arith.divf %472, %473 : vector<2x32xf32>
    %475 = vector.extract_strided_slice %458 {offsets = [0, 64], sizes = [2, 32], strides = [1, 1]} : vector<2x128xf32> to vector<2x32xf32>
    %476 = math.tanh %475 : vector<2x32xf32>
    %477 = vector.extract_strided_slice %458 {offsets = [0, 96], sizes = [2, 32], strides = [1, 1]} : vector<2x128xf32> to vector<2x32xf32>
    %478 = arith.negf %477 : vector<2x32xf32>
    %479 = math.exp %478 : vector<2x32xf32>
    %cst_104 = arith.constant 1.000000e+00 : f32
    %480 = vector.broadcast %cst_104 : f32 to vector<2x32xf32>
    %481 = arith.addf %480, %479 : vector<2x32xf32>
    %482 = arith.divf %480, %481 : vector<2x32xf32>
    %483 = arith.mulf %474, %462 : vector<2x32xf32>
    %484 = arith.mulf %468, %476 : vector<2x32xf32>
    %485 = arith.addf %483, %484 : vector<2x32xf32>
    %486 = math.tanh %485 : vector<2x32xf32>
    %487 = arith.mulf %482, %486 : vector<2x32xf32>
    %488 = vector.extract_strided_slice %446 {offsets = [0, 32], sizes = [2, 32], strides = [1, 1]} : vector<2x64xf32> to vector<2x32xf32>
    %489 = vector.extract_strided_slice %461 {offsets = [0, 0], sizes = [2, 32], strides = [1, 1]} : vector<2x128xf32> to vector<2x32xf32>
    %490 = arith.negf %489 : vector<2x32xf32>
    %491 = math.exp %490 : vector<2x32xf32>
    %cst_105 = arith.constant 1.000000e+00 : f32
    %492 = vector.broadcast %cst_105 : f32 to vector<2x32xf32>
    %493 = arith.addf %492, %491 : vector<2x32xf32>
    %494 = arith.divf %492, %493 : vector<2x32xf32>
    %495 = vector.extract_strided_slice %461 {offsets = [0, 32], sizes = [2, 32], strides = [1, 1]} : vector<2x128xf32> to vector<2x32xf32>
    %496 = arith.negf %495 : vector<2x32xf32>
    %497 = math.exp %496 : vector<2x32xf32>
    %cst_106 = arith.constant 1.000000e+00 : f32
    %498 = vector.broadcast %cst_106 : f32 to vector<2x32xf32>
    %499 = arith.addf %498, %497 : vector<2x32xf32>
    %500 = arith.divf %498, %499 : vector<2x32xf32>
    %501 = vector.extract_strided_slice %461 {offsets = [0, 64], sizes = [2, 32], strides = [1, 1]} : vector<2x128xf32> to vector<2x32xf32>
    %502 = math.tanh %501 : vector<2x32xf32>
    %503 = vector.extract_strided_slice %461 {offsets = [0, 96], sizes = [2, 32], strides = [1, 1]} : vector<2x128xf32> to vector<2x32xf32>
    %504 = arith.negf %503 : vector<2x32xf32>
    %505 = math.exp %504 : vector<2x32xf32>
    %cst_107 = arith.constant 1.000000e+00 : f32
    %506 = vector.broadcast %cst_107 : f32 to vector<2x32xf32>
    %507 = arith.addf %506, %505 : vector<2x32xf32>
    %508 = arith.divf %506, %507 : vector<2x32xf32>
    %509 = arith.mulf %500, %488 : vector<2x32xf32>
    %510 = arith.mulf %494, %502 : vector<2x32xf32>
    %511 = arith.addf %509, %510 : vector<2x32xf32>
    %512 = math.tanh %511 : vector<2x32xf32>
    %513 = arith.mulf %508, %512 : vector<2x32xf32>
    %514 = arith.index_cast %c4_i32 : i32 to index
    %c0_108 = arith.constant 0 : index
    %c0_109 = arith.constant 0 : index
    %515 = vector.load %arg2[%514, %c0_108, %c0_109] : memref<8x2x1xf32, #tpu.memory_space<vmem>>, vector<1x2x1xf32>
    %516 = vector.shape_cast %515 : vector<1x2x1xf32> to vector<2x1xf32>
    %cst_110 = arith.constant 0.000000e+00 : f32
    %517 = vector.broadcast %cst_110 : f32 to vector<2x1xf32>
    %518 = arith.cmpf ogt, %516, %517 : vector<2x1xf32>
    %519 = arith.index_cast %447 : i32 to index
    %c0_111 = arith.constant 0 : index
    %c0_112 = arith.constant 0 : index
    %520 = vector.load %arg2[%519, %c0_111, %c0_112] : memref<8x2x1xf32, #tpu.memory_space<vmem>>, vector<1x2x1xf32>
    %521 = vector.shape_cast %520 : vector<1x2x1xf32> to vector<2x1xf32>
    %cst_113 = arith.constant 0.000000e+00 : f32
    %522 = vector.broadcast %cst_113 : f32 to vector<2x1xf32>
    %523 = arith.cmpf ogt, %521, %522 : vector<2x1xf32>
    %cst_114 = arith.constant 0.000000e+00 : f32
    %524 = vector.shape_cast %518 : vector<2x1xi1> to vector<2x1xi1>
    %525 = vector.broadcast %524 : vector<2x1xi1> to vector<2x32xi1>
    %526 = vector.broadcast %cst_114 : f32 to vector<2x32xf32>
    %527 = arith.select %525, %487, %526 : vector<2x32xi1>, vector<2x32xf32>
    %528 = arith.index_cast %c4_i32 : i32 to index
    %c0_115 = arith.constant 0 : index
    %c0_116 = arith.constant 0 : index
    %529 = vector.load %arg4[%528, %c0_115, %c0_116] : memref<8x2x64xf32, #tpu.memory_space<vmem>>, vector<1x2x32xf32>
    %530 = vector.shape_cast %529 : vector<1x2x32xf32> to vector<2x32xf32>
    %531 = vector.shape_cast %527 : vector<2x32xf32> to vector<1x2x32xf32>
    tpu.vector_store %arg4[%528, %c0_115, %c0_116], %531 {strides = array<i32>} : memref<8x2x64xf32, #tpu.memory_space<vmem>>, vector<1x2x32xf32>,
    %cst_117 = arith.constant 0.000000e+00 : f32
    %532 = vector.shape_cast %523 : vector<2x1xi1> to vector<2x1xi1>
    %533 = vector.broadcast %532 : vector<2x1xi1> to vector<2x32xi1>
    %534 = vector.broadcast %cst_117 : f32 to vector<2x32xf32>
    %535 = arith.select %533, %513, %534 : vector<2x32xi1>, vector<2x32xf32>
    %536 = arith.index_cast %447 : i32 to index
    %c0_118 = arith.constant 0 : index
    %c32_119 = arith.constant 32 : index
    %537 = vector.load %arg4[%536, %c0_118, %c32_119] : memref<8x2x64xf32, #tpu.memory_space<vmem>>, vector<1x2x32xf32>
    %538 = vector.shape_cast %537 : vector<1x2x32xf32> to vector<2x32xf32>
    %539 = vector.shape_cast %535 : vector<2x32xf32> to vector<1x2x32xf32>
    tpu.vector_store %arg4[%536, %c0_118, %c32_119], %539 {strides = array<i32>} : memref<8x2x64xf32, #tpu.memory_space<vmem>>, vector<1x2x32xf32>,
    %540 = vector.extract_strided_slice %437 {offsets = [0, 0], sizes = [2, 32], strides = [1, 1]} : vector<2x64xf32> to vector<2x32xf32>
    %541 = vector.shape_cast %518 : vector<2x1xi1> to vector<2x1xi1>
    %542 = vector.broadcast %541 : vector<2x1xi1> to vector<2x32xi1>
    %543 = arith.select %542, %487, %540 : vector<2x32xi1>, vector<2x32xf32>
    %544 = vector.extract_strided_slice %437 {offsets = [0, 32], sizes = [2, 32], strides = [1, 1]} : vector<2x64xf32> to vector<2x32xf32>
    %545 = vector.shape_cast %523 : vector<2x1xi1> to vector<2x1xi1>
    %546 = vector.broadcast %545 : vector<2x1xi1> to vector<2x32xi1>
    %547 = arith.select %546, %513, %544 : vector<2x32xi1>, vector<2x32xf32>
    %548 = tpu.concatenate %543, %547 in 1 : vector<2x32xf32>, vector<2x32xf32> -> vector<2x64xf32>
    %549 = vector.extract_strided_slice %446 {offsets = [0, 0], sizes = [2, 32], strides = [1, 1]} : vector<2x64xf32> to vector<2x32xf32>
    %550 = vector.shape_cast %518 : vector<2x1xi1> to vector<2x1xi1>
    %551 = vector.broadcast %550 : vector<2x1xi1> to vector<2x32xi1>
    %552 = arith.select %551, %485, %549 : vector<2x32xi1>, vector<2x32xf32>
    %553 = vector.extract_strided_slice %446 {offsets = [0, 32], sizes = [2, 32], strides = [1, 1]} : vector<2x64xf32> to vector<2x32xf32>
    %554 = vector.shape_cast %523 : vector<2x1xi1> to vector<2x1xi1>
    %555 = vector.broadcast %554 : vector<2x1xi1> to vector<2x32xi1>
    %556 = arith.select %555, %511, %553 : vector<2x32xi1>, vector<2x32xf32>
    %557 = tpu.concatenate %552, %556 in 1 : vector<2x32xf32>, vector<2x32xf32> -> vector<2x64xf32>
    %c5_i32 = arith.constant 5 : i32
    %c7_i32_120 = arith.constant 7 : i32
    %558 = arith.subi %c7_i32_120, %c5_i32 : i32
    %559 = arith.truncf %548 : vector<2x64xf32> to vector<2x64xbf16>
    %cst_121 = arith.constant dense<0.000000e+00> : vector<2x256xf32>
    %560 = tpu.matmul %559, %0, %cst_121 {dimension_numbers = #tpu.dot_dimension_numbers<[1], [0], [0], [1], [0, 0, 1, 1], [], []>} : vector<2x64xbf16>, vector<64x256xbf16>, vector<2x256xf32> -> vector<2x256xf32>
    %561 = arith.index_cast %c5_i32 : i32 to index
    %c0_122 = arith.constant 0 : index
    %c0_123 = arith.constant 0 : index
    %562 = vector.load %arg1[%561, %c0_122, %c0_123] : memref<8x2x256xf32, #tpu.memory_space<vmem>>, vector<1x2x256xf32>
    %563 = vector.shape_cast %562 : vector<1x2x256xf32> to vector<2x256xf32>
    %564 = arith.index_cast %558 : i32 to index
    %c0_124 = arith.constant 0 : index
    %c0_125 = arith.constant 0 : index
    %565 = vector.load %arg1[%564, %c0_124, %c0_125] : memref<8x2x256xf32, #tpu.memory_space<vmem>>, vector<1x2x256xf32>
    %566 = vector.shape_cast %565 : vector<1x2x256xf32> to vector<2x256xf32>
    %567 = vector.extract_strided_slice %563 {offsets = [0, 0], sizes = [2, 128], strides = [1, 1]} : vector<2x256xf32> to vector<2x128xf32>
    %568 = vector.extract_strided_slice %560 {offsets = [0, 0], sizes = [2, 128], strides = [1, 1]} : vector<2x256xf32> to vector<2x128xf32>
    %569 = arith.addf %567, %568 : vector<2x128xf32>
    %570 = vector.extract_strided_slice %566 {offsets = [0, 128], sizes = [2, 128], strides = [1, 1]} : vector<2x256xf32> to vector<2x128xf32>
    %571 = vector.extract_strided_slice %560 {offsets = [0, 128], sizes = [2, 128], strides = [1, 1]} : vector<2x256xf32> to vector<2x128xf32>
    %572 = arith.addf %570, %571 : vector<2x128xf32>
    %573 = vector.extract_strided_slice %557 {offsets = [0, 0], sizes = [2, 32], strides = [1, 1]} : vector<2x64xf32> to vector<2x32xf32>
    %574 = vector.extract_strided_slice %569 {offsets = [0, 0], sizes = [2, 32], strides = [1, 1]} : vector<2x128xf32> to vector<2x32xf32>
    %575 = arith.negf %574 : vector<2x32xf32>
    %576 = math.exp %575 : vector<2x32xf32>
    %cst_126 = arith.constant 1.000000e+00 : f32
    %577 = vector.broadcast %cst_126 : f32 to vector<2x32xf32>
    %578 = arith.addf %577, %576 : vector<2x32xf32>
    %579 = arith.divf %577, %578 : vector<2x32xf32>
    %580 = vector.extract_strided_slice %569 {offsets = [0, 32], sizes = [2, 32], strides = [1, 1]} : vector<2x128xf32> to vector<2x32xf32>
    %581 = arith.negf %580 : vector<2x32xf32>
    %582 = math.exp %581 : vector<2x32xf32>
    %cst_127 = arith.constant 1.000000e+00 : f32
    %583 = vector.broadcast %cst_127 : f32 to vector<2x32xf32>
    %584 = arith.addf %583, %582 : vector<2x32xf32>
    %585 = arith.divf %583, %584 : vector<2x32xf32>
    %586 = vector.extract_strided_slice %569 {offsets = [0, 64], sizes = [2, 32], strides = [1, 1]} : vector<2x128xf32> to vector<2x32xf32>
    %587 = math.tanh %586 : vector<2x32xf32>
    %588 = vector.extract_strided_slice %569 {offsets = [0, 96], sizes = [2, 32], strides = [1, 1]} : vector<2x128xf32> to vector<2x32xf32>
    %589 = arith.negf %588 : vector<2x32xf32>
    %590 = math.exp %589 : vector<2x32xf32>
    %cst_128 = arith.constant 1.000000e+00 : f32
    %591 = vector.broadcast %cst_128 : f32 to vector<2x32xf32>
    %592 = arith.addf %591, %590 : vector<2x32xf32>
    %593 = arith.divf %591, %592 : vector<2x32xf32>
    %594 = arith.mulf %585, %573 : vector<2x32xf32>
    %595 = arith.mulf %579, %587 : vector<2x32xf32>
    %596 = arith.addf %594, %595 : vector<2x32xf32>
    %597 = math.tanh %596 : vector<2x32xf32>
    %598 = arith.mulf %593, %597 : vector<2x32xf32>
    %599 = vector.extract_strided_slice %557 {offsets = [0, 32], sizes = [2, 32], strides = [1, 1]} : vector<2x64xf32> to vector<2x32xf32>
    %600 = vector.extract_strided_slice %572 {offsets = [0, 0], sizes = [2, 32], strides = [1, 1]} : vector<2x128xf32> to vector<2x32xf32>
    %601 = arith.negf %600 : vector<2x32xf32>
    %602 = math.exp %601 : vector<2x32xf32>
    %cst_129 = arith.constant 1.000000e+00 : f32
    %603 = vector.broadcast %cst_129 : f32 to vector<2x32xf32>
    %604 = arith.addf %603, %602 : vector<2x32xf32>
    %605 = arith.divf %603, %604 : vector<2x32xf32>
    %606 = vector.extract_strided_slice %572 {offsets = [0, 32], sizes = [2, 32], strides = [1, 1]} : vector<2x128xf32> to vector<2x32xf32>
    %607 = arith.negf %606 : vector<2x32xf32>
    %608 = math.exp %607 : vector<2x32xf32>
    %cst_130 = arith.constant 1.000000e+00 : f32
    %609 = vector.broadcast %cst_130 : f32 to vector<2x32xf32>
    %610 = arith.addf %609, %608 : vector<2x32xf32>
    %611 = arith.divf %609, %610 : vector<2x32xf32>
    %612 = vector.extract_strided_slice %572 {offsets = [0, 64], sizes = [2, 32], strides = [1, 1]} : vector<2x128xf32> to vector<2x32xf32>
    %613 = math.tanh %612 : vector<2x32xf32>
    %614 = vector.extract_strided_slice %572 {offsets = [0, 96], sizes = [2, 32], strides = [1, 1]} : vector<2x128xf32> to vector<2x32xf32>
    %615 = arith.negf %614 : vector<2x32xf32>
    %616 = math.exp %615 : vector<2x32xf32>
    %cst_131 = arith.constant 1.000000e+00 : f32
    %617 = vector.broadcast %cst_131 : f32 to vector<2x32xf32>
    %618 = arith.addf %617, %616 : vector<2x32xf32>
    %619 = arith.divf %617, %618 : vector<2x32xf32>
    %620 = arith.mulf %611, %599 : vector<2x32xf32>
    %621 = arith.mulf %605, %613 : vector<2x32xf32>
    %622 = arith.addf %620, %621 : vector<2x32xf32>
    %623 = math.tanh %622 : vector<2x32xf32>
    %624 = arith.mulf %619, %623 : vector<2x32xf32>
    %625 = arith.index_cast %c5_i32 : i32 to index
    %c0_132 = arith.constant 0 : index
    %c0_133 = arith.constant 0 : index
    %626 = vector.load %arg2[%625, %c0_132, %c0_133] : memref<8x2x1xf32, #tpu.memory_space<vmem>>, vector<1x2x1xf32>
    %627 = vector.shape_cast %626 : vector<1x2x1xf32> to vector<2x1xf32>
    %cst_134 = arith.constant 0.000000e+00 : f32
    %628 = vector.broadcast %cst_134 : f32 to vector<2x1xf32>
    %629 = arith.cmpf ogt, %627, %628 : vector<2x1xf32>
    %630 = arith.index_cast %558 : i32 to index
    %c0_135 = arith.constant 0 : index
    %c0_136 = arith.constant 0 : index
    %631 = vector.load %arg2[%630, %c0_135, %c0_136] : memref<8x2x1xf32, #tpu.memory_space<vmem>>, vector<1x2x1xf32>
    %632 = vector.shape_cast %631 : vector<1x2x1xf32> to vector<2x1xf32>
    %cst_137 = arith.constant 0.000000e+00 : f32
    %633 = vector.broadcast %cst_137 : f32 to vector<2x1xf32>
    %634 = arith.cmpf ogt, %632, %633 : vector<2x1xf32>
    %cst_138 = arith.constant 0.000000e+00 : f32
    %635 = vector.shape_cast %629 : vector<2x1xi1> to vector<2x1xi1>
    %636 = vector.broadcast %635 : vector<2x1xi1> to vector<2x32xi1>
    %637 = vector.broadcast %cst_138 : f32 to vector<2x32xf32>
    %638 = arith.select %636, %598, %637 : vector<2x32xi1>, vector<2x32xf32>
    %639 = arith.index_cast %c5_i32 : i32 to index
    %c0_139 = arith.constant 0 : index
    %c0_140 = arith.constant 0 : index
    %640 = vector.load %arg4[%639, %c0_139, %c0_140] : memref<8x2x64xf32, #tpu.memory_space<vmem>>, vector<1x2x32xf32>
    %641 = vector.shape_cast %640 : vector<1x2x32xf32> to vector<2x32xf32>
    %642 = vector.shape_cast %638 : vector<2x32xf32> to vector<1x2x32xf32>
    tpu.vector_store %arg4[%639, %c0_139, %c0_140], %642 {strides = array<i32>} : memref<8x2x64xf32, #tpu.memory_space<vmem>>, vector<1x2x32xf32>,
    %cst_141 = arith.constant 0.000000e+00 : f32
    %643 = vector.shape_cast %634 : vector<2x1xi1> to vector<2x1xi1>
    %644 = vector.broadcast %643 : vector<2x1xi1> to vector<2x32xi1>
    %645 = vector.broadcast %cst_141 : f32 to vector<2x32xf32>
    %646 = arith.select %644, %624, %645 : vector<2x32xi1>, vector<2x32xf32>
    %647 = arith.index_cast %558 : i32 to index
    %c0_142 = arith.constant 0 : index
    %c32_143 = arith.constant 32 : index
    %648 = vector.load %arg4[%647, %c0_142, %c32_143] : memref<8x2x64xf32, #tpu.memory_space<vmem>>, vector<1x2x32xf32>
    %649 = vector.shape_cast %648 : vector<1x2x32xf32> to vector<2x32xf32>
    %650 = vector.shape_cast %646 : vector<2x32xf32> to vector<1x2x32xf32>
    tpu.vector_store %arg4[%647, %c0_142, %c32_143], %650 {strides = array<i32>} : memref<8x2x64xf32, #tpu.memory_space<vmem>>, vector<1x2x32xf32>,
    %651 = vector.extract_strided_slice %548 {offsets = [0, 0], sizes = [2, 32], strides = [1, 1]} : vector<2x64xf32> to vector<2x32xf32>
    %652 = vector.shape_cast %629 : vector<2x1xi1> to vector<2x1xi1>
    %653 = vector.broadcast %652 : vector<2x1xi1> to vector<2x32xi1>
    %654 = arith.select %653, %598, %651 : vector<2x32xi1>, vector<2x32xf32>
    %655 = vector.extract_strided_slice %548 {offsets = [0, 32], sizes = [2, 32], strides = [1, 1]} : vector<2x64xf32> to vector<2x32xf32>
    %656 = vector.shape_cast %634 : vector<2x1xi1> to vector<2x1xi1>
    %657 = vector.broadcast %656 : vector<2x1xi1> to vector<2x32xi1>
    %658 = arith.select %657, %624, %655 : vector<2x32xi1>, vector<2x32xf32>
    %659 = tpu.concatenate %654, %658 in 1 : vector<2x32xf32>, vector<2x32xf32> -> vector<2x64xf32>
    %660 = vector.extract_strided_slice %557 {offsets = [0, 0], sizes = [2, 32], strides = [1, 1]} : vector<2x64xf32> to vector<2x32xf32>
    %661 = vector.shape_cast %629 : vector<2x1xi1> to vector<2x1xi1>
    %662 = vector.broadcast %661 : vector<2x1xi1> to vector<2x32xi1>
    %663 = arith.select %662, %596, %660 : vector<2x32xi1>, vector<2x32xf32>
    %664 = vector.extract_strided_slice %557 {offsets = [0, 32], sizes = [2, 32], strides = [1, 1]} : vector<2x64xf32> to vector<2x32xf32>
    %665 = vector.shape_cast %634 : vector<2x1xi1> to vector<2x1xi1>
    %666 = vector.broadcast %665 : vector<2x1xi1> to vector<2x32xi1>
    %667 = arith.select %666, %622, %664 : vector<2x32xi1>, vector<2x32xf32>
    %668 = tpu.concatenate %663, %667 in 1 : vector<2x32xf32>, vector<2x32xf32> -> vector<2x64xf32>
    %c6_i32 = arith.constant 6 : i32
    %c7_i32_144 = arith.constant 7 : i32
    %669 = arith.subi %c7_i32_144, %c6_i32 : i32
    %670 = arith.truncf %659 : vector<2x64xf32> to vector<2x64xbf16>
    %cst_145 = arith.constant dense<0.000000e+00> : vector<2x256xf32>
    %671 = tpu.matmul %670, %0, %cst_145 {dimension_numbers = #tpu.dot_dimension_numbers<[1], [0], [0], [1], [0, 0, 1, 1], [], []>} : vector<2x64xbf16>, vector<64x256xbf16>, vector<2x256xf32> -> vector<2x256xf32>
    %672 = arith.index_cast %c6_i32 : i32 to index
    %c0_146 = arith.constant 0 : index
    %c0_147 = arith.constant 0 : index
    %673 = vector.load %arg1[%672, %c0_146, %c0_147] : memref<8x2x256xf32, #tpu.memory_space<vmem>>, vector<1x2x256xf32>
    %674 = vector.shape_cast %673 : vector<1x2x256xf32> to vector<2x256xf32>
    %675 = arith.index_cast %669 : i32 to index
    %c0_148 = arith.constant 0 : index
    %c0_149 = arith.constant 0 : index
    %676 = vector.load %arg1[%675, %c0_148, %c0_149] : memref<8x2x256xf32, #tpu.memory_space<vmem>>, vector<1x2x256xf32>
    %677 = vector.shape_cast %676 : vector<1x2x256xf32> to vector<2x256xf32>
    %678 = vector.extract_strided_slice %674 {offsets = [0, 0], sizes = [2, 128], strides = [1, 1]} : vector<2x256xf32> to vector<2x128xf32>
    %679 = vector.extract_strided_slice %671 {offsets = [0, 0], sizes = [2, 128], strides = [1, 1]} : vector<2x256xf32> to vector<2x128xf32>
    %680 = arith.addf %678, %679 : vector<2x128xf32>
    %681 = vector.extract_strided_slice %677 {offsets = [0, 128], sizes = [2, 128], strides = [1, 1]} : vector<2x256xf32> to vector<2x128xf32>
    %682 = vector.extract_strided_slice %671 {offsets = [0, 128], sizes = [2, 128], strides = [1, 1]} : vector<2x256xf32> to vector<2x128xf32>
    %683 = arith.addf %681, %682 : vector<2x128xf32>
    %684 = vector.extract_strided_slice %668 {offsets = [0, 0], sizes = [2, 32], strides = [1, 1]} : vector<2x64xf32> to vector<2x32xf32>
    %685 = vector.extract_strided_slice %680 {offsets = [0, 0], sizes = [2, 32], strides = [1, 1]} : vector<2x128xf32> to vector<2x32xf32>
    %686 = arith.negf %685 : vector<2x32xf32>
    %687 = math.exp %686 : vector<2x32xf32>
    %cst_150 = arith.constant 1.000000e+00 : f32
    %688 = vector.broadcast %cst_150 : f32 to vector<2x32xf32>
    %689 = arith.addf %688, %687 : vector<2x32xf32>
    %690 = arith.divf %688, %689 : vector<2x32xf32>
    %691 = vector.extract_strided_slice %680 {offsets = [0, 32], sizes = [2, 32], strides = [1, 1]} : vector<2x128xf32> to vector<2x32xf32>
    %692 = arith.negf %691 : vector<2x32xf32>
    %693 = math.exp %692 : vector<2x32xf32>
    %cst_151 = arith.constant 1.000000e+00 : f32
    %694 = vector.broadcast %cst_151 : f32 to vector<2x32xf32>
    %695 = arith.addf %694, %693 : vector<2x32xf32>
    %696 = arith.divf %694, %695 : vector<2x32xf32>
    %697 = vector.extract_strided_slice %680 {offsets = [0, 64], sizes = [2, 32], strides = [1, 1]} : vector<2x128xf32> to vector<2x32xf32>
    %698 = math.tanh %697 : vector<2x32xf32>
    %699 = vector.extract_strided_slice %680 {offsets = [0, 96], sizes = [2, 32], strides = [1, 1]} : vector<2x128xf32> to vector<2x32xf32>
    %700 = arith.negf %699 : vector<2x32xf32>
    %701 = math.exp %700 : vector<2x32xf32>
    %cst_152 = arith.constant 1.000000e+00 : f32
    %702 = vector.broadcast %cst_152 : f32 to vector<2x32xf32>
    %703 = arith.addf %702, %701 : vector<2x32xf32>
    %704 = arith.divf %702, %703 : vector<2x32xf32>
    %705 = arith.mulf %696, %684 : vector<2x32xf32>
    %706 = arith.mulf %690, %698 : vector<2x32xf32>
    %707 = arith.addf %705, %706 : vector<2x32xf32>
    %708 = math.tanh %707 : vector<2x32xf32>
    %709 = arith.mulf %704, %708 : vector<2x32xf32>
    %710 = vector.extract_strided_slice %668 {offsets = [0, 32], sizes = [2, 32], strides = [1, 1]} : vector<2x64xf32> to vector<2x32xf32>
    %711 = vector.extract_strided_slice %683 {offsets = [0, 0], sizes = [2, 32], strides = [1, 1]} : vector<2x128xf32> to vector<2x32xf32>
    %712 = arith.negf %711 : vector<2x32xf32>
    %713 = math.exp %712 : vector<2x32xf32>
    %cst_153 = arith.constant 1.000000e+00 : f32
    %714 = vector.broadcast %cst_153 : f32 to vector<2x32xf32>
    %715 = arith.addf %714, %713 : vector<2x32xf32>
    %716 = arith.divf %714, %715 : vector<2x32xf32>
    %717 = vector.extract_strided_slice %683 {offsets = [0, 32], sizes = [2, 32], strides = [1, 1]} : vector<2x128xf32> to vector<2x32xf32>
    %718 = arith.negf %717 : vector<2x32xf32>
    %719 = math.exp %718 : vector<2x32xf32>
    %cst_154 = arith.constant 1.000000e+00 : f32
    %720 = vector.broadcast %cst_154 : f32 to vector<2x32xf32>
    %721 = arith.addf %720, %719 : vector<2x32xf32>
    %722 = arith.divf %720, %721 : vector<2x32xf32>
    %723 = vector.extract_strided_slice %683 {offsets = [0, 64], sizes = [2, 32], strides = [1, 1]} : vector<2x128xf32> to vector<2x32xf32>
    %724 = math.tanh %723 : vector<2x32xf32>
    %725 = vector.extract_strided_slice %683 {offsets = [0, 96], sizes = [2, 32], strides = [1, 1]} : vector<2x128xf32> to vector<2x32xf32>
    %726 = arith.negf %725 : vector<2x32xf32>
    %727 = math.exp %726 : vector<2x32xf32>
    %cst_155 = arith.constant 1.000000e+00 : f32
    %728 = vector.broadcast %cst_155 : f32 to vector<2x32xf32>
    %729 = arith.addf %728, %727 : vector<2x32xf32>
    %730 = arith.divf %728, %729 : vector<2x32xf32>
    %731 = arith.mulf %722, %710 : vector<2x32xf32>
    %732 = arith.mulf %716, %724 : vector<2x32xf32>
    %733 = arith.addf %731, %732 : vector<2x32xf32>
    %734 = math.tanh %733 : vector<2x32xf32>
    %735 = arith.mulf %730, %734 : vector<2x32xf32>
    %736 = arith.index_cast %c6_i32 : i32 to index
    %c0_156 = arith.constant 0 : index
    %c0_157 = arith.constant 0 : index
    %737 = vector.load %arg2[%736, %c0_156, %c0_157] : memref<8x2x1xf32, #tpu.memory_space<vmem>>, vector<1x2x1xf32>
    %738 = vector.shape_cast %737 : vector<1x2x1xf32> to vector<2x1xf32>
    %cst_158 = arith.constant 0.000000e+00 : f32
    %739 = vector.broadcast %cst_158 : f32 to vector<2x1xf32>
    %740 = arith.cmpf ogt, %738, %739 : vector<2x1xf32>
    %741 = arith.index_cast %669 : i32 to index
    %c0_159 = arith.constant 0 : index
    %c0_160 = arith.constant 0 : index
    %742 = vector.load %arg2[%741, %c0_159, %c0_160] : memref<8x2x1xf32, #tpu.memory_space<vmem>>, vector<1x2x1xf32>
    %743 = vector.shape_cast %742 : vector<1x2x1xf32> to vector<2x1xf32>
    %cst_161 = arith.constant 0.000000e+00 : f32
    %744 = vector.broadcast %cst_161 : f32 to vector<2x1xf32>
    %745 = arith.cmpf ogt, %743, %744 : vector<2x1xf32>
    %cst_162 = arith.constant 0.000000e+00 : f32
    %746 = vector.shape_cast %740 : vector<2x1xi1> to vector<2x1xi1>
    %747 = vector.broadcast %746 : vector<2x1xi1> to vector<2x32xi1>
    %748 = vector.broadcast %cst_162 : f32 to vector<2x32xf32>
    %749 = arith.select %747, %709, %748 : vector<2x32xi1>, vector<2x32xf32>
    %750 = arith.index_cast %c6_i32 : i32 to index
    %c0_163 = arith.constant 0 : index
    %c0_164 = arith.constant 0 : index
    %751 = vector.load %arg4[%750, %c0_163, %c0_164] : memref<8x2x64xf32, #tpu.memory_space<vmem>>, vector<1x2x32xf32>
    %752 = vector.shape_cast %751 : vector<1x2x32xf32> to vector<2x32xf32>
    %753 = vector.shape_cast %749 : vector<2x32xf32> to vector<1x2x32xf32>
    tpu.vector_store %arg4[%750, %c0_163, %c0_164], %753 {strides = array<i32>} : memref<8x2x64xf32, #tpu.memory_space<vmem>>, vector<1x2x32xf32>,
    %cst_165 = arith.constant 0.000000e+00 : f32
    %754 = vector.shape_cast %745 : vector<2x1xi1> to vector<2x1xi1>
    %755 = vector.broadcast %754 : vector<2x1xi1> to vector<2x32xi1>
    %756 = vector.broadcast %cst_165 : f32 to vector<2x32xf32>
    %757 = arith.select %755, %735, %756 : vector<2x32xi1>, vector<2x32xf32>
    %758 = arith.index_cast %669 : i32 to index
    %c0_166 = arith.constant 0 : index
    %c32_167 = arith.constant 32 : index
    %759 = vector.load %arg4[%758, %c0_166, %c32_167] : memref<8x2x64xf32, #tpu.memory_space<vmem>>, vector<1x2x32xf32>
    %760 = vector.shape_cast %759 : vector<1x2x32xf32> to vector<2x32xf32>
    %761 = vector.shape_cast %757 : vector<2x32xf32> to vector<1x2x32xf32>
    tpu.vector_store %arg4[%758, %c0_166, %c32_167], %761 {strides = array<i32>} : memref<8x2x64xf32, #tpu.memory_space<vmem>>, vector<1x2x32xf32>,
    %762 = vector.extract_strided_slice %659 {offsets = [0, 0], sizes = [2, 32], strides = [1, 1]} : vector<2x64xf32> to vector<2x32xf32>
    %763 = vector.shape_cast %740 : vector<2x1xi1> to vector<2x1xi1>
    %764 = vector.broadcast %763 : vector<2x1xi1> to vector<2x32xi1>
    %765 = arith.select %764, %709, %762 : vector<2x32xi1>, vector<2x32xf32>
    %766 = vector.extract_strided_slice %659 {offsets = [0, 32], sizes = [2, 32], strides = [1, 1]} : vector<2x64xf32> to vector<2x32xf32>
    %767 = vector.shape_cast %745 : vector<2x1xi1> to vector<2x1xi1>
    %768 = vector.broadcast %767 : vector<2x1xi1> to vector<2x32xi1>
    %769 = arith.select %768, %735, %766 : vector<2x32xi1>, vector<2x32xf32>
    %770 = tpu.concatenate %765, %769 in 1 : vector<2x32xf32>, vector<2x32xf32> -> vector<2x64xf32>
    %771 = vector.extract_strided_slice %668 {offsets = [0, 0], sizes = [2, 32], strides = [1, 1]} : vector<2x64xf32> to vector<2x32xf32>
    %772 = vector.shape_cast %740 : vector<2x1xi1> to vector<2x1xi1>
    %773 = vector.broadcast %772 : vector<2x1xi1> to vector<2x32xi1>
    %774 = arith.select %773, %707, %771 : vector<2x32xi1>, vector<2x32xf32>
    %775 = vector.extract_strided_slice %668 {offsets = [0, 32], sizes = [2, 32], strides = [1, 1]} : vector<2x64xf32> to vector<2x32xf32>
    %776 = vector.shape_cast %745 : vector<2x1xi1> to vector<2x1xi1>
    %777 = vector.broadcast %776 : vector<2x1xi1> to vector<2x32xi1>
    %778 = arith.select %777, %733, %775 : vector<2x32xi1>, vector<2x32xf32>
    %779 = tpu.concatenate %774, %778 in 1 : vector<2x32xf32>, vector<2x32xf32> -> vector<2x64xf32>
    %c7_i32_168 = arith.constant 7 : i32
    %c7_i32_169 = arith.constant 7 : i32
    %780 = arith.subi %c7_i32_169, %c7_i32_168 : i32
    %781 = arith.truncf %770 : vector<2x64xf32> to vector<2x64xbf16>
    %cst_170 = arith.constant dense<0.000000e+00> : vector<2x256xf32>
    %782 = tpu.matmul %781, %0, %cst_170 {dimension_numbers = #tpu.dot_dimension_numbers<[1], [0], [0], [1], [0, 0, 1, 1], [], []>} : vector<2x64xbf16>, vector<64x256xbf16>, vector<2x256xf32> -> vector<2x256xf32>
    %783 = arith.index_cast %c7_i32_168 : i32 to index
    %c0_171 = arith.constant 0 : index
    %c0_172 = arith.constant 0 : index
    %784 = vector.load %arg1[%783, %c0_171, %c0_172] : memref<8x2x256xf32, #tpu.memory_space<vmem>>, vector<1x2x256xf32>
    %785 = vector.shape_cast %784 : vector<1x2x256xf32> to vector<2x256xf32>
    %786 = arith.index_cast %780 : i32 to index
    %c0_173 = arith.constant 0 : index
    %c0_174 = arith.constant 0 : index
    %787 = vector.load %arg1[%786, %c0_173, %c0_174] : memref<8x2x256xf32, #tpu.memory_space<vmem>>, vector<1x2x256xf32>
    %788 = vector.shape_cast %787 : vector<1x2x256xf32> to vector<2x256xf32>
    %789 = vector.extract_strided_slice %785 {offsets = [0, 0], sizes = [2, 128], strides = [1, 1]} : vector<2x256xf32> to vector<2x128xf32>
    %790 = vector.extract_strided_slice %782 {offsets = [0, 0], sizes = [2, 128], strides = [1, 1]} : vector<2x256xf32> to vector<2x128xf32>
    %791 = arith.addf %789, %790 : vector<2x128xf32>
    %792 = vector.extract_strided_slice %788 {offsets = [0, 128], sizes = [2, 128], strides = [1, 1]} : vector<2x256xf32> to vector<2x128xf32>
    %793 = vector.extract_strided_slice %782 {offsets = [0, 128], sizes = [2, 128], strides = [1, 1]} : vector<2x256xf32> to vector<2x128xf32>
    %794 = arith.addf %792, %793 : vector<2x128xf32>
    %795 = vector.extract_strided_slice %779 {offsets = [0, 0], sizes = [2, 32], strides = [1, 1]} : vector<2x64xf32> to vector<2x32xf32>
    %796 = vector.extract_strided_slice %791 {offsets = [0, 0], sizes = [2, 32], strides = [1, 1]} : vector<2x128xf32> to vector<2x32xf32>
    %797 = arith.negf %796 : vector<2x32xf32>
    %798 = math.exp %797 : vector<2x32xf32>
    %cst_175 = arith.constant 1.000000e+00 : f32
    %799 = vector.broadcast %cst_175 : f32 to vector<2x32xf32>
    %800 = arith.addf %799, %798 : vector<2x32xf32>
    %801 = arith.divf %799, %800 : vector<2x32xf32>
    %802 = vector.extract_strided_slice %791 {offsets = [0, 32], sizes = [2, 32], strides = [1, 1]} : vector<2x128xf32> to vector<2x32xf32>
    %803 = arith.negf %802 : vector<2x32xf32>
    %804 = math.exp %803 : vector<2x32xf32>
    %cst_176 = arith.constant 1.000000e+00 : f32
    %805 = vector.broadcast %cst_176 : f32 to vector<2x32xf32>
    %806 = arith.addf %805, %804 : vector<2x32xf32>
    %807 = arith.divf %805, %806 : vector<2x32xf32>
    %808 = vector.extract_strided_slice %791 {offsets = [0, 64], sizes = [2, 32], strides = [1, 1]} : vector<2x128xf32> to vector<2x32xf32>
    %809 = math.tanh %808 : vector<2x32xf32>
    %810 = vector.extract_strided_slice %791 {offsets = [0, 96], sizes = [2, 32], strides = [1, 1]} : vector<2x128xf32> to vector<2x32xf32>
    %811 = arith.negf %810 : vector<2x32xf32>
    %812 = math.exp %811 : vector<2x32xf32>
    %cst_177 = arith.constant 1.000000e+00 : f32
    %813 = vector.broadcast %cst_177 : f32 to vector<2x32xf32>
    %814 = arith.addf %813, %812 : vector<2x32xf32>
    %815 = arith.divf %813, %814 : vector<2x32xf32>
    %816 = arith.mulf %807, %795 : vector<2x32xf32>
    %817 = arith.mulf %801, %809 : vector<2x32xf32>
    %818 = arith.addf %816, %817 : vector<2x32xf32>
    %819 = math.tanh %818 : vector<2x32xf32>
    %820 = arith.mulf %815, %819 : vector<2x32xf32>
    %821 = vector.extract_strided_slice %779 {offsets = [0, 32], sizes = [2, 32], strides = [1, 1]} : vector<2x64xf32> to vector<2x32xf32>
    %822 = vector.extract_strided_slice %794 {offsets = [0, 0], sizes = [2, 32], strides = [1, 1]} : vector<2x128xf32> to vector<2x32xf32>
    %823 = arith.negf %822 : vector<2x32xf32>
    %824 = math.exp %823 : vector<2x32xf32>
    %cst_178 = arith.constant 1.000000e+00 : f32
    %825 = vector.broadcast %cst_178 : f32 to vector<2x32xf32>
    %826 = arith.addf %825, %824 : vector<2x32xf32>
    %827 = arith.divf %825, %826 : vector<2x32xf32>
    %828 = vector.extract_strided_slice %794 {offsets = [0, 32], sizes = [2, 32], strides = [1, 1]} : vector<2x128xf32> to vector<2x32xf32>
    %829 = arith.negf %828 : vector<2x32xf32>
    %830 = math.exp %829 : vector<2x32xf32>
    %cst_179 = arith.constant 1.000000e+00 : f32
    %831 = vector.broadcast %cst_179 : f32 to vector<2x32xf32>
    %832 = arith.addf %831, %830 : vector<2x32xf32>
    %833 = arith.divf %831, %832 : vector<2x32xf32>
    %834 = vector.extract_strided_slice %794 {offsets = [0, 64], sizes = [2, 32], strides = [1, 1]} : vector<2x128xf32> to vector<2x32xf32>
    %835 = math.tanh %834 : vector<2x32xf32>
    %836 = vector.extract_strided_slice %794 {offsets = [0, 96], sizes = [2, 32], strides = [1, 1]} : vector<2x128xf32> to vector<2x32xf32>
    %837 = arith.negf %836 : vector<2x32xf32>
    %838 = math.exp %837 : vector<2x32xf32>
    %cst_180 = arith.constant 1.000000e+00 : f32
    %839 = vector.broadcast %cst_180 : f32 to vector<2x32xf32>
    %840 = arith.addf %839, %838 : vector<2x32xf32>
    %841 = arith.divf %839, %840 : vector<2x32xf32>
    %842 = arith.mulf %833, %821 : vector<2x32xf32>
    %843 = arith.mulf %827, %835 : vector<2x32xf32>
    %844 = arith.addf %842, %843 : vector<2x32xf32>
    %845 = math.tanh %844 : vector<2x32xf32>
    %846 = arith.mulf %841, %845 : vector<2x32xf32>
    %847 = arith.index_cast %c7_i32_168 : i32 to index
    %c0_181 = arith.constant 0 : index
    %c0_182 = arith.constant 0 : index
    %848 = vector.load %arg2[%847, %c0_181, %c0_182] : memref<8x2x1xf32, #tpu.memory_space<vmem>>, vector<1x2x1xf32>
    %849 = vector.shape_cast %848 : vector<1x2x1xf32> to vector<2x1xf32>
    %cst_183 = arith.constant 0.000000e+00 : f32
    %850 = vector.broadcast %cst_183 : f32 to vector<2x1xf32>
    %851 = arith.cmpf ogt, %849, %850 : vector<2x1xf32>
    %852 = arith.index_cast %780 : i32 to index
    %c0_184 = arith.constant 0 : index
    %c0_185 = arith.constant 0 : index
    %853 = vector.load %arg2[%852, %c0_184, %c0_185] : memref<8x2x1xf32, #tpu.memory_space<vmem>>, vector<1x2x1xf32>
    %854 = vector.shape_cast %853 : vector<1x2x1xf32> to vector<2x1xf32>
    %cst_186 = arith.constant 0.000000e+00 : f32
    %855 = vector.broadcast %cst_186 : f32 to vector<2x1xf32>
    %856 = arith.cmpf ogt, %854, %855 : vector<2x1xf32>
    %cst_187 = arith.constant 0.000000e+00 : f32
    %857 = vector.shape_cast %851 : vector<2x1xi1> to vector<2x1xi1>
    %858 = vector.broadcast %857 : vector<2x1xi1> to vector<2x32xi1>
    %859 = vector.broadcast %cst_187 : f32 to vector<2x32xf32>
    %860 = arith.select %858, %820, %859 : vector<2x32xi1>, vector<2x32xf32>
    %861 = arith.index_cast %c7_i32_168 : i32 to index
    %c0_188 = arith.constant 0 : index
    %c0_189 = arith.constant 0 : index
    %862 = vector.load %arg4[%861, %c0_188, %c0_189] : memref<8x2x64xf32, #tpu.memory_space<vmem>>, vector<1x2x32xf32>
    %863 = vector.shape_cast %862 : vector<1x2x32xf32> to vector<2x32xf32>
    %864 = vector.shape_cast %860 : vector<2x32xf32> to vector<1x2x32xf32>
    tpu.vector_store %arg4[%861, %c0_188, %c0_189], %864 {strides = array<i32>} : memref<8x2x64xf32, #tpu.memory_space<vmem>>, vector<1x2x32xf32>,
    %cst_190 = arith.constant 0.000000e+00 : f32
    %865 = vector.shape_cast %856 : vector<2x1xi1> to vector<2x1xi1>
    %866 = vector.broadcast %865 : vector<2x1xi1> to vector<2x32xi1>
    %867 = vector.broadcast %cst_190 : f32 to vector<2x32xf32>
    %868 = arith.select %866, %846, %867 : vector<2x32xi1>, vector<2x32xf32>
    %869 = arith.index_cast %780 : i32 to index
    %c0_191 = arith.constant 0 : index
    %c32_192 = arith.constant 32 : index
    %870 = vector.load %arg4[%869, %c0_191, %c32_192] : memref<8x2x64xf32, #tpu.memory_space<vmem>>, vector<1x2x32xf32>
    %871 = vector.shape_cast %870 : vector<1x2x32xf32> to vector<2x32xf32>
    %872 = vector.shape_cast %868 : vector<2x32xf32> to vector<1x2x32xf32>
    tpu.vector_store %arg4[%869, %c0_191, %c32_192], %872 {strides = array<i32>} : memref<8x2x64xf32, #tpu.memory_space<vmem>>, vector<1x2x32xf32>,
    %873 = vector.extract_strided_slice %770 {offsets = [0, 0], sizes = [2, 32], strides = [1, 1]} : vector<2x64xf32> to vector<2x32xf32>
    %874 = vector.shape_cast %851 : vector<2x1xi1> to vector<2x1xi1>
    %875 = vector.broadcast %874 : vector<2x1xi1> to vector<2x32xi1>
    %876 = arith.select %875, %820, %873 : vector<2x32xi1>, vector<2x32xf32>
    %877 = vector.extract_strided_slice %770 {offsets = [0, 32], sizes = [2, 32], strides = [1, 1]} : vector<2x64xf32> to vector<2x32xf32>
    %878 = vector.shape_cast %856 : vector<2x1xi1> to vector<2x1xi1>
    %879 = vector.broadcast %878 : vector<2x1xi1> to vector<2x32xi1>
    %880 = arith.select %879, %846, %877 : vector<2x32xi1>, vector<2x32xf32>
    %881 = tpu.concatenate %876, %880 in 1 : vector<2x32xf32>, vector<2x32xf32> -> vector<2x64xf32>
    %882 = vector.extract_strided_slice %779 {offsets = [0, 0], sizes = [2, 32], strides = [1, 1]} : vector<2x64xf32> to vector<2x32xf32>
    %883 = vector.shape_cast %851 : vector<2x1xi1> to vector<2x1xi1>
    %884 = vector.broadcast %883 : vector<2x1xi1> to vector<2x32xi1>
    %885 = arith.select %884, %818, %882 : vector<2x32xi1>, vector<2x32xf32>
    %886 = vector.extract_strided_slice %779 {offsets = [0, 32], sizes = [2, 32], strides = [1, 1]} : vector<2x64xf32> to vector<2x32xf32>
    %887 = vector.shape_cast %856 : vector<2x1xi1> to vector<2x1xi1>
    %888 = vector.broadcast %887 : vector<2x1xi1> to vector<2x32xi1>
    %889 = arith.select %888, %844, %886 : vector<2x32xi1>, vector<2x32xf32>
    %890 = tpu.concatenate %885, %889 in 1 : vector<2x32xf32>, vector<2x32xf32> -> vector<2x64xf32>
    %c8_i32 = arith.constant 8 : i32
    return
  }
  func.func @transform_0(%arg0: i32) -> (i32, i32, i32) {
    %c0_i32 = arith.constant 0 : i32
    %c0_i32_0 = arith.constant 0 : i32
    %c0_i32_1 = arith.constant 0 : i32
    %c0_i32_2 = arith.constant 0 : i32
    return %c0_i32, %c0_i32_0, %c0_i32_1 : i32, i32, i32
  }
  func.func @transform_1(%arg0: i32) -> (i32, i32, i32) {
    %c0_i32 = arith.constant 0 : i32
    %c0_i32_0 = arith.constant 0 : i32
    %c0_i32_1 = arith.constant 0 : i32
    %c0_i32_2 = arith.constant 0 : i32
    return %c0_i32, %c0_i32_0, %c0_i32_1 : i32, i32, i32
  }
  func.func @transform_2(%arg0: i32) -> (i32, i32) {
    %c0_i32 = arith.constant 0 : i32
    %c0_i32_0 = arith.constant 0 : i32
    %c0_i32_1 = arith.constant 0 : i32
    return %c0_i32, %c0_i32_0 : i32, i32
  }
  func.func @transform_3(%arg0: i32) -> (i32, i32, i32) {
    %c0_i32 = arith.constant 0 : i32
    %c0_i32_0 = arith.constant 0 : i32
    %c0_i32_1 = arith.constant 0 : i32
    %c0_i32_2 = arith.constant 0 : i32
    return %c0_i32, %c0_i32_0, %c0_i32_1 : i32, i32, i32
  }
}

module attributes {stable_mosaic.version = 11 : i64} {
  func.func @viterbi_kernel(%arg0: i32, %arg1: memref<8x2x64xf32, #tpu.memory_space<vmem>>, %arg2: memref<64x8xf32, #tpu.memory_space<vmem>>, %arg3: memref<1x8xf32, #tpu.memory_space<vmem>>, %arg4: memref<1x8xf32, #tpu.memory_space<vmem>>, %arg5: memref<1x8xf32, #tpu.memory_space<vmem>>, %arg6: memref<8x8xf32, #tpu.memory_space<vmem>>, %arg7: memref<8x2x8xi32, #tpu.memory_space<vmem>>, %arg8: memref<2x8xf32, #tpu.memory_space<vmem>>, %arg9: memref<8x2x8xf32, #tpu.memory_space<vmem>>) attributes {dimension_semantics = [#tpu.dimension_semantics<arbitrary>], iteration_bounds = array<i64: 1>, scalar_prefetch = 0 : i64, scratch_operands = 1 : i64, tpu.core_type = #tpu.core_type<tc>, window_params = [{pipeline_mode = #tpu.pipeline_mode<synchronous>, transform_indices = @transform_0, window_bounds = array<i64: 8, 2, 64>}, {pipeline_mode = #tpu.pipeline_mode<synchronous>, transform_indices = @transform_1, window_bounds = array<i64: 64, 8>}, {pipeline_mode = #tpu.pipeline_mode<synchronous>, transform_indices = @transform_2, window_bounds = array<i64: 1, 8>}, {pipeline_mode = #tpu.pipeline_mode<synchronous>, transform_indices = @transform_3, window_bounds = array<i64: 1, 8>}, {pipeline_mode = #tpu.pipeline_mode<synchronous>, transform_indices = @transform_4, window_bounds = array<i64: 1, 8>}, {pipeline_mode = #tpu.pipeline_mode<synchronous>, transform_indices = @transform_5, window_bounds = array<i64: 8, 8>}, {pipeline_mode = #tpu.pipeline_mode<synchronous>, transform_indices = @transform_6, window_bounds = array<i64: 8, 2, 8>}, {pipeline_mode = #tpu.pipeline_mode<synchronous>, transform_indices = @transform_7, window_bounds = array<i64: 2, 8>}]} {
    %c0 = arith.constant 0 : index
    %c0_0 = arith.constant 0 : index
    %0 = vector.load %arg2[%c0, %c0_0] : memref<64x8xf32, #tpu.memory_space<vmem>>, vector<64x8xf32>
    %c0_1 = arith.constant 0 : index
    %c0_2 = arith.constant 0 : index
    %1 = vector.load %arg3[%c0_1, %c0_2] : memref<1x8xf32, #tpu.memory_space<vmem>>, vector<1x8xf32>
    %c0_3 = arith.constant 0 : index
    %c0_4 = arith.constant 0 : index
    %c0_5 = arith.constant 0 : index
    %2 = vector.load %arg1[%c0_3, %c0_4, %c0_5] : memref<8x2x64xf32, #tpu.memory_space<vmem>>, vector<1x2x64xf32>
    %3 = vector.shape_cast %2 : vector<1x2x64xf32> to vector<2x64xf32>
    %cst = arith.constant dense<0.000000e+00> : vector<2x8xf32>
    %4 = tpu.matmul %3, %0, %cst {dimension_numbers = #tpu.dot_dimension_numbers<[1], [0], [0], [1], [0, 0, 1, 1], [], []>} : vector<2x64xf32>, vector<64x8xf32>, vector<2x8xf32> -> vector<2x8xf32>
    %5 = vector.broadcast %1 : vector<1x8xf32> to vector<2x8xf32>
    %6 = arith.addf %4, %5 : vector<2x8xf32>
    %c0_6 = arith.constant 0 : index
    %c0_7 = arith.constant 0 : index
    %c0_8 = arith.constant 0 : index
    %7 = vector.load %arg9[%c0_6, %c0_7, %c0_8] : memref<8x2x8xf32, #tpu.memory_space<vmem>>, vector<1x2x8xf32>
    %8 = vector.shape_cast %7 : vector<1x2x8xf32> to vector<2x8xf32>
    %9 = vector.shape_cast %6 : vector<2x8xf32> to vector<1x2x8xf32>
    tpu.vector_store %arg9[%c0_6, %c0_7, %c0_8], %9 {strides = array<i32>} : memref<8x2x8xf32, #tpu.memory_space<vmem>>, vector<1x2x8xf32>,
    %c1 = arith.constant 1 : index
    %c0_9 = arith.constant 0 : index
    %c0_10 = arith.constant 0 : index
    %10 = vector.load %arg1[%c1, %c0_9, %c0_10] : memref<8x2x64xf32, #tpu.memory_space<vmem>>, vector<1x2x64xf32>
    %11 = vector.shape_cast %10 : vector<1x2x64xf32> to vector<2x64xf32>
    %cst_11 = arith.constant dense<0.000000e+00> : vector<2x8xf32>
    %12 = tpu.matmul %11, %0, %cst_11 {dimension_numbers = #tpu.dot_dimension_numbers<[1], [0], [0], [1], [0, 0, 1, 1], [], []>} : vector<2x64xf32>, vector<64x8xf32>, vector<2x8xf32> -> vector<2x8xf32>
    %13 = vector.broadcast %1 : vector<1x8xf32> to vector<2x8xf32>
    %14 = arith.addf %12, %13 : vector<2x8xf32>
    %c1_12 = arith.constant 1 : index
    %c0_13 = arith.constant 0 : index
    %c0_14 = arith.constant 0 : index
    %15 = vector.load %arg9[%c1_12, %c0_13, %c0_14] : memref<8x2x8xf32, #tpu.memory_space<vmem>>, vector<1x2x8xf32>
    %16 = vector.shape_cast %15 : vector<1x2x8xf32> to vector<2x8xf32>
    %17 = vector.shape_cast %14 : vector<2x8xf32> to vector<1x2x8xf32>
    tpu.vector_store %arg9[%c1_12, %c0_13, %c0_14], %17 {strides = array<i32>} : memref<8x2x8xf32, #tpu.memory_space<vmem>>, vector<1x2x8xf32>,
    %c2 = arith.constant 2 : index
    %c0_15 = arith.constant 0 : index
    %c0_16 = arith.constant 0 : index
    %18 = vector.load %arg1[%c2, %c0_15, %c0_16] : memref<8x2x64xf32, #tpu.memory_space<vmem>>, vector<1x2x64xf32>
    %19 = vector.shape_cast %18 : vector<1x2x64xf32> to vector<2x64xf32>
    %cst_17 = arith.constant dense<0.000000e+00> : vector<2x8xf32>
    %20 = tpu.matmul %19, %0, %cst_17 {dimension_numbers = #tpu.dot_dimension_numbers<[1], [0], [0], [1], [0, 0, 1, 1], [], []>} : vector<2x64xf32>, vector<64x8xf32>, vector<2x8xf32> -> vector<2x8xf32>
    %21 = vector.broadcast %1 : vector<1x8xf32> to vector<2x8xf32>
    %22 = arith.addf %20, %21 : vector<2x8xf32>
    %c2_18 = arith.constant 2 : index
    %c0_19 = arith.constant 0 : index
    %c0_20 = arith.constant 0 : index
    %23 = vector.load %arg9[%c2_18, %c0_19, %c0_20] : memref<8x2x8xf32, #tpu.memory_space<vmem>>, vector<1x2x8xf32>
    %24 = vector.shape_cast %23 : vector<1x2x8xf32> to vector<2x8xf32>
    %25 = vector.shape_cast %22 : vector<2x8xf32> to vector<1x2x8xf32>
    tpu.vector_store %arg9[%c2_18, %c0_19, %c0_20], %25 {strides = array<i32>} : memref<8x2x8xf32, #tpu.memory_space<vmem>>, vector<1x2x8xf32>,
    %c3 = arith.constant 3 : index
    %c0_21 = arith.constant 0 : index
    %c0_22 = arith.constant 0 : index
    %26 = vector.load %arg1[%c3, %c0_21, %c0_22] : memref<8x2x64xf32, #tpu.memory_space<vmem>>, vector<1x2x64xf32>
    %27 = vector.shape_cast %26 : vector<1x2x64xf32> to vector<2x64xf32>
    %cst_23 = arith.constant dense<0.000000e+00> : vector<2x8xf32>
    %28 = tpu.matmul %27, %0, %cst_23 {dimension_numbers = #tpu.dot_dimension_numbers<[1], [0], [0], [1], [0, 0, 1, 1], [], []>} : vector<2x64xf32>, vector<64x8xf32>, vector<2x8xf32> -> vector<2x8xf32>
    %29 = vector.broadcast %1 : vector<1x8xf32> to vector<2x8xf32>
    %30 = arith.addf %28, %29 : vector<2x8xf32>
    %c3_24 = arith.constant 3 : index
    %c0_25 = arith.constant 0 : index
    %c0_26 = arith.constant 0 : index
    %31 = vector.load %arg9[%c3_24, %c0_25, %c0_26] : memref<8x2x8xf32, #tpu.memory_space<vmem>>, vector<1x2x8xf32>
    %32 = vector.shape_cast %31 : vector<1x2x8xf32> to vector<2x8xf32>
    %33 = vector.shape_cast %30 : vector<2x8xf32> to vector<1x2x8xf32>
    tpu.vector_store %arg9[%c3_24, %c0_25, %c0_26], %33 {strides = array<i32>} : memref<8x2x8xf32, #tpu.memory_space<vmem>>, vector<1x2x8xf32>,
    %c4 = arith.constant 4 : index
    %c0_27 = arith.constant 0 : index
    %c0_28 = arith.constant 0 : index
    %34 = vector.load %arg1[%c4, %c0_27, %c0_28] : memref<8x2x64xf32, #tpu.memory_space<vmem>>, vector<1x2x64xf32>
    %35 = vector.shape_cast %34 : vector<1x2x64xf32> to vector<2x64xf32>
    %cst_29 = arith.constant dense<0.000000e+00> : vector<2x8xf32>
    %36 = tpu.matmul %35, %0, %cst_29 {dimension_numbers = #tpu.dot_dimension_numbers<[1], [0], [0], [1], [0, 0, 1, 1], [], []>} : vector<2x64xf32>, vector<64x8xf32>, vector<2x8xf32> -> vector<2x8xf32>
    %37 = vector.broadcast %1 : vector<1x8xf32> to vector<2x8xf32>
    %38 = arith.addf %36, %37 : vector<2x8xf32>
    %c4_30 = arith.constant 4 : index
    %c0_31 = arith.constant 0 : index
    %c0_32 = arith.constant 0 : index
    %39 = vector.load %arg9[%c4_30, %c0_31, %c0_32] : memref<8x2x8xf32, #tpu.memory_space<vmem>>, vector<1x2x8xf32>
    %40 = vector.shape_cast %39 : vector<1x2x8xf32> to vector<2x8xf32>
    %41 = vector.shape_cast %38 : vector<2x8xf32> to vector<1x2x8xf32>
    tpu.vector_store %arg9[%c4_30, %c0_31, %c0_32], %41 {strides = array<i32>} : memref<8x2x8xf32, #tpu.memory_space<vmem>>, vector<1x2x8xf32>,
    %c5 = arith.constant 5 : index
    %c0_33 = arith.constant 0 : index
    %c0_34 = arith.constant 0 : index
    %42 = vector.load %arg1[%c5, %c0_33, %c0_34] : memref<8x2x64xf32, #tpu.memory_space<vmem>>, vector<1x2x64xf32>
    %43 = vector.shape_cast %42 : vector<1x2x64xf32> to vector<2x64xf32>
    %cst_35 = arith.constant dense<0.000000e+00> : vector<2x8xf32>
    %44 = tpu.matmul %43, %0, %cst_35 {dimension_numbers = #tpu.dot_dimension_numbers<[1], [0], [0], [1], [0, 0, 1, 1], [], []>} : vector<2x64xf32>, vector<64x8xf32>, vector<2x8xf32> -> vector<2x8xf32>
    %45 = vector.broadcast %1 : vector<1x8xf32> to vector<2x8xf32>
    %46 = arith.addf %44, %45 : vector<2x8xf32>
    %c5_36 = arith.constant 5 : index
    %c0_37 = arith.constant 0 : index
    %c0_38 = arith.constant 0 : index
    %47 = vector.load %arg9[%c5_36, %c0_37, %c0_38] : memref<8x2x8xf32, #tpu.memory_space<vmem>>, vector<1x2x8xf32>
    %48 = vector.shape_cast %47 : vector<1x2x8xf32> to vector<2x8xf32>
    %49 = vector.shape_cast %46 : vector<2x8xf32> to vector<1x2x8xf32>
    tpu.vector_store %arg9[%c5_36, %c0_37, %c0_38], %49 {strides = array<i32>} : memref<8x2x8xf32, #tpu.memory_space<vmem>>, vector<1x2x8xf32>,
    %c6 = arith.constant 6 : index
    %c0_39 = arith.constant 0 : index
    %c0_40 = arith.constant 0 : index
    %50 = vector.load %arg1[%c6, %c0_39, %c0_40] : memref<8x2x64xf32, #tpu.memory_space<vmem>>, vector<1x2x64xf32>
    %51 = vector.shape_cast %50 : vector<1x2x64xf32> to vector<2x64xf32>
    %cst_41 = arith.constant dense<0.000000e+00> : vector<2x8xf32>
    %52 = tpu.matmul %51, %0, %cst_41 {dimension_numbers = #tpu.dot_dimension_numbers<[1], [0], [0], [1], [0, 0, 1, 1], [], []>} : vector<2x64xf32>, vector<64x8xf32>, vector<2x8xf32> -> vector<2x8xf32>
    %53 = vector.broadcast %1 : vector<1x8xf32> to vector<2x8xf32>
    %54 = arith.addf %52, %53 : vector<2x8xf32>
    %c6_42 = arith.constant 6 : index
    %c0_43 = arith.constant 0 : index
    %c0_44 = arith.constant 0 : index
    %55 = vector.load %arg9[%c6_42, %c0_43, %c0_44] : memref<8x2x8xf32, #tpu.memory_space<vmem>>, vector<1x2x8xf32>
    %56 = vector.shape_cast %55 : vector<1x2x8xf32> to vector<2x8xf32>
    %57 = vector.shape_cast %54 : vector<2x8xf32> to vector<1x2x8xf32>
    tpu.vector_store %arg9[%c6_42, %c0_43, %c0_44], %57 {strides = array<i32>} : memref<8x2x8xf32, #tpu.memory_space<vmem>>, vector<1x2x8xf32>,
    %c7 = arith.constant 7 : index
    %c0_45 = arith.constant 0 : index
    %c0_46 = arith.constant 0 : index
    %58 = vector.load %arg1[%c7, %c0_45, %c0_46] : memref<8x2x64xf32, #tpu.memory_space<vmem>>, vector<1x2x64xf32>
    %59 = vector.shape_cast %58 : vector<1x2x64xf32> to vector<2x64xf32>
    %cst_47 = arith.constant dense<0.000000e+00> : vector<2x8xf32>
    %60 = tpu.matmul %59, %0, %cst_47 {dimension_numbers = #tpu.dot_dimension_numbers<[1], [0], [0], [1], [0, 0, 1, 1], [], []>} : vector<2x64xf32>, vector<64x8xf32>, vector<2x8xf32> -> vector<2x8xf32>
    %61 = vector.broadcast %1 : vector<1x8xf32> to vector<2x8xf32>
    %62 = arith.addf %60, %61 : vector<2x8xf32>
    %c7_48 = arith.constant 7 : index
    %c0_49 = arith.constant 0 : index
    %c0_50 = arith.constant 0 : index
    %63 = vector.load %arg9[%c7_48, %c0_49, %c0_50] : memref<8x2x8xf32, #tpu.memory_space<vmem>>, vector<1x2x8xf32>
    %64 = vector.shape_cast %63 : vector<1x2x8xf32> to vector<2x8xf32>
    %65 = vector.shape_cast %62 : vector<2x8xf32> to vector<1x2x8xf32>
    tpu.vector_store %arg9[%c7_48, %c0_49, %c0_50], %65 {strides = array<i32>} : memref<8x2x8xf32, #tpu.memory_space<vmem>>, vector<1x2x8xf32>,
    %c0_i32 = arith.constant 0 : i32
    %66 = vector.broadcast %c0_i32 : i32 to vector<2x8xi32>
    %c0_51 = arith.constant 0 : index
    %c0_52 = arith.constant 0 : index
    %c0_53 = arith.constant 0 : index
    %67 = vector.load %arg7[%c0_51, %c0_52, %c0_53] : memref<8x2x8xi32, #tpu.memory_space<vmem>>, vector<1x2x8xi32>
    %68 = vector.shape_cast %67 : vector<1x2x8xi32> to vector<2x8xi32>
    %69 = vector.shape_cast %66 : vector<2x8xi32> to vector<1x2x8xi32>
    tpu.vector_store %arg7[%c0_51, %c0_52, %c0_53], %69 {strides = array<i32>} : memref<8x2x8xi32, #tpu.memory_space<vmem>>, vector<1x2x8xi32>,
    %c0_54 = arith.constant 0 : index
    %c0_55 = arith.constant 0 : index
    %70 = vector.load %arg4[%c0_54, %c0_55] : memref<1x8xf32, #tpu.memory_space<vmem>>, vector<1x8xf32>
    %c0_56 = arith.constant 0 : index
    %c0_57 = arith.constant 0 : index
    %c0_58 = arith.constant 0 : index
    %71 = vector.load %arg9[%c0_56, %c0_57, %c0_58] : memref<8x2x8xf32, #tpu.memory_space<vmem>>, vector<1x2x8xf32>
    %72 = vector.shape_cast %71 : vector<1x2x8xf32> to vector<2x8xf32>
    %73 = vector.broadcast %70 : vector<1x8xf32> to vector<2x8xf32>
    %74 = arith.addf %73, %72 : vector<2x8xf32>
    %c0_59 = arith.constant 0 : index
    %c0_60 = arith.constant 0 : index
    %75 = vector.load %arg6[%c0_59, %c0_60] : memref<8x8xf32, #tpu.memory_space<vmem>>, vector<8x8xf32>
    %76 = vector.shape_cast %75 : vector<8x8xf32> to vector<1x8x8xf32>
    %77 = tpu.iota {dimensions = array<i32: 2>} : vector<2x8x8xi32>
    %c1_i32 = arith.constant 1 : i32
    %78 = vector.shape_cast %74 : vector<2x8xf32> to vector<2x1x8xf32>
    %79 = vector.broadcast %78 : vector<2x1x8xf32> to vector<2x8x8xf32>
    %80 = vector.broadcast %76 : vector<1x8x8xf32> to vector<2x8x8xf32>
    %81 = arith.addf %79, %80 : vector<2x8x8xf32>
    %cst_61 = arith.constant dense<0xFF800000> : vector<2x8xf32>
    %82 = vector.multi_reduction <maximumf>, %81, %cst_61 [2] : vector<2x8x8xf32> to vector<2x8xf32>
    %83 = vector.shape_cast %82 : vector<2x8xf32> to vector<2x8x1xf32>
    %84 = vector.broadcast %83 : vector<2x8x1xf32> to vector<2x8x8xf32>
    %85 = arith.cmpf oeq, %81, %84 : vector<2x8x8xf32>
    %c8_i32 = arith.constant 8 : i32
    %86 = vector.broadcast %c8_i32 : i32 to vector<2x8x8xi32>
    %87 = arith.select %85, %77, %86 : vector<2x8x8xi1>, vector<2x8x8xi32>
    %cst_62 = arith.constant dense<2147483647> : vector<2x8xi32>
    %88 = vector.multi_reduction <minsi>, %87, %cst_62 [2] : vector<2x8x8xi32> to vector<2x8xi32>
    %89 = arith.index_cast %c1_i32 : i32 to index
    %c0_63 = arith.constant 0 : index
    %c0_64 = arith.constant 0 : index
    %90 = vector.load %arg7[%89, %c0_63, %c0_64] : memref<8x2x8xi32, #tpu.memory_space<vmem>>, vector<1x2x8xi32>
    %91 = vector.shape_cast %90 : vector<1x2x8xi32> to vector<2x8xi32>
    %92 = vector.shape_cast %88 : vector<2x8xi32> to vector<1x2x8xi32>
    tpu.vector_store %arg7[%89, %c0_63, %c0_64], %92 {strides = array<i32>} : memref<8x2x8xi32, #tpu.memory_space<vmem>>, vector<1x2x8xi32>,
    %93 = arith.index_cast %c1_i32 : i32 to index
    %c0_65 = arith.constant 0 : index
    %c0_66 = arith.constant 0 : index
    %94 = vector.load %arg9[%93, %c0_65, %c0_66] : memref<8x2x8xf32, #tpu.memory_space<vmem>>, vector<1x2x8xf32>
    %95 = vector.shape_cast %94 : vector<1x2x8xf32> to vector<2x8xf32>
    %96 = arith.addf %82, %95 : vector<2x8xf32>
    %c2_i32 = arith.constant 2 : i32
    %97 = vector.shape_cast %96 : vector<2x8xf32> to vector<2x1x8xf32>
    %98 = vector.broadcast %97 : vector<2x1x8xf32> to vector<2x8x8xf32>
    %99 = vector.broadcast %76 : vector<1x8x8xf32> to vector<2x8x8xf32>
    %100 = arith.addf %98, %99 : vector<2x8x8xf32>
    %cst_67 = arith.constant dense<0xFF800000> : vector<2x8xf32>
    %101 = vector.multi_reduction <maximumf>, %100, %cst_67 [2] : vector<2x8x8xf32> to vector<2x8xf32>
    %102 = vector.shape_cast %101 : vector<2x8xf32> to vector<2x8x1xf32>
    %103 = vector.broadcast %102 : vector<2x8x1xf32> to vector<2x8x8xf32>
    %104 = arith.cmpf oeq, %100, %103 : vector<2x8x8xf32>
    %c8_i32_68 = arith.constant 8 : i32
    %105 = vector.broadcast %c8_i32_68 : i32 to vector<2x8x8xi32>
    %106 = arith.select %104, %77, %105 : vector<2x8x8xi1>, vector<2x8x8xi32>
    %cst_69 = arith.constant dense<2147483647> : vector<2x8xi32>
    %107 = vector.multi_reduction <minsi>, %106, %cst_69 [2] : vector<2x8x8xi32> to vector<2x8xi32>
    %108 = arith.index_cast %c2_i32 : i32 to index
    %c0_70 = arith.constant 0 : index
    %c0_71 = arith.constant 0 : index
    %109 = vector.load %arg7[%108, %c0_70, %c0_71] : memref<8x2x8xi32, #tpu.memory_space<vmem>>, vector<1x2x8xi32>
    %110 = vector.shape_cast %109 : vector<1x2x8xi32> to vector<2x8xi32>
    %111 = vector.shape_cast %107 : vector<2x8xi32> to vector<1x2x8xi32>
    tpu.vector_store %arg7[%108, %c0_70, %c0_71], %111 {strides = array<i32>} : memref<8x2x8xi32, #tpu.memory_space<vmem>>, vector<1x2x8xi32>,
    %112 = arith.index_cast %c2_i32 : i32 to index
    %c0_72 = arith.constant 0 : index
    %c0_73 = arith.constant 0 : index
    %113 = vector.load %arg9[%112, %c0_72, %c0_73] : memref<8x2x8xf32, #tpu.memory_space<vmem>>, vector<1x2x8xf32>
    %114 = vector.shape_cast %113 : vector<1x2x8xf32> to vector<2x8xf32>
    %115 = arith.addf %101, %114 : vector<2x8xf32>
    %c3_i32 = arith.constant 3 : i32
    %116 = vector.shape_cast %115 : vector<2x8xf32> to vector<2x1x8xf32>
    %117 = vector.broadcast %116 : vector<2x1x8xf32> to vector<2x8x8xf32>
    %118 = vector.broadcast %76 : vector<1x8x8xf32> to vector<2x8x8xf32>
    %119 = arith.addf %117, %118 : vector<2x8x8xf32>
    %cst_74 = arith.constant dense<0xFF800000> : vector<2x8xf32>
    %120 = vector.multi_reduction <maximumf>, %119, %cst_74 [2] : vector<2x8x8xf32> to vector<2x8xf32>
    %121 = vector.shape_cast %120 : vector<2x8xf32> to vector<2x8x1xf32>
    %122 = vector.broadcast %121 : vector<2x8x1xf32> to vector<2x8x8xf32>
    %123 = arith.cmpf oeq, %119, %122 : vector<2x8x8xf32>
    %c8_i32_75 = arith.constant 8 : i32
    %124 = vector.broadcast %c8_i32_75 : i32 to vector<2x8x8xi32>
    %125 = arith.select %123, %77, %124 : vector<2x8x8xi1>, vector<2x8x8xi32>
    %cst_76 = arith.constant dense<2147483647> : vector<2x8xi32>
    %126 = vector.multi_reduction <minsi>, %125, %cst_76 [2] : vector<2x8x8xi32> to vector<2x8xi32>
    %127 = arith.index_cast %c3_i32 : i32 to index
    %c0_77 = arith.constant 0 : index
    %c0_78 = arith.constant 0 : index
    %128 = vector.load %arg7[%127, %c0_77, %c0_78] : memref<8x2x8xi32, #tpu.memory_space<vmem>>, vector<1x2x8xi32>
    %129 = vector.shape_cast %128 : vector<1x2x8xi32> to vector<2x8xi32>
    %130 = vector.shape_cast %126 : vector<2x8xi32> to vector<1x2x8xi32>
    tpu.vector_store %arg7[%127, %c0_77, %c0_78], %130 {strides = array<i32>} : memref<8x2x8xi32, #tpu.memory_space<vmem>>, vector<1x2x8xi32>,
    %131 = arith.index_cast %c3_i32 : i32 to index
    %c0_79 = arith.constant 0 : index
    %c0_80 = arith.constant 0 : index
    %132 = vector.load %arg9[%131, %c0_79, %c0_80] : memref<8x2x8xf32, #tpu.memory_space<vmem>>, vector<1x2x8xf32>
    %133 = vector.shape_cast %132 : vector<1x2x8xf32> to vector<2x8xf32>
    %134 = arith.addf %120, %133 : vector<2x8xf32>
    %c4_i32 = arith.constant 4 : i32
    %135 = vector.shape_cast %134 : vector<2x8xf32> to vector<2x1x8xf32>
    %136 = vector.broadcast %135 : vector<2x1x8xf32> to vector<2x8x8xf32>
    %137 = vector.broadcast %76 : vector<1x8x8xf32> to vector<2x8x8xf32>
    %138 = arith.addf %136, %137 : vector<2x8x8xf32>
    %cst_81 = arith.constant dense<0xFF800000> : vector<2x8xf32>
    %139 = vector.multi_reduction <maximumf>, %138, %cst_81 [2] : vector<2x8x8xf32> to vector<2x8xf32>
    %140 = vector.shape_cast %139 : vector<2x8xf32> to vector<2x8x1xf32>
    %141 = vector.broadcast %140 : vector<2x8x1xf32> to vector<2x8x8xf32>
    %142 = arith.cmpf oeq, %138, %141 : vector<2x8x8xf32>
    %c8_i32_82 = arith.constant 8 : i32
    %143 = vector.broadcast %c8_i32_82 : i32 to vector<2x8x8xi32>
    %144 = arith.select %142, %77, %143 : vector<2x8x8xi1>, vector<2x8x8xi32>
    %cst_83 = arith.constant dense<2147483647> : vector<2x8xi32>
    %145 = vector.multi_reduction <minsi>, %144, %cst_83 [2] : vector<2x8x8xi32> to vector<2x8xi32>
    %146 = arith.index_cast %c4_i32 : i32 to index
    %c0_84 = arith.constant 0 : index
    %c0_85 = arith.constant 0 : index
    %147 = vector.load %arg7[%146, %c0_84, %c0_85] : memref<8x2x8xi32, #tpu.memory_space<vmem>>, vector<1x2x8xi32>
    %148 = vector.shape_cast %147 : vector<1x2x8xi32> to vector<2x8xi32>
    %149 = vector.shape_cast %145 : vector<2x8xi32> to vector<1x2x8xi32>
    tpu.vector_store %arg7[%146, %c0_84, %c0_85], %149 {strides = array<i32>} : memref<8x2x8xi32, #tpu.memory_space<vmem>>, vector<1x2x8xi32>,
    %150 = arith.index_cast %c4_i32 : i32 to index
    %c0_86 = arith.constant 0 : index
    %c0_87 = arith.constant 0 : index
    %151 = vector.load %arg9[%150, %c0_86, %c0_87] : memref<8x2x8xf32, #tpu.memory_space<vmem>>, vector<1x2x8xf32>
    %152 = vector.shape_cast %151 : vector<1x2x8xf32> to vector<2x8xf32>
    %153 = arith.addf %139, %152 : vector<2x8xf32>
    %c5_i32 = arith.constant 5 : i32
    %154 = vector.shape_cast %153 : vector<2x8xf32> to vector<2x1x8xf32>
    %155 = vector.broadcast %154 : vector<2x1x8xf32> to vector<2x8x8xf32>
    %156 = vector.broadcast %76 : vector<1x8x8xf32> to vector<2x8x8xf32>
    %157 = arith.addf %155, %156 : vector<2x8x8xf32>
    %cst_88 = arith.constant dense<0xFF800000> : vector<2x8xf32>
    %158 = vector.multi_reduction <maximumf>, %157, %cst_88 [2] : vector<2x8x8xf32> to vector<2x8xf32>
    %159 = vector.shape_cast %158 : vector<2x8xf32> to vector<2x8x1xf32>
    %160 = vector.broadcast %159 : vector<2x8x1xf32> to vector<2x8x8xf32>
    %161 = arith.cmpf oeq, %157, %160 : vector<2x8x8xf32>
    %c8_i32_89 = arith.constant 8 : i32
    %162 = vector.broadcast %c8_i32_89 : i32 to vector<2x8x8xi32>
    %163 = arith.select %161, %77, %162 : vector<2x8x8xi1>, vector<2x8x8xi32>
    %cst_90 = arith.constant dense<2147483647> : vector<2x8xi32>
    %164 = vector.multi_reduction <minsi>, %163, %cst_90 [2] : vector<2x8x8xi32> to vector<2x8xi32>
    %165 = arith.index_cast %c5_i32 : i32 to index
    %c0_91 = arith.constant 0 : index
    %c0_92 = arith.constant 0 : index
    %166 = vector.load %arg7[%165, %c0_91, %c0_92] : memref<8x2x8xi32, #tpu.memory_space<vmem>>, vector<1x2x8xi32>
    %167 = vector.shape_cast %166 : vector<1x2x8xi32> to vector<2x8xi32>
    %168 = vector.shape_cast %164 : vector<2x8xi32> to vector<1x2x8xi32>
    tpu.vector_store %arg7[%165, %c0_91, %c0_92], %168 {strides = array<i32>} : memref<8x2x8xi32, #tpu.memory_space<vmem>>, vector<1x2x8xi32>,
    %169 = arith.index_cast %c5_i32 : i32 to index
    %c0_93 = arith.constant 0 : index
    %c0_94 = arith.constant 0 : index
    %170 = vector.load %arg9[%169, %c0_93, %c0_94] : memref<8x2x8xf32, #tpu.memory_space<vmem>>, vector<1x2x8xf32>
    %171 = vector.shape_cast %170 : vector<1x2x8xf32> to vector<2x8xf32>
    %172 = arith.addf %158, %171 : vector<2x8xf32>
    %c6_i32 = arith.constant 6 : i32
    %173 = vector.shape_cast %172 : vector<2x8xf32> to vector<2x1x8xf32>
    %174 = vector.broadcast %173 : vector<2x1x8xf32> to vector<2x8x8xf32>
    %175 = vector.broadcast %76 : vector<1x8x8xf32> to vector<2x8x8xf32>
    %176 = arith.addf %174, %175 : vector<2x8x8xf32>
    %cst_95 = arith.constant dense<0xFF800000> : vector<2x8xf32>
    %177 = vector.multi_reduction <maximumf>, %176, %cst_95 [2] : vector<2x8x8xf32> to vector<2x8xf32>
    %178 = vector.shape_cast %177 : vector<2x8xf32> to vector<2x8x1xf32>
    %179 = vector.broadcast %178 : vector<2x8x1xf32> to vector<2x8x8xf32>
    %180 = arith.cmpf oeq, %176, %179 : vector<2x8x8xf32>
    %c8_i32_96 = arith.constant 8 : i32
    %181 = vector.broadcast %c8_i32_96 : i32 to vector<2x8x8xi32>
    %182 = arith.select %180, %77, %181 : vector<2x8x8xi1>, vector<2x8x8xi32>
    %cst_97 = arith.constant dense<2147483647> : vector<2x8xi32>
    %183 = vector.multi_reduction <minsi>, %182, %cst_97 [2] : vector<2x8x8xi32> to vector<2x8xi32>
    %184 = arith.index_cast %c6_i32 : i32 to index
    %c0_98 = arith.constant 0 : index
    %c0_99 = arith.constant 0 : index
    %185 = vector.load %arg7[%184, %c0_98, %c0_99] : memref<8x2x8xi32, #tpu.memory_space<vmem>>, vector<1x2x8xi32>
    %186 = vector.shape_cast %185 : vector<1x2x8xi32> to vector<2x8xi32>
    %187 = vector.shape_cast %183 : vector<2x8xi32> to vector<1x2x8xi32>
    tpu.vector_store %arg7[%184, %c0_98, %c0_99], %187 {strides = array<i32>} : memref<8x2x8xi32, #tpu.memory_space<vmem>>, vector<1x2x8xi32>,
    %188 = arith.index_cast %c6_i32 : i32 to index
    %c0_100 = arith.constant 0 : index
    %c0_101 = arith.constant 0 : index
    %189 = vector.load %arg9[%188, %c0_100, %c0_101] : memref<8x2x8xf32, #tpu.memory_space<vmem>>, vector<1x2x8xf32>
    %190 = vector.shape_cast %189 : vector<1x2x8xf32> to vector<2x8xf32>
    %191 = arith.addf %177, %190 : vector<2x8xf32>
    %c7_i32 = arith.constant 7 : i32
    %192 = vector.shape_cast %191 : vector<2x8xf32> to vector<2x1x8xf32>
    %193 = vector.broadcast %192 : vector<2x1x8xf32> to vector<2x8x8xf32>
    %194 = vector.broadcast %76 : vector<1x8x8xf32> to vector<2x8x8xf32>
    %195 = arith.addf %193, %194 : vector<2x8x8xf32>
    %cst_102 = arith.constant dense<0xFF800000> : vector<2x8xf32>
    %196 = vector.multi_reduction <maximumf>, %195, %cst_102 [2] : vector<2x8x8xf32> to vector<2x8xf32>
    %197 = vector.shape_cast %196 : vector<2x8xf32> to vector<2x8x1xf32>
    %198 = vector.broadcast %197 : vector<2x8x1xf32> to vector<2x8x8xf32>
    %199 = arith.cmpf oeq, %195, %198 : vector<2x8x8xf32>
    %c8_i32_103 = arith.constant 8 : i32
    %200 = vector.broadcast %c8_i32_103 : i32 to vector<2x8x8xi32>
    %201 = arith.select %199, %77, %200 : vector<2x8x8xi1>, vector<2x8x8xi32>
    %cst_104 = arith.constant dense<2147483647> : vector<2x8xi32>
    %202 = vector.multi_reduction <minsi>, %201, %cst_104 [2] : vector<2x8x8xi32> to vector<2x8xi32>
    %203 = arith.index_cast %c7_i32 : i32 to index
    %c0_105 = arith.constant 0 : index
    %c0_106 = arith.constant 0 : index
    %204 = vector.load %arg7[%203, %c0_105, %c0_106] : memref<8x2x8xi32, #tpu.memory_space<vmem>>, vector<1x2x8xi32>
    %205 = vector.shape_cast %204 : vector<1x2x8xi32> to vector<2x8xi32>
    %206 = vector.shape_cast %202 : vector<2x8xi32> to vector<1x2x8xi32>
    tpu.vector_store %arg7[%203, %c0_105, %c0_106], %206 {strides = array<i32>} : memref<8x2x8xi32, #tpu.memory_space<vmem>>, vector<1x2x8xi32>,
    %207 = arith.index_cast %c7_i32 : i32 to index
    %c0_107 = arith.constant 0 : index
    %c0_108 = arith.constant 0 : index
    %208 = vector.load %arg9[%207, %c0_107, %c0_108] : memref<8x2x8xf32, #tpu.memory_space<vmem>>, vector<1x2x8xf32>
    %209 = vector.shape_cast %208 : vector<1x2x8xf32> to vector<2x8xf32>
    %210 = arith.addf %196, %209 : vector<2x8xf32>
    %c7_i32_109 = arith.constant 7 : i32
    %c0_110 = arith.constant 0 : index
    %c0_111 = arith.constant 0 : index
    %211 = vector.load %arg5[%c0_110, %c0_111] : memref<1x8xf32, #tpu.memory_space<vmem>>, vector<1x8xf32>
    %212 = vector.broadcast %211 : vector<1x8xf32> to vector<2x8xf32>
    %213 = arith.addf %210, %212 : vector<2x8xf32>
    %c0_112 = arith.constant 0 : index
    %c0_113 = arith.constant 0 : index
    %214 = vector.load %arg8[%c0_112, %c0_113] : memref<2x8xf32, #tpu.memory_space<vmem>>, vector<2x8xf32>
    tpu.vector_store %arg8[%c0_112, %c0_113], %213 {strides = array<i32>} : memref<2x8xf32, #tpu.memory_space<vmem>>, vector<2x8xf32>,
    return
  }
  func.func @transform_0(%arg0: i32) -> (i32, i32, i32) {
    %c0_i32 = arith.constant 0 : i32
    %c0_i32_0 = arith.constant 0 : i32
    %c0_i32_1 = arith.constant 0 : i32
    %c0_i32_2 = arith.constant 0 : i32
    return %c0_i32, %c0_i32_0, %c0_i32_1 : i32, i32, i32
  }
  func.func @transform_1(%arg0: i32) -> (i32, i32) {
    %c0_i32 = arith.constant 0 : i32
    %c0_i32_0 = arith.constant 0 : i32
    %c0_i32_1 = arith.constant 0 : i32
    return %c0_i32, %c0_i32_0 : i32, i32
  }
  func.func @transform_2(%arg0: i32) -> (i32, i32) {
    %c0_i32 = arith.constant 0 : i32
    %c0_i32_0 = arith.constant 0 : i32
    %c0_i32_1 = arith.constant 0 : i32
    return %c0_i32, %c0_i32_0 : i32, i32
  }
  func.func @transform_3(%arg0: i32) -> (i32, i32) {
    %c0_i32 = arith.constant 0 : i32
    %c0_i32_0 = arith.constant 0 : i32
    %c0_i32_1 = arith.constant 0 : i32
    return %c0_i32, %c0_i32_0 : i32, i32
  }
  func.func @transform_4(%arg0: i32) -> (i32, i32) {
    %c0_i32 = arith.constant 0 : i32
    %c0_i32_0 = arith.constant 0 : i32
    %c0_i32_1 = arith.constant 0 : i32
    return %c0_i32, %c0_i32_0 : i32, i32
  }
  func.func @transform_5(%arg0: i32) -> (i32, i32) {
    %c0_i32 = arith.constant 0 : i32
    %c0_i32_0 = arith.constant 0 : i32
    %c0_i32_1 = arith.constant 0 : i32
    return %c0_i32, %c0_i32_0 : i32, i32
  }
  func.func @transform_6(%arg0: i32) -> (i32, i32, i32) {
    %c0_i32 = arith.constant 0 : i32
    %c0_i32_0 = arith.constant 0 : i32
    %c0_i32_1 = arith.constant 0 : i32
    %c0_i32_2 = arith.constant 0 : i32
    return %c0_i32, %c0_i32_0, %c0_i32_1 : i32, i32, i32
  }
  func.func @transform_7(%arg0: i32) -> (i32, i32) {
    %c0_i32 = arith.constant 0 : i32
    %c0_i32_0 = arith.constant 0 : i32
    %c0_i32_1 = arith.constant 0 : i32
    return %c0_i32, %c0_i32_0 : i32, i32
  }
}

</mosaic_0001>

<bundles_post_ra>
// kernel: pos_tagger_forward.5
= control target key start
LH: loop header
LB: loop body
LE: loop exit
PB: predicated region body
PF: predicated region fallthrough
CT: control target
= control target key end

     0   :  { %8 = vsyncpa [#allocation3], 0  ;;  %s381_s0 = inlined_call_operand.hbm [shape: bf16[16,48], index: 0, kind: input, shape index: {}]   ;;  %s382_s1 = inlined_call_operand.hbm [shape: bf16[48,256], index: 1, kind: input, shape index: {}]   ;;  %s383_s2 = inlined_call_operand.hbm [shape: f32[1,256], index: 2, kind: input, shape index: {}]   ;;  %s384_s3 = inlined_call_operand.hbm [shape: f32[16,256], index: 3, kind: output, shape index: {}]  }
   0x1   :  { %9 = vsyncpa [#allocation6], 0 }
   0x2   :  { %10 = vsyncpa [#allocation4], 0  ;;  %s302_s12 = smov [#allocation5]   ;;  %s208_s16 = scalar_lea.hbm %s382_s1, 768 }
   0x3   :  { %s28_s13 = sshll.u32 %s302_s12, 4  ;;  %p209_p0 = scmp.ne.s32.totalorder %s382_s1, %s208_s16  ;;  %s29_s13 = int_to_ptr.vmem [resolvable:$true] %s28_s13 }
   0x4   :  { %p212_p1 = scmp.lt.u32.totalorder %s208_s16, %s382_s1 }
   0x6   :  { %p214_p2 = pnand %p212_p1, %p209_p0 }
   0x8   :  { %217 = shalt.err (!%p214_p2)
}
   0x9   :  { %s218_s21 = scalar_lea.vmem %s29_s13, 768  ;;  %p223_p4 = scmp.lt.s32.totalorder %s29_s13, %s29_s13 }
   0xa   :  { %p219_p3 = scmp.ne.s32.totalorder %s29_s13, %s218_s21  ;;  %p224_p5 = scmp.lt.s32.totalorder %s218_s21, %s218_s21 }
   0xc   :  { %p225_p6 = por %p224_p5, %p223_p4 }
   0xe   :  { %p226_p7 = pnand %p225_p6, %p219_p3 }
  0x10   :  { %229 = shalt.err (!%p226_p7)
}
  0x11   :  { %s303_s22 = smov 128   ;;  %s304_s23 = smov 8  }
  0x12   :  { %34 = dma.hbm_to_vmem [thread:$0]  %s382_s1, 768, %s29_s13, [#allocation6], %s303_s22, %s303_s22, %s304_s23  }
  0x13   :  { %s305_s26 = smov [#allocation2]   ;;  %s230_s30 = scalar_lea.hbm %s381_s0, 128 }
  0x14   :  { %s16_s27 = sshll.u32 %s305_s26, 4  ;;  %p231_p8 = scmp.ne.s32.totalorder %s381_s0, %s230_s30  ;;  %s17_s27 = int_to_ptr.vmem [resolvable:$true] %s16_s27 }
  0x15   :  { %p234_p9 = scmp.lt.u32.totalorder %s230_s30, %s381_s0 }
  0x17   :  { %p236_p10 = pnand %p234_p9, %p231_p8 }
  0x19   :  { %239 = shalt.err (!%p236_p10)
}
  0x1a   :  { %s240_s8 = scalar_lea.vmem %s17_s27, 128  ;;  %p245_p12 = scmp.lt.s32.totalorder %s17_s27, %s17_s27 }
  0x1b   :  { %p241_p11 = scmp.ne.s32.totalorder %s17_s27, %s240_s8  ;;  %p246_p13 = scmp.lt.s32.totalorder %s240_s8, %s240_s8 }
  0x1d   :  { %p247_p0 = por %p246_p13, %p245_p12 }
  0x1f   :  { %p248_p1 = pnand %p247_p0, %p241_p11 }
  0x21   :  { %251 = shalt.err (!%p248_p1)
}
  0x22   :  { %s306_s1 = smov 64   ;;  %s307_s9 = smov 4  }
  0x23   :  { %22 = dma.hbm_to_vmem [thread:$0]  %s381_s0, 128, %s17_s27, [#allocation3], %s306_s1, %s306_s1, %s307_s9  }
  0x24   :  { %s308_s12 = smov [#allocation7]   ;;  %s252_s16 = scalar_lea.hbm %s383_s2, 32 }
  0x25   :  { %s41_s13 = sshll.u32 %s308_s12, 4  ;;  %p253_p2 = scmp.ne.s32.totalorder %s383_s2, %s252_s16  ;;  %s42_s13 = int_to_ptr.vmem [resolvable:$true] %s41_s13 }
  0x26   :  { %p256_p3 = scmp.lt.u32.totalorder %s252_s16, %s383_s2 }
  0x28   :  { %p258_p4 = pnand %p256_p3, %p253_p2 }
  0x2a   :  { %261 = shalt.err (!%p258_p4)
}
  0x2b   :  { %s262_s21 = scalar_lea.vmem %s42_s13, 32  ;;  %p267_p6 = scmp.lt.s32.totalorder %s42_s13, %s42_s13 }
  0x2c   :  { %p263_p5 = scmp.ne.s32.totalorder %s42_s13, %s262_s21  ;;  %p268_p7 = scmp.lt.s32.totalorder %s262_s21, %s262_s21 }
  0x2e   :  { %p269_p8 = por %p268_p7, %p267_p6 }
  0x30   :  { %p270_p9 = pnand %p269_p8, %p263_p5 }
  0x32   :  { %273 = shalt.err (!%p270_p9)
}
  0x33   :  { %44 = dma.hbm_to_vmem [thread:$0]  %s383_s2, 32, %s42_s13, [#allocation6]  }
  0x34   :  { %296 = dma.done.wait [#allocation3], 128  }
  0x35   :  { %297 = vsyncadd [#allocation3], 4294967168 }
  0x36   :  { %298 = dma.done.wait [#allocation6], 800  }
  0x37   :  { %299 = vsyncadd [#allocation6], 4294966496  ;;  %v309_v0 = vmov 0   ;;  %v198_v1 = vld [vmem:[#allocation5 + $0x4] ss:$8 sps:$4 sm:$0xff]   ;;  %v207_v7 = vld [vmem:[#allocation2] sm:$0xff]   ;;  %v65_v8 = vlaneseq }
  0x38   :  { %146 = vmatprep.mubr.bf16.mxu0 %v309_v0  ;;  %v200_v2 = vld [vmem:[#allocation5] ss:$8 sps:$4 sm:$0xff]   ;;  %114 = vmatprep.subr.bf16.mxu0 %v198_v1  ;;  %v201_v3 = vld [vmem:[#allocation5 + $0x14] ss:$8 sps:$4 sm:$0xff]   ;;  %v203_v4 = vld [vmem:[#allocation5 + $0x10] ss:$8 sps:$4 sm:$0xff]  }
  0x39   :  { %115 = vmatpush1.bf16.msra.mxu0 %v200_v2  ;;  %v204_v5 = vld [vmem:[#allocation5 + $0x24] ss:$8 sps:$4 sm:$0xff]   ;;  %v206_v6 = vld [vmem:[#allocation5 + $0x20] ss:$8 sps:$4 sm:$0xff]   ;;  %vm110_vm0 = vcmask 392192   ;;  %v66_v9 = vshrl.u32 %v65_v8, 7 }
  0x3a   :  { %116 = vmatprep.subr.bf16.mxu0 %v201_v3  ;;  %v63_v11 = vld [vmem:[#allocation7] sm:$0x3]  ;;  %s310_s2 = smov [#allocation8]  }
  0x3b   :  { %v67_v10 = vsub.s32 0, %v66_v9  ;;  %v71_v12 = vsub.s32 1, %v66_v9  ;;  %s166_s23 = sshll.u32 %s310_s2, 4  ;;  %s167_s23 = int_to_ptr.vmem [resolvable:$true] %s166_s23 }
  0x3c   :  { %s274_s24 = scalar_lea.vmem %s167_s23, 512  ;;  %p279_p11 = scmp.lt.s32.totalorder %s167_s23, %s167_s23 }
  0x3d   :  { %117 = vmatpush1.bf16.msra.mxu0 %v203_v4  ;;  %v68_v13 = vrot.slane %v63_v11, %v67_v10  ;;  %v72_v14 = vrot.slane %v63_v11, %v71_v12  ;;  %p275_p10 = scmp.ne.s32.totalorder %s167_s23, %s274_s24  ;;  %p280_p12 = scmp.lt.s32.totalorder %s274_s24, %s274_s24 }
  0x3e   :  { %118 = vmatprep.subr.bf16.mxu0 %v204_v5 }
  0x3f   :  { %p281_p13 = por %p280_p12, %p279_p11 }
  0x41   :  { %119 = vmatpush1.bf16.msra.mxu0 %v206_v6  ;;  %p282_p0 = pnand %p281_p13, %p275_p10 }
  0x44   :  { %186 = vmatmul.mubr.msk.bf16.vlgmr.msra.gmra.mrb[0].mxu0 %vm110_vm0, %v207_v7 }
 0x117   :  { %v148_v15 = vpop.f32.mrb[0].mxu0 }
 0x118   :  { %v149_v16 = vadd.f32 %v148_v15, %v68_v13  ;;  %v150_v17 = vpop.f32.mrb[1].mxu0 }
 0x119   :  { %v151_v18 = vadd.f32 %v150_v17, %v72_v14  ;;  %v152_v19 = vpop.f32.mrb[2].mxu0 }
 0x11a   :  { %157 = vst [vmem:[#allocation8] sm:$0xff] %v149_v16  ;;  %v153_v20 = vadd.f32 %v152_v19, %v68_v13  ;;  %v154_v21 = vpop.f32.mrb[3].mxu0 }
 0x11b   :  { %158 = vst [vmem:[#allocation8 + $0x8] sm:$0xff] %v151_v18  ;;  %v155_v22 = vadd.f32 %v154_v21, %v72_v14 }
 0x11c   :  { %159 = vst [vmem:[#allocation8 + $0x10] sm:$0xff] %v153_v20 }
 0x11d   :  { %160 = vst [vmem:[#allocation8 + $0x18] sm:$0xff] %v155_v22 }
 0x11e   :  { %285 = shalt.err (!%p282_p0)
}
 0x11f   :  { %s286_s27 = scalar_lea.hbm %s384_s3, 512 }
 0x120   :  { %p287_p1 = scmp.ne.s32.totalorder %s384_s3, %s286_s27  ;;  %p290_p2 = scmp.lt.u32.totalorder %s286_s27, %s384_s3 }
 0x122   :  { %p292_p3 = pnand %p290_p2, %p287_p1 }
 0x124   :  { %295 = shalt.err (!%p292_p3)
}
 0x125   :  { %s311_s5 = smov 256   ;;  %s312_s6 = smov 16  }
 0x126   :  { %172 = dma.vmem_to_hbm [thread:$0]  %s167_s23, 512, %s384_s3, [#allocation4], %s311_s5, %s311_s5, %s312_s6  }
 0x127   :  { %300 = dma.done.wait [#allocation4], 512  }
 0x128   :  { %301 = vsyncadd [#allocation4], 4294966784 }
 0x129   :  { %176 = vsyncpa [#allocation3], 1 }
 0x12a   :  { %177 = vsyncpa [#allocation6], 1 }
 0x12b   :  { %178 = vsyncpa [#allocation4], 1 }

// kernel: pos_tagger_forward.4
= control target key start
LH: loop header
LB: loop body
LE: loop exit
PB: predicated region body
PF: predicated region fallthrough
CT: control target
= control target key end

     0   :  { %vm83_vm0 = vcmask 130048   ;;  %s889_s1 = inlined_call_operand.vmem [shape: bf16[48,16], index: 1, kind: input, shape index: {}]   ;;  %s890_s0 = inlined_call_operand.vmem [shape: bf16[160,16], index: 0, kind: input, shape index: {}]   ;;  %s891_s2 = inlined_call_operand.vmem [shape: f32[1,16], index: 2, kind: input, shape index: {}]   ;;  %s892_s3 = inlined_call_operand.vmem [shape: f32[16,16], index: 3, kind: output, shape index: {}]  }
   0x1   :  { %v736_v0 = vld [vmem:[%s889_s1 + $0x8] sm:$0xff]   ;;  %v737_v1 = vld [vmem:[%s889_s1] sm:$0xff]   ;;  %v740_v4 = vld [vmem:[%s890_s0 + $0x10] sm:$0xff]  }
   0x2   :  { %648 = vmatprep.subr.bf16.mxu1 %v736_v0  ;;  %v738_v2 = vld [vmem:[%s890_s0 + $0x8] sm:$0xff]   ;;  %666 = vmatprep.subr.bf16.mxu0 %v737_v1  ;;  %v739_v3 = vld [vmem:[%s890_s0] sm:$0xff]   ;;  %v741_v5 = vld [vmem:[%s889_s1 + $0x10] sm:$0xff]  }
   0x3   :  { %649 = vmatpush3.bf16.msra.mxu1 %v736_v0  ;;  %667 = vmatpush3.bf16.msra.mxu0 %v737_v1  ;;  %v742_v6 = vld [vmem:[%s890_s0 + $0x18] sm:$0xff]   ;;  %v743_v7 = vld [vmem:[%s890_s0 + $0x20] sm:$0xff]   ;;  %v744_v8 = vld [vmem:[%s890_s0 + $0x28] sm:$0xff]  }
   0x4   :  { %650 = vmatprep.mubr.msk.bf16.mxu1 %vm83_vm0, %v738_v2  ;;  %668 = vmatprep.mubr.msk.bf16.mxu0 %vm83_vm0, %v739_v3  ;;  %v745_v9 = vld [vmem:[%s890_s0 + $0x10] sm:$0xff]   ;;  %v747_v11 = vld [vmem:[%s890_s0 + $0x18] sm:$0xff]   ;;  %v749_v13 = vld [vmem:[%s890_s0 + $0x20] sm:$0xff]  }
   0x5   :  { %702 = vmatprep.subr.bf16.mxu1 %v737_v1  ;;  %684 = vmatprep.subr.bf16.mxu0 %v741_v5  ;;  %v746_v10 = vld [vmem:[%s890_s0 + $0x30] sm:$0xff]   ;;  %v748_v12 = vld [vmem:[%s890_s0 + $0x38] sm:$0xff]   ;;  %v750_v14 = vld [vmem:[%s890_s0 + $0x40] sm:$0xff]  }
   0x6   :  { %651 = vmatmul.mubr.msk.bf16.vlgmr.msra.gmra.mrb[0].mxu1 %vm83_vm0, %v740_v4  ;;  %669 = vmatmul.mubr.msk.bf16.vlgmr.msra.gmra.mrb[0].mxu0 %vm83_vm0, %v738_v2  ;;  %v751_v15 = vld [vmem:[%s890_s0 + $0x28] sm:$0xff]   ;;  %v752_v16 = vld [vmem:[%s890_s0 + $0x30] sm:$0xff]   ;;  %v753_v17 = vld [vmem:[%s890_s0 + $0x38] sm:$0xff]  }
   0x7   :  { %703 = vmatpush3.bf16.msra.mxu1 %v737_v1  ;;  %685 = vmatpush3.bf16.msra.mxu0 %v741_v5  ;;  %v754_v18 = vld [vmem:[%s890_s0 + $0x40] sm:$0xff]   ;;  %v755_v19 = vld [vmem:[%s890_s0 + $0x48] sm:$0xff]  }
   0x8   :  { %654 = vmatprep.mubr.msk.bf16.mxu1 %vm83_vm0, %v742_v6  ;;  %672 = vmatprep.mubr.msk.bf16.mxu0 %vm83_vm0, %v740_v4  ;;  %v863_v29 = vld [vmem:[%s891_s2] ss:$0 sm:$0xff] }
   0xe   :  { %655 = vmatmul.mubr.msk.bf16.gmra.mrb[4].mxu1 %vm83_vm0, %v743_v7  ;;  %673 = vmatmul.mubr.msk.bf16.gmra.mrb[4].mxu0 %vm83_vm0, %v742_v6 }
   0xf   :  { %658 = vmatprep.mubr.msk.bf16.mxu1 %vm83_vm0, %v744_v8  ;;  %686 = vmatprep.mubr.msk.bf16.mxu0 %vm83_vm0, %v745_v9 }
  0x16   :  { %659 = vmatmul.mubr.msk.bf16.gmra.mrb[8].mxu1 %vm83_vm0, %v746_v10  ;;  %687 = vmatmul.mubr.msk.bf16.vlgmr.msra.gmra.mrb[0].mxu0 %vm83_vm0, %v747_v11 }
  0x17   :  { %662 = vmatprep.mubr.msk.bf16.mxu1 %vm83_vm0, %v748_v12  ;;  %690 = vmatprep.mubr.msk.bf16.mxu0 %vm83_vm0, %v749_v13 }
  0x1e   :  { %663 = vmatmul.mubr.msk.bf16.gmra.mrb[12].mxu1 %vm83_vm0, %v750_v14  ;;  %691 = vmatmul.mubr.msk.bf16.gmra.mrb[4].mxu0 %vm83_vm0, %v751_v15 }
  0x1f   :  { %676 = vmatprep.mubr.msk.bf16.mxu1 %vm83_vm0, %v743_v7  ;;  %694 = vmatprep.mubr.msk.bf16.mxu0 %vm83_vm0, %v752_v16 }
  0x26   :  { %677 = vmatmul.mubr.msk.bf16.vlgmr.msra.gmra.mrb[8].mxu1 %vm83_vm0, %v744_v8  ;;  %695 = vmatmul.mubr.msk.bf16.gmra.mrb[8].mxu0 %vm83_vm0, %v753_v17 }
  0x27   :  { %680 = vmatprep.mubr.msk.bf16.mxu1 %vm83_vm0, %v746_v10  ;;  %698 = vmatprep.mubr.msk.bf16.mxu0 %vm83_vm0, %v754_v18 }
  0x2e   :  { %681 = vmatmul.mubr.msk.bf16.gmra.mrb[12].mxu1 %vm83_vm0, %v748_v12  ;;  %699 = vmatmul.mubr.msk.bf16.gmra.mrb[12].mxu0 %vm83_vm0, %v755_v19 }
  0xd9   :  { %v652_v20 = vpop.f32.mrb[0].mxu1 }
  0xda   :  { %v142_v21 = vpop.f32.mrb[1].mxu1 }
  0xdb   :  { %v653_v22 = vpop.f32.mrb[2].mxu1 }
  0xdc   :  { %v145_v23 = vpop.f32.mrb[3].mxu1 }
  0xe1   :  { %v656_v24 = vpop.f32.mrb[4].mxu1 }
  0xe2   :  { %v158_v25 = vpop.f32.mrb[5].mxu1 }
  0xe3   :  { %v657_v26 = vpop.f32.mrb[6].mxu1 }
  0xe4   :  { %v161_v27 = vpop.f32.mrb[7].mxu1 }
  0xe9   :  { %v688_v28 = vpop.f32.mrb[0].mxu0 }
  0xea   :  { %v704_v30 = vadd.f32 %v688_v28, %v652_v20  ;;  %v438_v31 = vpop.f32.mrb[1].mxu0 }
  0xeb   :  { %v705_v32 = vadd.f32 %v438_v31, %v142_v21  ;;  %v689_v33 = vpop.f32.mrb[2].mxu0 }
  0xec   :  { %v526_v34 = vadd.f32 %v704_v30, %v863_v29  ;;  %v706_v35 = vadd.f32 %v689_v33, %v653_v22  ;;  %v441_v36 = vpop.f32.mrb[3].mxu0 }
  0xed   :  { %v524_v37 = vadd.f32 %v705_v32, %v863_v29  ;;  %v707_v38 = vadd.f32 %v441_v36, %v145_v23 }
  0xee   :  { %v542_v39 = vmax.f32 %v526_v34, 0.0  ;;  %v527_v40 = vadd.f32 %v706_v35, %v863_v29 }
  0xef   :  { %v540_v41 = vmax.f32 %v524_v37, 0.0  ;;  %v525_v42 = vadd.f32 %v707_v38, %v863_v29 }
  0xf0   :  { %v543_v43 = vmax.f32 %v527_v40, 0.0 }
  0xf1   :  { %v556_v44 = vmax.f32 %v540_v41, %v542_v39  ;;  %v541_v45 = vmax.f32 %v525_v42, 0.0  ;;  %v692_v46 = vpop.f32.mrb[4].mxu0 }
  0xf2   :  { %v708_v47 = vadd.f32 %v692_v46, %v656_v24  ;;  %v454_v48 = vpop.f32.mrb[5].mxu0 }
  0xf3   :  { %v557_v49 = vmax.f32 %v541_v45, %v543_v43  ;;  %v709_v50 = vadd.f32 %v454_v48, %v158_v25  ;;  %v693_v51 = vpop.f32.mrb[6].mxu0 }
  0xf4   :  { %v710_v52 = vadd.f32 %v693_v51, %v657_v26  ;;  %v457_v53 = vpop.f32.mrb[7].mxu0  ;;  %v530_v54 = vadd.f32 %v708_v47, %v863_v29 }
  0xf5   :  { %v528_v55 = vadd.f32 %v709_v50, %v863_v29  ;;  %v711_v56 = vadd.f32 %v457_v53, %v161_v27 }
  0xf6   :  { %v531_v58 = vadd.f32 %v710_v52, %v863_v29  ;;  %v546_v61 = vmax.f32 %v530_v54, 0.0 }
  0xf7   :  { %v544_v57 = vmax.f32 %v528_v55, 0.0  ;;  %v529_v59 = vadd.f32 %v711_v56, %v863_v29 }
  0xf8   :  { %v547_v5 = vmax.f32 %v531_v58, 0.0 }
  0xf9   :  { %v678_v60 = vpop.f32.mrb[8].mxu1  ;;  %v558_v62 = vmax.f32 %v556_v44, %v544_v57  ;;  %v545_v63 = vmax.f32 %v529_v59, 0.0  ;;  %v696_v0 = vpop.f32.mrb[8].mxu0 }
  0xfa   :  { %v285_v1 = vpop.f32.mrb[9].mxu1  ;;  %v712_v2 = vadd.f32 %v696_v0, %v678_v60  ;;  %v470_v3 = vpop.f32.mrb[9].mxu0 }
  0xfb   :  { %v679_v4 = vpop.f32.mrb[10].mxu1  ;;  %v559_v6 = vmax.f32 %v557_v49, %v545_v63  ;;  %v713_v7 = vadd.f32 %v470_v3, %v285_v1  ;;  %v560_v8 = vmax.f32 %v558_v62, %v546_v61  ;;  %v697_v9 = vpop.f32.mrb[10].mxu0 }
  0xfc   :  { %v288_v10 = vpop.f32.mrb[11].mxu1  ;;  %v714_v11 = vadd.f32 %v697_v9, %v679_v4  ;;  %v473_v12 = vpop.f32.mrb[11].mxu0  ;;  %v534_v13 = vadd.f32 %v712_v2, %v863_v29 }
  0xfd   :  { %v532_v14 = vadd.f32 %v713_v7, %v863_v29  ;;  %v715_v15 = vadd.f32 %v473_v12, %v288_v10  ;;  %v561_v16 = vmax.f32 %v559_v6, %v547_v5 }
  0xfe   :  { %v535_v18 = vadd.f32 %v714_v11, %v863_v29  ;;  %v550_v21 = vmax.f32 %v534_v13, 0.0 }
  0xff   :  { %v548_v17 = vmax.f32 %v532_v14, 0.0  ;;  %v533_v19 = vadd.f32 %v715_v15, %v863_v29 }
 0x100   :  { %v551_v30 = vmax.f32 %v535_v18, 0.0 }
 0x101   :  { %v682_v20 = vpop.f32.mrb[12].mxu1  ;;  %v562_v22 = vmax.f32 %v560_v8, %v548_v17  ;;  %v549_v23 = vmax.f32 %v533_v19, 0.0  ;;  %v700_v24 = vpop.f32.mrb[12].mxu0 }
 0x102   :  { %v301_v25 = vpop.f32.mrb[13].mxu1  ;;  %v716_v26 = vadd.f32 %v700_v24, %v682_v20  ;;  %v486_v27 = vpop.f32.mrb[13].mxu0 }
 0x103   :  { %v683_v28 = vpop.f32.mrb[14].mxu1  ;;  %v563_v31 = vmax.f32 %v561_v16, %v549_v23  ;;  %v717_v32 = vadd.f32 %v486_v27, %v301_v25  ;;  %v564_v33 = vmax.f32 %v562_v22, %v550_v21  ;;  %v701_v34 = vpop.f32.mrb[14].mxu0 }
 0x104   :  { %v304_v35 = vpop.f32.mrb[15].mxu1  ;;  %v718_v36 = vadd.f32 %v701_v34, %v683_v28  ;;  %v489_v37 = vpop.f32.mrb[15].mxu0  ;;  %v538_v38 = vadd.f32 %v716_v26, %v863_v29 }
 0x105   :  { %v536_v39 = vadd.f32 %v717_v32, %v863_v29  ;;  %v719_v40 = vadd.f32 %v489_v37, %v304_v35  ;;  %v565_v41 = vmax.f32 %v563_v31, %v551_v30 }
 0x106   :  { %v539_v43 = vadd.f32 %v718_v36, %v863_v29  ;;  %v554_v45 = vmax.f32 %v538_v38, 0.0 }
 0x107   :  { %v552_v42 = vmax.f32 %v536_v39, 0.0  ;;  %v537_v44 = vadd.f32 %v719_v40, %v863_v29 }
 0x108   :  { %v555_v49 = vmax.f32 %v539_v43, 0.0 }
 0x109   :  { %v566_v46 = vmax.f32 %v564_v33, %v552_v42  ;;  %v553_v47 = vmax.f32 %v537_v44, 0.0 }
 0x10b   :  { %v568_v48 = vmax.f32 %v566_v46, %v554_v45  ;;  %v567_v50 = vmax.f32 %v565_v41, %v553_v47 }
 0x10d   :  { %570 = vst.msk [vmem:[%s892_s3] sm:$0xff] %vm83_vm0, %v568_v48  ;;  %v569_v51 = vmax.f32 %v567_v50, %v555_v49 }
 0x10f   :  { %571 = vst.msk [vmem:[%s892_s3 + $0x8] sm:$0xff] %vm83_vm0, %v569_v51 }

// kernel: custom-call.6
= control target key start
LH: loop header
LB: loop body
LE: loop exit
PB: predicated region body
PF: predicated region fallthrough
CT: control target
= control target key end

     0   :  { %s6_s0 = inlined_call_operand.vmem [shape: s32[7,2], index: 0, kind: output, shape index: {}]  }

// kernel: pos_tagger_forward.6
= control target key start
LH: loop header
LB: loop body
LE: loop exit
PB: predicated region body
PF: predicated region fallthrough
CT: control target
= control target key end

     0   :  { %8 = vsyncpa [#allocation3], 0  ;;  %s2536_s0 = inlined_call_operand.hbm [shape: f32[8,2,256], index: 0, kind: input, shape index: {}]   ;;  %s2537_s1 = inlined_call_operand.hbm [shape: f32[8,2,1], index: 1, kind: input, shape index: {}]   ;;  %s2538_s2 = inlined_call_operand.hbm [shape: bf16[64,256], index: 2, kind: input, shape index: {}]   ;;  %s2539_s3 = inlined_call_operand.hbm [shape: f32[8,2,64], index: 3, kind: output, shape index: {}]  }
   0x1   :  { %9 = vsyncpa [#allocation6], 0 }
   0x2   :  { %10 = vsyncpa [#allocation4], 0  ;;  %s1951_s12 = smov [#allocation5]   ;;  %s1857_s16 = scalar_lea.hbm %s2537_s1, 256 }
   0x3   :  { %s28_s13 = sshll.u32 %s1951_s12, 4  ;;  %p1858_p0 = scmp.ne.s32.totalorder %s2537_s1, %s1857_s16  ;;  %s29_s13 = int_to_ptr.vmem [resolvable:$true] %s28_s13 }
   0x4   :  { %p1861_p1 = scmp.lt.u32.totalorder %s1857_s16, %s2537_s1 }
   0x6   :  { %p1863_p2 = pnand %p1861_p1, %p1858_p0 }
   0x8   :  { %1866 = shalt.err (!%p1863_p2)
}
   0x9   :  { %s1867_s21 = scalar_lea.vmem %s29_s13, 256  ;;  %p1872_p4 = scmp.lt.s32.totalorder %s29_s13, %s29_s13 }
   0xa   :  { %p1868_p3 = scmp.ne.s32.totalorder %s29_s13, %s1867_s21  ;;  %p1873_p5 = scmp.lt.s32.totalorder %s1867_s21, %s1867_s21 }
   0xc   :  { %p1874_p6 = por %p1873_p5, %p1872_p4 }
   0xe   :  { %p1875_p7 = pnand %p1874_p6, %p1868_p3 }
  0x10   :  { %1878 = shalt.err (!%p1875_p7)
}
  0x11   :  { %s1952_s22 = smov 32   ;;  %s1953_s23 = smov 2  }
  0x12   :  { %34 = dma.hbm_to_vmem [thread:$0]  %s2537_s1, 256, %s29_s13, [#allocation6], %s1952_s22, %s1952_s22, %s1953_s23  }
  0x13   :  { %s1954_s26 = smov [#allocation2]   ;;  %s1879_s30 = scalar_lea.hbm %s2536_s0, 512 }
  0x14   :  { %s16_s27 = sshll.u32 %s1954_s26, 4  ;;  %p1880_p8 = scmp.ne.s32.totalorder %s2536_s0, %s1879_s30  ;;  %s17_s27 = int_to_ptr.vmem [resolvable:$true] %s16_s27 }
  0x15   :  { %p1883_p9 = scmp.lt.u32.totalorder %s1879_s30, %s2536_s0 }
  0x17   :  { %p1885_p10 = pnand %p1883_p9, %p1880_p8 }
  0x19   :  { %1888 = shalt.err (!%p1885_p10)
}
  0x1a   :  { %s1889_s8 = scalar_lea.vmem %s17_s27, 512  ;;  %p1894_p12 = scmp.lt.s32.totalorder %s17_s27, %s17_s27 }
  0x1b   :  { %p1890_p11 = scmp.ne.s32.totalorder %s17_s27, %s1889_s8  ;;  %p1895_p13 = scmp.lt.s32.totalorder %s1889_s8, %s1889_s8 }
  0x1d   :  { %p1896_p0 = por %p1895_p13, %p1894_p12 }
  0x1f   :  { %p1897_p1 = pnand %p1896_p0, %p1890_p11 }
  0x21   :  { %1900 = shalt.err (!%p1897_p1)
}
  0x22   :  { %s1955_s1 = smov 64   ;;  %s1956_s9 = smov 4  }
  0x23   :  { %22 = dma.hbm_to_vmem [thread:$0]  %s2536_s0, 512, %s17_s27, [#allocation3], %s1955_s1, %s1955_s1, %s1956_s9  }
  0x24   :  { %s1957_s12 = smov [#allocation7]   ;;  %s1901_s16 = scalar_lea.hbm %s2538_s2, 1024 }
  0x25   :  { %s40_s13 = sshll.u32 %s1957_s12, 4  ;;  %p1902_p2 = scmp.ne.s32.totalorder %s2538_s2, %s1901_s16  ;;  %s41_s13 = int_to_ptr.vmem [resolvable:$true] %s40_s13 }
  0x26   :  { %p1905_p3 = scmp.lt.u32.totalorder %s1901_s16, %s2538_s2 }
  0x28   :  { %p1907_p4 = pnand %p1905_p3, %p1902_p2 }
  0x2a   :  { %1910 = shalt.err (!%p1907_p4)
}
  0x2b   :  { %s1911_s21 = scalar_lea.vmem %s41_s13, 1024  ;;  %p1916_p6 = scmp.lt.s32.totalorder %s41_s13, %s41_s13 }
  0x2c   :  { %p1912_p5 = scmp.ne.s32.totalorder %s41_s13, %s1911_s21  ;;  %p1917_p7 = scmp.lt.s32.totalorder %s1911_s21, %s1911_s21 }
  0x2e   :  { %p1918_p8 = por %p1917_p7, %p1916_p6 }
  0x30   :  { %p1919_p9 = pnand %p1918_p8, %p1912_p5 }
  0x32   :  { %1922 = shalt.err (!%p1919_p9)
}
  0x33   :  { %s1958_s0 = smov 128   ;;  %s1959_s24 = smov 8  }
  0x34   :  { %46 = dma.hbm_to_vmem [thread:$0]  %s2538_s2, 1024, %s41_s13, [#allocation6], %s1958_s0, %s1958_s0, %s1959_s24  }
  0x35   :  { %1945 = dma.done.wait [#allocation3], 512  }
  0x36   :  { %1946 = vsyncadd [#allocation3], 4294966784 }
  0x37   :  { %1947 = dma.done.wait [#allocation6], 1280  }
  0x38   :  { %1948 = vsyncadd [#allocation6], 4294966016  ;;  %v1960_v0 = vmov 0   ;;  %v2029_v1 = vld [vmem:[#allocation7 + $0x4] ss:$8 sps:$4 sm:$0xff]   ;;  %v220_v42 = vlaneseq  ;;  %s1962_s2 = smov 96  }
  0x39   :  { %141 = vmatprep.mubr.bf16.mxu0 %v1960_v0  ;;  %1709 = vset.pattern.permute.xlu0 %v1960_v0  ;;  %v2031_v2 = vld [vmem:[#allocation7] ss:$8 sps:$4 sm:$0xff]   ;;  %v2034_v3 = vld [vmem:[#allocation7 + $0x14] ss:$8 sps:$4 sm:$0xff]   ;;  %v2038_v4 = vld [vmem:[#allocation7 + $0x10] ss:$8 sps:$4 sm:$0xff]  }
  0x3a   :  { %1708 = vset.pattern.permute.xlu1 %v1960_v0  ;;  %321 = vmatprep.mubr.bf16.mxu1 %v1960_v0  ;;  %v2042_v5 = vld [vmem:[#allocation7 + $0x24] ss:$8 sps:$4 sm:$0xff]   ;;  %v2046_v6 = vld [vmem:[#allocation7 + $0x20] ss:$8 sps:$4 sm:$0xff]   ;;  %v2050_v7 = vld [vmem:[#allocation7 + $0x34] ss:$8 sps:$4 sm:$0xff]  }
  0x3b   :  { %109 = vmatprep.subr.bf16.mxu0 %v2029_v1  ;;  %289 = vmatprep.subr.bf16.mxu1 %v2029_v1  ;;  %v2054_v8 = vld [vmem:[#allocation7 + $0x30] ss:$8 sps:$4 sm:$0xff]   ;;  %v152_v9 = vld [vmem:[#allocation2 + $0x1c] sm:$0xf]  ;;  %v209_v32 = vld [vmem:[#allocation5 + $0xe] sm:$0x3] }
  0x3c   :  { %110 = vmatpush1.bf16.msra.mxu0 %v2031_v2  ;;  %290 = vmatpush1.bf16.msra.mxu1 %v2031_v2  ;;  %v155_v10 = vrot.slane %v152_v9, 2  ;;  %v150_v12 = vld [vmem:[#allocation2] sm:$0xf]  ;;  %vm210_vm0 = vcmp.gt.f32.partialorder %v209_v32, 0.0  ;;  %v1961_v40 = vmov 1983009808  }
  0x3d   :  { %111 = vmatprep.subr.bf16.mxu0 %v2034_v3  ;;  %291 = vmatprep.subr.bf16.mxu1 %v2034_v3  ;;  %v230_v33 = vsel %vm210_vm0, 1, %v1960_v0  ;;  %v218_v41 = vunpack.c.l.s4 %v1961_v40  ;;  %v206_v44 = vld [vmem:[#allocation5] sm:$0x3]  ;;  %v221_v46 = vshrl.u32 %v220_v42, 7  ;;  %vm228_vm3 = vcmask 254976   ;;  %s1963_s27 = smov [#allocation8]  }
  0x3e   :  { %vm207_vm1 = vcmp.gt.f32.partialorder %v206_v44, 0.0  ;;  %vm252_vm5 = vcmask 517376   ;;  %vm254_vm6 = vcmask 261120   ;;  %vm105_vm7 = vcmask 523264   ;;  %s1651_s28 = sshll.u32 %s1963_s27, 4  ;;  %s1652_s28 = int_to_ptr.vmem [resolvable:$true] %s1651_s28 }
  0x3f   :  { %v219_v45 = vunpack.c.0.s8 %v218_v41  ;;  %v211_v48 = vsel %vm207_vm1, 1, %v1960_v0  ;;  %s1923_s29 = scalar_lea.vmem %s1652_s28, 256  ;;  %p1928_p11 = scmp.lt.s32.totalorder %s1652_s28, %s1652_s28 }
  0x40   :  { %112 = vmatpush1.bf16.msra.mxu0 %v2038_v4  ;;  %292 = vmatpush1.bf16.msra.mxu1 %v2038_v4  ;;  %p1924_p10 = scmp.ne.s32.totalorder %s1652_s28, %s1923_s29  ;;  %p1929_p12 = scmp.lt.s32.totalorder %s1923_s29, %s1923_s29 }
  0x41   :  { %113 = vmatprep.subr.bf16.mxu0 %v2042_v5  ;;  %293 = vmatprep.subr.bf16.mxu1 %v2042_v5  ;;  %v2081_v49 = vsub.s32 %v219_v45, %v221_v46 }
  0x42   :  { %p1930_p13 = por %p1929_p12, %p1928_p11 }
  0x44   :  { %114 = vmatpush1.bf16.msra.mxu0 %v2046_v6  ;;  %294 = vmatpush1.bf16.msra.mxu1 %v2046_v6  ;;  %p1931_p0 = pnand %p1930_p13, %p1924_p10 }
  0x45   :  { %115 = vmatprep.subr.bf16.mxu0 %v2050_v7  ;;  %295 = vmatprep.subr.bf16.mxu1 %v2050_v7 }
  0x48   :  { %116 = vmatpush1.bf16.msra.mxu0 %v2054_v8  ;;  %296 = vmatpush1.bf16.msra.mxu1 %v2054_v8 }
  0x49   :  { %493 = vmatprep.subr.bf16.mxu0 %v2029_v1  ;;  %697 = vmatprep.subr.bf16.mxu1 %v2029_v1 }
  0x4b   :  { %142 = vmatmul.mubr.bf16.vlgmr.msra.gmra.mrb[0].mxu0 %v1960_v0 }
  0x4c   :  { %494 = vmatpush1.bf16.msra.mxu0 %v2031_v2  ;;  %525 = vmatprep.mubr.bf16.mxu0 %v1960_v0 }
  0x4d   :  { %495 = vmatprep.subr.bf16.mxu0 %v2034_v3 }
  0x50   :  { %496 = vmatpush1.bf16.msra.mxu0 %v2038_v4 }
  0x51   :  { %497 = vmatprep.subr.bf16.mxu0 %v2042_v5 }
  0x54   :  { %498 = vmatpush1.bf16.msra.mxu0 %v2046_v6 }
  0x55   :  { %499 = vmatprep.subr.bf16.mxu0 %v2050_v7 }
  0x58   :  { %500 = vmatpush1.bf16.msra.mxu0 %v2054_v8 }
  0x59   :  { %901 = vmatprep.subr.bf16.mxu0 %v2029_v1 }
 0x11e   :  { %v143_v11 = vpop.f32.mrb[0].mxu0 }
 0x11f   :  { %v145_v13 = vpop.f32.mrb[1].mxu0  ;;  %v153_v17 = vadd.f32 %v150_v12, %v143_v11  ;;  %v333_v12 = vld [vmem:[#allocation2 + $0x18] sm:$0xf] }
 0x120   :  { %v157_v14 = vadd.f32 %v155_v10, %v145_v13  ;;  %v147_v15 = vpop.f32.mrb[2].mxu0  ;;  %v331_v13 = vld [vmem:[#allocation2 + $0x4] sm:$0xf] }
 0x121   :  { %v148_v16 = vpop.f32.mrb[3].mxu0  ;;  %v1672_v21 = vmul.f32 -1.442695, %v153_v17 }
 0x122   :  { %1722 = vtanh.f32 %v157_v14  ;;  %v1673_v20 = vmul.f32 -1.442695, %v157_v14  ;;  %v336_v14 = vrot.slane %v333_v12, 2 }
 0x123   :  { %1724 = vtanh.f32 %v153_v17 }
 0x124   :  { %1726 = vpow2.f32 %v1673_v20 }
 0x125   :  { %1728 = vpow2.f32 %v1672_v21 }
 0x12c   :  { %v1723_v18 = vpop.eup %1722 }
 0x12d   :  { %191 = vrot.lane.b32.xlu0 %v1723_v18, %s1955_s1  ;;  %v1725_v19 = vpop.eup %1724 }
 0x12e   :  { %v1727_v22 = vpop.eup %1726 }
 0x12f   :  { %v185_v23 = vadd.f32 1.0, %v1727_v22  ;;  %v1729_v24 = vpop.eup %1728 }
 0x130   :  { %v161_v25 = vadd.f32 1.0, %v1729_v24 }
 0x131   :  { %167 = vrot.lane.b32.xlu0 %v1725_v19, %s1955_s1  ;;  %1730 = vrcp.f32 %v185_v23 }
 0x132   :  { %1732 = vrcp.f32 %v161_v25 }
 0x13b   :  { %v1731_v26 = vpop.eup %1730 }
 0x13c   :  { %v1733_v29 = vpop.eup %1732  ;;  %v189_v34 = vmul.f32 0.0, %v1731_v26 }
 0x13d   :  { %v165_v37 = vmul.f32 0.0, %v1733_v29 }
 0x19f   :  { %v192_v27 = vpop.permute.xlu0 %191 }
 0x1a0   :  { %v194_v28 = vmul.f32 %v1731_v26, %v192_v27 }
 0x1a2   :  { %196 = vrot.lane.b32.xlu1 %v194_v28, %s1952_s22 }
 0x1a3   :  { %v168_v30 = vpop.permute.xlu0 %167 }
 0x1a4   :  { %v170_v31 = vmul.f32 %v1733_v29, %v168_v30 }
 0x1a6   :  { %172 = vrot.lane.b32.xlu1 %v170_v31, %s1952_s22 }
 0x1aa   :  { %232 = vperm.xlu1 %1708, %v230_v33  }
 0x214   :  { %v197_v35 = vpop.permute.xlu1 %196 }
 0x215   :  { %v199_v36 = vadd.f32 %v197_v35, %v189_v34 }
 0x217   :  { %1734 = vtanh.f32 %v199_v36  ;;  %v275_v50 = vrot.slane %v199_v36, %v2081_v49  ;;  %v402_v36 = vld [vmem:[#allocation5 + $0xc] sm:$0x3] }
 0x218   :  { %v173_v38 = vpop.permute.xlu1 %172  ;;  %vm403_vm8 = vcmp.gt.f32.partialorder %v402_v36, 0.0 }
 0x219   :  { %v175_v39 = vadd.f32 %v173_v38, %v165_v37 }
 0x21b   :  { %1736 = vtanh.f32 %v175_v39  ;;  %v263_v51 = vrot.slane %v175_v39, %v2081_v49 }
 0x221   :  { %v1735_v43 = vpop.eup %1734 }
 0x222   :  { %202 = vrot.lane.b32.xlu0 %v1735_v43, %s1955_s1  ;;  %v423_v43 = vsel %vm403_vm8, 1, %v1960_v0 }
 0x225   :  { %v1737_v47 = vpop.eup %1736 }
 0x226   :  { %178 = vrot.lane.b32.xlu0 %v1737_v47, %s1955_s1 }
 0x229   :  { %v233_v58 = vpop.permute.xlu1 %232 }
 0x22a   :  { %213 = vperm.xlu0 %1709, %v211_v48   ;;  %vm234_vm2 = vcmp.eq.s32.totalorder %v233_v58, 1 }
 0x22e   :  { %276 = vrot.lane.b32.xlu0 %v275_v50, %s1962_s2 }
 0x232   :  { %264 = vrot.lane.b32.xlu0 %v263_v51, %s1962_s2 }
 0x294   :  { %v203_v52 = vpop.permute.xlu0 %202 }
 0x295   :  { %v205_v53 = vmul.f32 %v1731_v26, %v203_v52 }
 0x297   :  { %v242_v54 = vrot.slane %v205_v53, %v2081_v49 }
 0x298   :  { %v179_v55 = vpop.permute.xlu0 %178 }
 0x299   :  { %v181_v56 = vmul.f32 %v1733_v29, %v179_v55  ;;  %243 = vrot.lane.b32.xlu1 %v242_v54, %s1952_s22  ;;  %v399_v55 = vld [vmem:[#allocation5 + $0x2] sm:$0x3] }
 0x29a   :  { %vm400_vm9 = vcmp.gt.f32.partialorder %v399_v55, 0.0 }
 0x29b   :  { %v223_v57 = vrot.slane %v181_v56, %v2081_v49  ;;  %v404_v58 = vsel %vm400_vm9, 1, %v1960_v0 }
 0x29d   :  { %224 = vrot.lane.b32.xlu1 %v223_v57, %s1952_s22 }
 0x2a9   :  { %v214_v61 = vpop.permute.xlu0 %213 }
 0x2aa   :  { %vm215_vm4 = vcmp.eq.s32.totalorder %v214_v61, 1 }
 0x2ad   :  { %v277_v23 = vpop.permute.xlu0 %276 }
 0x2ae   :  { %v279_v24 = vsel %vm234_vm2, %v277_v23, 0.0 }
 0x2b1   :  { %v265_v31 = vpop.permute.xlu0 %264 }
 0x2b2   :  { %v267_v38 = vsel %vm215_vm4, %v265_v31, 0.0 }
 0x30b   :  { %v244_v59 = vpop.permute.xlu1 %243 }
 0x30c   :  { %v246_v60 = vsel %vm234_vm2, %v244_v59, 0.0 }
 0x30d   :  { %248 = vrot.lane.b32.xlu1 %v246_v60, %s1952_s22 }
 0x30f   :  { %v225_v62 = vpop.permute.xlu1 %224 }
 0x310   :  { %v227_v63 = vsel %vm215_vm4, %v225_v62, 0.0 }
 0x311   :  { %229 = vst.msk [vmem:[#allocation8] sm:$0x3] %vm228_vm3, %v227_v63 }
 0x37f   :  { %v249_v9 = vpop.permute.xlu1 %248 }
 0x380   :  { %253 = vst.msk [vmem:[#allocation8 + $0xe] sm:$0x3] %vm252_vm5, %v249_v9  ;;  %v2097_v10 = vsel %vm254_vm6, %v227_v63, %v249_v9 }
 0x381   :  { %v285_v11 = vpack.c.bf16 %v2097_v10, %v2097_v10 }
 0x383   :  { %1674 = vmatmul.mubr.msk.bf16.vlgmr.msra.gmra.mrb[0].mxu1 %vm105_vm7, %v285_v11 }
 0x384   :  { %698 = vmatpush1.bf16.msra.mxu1 %v2031_v2  ;;  %729 = vmatprep.mubr.bf16.mxu1 %v1960_v0 }
 0x385   :  { %699 = vmatprep.subr.bf16.mxu1 %v2034_v3 }
 0x388   :  { %700 = vmatpush1.bf16.msra.mxu1 %v2038_v4 }
 0x389   :  { %701 = vmatprep.subr.bf16.mxu1 %v2042_v5 }
 0x38c   :  { %702 = vmatpush1.bf16.msra.mxu1 %v2046_v6 }
 0x38d   :  { %703 = vmatprep.subr.bf16.mxu1 %v2050_v7 }
 0x390   :  { %704 = vmatpush1.bf16.msra.mxu1 %v2054_v8 }
 0x391   :  { %1099 = vmatprep.subr.bf16.mxu1 %v2029_v1 }
 0x456   :  { %v323_v15 = vpop.f32.mrb[0].mxu1 }
 0x457   :  { %v334_v16 = vadd.f32 %v331_v13, %v323_v15  ;;  %v325_v17 = vpop.f32.mrb[1].mxu1 }
 0x458   :  { %v338_v18 = vadd.f32 %v336_v14, %v325_v17  ;;  %v327_v19 = vpop.f32.mrb[2].mxu1 }
 0x459   :  { %1738 = vtanh.f32 %v334_v16  ;;  %v328_v20 = vpop.f32.mrb[3].mxu1  ;;  %v1675_v26 = vmul.f32 -1.442695, %v334_v16 }
 0x45a   :  { %1740 = vtanh.f32 %v338_v18  ;;  %v1676_v25 = vmul.f32 -1.442695, %v338_v18 }
 0x45c   :  { %1742 = vpow2.f32 %v1676_v25 }
 0x45d   :  { %1744 = vpow2.f32 %v1675_v26 }
 0x463   :  { %v1739_v21 = vpop.eup %1738 }
 0x464   :  { %v1741_v22 = vpop.eup %1740  ;;  %359 = vrot.lane.b32.xlu0 %v1739_v21, %s1955_s1  ;;  %v535_v21 = vld [vmem:[#allocation2 + $0x8] sm:$0xf] }
 0x465   :  { %383 = vrot.lane.b32.xlu1 %v1741_v22, %s1955_s1 }
 0x466   :  { %v1743_v27 = vpop.eup %1742 }
 0x467   :  { %v377_v28 = vadd.f32 1.0, %v1743_v27  ;;  %v1745_v29 = vpop.eup %1744 }
 0x468   :  { %v342_v30 = vadd.f32 1.0, %v1745_v29 }
 0x469   :  { %281 = vrot.lane.b32.xlu1 %v279_v24, %s1952_s22  ;;  %1746 = vrcp.f32 %v377_v28 }
 0x46a   :  { %1748 = vrcp.f32 %v342_v30 }
 0x473   :  { %v1747_v32 = vpop.eup %1746 }
 0x474   :  { %v1749_v37 = vpop.eup %1748 }
 0x4d6   :  { %v360_v35 = vpop.permute.xlu0 %359 }
 0x4d7   :  { %v384_v33 = vpop.permute.xlu1 %383  ;;  %v362_v41 = vmul.f32 %v1749_v37, %v360_v35 }
 0x4d8   :  { %v386_v34 = vmul.f32 %v1747_v32, %v384_v33 }
 0x4da   :  { %388 = vrot.lane.b32.xlu1 %v386_v34, %s1952_s22 }
 0x4db   :  { %v282_v39 = vpop.permute.xlu1 %281 }
 0x4dc   :  { %v2118_v40 = vsel %vm254_vm6, %v267_v38, %v282_v39 }
 0x4dd   :  { %v353_v42 = vrot.slane %v2118_v40, %v2081_v49  ;;  %v381_v44 = vmul.f32 %v1747_v32, %v2118_v40 }
 0x4de   :  { %364 = vrot.lane.b32.xlu1 %v362_v41, %s1952_s22 }
 0x4df   :  { %354 = vrot.lane.b32.xlu0 %v353_v42, %s1952_s22 }
 0x4e2   :  { %425 = vperm.xlu1 %1708, %v423_v43  }
 0x54c   :  { %v389_v45 = vpop.permute.xlu1 %388 }
 0x54d   :  { %v391_v46 = vadd.f32 %v389_v45, %v381_v44 }
 0x54f   :  { %1750 = vtanh.f32 %v391_v46  ;;  %v476_v62 = vrot.slane %v391_v46, %v2081_v49  ;;  %v606_v46 = vld [vmem:[#allocation5 + $0xa] sm:$0x3] }
 0x550   :  { %v365_v50 = vpop.permute.xlu1 %364  ;;  %vm607_vm12 = vcmp.gt.f32.partialorder %v606_v46, 0.0 }
 0x551   :  { %v355_v47 = vpop.permute.xlu0 %354 }
 0x552   :  { %v357_v48 = vmul.f32 %v1749_v37, %v355_v47 }
 0x554   :  { %v367_v51 = vadd.f32 %v365_v50, %v357_v48 }
 0x556   :  { %1752 = vtanh.f32 %v367_v51  ;;  %v464_v13 = vrot.slane %v367_v51, %v2081_v49 }
 0x559   :  { %v1751_v52 = vpop.eup %1750 }
 0x55a   :  { %394 = vrot.lane.b32.xlu0 %v1751_v52, %s1955_s1 }
 0x560   :  { %v1753_v53 = vpop.eup %1752 }
 0x561   :  { %370 = vrot.lane.b32.xlu0 %v1753_v53, %s1955_s1  ;;  %v2137_v63 = vpop.permute.xlu1 %425 }
 0x562   :  { %vm427_vm10 = vcmp.eq.s32.totalorder %v2137_v63, 1 }
 0x565   :  { %448 = vrot.lane.b32.xlu0 %v2097_v10, %s1962_s2 }
 0x5cc   :  { %v395_v54 = vpop.permute.xlu0 %394 }
 0x5cd   :  { %v397_v56 = vmul.f32 %v1747_v32, %v395_v54  ;;  %v627_v54 = vsel %vm607_vm12, 1, %v1960_v0 }
 0x5cf   :  { %v435_v57 = vrot.slane %v397_v56, %v2081_v49 }
 0x5d1   :  { %436 = vrot.lane.b32.xlu1 %v435_v57, %s1952_s22 }
 0x5d3   :  { %v371_v59 = vpop.permute.xlu0 %370 }
 0x5d4   :  { %v373_v60 = vmul.f32 %v1749_v37, %v371_v59 }
 0x5d5   :  { %406 = vperm.xlu1 %1708, %v404_v58  }
 0x5d6   :  { %v416_v61 = vrot.slane %v373_v60, %v2081_v49 }
 0x5d7   :  { %v449_v9 = vpop.permute.xlu0 %448 }
 0x5d8   :  { %417 = vrot.lane.b32.xlu0 %v416_v61, %s1952_s22 }
 0x5dc   :  { %477 = vrot.lane.b32.xlu0 %v476_v62, %s1962_s2 }
 0x643   :  { %v2140_v11 = vpop.permute.xlu1 %436 }
 0x644   :  { %v451_v12 = vsel %vm427_vm10, %v2140_v11, %v449_v9 }
 0x645   :  { %453 = vrot.lane.b32.xlu1 %v451_v12, %s1952_s22  ;;  %v603_v12 = vld [vmem:[#allocation5 + $0x4] sm:$0x3] }
 0x646   :  { %vm604_vm13 = vcmp.gt.f32.partialorder %v603_v12, 0.0 }
 0x649   :  { %480 = vrot.lane.b32.xlu1 %v2118_v40, %s1962_s2 }
 0x64a   :  { %v418_v15 = vpop.permute.xlu0 %417 }
 0x64d   :  { %465 = vrot.lane.b32.xlu1 %v464_v13, %s1962_s2 }
 0x64e   :  { %v478_v32 = vpop.permute.xlu0 %477 }
 0x654   :  { %v407_v14 = vpop.permute.xlu1 %406 }
 0x655   :  { %vm408_vm11 = vcmp.eq.s32.totalorder %v407_v14, 1 }
 0x656   :  { %v420_v16 = vsel %vm408_vm11, %v418_v15, 0.0  ;;  %v446_v18 = vsel %vm408_vm11, %v418_v15, %v2097_v10  ;;  %v537_v10 = vld [vmem:[#allocation2 + $0x14] sm:$0xf]  ;;  %v608_v15 = vsel %vm604_vm13, 1, %v1960_v0 }
 0x657   :  { %422 = vst.msk [vmem:[#allocation8 + $0x2] sm:$0x3] %vm228_vm3, %v420_v16  ;;  %v540_v22 = vrot.slane %v537_v10, 2 }
 0x6b7   :  { %v454_v17 = vpop.permute.xlu1 %453 }
 0x6b8   :  { %v2155_v19 = vsel %vm254_vm6, %v446_v18, %v454_v17 }
 0x6b9   :  { %v489_v20 = vpack.c.bf16 %v2155_v19, %v2155_v19 }
 0x6bb   :  { %1677 = vmatmul.mubr.msk.bf16.vlgmr.msra.gmra.mrb[4].mxu0 %vm105_vm7, %v489_v20  ;;  %v481_v31 = vpop.permute.xlu1 %480 }
 0x6bc   :  { %902 = vmatpush1.bf16.msra.mxu0 %v2031_v2  ;;  %933 = vmatprep.mubr.bf16.mxu0 %v1960_v0  ;;  %v483_v33 = vsel %vm427_vm10, %v478_v32, %v481_v31  ;;  %v739_v32 = vld [vmem:[#allocation2 + $0xc] sm:$0xf] }
 0x6bd   :  { %903 = vmatprep.subr.bf16.mxu0 %v2034_v3 }
 0x6bf   :  { %v466_v41 = vpop.permute.xlu1 %465 }
 0x6c0   :  { %904 = vmatpush1.bf16.msra.mxu0 %v2038_v4  ;;  %v468_v48 = vsel %vm408_vm11, %v466_v41, %v2118_v40 }
 0x6c1   :  { %905 = vmatprep.subr.bf16.mxu0 %v2042_v5 }
 0x6c4   :  { %906 = vmatpush1.bf16.msra.mxu0 %v2046_v6 }
 0x6c5   :  { %907 = vmatprep.subr.bf16.mxu0 %v2050_v7 }
 0x6c8   :  { %908 = vmatpush1.bf16.msra.mxu0 %v2054_v8 }
 0x6c9   :  { %1297 = vmatprep.subr.bf16.mxu0 %v2029_v1 }
 0x78e   :  { %v527_v23 = vpop.f32.mrb[4].mxu0 }
 0x78f   :  { %v538_v24 = vadd.f32 %v535_v21, %v527_v23  ;;  %v529_v25 = vpop.f32.mrb[5].mxu0 }
 0x790   :  { %v542_v26 = vadd.f32 %v540_v22, %v529_v25  ;;  %v531_v27 = vpop.f32.mrb[6].mxu0 }
 0x791   :  { %1754 = vtanh.f32 %v538_v24  ;;  %v532_v28 = vpop.f32.mrb[7].mxu0  ;;  %v1678_v35 = vmul.f32 -1.442695, %v538_v24 }
 0x792   :  { %1756 = vtanh.f32 %v542_v26  ;;  %v1679_v34 = vmul.f32 -1.442695, %v542_v26 }
 0x794   :  { %1758 = vpow2.f32 %v1679_v34 }
 0x795   :  { %1760 = vpow2.f32 %v1678_v35 }
 0x79b   :  { %v1755_v29 = vpop.eup %1754 }
 0x79c   :  { %v1757_v30 = vpop.eup %1756  ;;  %563 = vrot.lane.b32.xlu1 %v1755_v29, %s1955_s1 }
 0x79d   :  { %587 = vrot.lane.b32.xlu0 %v1757_v30, %s1955_s1 }
 0x79e   :  { %v1759_v36 = vpop.eup %1758 }
 0x79f   :  { %v581_v37 = vadd.f32 1.0, %v1759_v36  ;;  %v1761_v38 = vpop.eup %1760 }
 0x7a0   :  { %v546_v39 = vadd.f32 1.0, %v1761_v38 }
 0x7a1   :  { %485 = vrot.lane.b32.xlu0 %v483_v33, %s1952_s22  ;;  %1762 = vrcp.f32 %v581_v37 }
 0x7a2   :  { %1764 = vrcp.f32 %v546_v39 }
 0x7ab   :  { %v1763_v42 = vpop.eup %1762 }
 0x7ac   :  { %v1765_v47 = vpop.eup %1764 }
 0x80e   :  { %v564_v45 = vpop.permute.xlu1 %563 }
 0x80f   :  { %v588_v43 = vpop.permute.xlu0 %587  ;;  %v566_v52 = vmul.f32 %v1765_v47, %v564_v45 }
 0x810   :  { %v590_v44 = vmul.f32 %v1763_v42, %v588_v43 }
 0x812   :  { %592 = vrot.lane.b32.xlu0 %v590_v44, %s1952_s22 }
 0x813   :  { %v486_v50 = vpop.permute.xlu0 %485 }
 0x814   :  { %v2178_v51 = vsel %vm254_vm6, %v468_v48, %v486_v50 }
 0x815   :  { %v557_v53 = vrot.slane %v2178_v51, %v2081_v49  ;;  %v585_v55 = vmul.f32 %v1763_v42, %v2178_v51 }
 0x816   :  { %568 = vrot.lane.b32.xlu0 %v566_v52, %s1952_s22 }
 0x817   :  { %558 = vrot.lane.b32.xlu1 %v557_v53, %s1952_s22 }
 0x81a   :  { %629 = vperm.xlu0 %1709, %v627_v54  }
 0x884   :  { %v593_v56 = vpop.permute.xlu0 %592 }
 0x885   :  { %v595_v40 = vadd.f32 %v593_v56, %v585_v55 }
 0x887   :  { %1766 = vtanh.f32 %v595_v40  ;;  %v680_v20 = vrot.slane %v595_v40, %v2081_v49 }
 0x888   :  { %v569_v59 = vpop.permute.xlu0 %568 }
 0x889   :  { %v559_v57 = vpop.permute.xlu1 %558 }
 0x88a   :  { %v561_v58 = vmul.f32 %v1765_v47, %v559_v57  ;;  %v810_v57 = vld [vmem:[#allocation5 + $0x8] sm:$0x3] }
 0x88b   :  { %vm811_vm0 = vcmp.gt.f32.partialorder %v810_v57, 0.0 }
 0x88c   :  { %v571_v60 = vadd.f32 %v569_v59, %v561_v58  ;;  %v831_v12 = vsel %vm811_vm0, 1, %v1960_v0 }
 0x88e   :  { %1768 = vtanh.f32 %v571_v60  ;;  %v668_v24 = vrot.slane %v571_v60, %v2081_v49 }
 0x891   :  { %v1767_v61 = vpop.eup %1766 }
 0x892   :  { %598 = vrot.lane.b32.xlu1 %v1767_v61, %s1955_s1 }
 0x898   :  { %v1769_v62 = vpop.eup %1768 }
 0x899   :  { %574 = vrot.lane.b32.xlu1 %v1769_v62, %s1955_s1  ;;  %v2197_v10 = vpop.permute.xlu0 %629 }
 0x89a   :  { %vm631_vm14 = vcmp.eq.s32.totalorder %v2197_v10, 1 }
 0x89d   :  { %652 = vrot.lane.b32.xlu1 %v2155_v19, %s1962_s2 }
 0x904   :  { %v599_v9 = vpop.permute.xlu1 %598 }
 0x905   :  { %v601_v13 = vmul.f32 %v1763_v42, %v599_v9 }
 0x907   :  { %v639_v14 = vrot.slane %v601_v13, %v2081_v49 }
 0x909   :  { %640 = vrot.lane.b32.xlu0 %v639_v14, %s1952_s22 }
 0x90b   :  { %v575_v16 = vpop.permute.xlu1 %574 }
 0x90c   :  { %v577_v17 = vmul.f32 %v1765_v47, %v575_v16 }
 0x90d   :  { %610 = vperm.xlu0 %1709, %v608_v15  }
 0x90e   :  { %v620_v18 = vrot.slane %v577_v17, %v2081_v49 }
 0x90f   :  { %v653_v21 = vpop.permute.xlu1 %652 }
 0x910   :  { %621 = vrot.lane.b32.xlu1 %v620_v18, %s1952_s22 }
 0x914   :  { %681 = vrot.lane.b32.xlu1 %v680_v20, %s1962_s2 }
 0x97b   :  { %v2200_v22 = vpop.permute.xlu0 %640 }
 0x97c   :  { %v655_v23 = vsel %vm631_vm14, %v2200_v22, %v653_v21 }
 0x97d   :  { %657 = vrot.lane.b32.xlu0 %v655_v23, %s1952_s22 }
 0x981   :  { %684 = vrot.lane.b32.xlu0 %v2178_v51, %s1962_s2 }
 0x982   :  { %v622_v26 = vpop.permute.xlu1 %621 }
 0x985   :  { %669 = vrot.lane.b32.xlu0 %v668_v24, %s1962_s2  ;;  %v807_v24 = vld [vmem:[#allocation5 + $0x6] sm:$0x3] }
 0x986   :  { %v682_v44 = vpop.permute.xlu1 %681  ;;  %vm808_vm1 = vcmp.gt.f32.partialorder %v807_v24, 0.0 }
 0x98c   :  { %v611_v25 = vpop.permute.xlu0 %610 }
 0x98d   :  { %vm612_vm15 = vcmp.eq.s32.totalorder %v611_v25, 1 }
 0x98e   :  { %v624_v27 = vsel %vm612_vm15, %v622_v26, 0.0  ;;  %v650_v28 = vsel %vm612_vm15, %v622_v26, %v2155_v19  ;;  %v741_v19 = vld [vmem:[#allocation2 + $0x10] sm:$0xf] }
 0x98f   :  { %626 = vst.msk [vmem:[#allocation8 + $0x4] sm:$0x3] %vm228_vm3, %v624_v27  ;;  %v744_v33 = vrot.slane %v741_v19, 2  ;;  %v812_v27 = vsel %vm808_vm1, 1, %v1960_v0 }
 0x9ef   :  { %v658_v29 = vpop.permute.xlu0 %657 }
 0x9f0   :  { %v2215_v30 = vsel %vm254_vm6, %v650_v28, %v658_v29 }
 0x9f1   :  { %v693_v31 = vpack.c.bf16 %v2215_v30, %v2215_v30 }
 0x9f3   :  { %1680 = vmatmul.mubr.msk.bf16.vlgmr.msra.gmra.mrb[4].mxu1 %vm105_vm7, %v693_v31  ;;  %v685_v43 = vpop.permute.xlu0 %684 }
 0x9f4   :  { %1100 = vmatpush1.bf16.msra.mxu1 %v2031_v2  ;;  %1131 = vmatprep.mubr.bf16.mxu1 %v1960_v0 }
 0x9f5   :  { %1101 = vmatprep.subr.bf16.mxu1 %v2034_v3 }
 0x9f7   :  { %v670_v53 = vpop.permute.xlu0 %669 }
 0x9f8   :  { %1102 = vmatpush1.bf16.msra.mxu1 %v2038_v4  ;;  %v672_v59 = vsel %vm612_vm15, %v670_v53, %v2178_v51 }
 0x9f9   :  { %1103 = vmatprep.subr.bf16.mxu1 %v2042_v5 }
 0x9fc   :  { %1104 = vmatpush1.bf16.msra.mxu1 %v2046_v6 }
 0x9fd   :  { %1105 = vmatprep.subr.bf16.mxu1 %v2050_v7 }
 0xa00   :  { %1106 = vmatpush1.bf16.msra.mxu1 %v2054_v8 }
 0xa01   :  { %1495 = vmatprep.subr.bf16.mxu1 %v2029_v1  ;;  %v687_v1 = vsel %vm631_vm14, %v682_v44, %v685_v43 }
 0xac6   :  { %v731_v34 = vpop.f32.mrb[4].mxu1 }
 0xac7   :  { %v742_v35 = vadd.f32 %v739_v32, %v731_v34  ;;  %v733_v36 = vpop.f32.mrb[5].mxu1 }
 0xac8   :  { %v746_v37 = vadd.f32 %v744_v33, %v733_v36  ;;  %v735_v38 = vpop.f32.mrb[6].mxu1 }
 0xac9   :  { %1770 = vtanh.f32 %v742_v35  ;;  %v736_v39 = vpop.f32.mrb[7].mxu1  ;;  %v1681_v46 = vmul.f32 -1.442695, %v742_v35 }
 0xaca   :  { %1772 = vtanh.f32 %v746_v37  ;;  %v1682_v45 = vmul.f32 -1.442695, %v746_v37 }
 0xacc   :  { %1774 = vpow2.f32 %v1682_v45 }
 0xacd   :  { %1776 = vpow2.f32 %v1681_v46 }
 0xad3   :  { %v1771_v41 = vpop.eup %1770 }
 0xad4   :  { %v1773_v42 = vpop.eup %1772  ;;  %767 = vrot.lane.b32.xlu0 %v1771_v41, %s1955_s1 }
 0xad5   :  { %791 = vrot.lane.b32.xlu1 %v1773_v42, %s1955_s1 }
 0xad6   :  { %v1775_v47 = vpop.eup %1774 }
 0xad7   :  { %v785_v48 = vadd.f32 1.0, %v1775_v47  ;;  %v1777_v50 = vpop.eup %1776 }
 0xad8   :  { %v750_v52 = vadd.f32 1.0, %v1777_v50 }
 0xad9   :  { %689 = vrot.lane.b32.xlu1 %v687_v1, %s1952_s22  ;;  %1778 = vrcp.f32 %v785_v48  ;;  %v942_v1 = vld [vmem:[#allocation2 + $0x10] sm:$0xf] }
 0xada   :  { %1780 = vrcp.f32 %v750_v52 }
 0xae3   :  { %v1779_v54 = vpop.eup %1778 }
 0xae4   :  { %v1781_v58 = vpop.eup %1780 }
 0xb46   :  { %v768_v40 = vpop.permute.xlu0 %767 }
 0xb47   :  { %v792_v55 = vpop.permute.xlu1 %791  ;;  %v770_v61 = vmul.f32 %v1781_v58, %v768_v40 }
 0xb48   :  { %v794_v56 = vmul.f32 %v1779_v54, %v792_v55 }
 0xb4a   :  { %796 = vrot.lane.b32.xlu1 %v794_v56, %s1952_s22 }
 0xb4b   :  { %v690_v60 = vpop.permute.xlu1 %689 }
 0xb4c   :  { %v2238_v62 = vsel %vm254_vm6, %v672_v59, %v690_v60 }
 0xb4d   :  { %v761_v9 = vrot.slane %v2238_v62, %v2081_v49  ;;  %v789_v13 = vmul.f32 %v1779_v54, %v2238_v62 }
 0xb4e   :  { %772 = vrot.lane.b32.xlu1 %v770_v61, %s1952_s22 }
 0xb4f   :  { %762 = vrot.lane.b32.xlu0 %v761_v9, %s1952_s22  ;;  %v1010_v9 = vld [vmem:[#allocation5 + $0x6] sm:$0x3] }
 0xb50   :  { %vm1011_vm8 = vcmp.gt.f32.partialorder %v1010_v9, 0.0 }
 0xb52   :  { %833 = vperm.xlu1 %1708, %v831_v12  }
 0xbbc   :  { %v797_v14 = vpop.permute.xlu1 %796 }
 0xbbd   :  { %v799_v51 = vadd.f32 %v797_v14, %v789_v13 }
 0xbbf   :  { %1782 = vtanh.f32 %v799_v51  ;;  %v884_v19 = vrot.slane %v799_v51, %v2081_v49 }
 0xbc0   :  { %v773_v17 = vpop.permute.xlu1 %772 }
 0xbc1   :  { %v763_v15 = vpop.permute.xlu0 %762 }
 0xbc2   :  { %v765_v16 = vmul.f32 %v1781_v58, %v763_v15 }
 0xbc4   :  { %v775_v18 = vadd.f32 %v773_v17, %v765_v16  ;;  %v1030_v17 = vsel %vm1011_vm8, 1, %v1960_v0 }
 0xbc6   :  { %1784 = vtanh.f32 %v775_v18  ;;  %v872_v36 = vrot.slane %v775_v18, %v2081_v49 }
 0xbc9   :  { %v1783_v20 = vpop.eup %1782 }
 0xbca   :  { %802 = vrot.lane.b32.xlu0 %v1783_v20, %s1955_s1 }
 0xbd0   :  { %v1785_v21 = vpop.eup %1784 }
 0xbd1   :  { %778 = vrot.lane.b32.xlu0 %v1785_v21, %s1955_s1  ;;  %v2257_v32 = vpop.permute.xlu1 %833 }
 0xbd2   :  { %vm835_vm2 = vcmp.eq.s32.totalorder %v2257_v32, 1 }
 0xbd5   :  { %856 = vrot.lane.b32.xlu0 %v2215_v30, %s1962_s2 }
 0xc3c   :  { %v803_v23 = vpop.permute.xlu0 %802 }
 0xc3d   :  { %v805_v25 = vmul.f32 %v1779_v54, %v803_v23 }
 0xc3f   :  { %v843_v26 = vrot.slane %v805_v25, %v2081_v49 }
 0xc41   :  { %844 = vrot.lane.b32.xlu1 %v843_v26, %s1952_s22 }
 0xc43   :  { %v779_v28 = vpop.permute.xlu0 %778 }
 0xc44   :  { %v781_v29 = vmul.f32 %v1781_v58, %v779_v28 }
 0xc45   :  { %814 = vperm.xlu1 %1708, %v812_v27  }
 0xc46   :  { %v824_v31 = vrot.slane %v781_v29, %v2081_v49  ;;  %v1008_v29 = vld [vmem:[#allocation5 + $0x8] sm:$0x3] }
 0xc47   :  { %v857_v33 = vpop.permute.xlu0 %856  ;;  %vm1009_vm9 = vcmp.gt.f32.partialorder %v1008_v29, 0.0 }
 0xc48   :  { %825 = vrot.lane.b32.xlu0 %v824_v31, %s1952_s22 }
 0xc4c   :  { %885 = vrot.lane.b32.xlu0 %v884_v19, %s1962_s2 }
 0xcb3   :  { %v2260_v34 = vpop.permute.xlu1 %844 }
 0xcb4   :  { %v859_v35 = vsel %vm835_vm2, %v2260_v34, %v857_v33  ;;  %v1012_v33 = vsel %vm1009_vm9, 1, %v1960_v0  ;;  %v847_v10 = vsel %vm835_vm2, %v2260_v34, 0.0 }
 0xcb5   :  { %861 = vrot.lane.b32.xlu1 %v859_v35, %s1952_s22 }
 0xcb9   :  { %888 = vrot.lane.b32.xlu1 %v2238_v62, %s1962_s2 }
 0xcba   :  { %v826_v38 = vpop.permute.xlu0 %825 }
 0xcbd   :  { %873 = vrot.lane.b32.xlu1 %v872_v36, %s1962_s2 }
 0xcc4   :  { %v815_v37 = vpop.permute.xlu1 %814 }
 0xcc5   :  { %vm816_vm4 = vcmp.eq.s32.totalorder %v815_v37, 1 }
 0xcc6   :  { %v828_v39 = vsel %vm816_vm4, %v826_v38, 0.0  ;;  %v854_v41 = vsel %vm816_vm4, %v826_v38, %v2215_v30  ;;  %v943_v30 = vld [vmem:[#allocation2 + $0xc] sm:$0xf] }
 0xcc7   :  { %830 = vst.msk [vmem:[#allocation8 + $0x6] sm:$0x3] %vm228_vm3, %v828_v39  ;;  %v946_v45 = vrot.slane %v943_v30, 2 }
 0xd27   :  { %v862_v42 = vpop.permute.xlu1 %861 }
 0xd28   :  { %v2275_v43 = vsel %vm254_vm6, %v854_v41, %v862_v42 }
 0xd29   :  { %v897_v44 = vpack.c.bf16 %v2275_v43, %v2275_v43 }
 0xd2b   :  { %1683 = vmatmul.mubr.msk.bf16.vlgmr.msra.gmra.mrb[8].mxu0 %vm105_vm7, %v897_v44 }
 0xd2c   :  { %1298 = vmatpush1.bf16.msra.mxu0 %v2031_v2  ;;  %1329 = vmatprep.mubr.bf16.mxu0 %v1960_v0 }
 0xd2d   :  { %1299 = vmatprep.subr.bf16.mxu0 %v2034_v3 }
 0xd30   :  { %1300 = vmatpush1.bf16.msra.mxu0 %v2038_v4 }
 0xd31   :  { %1301 = vmatprep.subr.bf16.mxu0 %v2042_v5  ;;  %v889_v5 = vpop.permute.xlu1 %888 }
 0xd34   :  { %1302 = vmatpush1.bf16.msra.mxu0 %v2046_v6  ;;  %v886_v6 = vpop.permute.xlu0 %885 }
 0xd35   :  { %1303 = vmatprep.subr.bf16.mxu0 %v2050_v7  ;;  %v891_v7 = vsel %vm835_vm2, %v886_v6, %v889_v5  ;;  %v874_v57 = vpop.permute.xlu1 %873  ;;  %v1855_v5 = vld [vmem:[#allocation7 + $0x34] ss:$8 sps:$4 sm:$0xff]   ;;  %v1856_v6 = vld [vmem:[#allocation7 + $0x30] ss:$8 sps:$4 sm:$0xff]  }
 0xd36   :  { %v876_v13 = vsel %vm816_vm4, %v874_v57, %v2238_v62 }
 0xd38   :  { %1304 = vmatpush1.bf16.msra.mxu0 %v2054_v8 }
 0xdfe   :  { %v935_v46 = vpop.f32.mrb[8].mxu0 }
 0xdff   :  { %v944_v47 = vadd.f32 %v942_v1, %v935_v46  ;;  %v937_v2 = vpop.f32.mrb[9].mxu0 }
 0xe00   :  { %v948_v48 = vadd.f32 %v946_v45, %v937_v2  ;;  %v939_v50 = vpop.f32.mrb[10].mxu0 }
 0xe01   :  { %1786 = vtanh.f32 %v944_v47  ;;  %v940_v3 = vpop.f32.mrb[11].mxu0  ;;  %v1684_v53 = vmul.f32 -1.442695, %v944_v47  ;;  %v1850_v50 = vld [vmem:[#allocation7] ss:$8 sps:$4 sm:$0xff]  }
 0xe02   :  { %1788 = vtanh.f32 %v948_v48  ;;  %v1685_v8 = vmul.f32 -1.442695, %v948_v48  ;;  %v1851_v3 = vld [vmem:[#allocation7 + $0x14] ss:$8 sps:$4 sm:$0xff]  }
 0xe04   :  { %1790 = vpow2.f32 %v1685_v8  ;;  %v1140_v8 = vld [vmem:[#allocation2 + $0x14] sm:$0xf] }
 0xe05   :  { %1792 = vpow2.f32 %v1684_v53 }
 0xe0b   :  { %v1787_v4 = vpop.eup %1786 }
 0xe0c   :  { %v1789_v52 = vpop.eup %1788  ;;  %969 = vrot.lane.b32.xlu1 %v1787_v4, %s1955_s1  ;;  %v1852_v4 = vld [vmem:[#allocation7 + $0x10] ss:$8 sps:$4 sm:$0xff]  }
 0xe0d   :  { %993 = vrot.lane.b32.xlu0 %v1789_v52, %s1955_s1  ;;  %v1853_v52 = vld [vmem:[#allocation7 + $0x24] ss:$8 sps:$4 sm:$0xff]  }
 0xe0e   :  { %v1791_v54 = vpop.eup %1790 }
 0xe0f   :  { %v987_v55 = vadd.f32 1.0, %v1791_v54  ;;  %v1793_v56 = vpop.eup %1792 }
 0xe10   :  { %v952_v40 = vadd.f32 1.0, %v1793_v56 }
 0xe11   :  { %893 = vrot.lane.b32.xlu0 %v891_v7, %s1952_s22  ;;  %1794 = vrcp.f32 %v987_v55  ;;  %v1141_v7 = vld [vmem:[#allocation2 + $0x8] sm:$0xf] }
 0xe12   :  { %1796 = vrcp.f32 %v952_v40  ;;  %v1144_v53 = vrot.slane %v1141_v7, 2 }
 0xe1b   :  { %v1795_v58 = vpop.eup %1794 }
 0xe1c   :  { %v1797_v12 = vpop.eup %1796 }
 0xe7e   :  { %v970_v61 = vpop.permute.xlu1 %969 }
 0xe7f   :  { %v994_v59 = vpop.permute.xlu0 %993  ;;  %v972_v51 = vmul.f32 %v1797_v12, %v970_v61 }
 0xe80   :  { %v996_v60 = vmul.f32 %v1795_v58, %v994_v59 }
 0xe82   :  { %998 = vrot.lane.b32.xlu0 %v996_v60, %s1952_s22 }
 0xe83   :  { %v894_v14 = vpop.permute.xlu0 %893 }
 0xe84   :  { %v2297_v15 = vsel %vm254_vm6, %v876_v13, %v894_v14 }
 0xe85   :  { %v963_v16 = vrot.slane %v2297_v15, %v2081_v49  ;;  %v991_v18 = vmul.f32 %v1795_v58, %v2297_v15 }
 0xe86   :  { %974 = vrot.lane.b32.xlu0 %v972_v51, %s1952_s22 }
 0xe87   :  { %964 = vrot.lane.b32.xlu1 %v963_v16, %s1952_s22 }
 0xe8a   :  { %1032 = vperm.xlu0 %1709, %v1030_v17  }
 0xef4   :  { %v999_v20 = vpop.permute.xlu0 %998 }
 0xef5   :  { %v1001_v62 = vadd.f32 %v999_v20, %v991_v18 }
 0xef7   :  { %1798 = vtanh.f32 %v1001_v62  ;;  %v1082_v38 = vrot.slane %v1001_v62, %v2081_v49 }
 0xef8   :  { %v975_v24 = vpop.permute.xlu0 %974 }
 0xef9   :  { %v965_v21 = vpop.permute.xlu1 %964 }
 0xefa   :  { %v967_v23 = vmul.f32 %v1797_v12, %v965_v21 }
 0xefc   :  { %v977_v25 = vadd.f32 %v975_v24, %v967_v23 }
 0xefe   :  { %1800 = vtanh.f32 %v977_v25  ;;  %v1070_v30 = vrot.slane %v977_v25, %v2081_v49  ;;  %v1208_v25 = vld [vmem:[#allocation5 + $0x4] sm:$0x3] }
 0xeff   :  { %vm1209_vm13 = vcmp.gt.f32.partialorder %v1208_v25, 0.0 }
 0xf01   :  { %v1799_v26 = vpop.eup %1798 }
 0xf02   :  { %1004 = vrot.lane.b32.xlu1 %v1799_v26, %s1955_s1 }
 0xf08   :  { %v1801_v27 = vpop.eup %1800 }
 0xf09   :  { %980 = vrot.lane.b32.xlu1 %v1801_v27, %s1955_s1  ;;  %v2316_v39 = vpop.permute.xlu0 %1032 }
 0xf0a   :  { %vm1034_vm11 = vcmp.eq.s32.totalorder %v2316_v39, 1 }
 0xf0d   :  { %1054 = vrot.lane.b32.xlu1 %v2275_v43, %s1962_s2 }
 0xf74   :  { %v1005_v28 = vpop.permute.xlu1 %1004 }
 0xf75   :  { %v1007_v31 = vmul.f32 %v1795_v58, %v1005_v28 }
 0xf77   :  { %v1042_v19 = vrot.slane %v1007_v31, %v2081_v49 }
 0xf79   :  { %1043 = vrot.lane.b32.xlu0 %v1042_v19, %s1952_s22 }
 0xf7b   :  { %v981_v35 = vpop.permute.xlu1 %980 }
 0xf7c   :  { %v983_v36 = vmul.f32 %v1797_v12, %v981_v35 }
 0xf7d   :  { %1014 = vperm.xlu0 %1709, %v1012_v33   ;;  %v1228_v33 = vsel %vm1209_vm13, 1, %v1960_v0 }
 0xf7e   :  { %v1024_v37 = vrot.slane %v983_v36, %v2081_v49 }
 0xf7f   :  { %v1055_v41 = vpop.permute.xlu1 %1054 }
 0xf80   :  { %1025 = vrot.lane.b32.xlu1 %v1024_v37, %s1952_s22 }
 0xf84   :  { %1083 = vrot.lane.b32.xlu1 %v1082_v38, %s1962_s2 }
 0xfeb   :  { %v2319_v42 = vpop.permute.xlu0 %1043 }
 0xfec   :  { %v1057_v44 = vsel %vm1034_vm11, %v2319_v42, %v1055_v41  ;;  %v1046_v63 = vsel %vm1034_vm11, %v2319_v42, 0.0 }
 0xfed   :  { %1059 = vrot.lane.b32.xlu0 %v1057_v44, %s1952_s22 }
 0xff1   :  { %1086 = vrot.lane.b32.xlu0 %v2297_v15, %s1962_s2 }
 0xff2   :  { %v2332_v45 = vpop.permute.xlu1 %1025 }
 0xff5   :  { %1071 = vrot.lane.b32.xlu0 %v1070_v30, %s1962_s2 }
 0xff6   :  { %v1084_v9 = vpop.permute.xlu1 %1083 }
 0xffc   :  { %v2329_v1 = vpop.permute.xlu0 %1014 }
 0xffd   :  { %vm1016_vm12 = vcmp.eq.s32.totalorder %v2329_v1, 1 }
 0xffe   :  { %v1052_v46 = vsel %vm1016_vm12, %v2332_v45, %v2275_v43  ;;  %v1854_v43 = vld [vmem:[#allocation7 + $0x20] ss:$8 sps:$4 sm:$0xff]  }
0x105f   :  { %v1060_v47 = vpop.permute.xlu0 %1059 }
0x1060   :  { %v2339_v2 = vsel %vm254_vm6, %v1052_v46, %v1060_v47 }
0x1061   :  { %v1095_v48 = vpack.c.bf16 %v2339_v2, %v2339_v2 }
0x1063   :  { %1686 = vmatmul.mubr.msk.bf16.vlgmr.msra.gmra.mrb[8].mxu1 %vm105_vm7, %v1095_v48  ;;  %v1087_v61 = vpop.permute.xlu0 %1086  ;;  %v1206_v48 = vld [vmem:[#allocation5 + $0xa] sm:$0x3] }
0x1064   :  { %1496 = vmatpush1.bf16.msra.mxu1 %v1850_v50  ;;  %1527 = vmatprep.mubr.bf16.mxu1 %v1960_v0  ;;  %v1089_v12 = vsel %vm1034_vm11, %v1084_v9, %v1087_v61  ;;  %vm1207_vm15 = vcmp.gt.f32.partialorder %v1206_v48, 0.0  ;;  %v1339_v61 = vld [vmem:[#allocation2 + $0x4] sm:$0xf]  ;;  %v1338_v9 = vld [vmem:[#allocation2 + $0x18] sm:$0xf] }
0x1065   :  { %1497 = vmatprep.subr.bf16.mxu1 %v1851_v3 }
0x1067   :  { %v1072_v20 = vpop.permute.xlu0 %1071 }
0x1068   :  { %1498 = vmatpush1.bf16.msra.mxu1 %v1852_v4  ;;  %v1074_v27 = vsel %vm1016_vm12, %v1072_v20, %v2297_v15  ;;  %v1210_v4 = vsel %vm1207_vm15, 1, %v1960_v0 }
0x1069   :  { %1499 = vmatprep.subr.bf16.mxu1 %v1853_v52 }
0x106c   :  { %1500 = vmatpush1.bf16.msra.mxu1 %v1854_v43 }
0x106d   :  { %1501 = vmatprep.subr.bf16.mxu1 %v1855_v5 }
0x1070   :  { %1502 = vmatpush1.bf16.msra.mxu1 %v1856_v6 }
0x1136   :  { %v1133_v54 = vpop.f32.mrb[8].mxu1 }
0x1137   :  { %v1142_v55 = vadd.f32 %v1140_v8, %v1133_v54  ;;  %v1135_v56 = vpop.f32.mrb[9].mxu1 }
0x1138   :  { %v1146_v40 = vadd.f32 %v1144_v53, %v1135_v56  ;;  %v1137_v57 = vpop.f32.mrb[10].mxu1 }
0x1139   :  { %1802 = vtanh.f32 %v1142_v55  ;;  %v1138_v58 = vpop.f32.mrb[11].mxu1  ;;  %v1687_v14 = vmul.f32 -1.442695, %v1142_v55 }
0x113a   :  { %1804 = vtanh.f32 %v1146_v40  ;;  %v1688_v13 = vmul.f32 -1.442695, %v1146_v40 }
0x113c   :  { %1806 = vpow2.f32 %v1688_v13 }
0x113d   :  { %1808 = vpow2.f32 %v1687_v14 }
0x1143   :  { %v1803_v59 = vpop.eup %1802 }
0x1144   :  { %v1805_v60 = vpop.eup %1804  ;;  %1167 = vrot.lane.b32.xlu0 %v1803_v59, %s1955_s1 }
0x1145   :  { %1191 = vrot.lane.b32.xlu1 %v1805_v60, %s1955_s1 }
0x1146   :  { %v1807_v51 = vpop.eup %1806 }
0x1147   :  { %v1185_v16 = vadd.f32 1.0, %v1807_v51  ;;  %v1809_v17 = vpop.eup %1808 }
0x1148   :  { %v1150_v18 = vadd.f32 1.0, %v1809_v17 }
0x1149   :  { %1091 = vrot.lane.b32.xlu1 %v1089_v12, %s1952_s22  ;;  %1810 = vrcp.f32 %v1185_v16  ;;  %v1342_v12 = vrot.slane %v1339_v61, 2 }
0x114a   :  { %1812 = vrcp.f32 %v1150_v18 }
0x1153   :  { %v1811_v62 = vpop.eup %1810 }
0x1154   :  { %v1813_v26 = vpop.eup %1812 }
0x11b6   :  { %v1168_v24 = vpop.permute.xlu0 %1167 }
0x11b7   :  { %v1192_v21 = vpop.permute.xlu1 %1191  ;;  %v1170_v29 = vmul.f32 %v1813_v26, %v1168_v24 }
0x11b8   :  { %v1194_v23 = vmul.f32 %v1811_v62, %v1192_v21 }
0x11ba   :  { %1196 = vrot.lane.b32.xlu1 %v1194_v23, %s1952_s22 }
0x11bb   :  { %v1092_v28 = vpop.permute.xlu1 %1091 }
0x11bc   :  { %v2355_v31 = vsel %vm254_vm6, %v1074_v27, %v1092_v28 }
0x11bd   :  { %v1161_v19 = vrot.slane %v2355_v31, %v2081_v49  ;;  %v1189_v35 = vmul.f32 %v1811_v62, %v2355_v31 }
0x11be   :  { %1172 = vrot.lane.b32.xlu1 %v1170_v29, %s1952_s22 }
0x11bf   :  { %1162 = vrot.lane.b32.xlu0 %v1161_v19, %s1952_s22 }
0x11c2   :  { %1230 = vperm.xlu1 %1708, %v1228_v33  }
0x122c   :  { %v1197_v36 = vpop.permute.xlu1 %1196 }
0x122d   :  { %v1199_v15 = vadd.f32 %v1197_v36, %v1189_v35 }
0x122f   :  { %1814 = vtanh.f32 %v1199_v15  ;;  %v1280_v6 = vrot.slane %v1199_v15, %v2081_v49 }
0x1230   :  { %v1173_v41 = vpop.permute.xlu1 %1172 }
0x1231   :  { %v1163_v37 = vpop.permute.xlu0 %1162 }
0x1232   :  { %v1165_v38 = vmul.f32 %v1813_v26, %v1163_v37  ;;  %v1406_v37 = vld [vmem:[#allocation5 + $0x2] sm:$0x3] }
0x1233   :  { %vm1407_vm4 = vcmp.gt.f32.partialorder %v1406_v37, 0.0 }
0x1234   :  { %v1175_v44 = vadd.f32 %v1173_v41, %v1165_v38  ;;  %v1426_v48 = vsel %vm1407_vm4, 1, %v1960_v0 }
0x1236   :  { %1816 = vtanh.f32 %v1175_v44  ;;  %v1268_v55 = vrot.slane %v1175_v44, %v2081_v49 }
0x1239   :  { %v1815_v30 = vpop.eup %1814 }
0x123a   :  { %1202 = vrot.lane.b32.xlu0 %v1815_v30, %s1955_s1 }
0x1240   :  { %v1817_v46 = vpop.eup %1816 }
0x1241   :  { %1178 = vrot.lane.b32.xlu0 %v1817_v46, %s1955_s1  ;;  %v2374_v7 = vpop.permute.xlu1 %1230 }
0x1242   :  { %vm1232_vm0 = vcmp.eq.s32.totalorder %v2374_v7, 1 }
0x1245   :  { %1252 = vrot.lane.b32.xlu0 %v2339_v2, %s1962_s2 }
0x12ac   :  { %v1203_v47 = vpop.permute.xlu0 %1202 }
0x12ad   :  { %v1205_v50 = vmul.f32 %v1811_v62, %v1203_v47 }
0x12af   :  { %v1240_v3 = vrot.slane %v1205_v50, %v2081_v49 }
0x12b1   :  { %1241 = vrot.lane.b32.xlu1 %v1240_v3, %s1952_s22 }
0x12b3   :  { %v1179_v52 = vpop.permute.xlu0 %1178 }
0x12b4   :  { %v1181_v43 = vmul.f32 %v1813_v26, %v1179_v52 }
0x12b5   :  { %1212 = vperm.xlu1 %1708, %v1210_v4  }
0x12b6   :  { %v1222_v5 = vrot.slane %v1181_v43, %v2081_v49 }
0x12b7   :  { %v1253_v8 = vpop.permute.xlu0 %1252 }
0x12b8   :  { %1223 = vrot.lane.b32.xlu0 %v1222_v5, %s1952_s22 }
0x12bc   :  { %1281 = vrot.lane.b32.xlu0 %v1280_v6, %s1962_s2 }
0x1323   :  { %v2377_v53 = vpop.permute.xlu1 %1241 }
0x1324   :  { %v1255_v54 = vsel %vm1232_vm0, %v2377_v53, %v1253_v8 }
0x1325   :  { %1257 = vrot.lane.b32.xlu1 %v1255_v54, %s1952_s22 }
0x1329   :  { %1284 = vrot.lane.b32.xlu1 %v2355_v31, %s1962_s2 }
0x132a   :  { %v2390_v40 = vpop.permute.xlu0 %1223 }
0x132d   :  { %1269 = vrot.lane.b32.xlu1 %v1268_v55, %s1962_s2  ;;  %v1404_v55 = vld [vmem:[#allocation5 + $0xc] sm:$0x3] }
0x132e   :  { %v1282_v21 = vpop.permute.xlu0 %1281  ;;  %vm1405_vm8 = vcmp.gt.f32.partialorder %v1404_v55, 0.0 }
0x1334   :  { %v2387_v56 = vpop.permute.xlu1 %1212 }
0x1335   :  { %vm1214_vm1 = vcmp.eq.s32.totalorder %v2387_v56, 1 }
0x1336   :  { %v1250_v57 = vsel %vm1214_vm1, %v2390_v40, %v2339_v2  ;;  %v1226_v34 = vsel %vm1214_vm1, %v2390_v40, 0.0 }
0x1397   :  { %v1258_v58 = vpop.permute.xlu1 %1257 }
0x1398   :  { %v2397_v59 = vsel %vm254_vm6, %v1250_v57, %v1258_v58 }
0x1399   :  { %v1293_v60 = vpack.c.bf16 %v2397_v59, %v2397_v59 }
0x139b   :  { %1689 = vmatmul.mubr.msk.bf16.vlgmr.msra.gmra.mrb[12].mxu0 %vm105_vm7, %v1293_v60  ;;  %v1285_v62 = vpop.permute.xlu1 %1284  ;;  %v1408_v60 = vsel %vm1405_vm8, 1, %v1960_v0 }
0x139c   :  { %v1287_v23 = vsel %vm1232_vm0, %v1282_v21, %v1285_v62 }
0x139f   :  { %v1270_v19 = vpop.permute.xlu1 %1269 }
0x13a0   :  { %v1272_v41 = vsel %vm1214_vm1, %v1270_v19, %v2355_v31 }
0x146e   :  { %v1331_v13 = vpop.f32.mrb[12].mxu0 }
0x146f   :  { %v1340_v14 = vadd.f32 %v1338_v9, %v1331_v13  ;;  %v1333_v51 = vpop.f32.mrb[13].mxu0 }
0x1470   :  { %v1344_v16 = vadd.f32 %v1342_v12, %v1333_v51  ;;  %v1335_v17 = vpop.f32.mrb[14].mxu0 }
0x1471   :  { %1818 = vtanh.f32 %v1340_v14  ;;  %v1336_v18 = vpop.f32.mrb[15].mxu0  ;;  %v1690_v25 = vmul.f32 -1.442695, %v1340_v14 }
0x1472   :  { %1820 = vtanh.f32 %v1344_v16  ;;  %v1691_v24 = vmul.f32 -1.442695, %v1344_v16 }
0x1474   :  { %1822 = vpow2.f32 %v1691_v24 }
0x1475   :  { %1824 = vpow2.f32 %v1690_v25  ;;  %v1537_v25 = vld [vmem:[#allocation2] sm:$0xf] }
0x147b   :  { %v1819_v2 = vpop.eup %1818 }
0x147c   :  { %v1821_v20 = vpop.eup %1820  ;;  %1365 = vrot.lane.b32.xlu1 %v1819_v2, %s1955_s1 }
0x147d   :  { %1389 = vrot.lane.b32.xlu0 %v1821_v20, %s1955_s1 }
0x147e   :  { %v1823_v26 = vpop.eup %1822 }
0x147f   :  { %v1383_v27 = vadd.f32 1.0, %v1823_v26  ;;  %v1825_v28 = vpop.eup %1824  ;;  %v1536_v26 = vld [vmem:[#allocation2 + $0x1c] sm:$0xf] }
0x1480   :  { %v1348_v29 = vadd.f32 1.0, %v1825_v28 }
0x1481   :  { %1289 = vrot.lane.b32.xlu0 %v1287_v23, %s1952_s22  ;;  %1826 = vrcp.f32 %v1383_v27  ;;  %v1540_v27 = vrot.slane %v1537_v25, 2  ;;  %v643_v25 = vsel %vm631_vm14, %v2200_v22, 0.0  ;;  %v1244_v22 = vsel %vm1232_vm0, %v2377_v53, 0.0 }
0x1482   :  { %1828 = vrcp.f32 %v1348_v29 }
0x148b   :  { %v1827_v33 = vpop.eup %1826 }
0x148c   :  { %v1829_v38 = vpop.eup %1828 }
0x14ee   :  { %v1366_v15 = vpop.permute.xlu1 %1365 }
0x14ef   :  { %v1390_v35 = vpop.permute.xlu0 %1389  ;;  %v1368_v30 = vmul.f32 %v1829_v38, %v1366_v15 }
0x14f0   :  { %v1392_v36 = vmul.f32 %v1827_v33, %v1390_v35 }
0x14f2   :  { %1394 = vrot.lane.b32.xlu0 %v1392_v36, %s1952_s22 }
0x14f3   :  { %v1290_v44 = vpop.permute.xlu0 %1289 }
0x14f4   :  { %v2412_v46 = vsel %vm254_vm6, %v1272_v41, %v1290_v44 }
0x14f5   :  { %v1359_v47 = vrot.slane %v2412_v46, %v2081_v49  ;;  %v1387_v50 = vmul.f32 %v1827_v33, %v2412_v46 }
0x14f6   :  { %1370 = vrot.lane.b32.xlu0 %v1368_v30, %s1952_s22 }
0x14f7   :  { %1360 = vrot.lane.b32.xlu1 %v1359_v47, %s1952_s22 }
0x14fa   :  { %1428 = vperm.xlu0 %1709, %v1426_v48  }
0x1564   :  { %v1395_v3 = vpop.permute.xlu0 %1394 }
0x1565   :  { %v1397_v31 = vadd.f32 %v1395_v3, %v1387_v50 }
0x1567   :  { %1830 = vtanh.f32 %v1397_v31  ;;  %v1478_v13 = vrot.slane %v1397_v31, %v2081_v49 }
0x1568   :  { %v1371_v43 = vpop.permute.xlu0 %1370 }
0x1569   :  { %v1361_v4 = vpop.permute.xlu1 %1360 }
0x156a   :  { %v1363_v52 = vmul.f32 %v1829_v38, %v1361_v4 }
0x156c   :  { %v1373_v5 = vadd.f32 %v1371_v43, %v1363_v52 }
0x156e   :  { %1832 = vtanh.f32 %v1373_v5  ;;  %v1466_v18 = vrot.slane %v1373_v5, %v2081_v49 }
0x1571   :  { %v1831_v6 = vpop.eup %1830 }
0x1572   :  { %1400 = vrot.lane.b32.xlu1 %v1831_v6, %s1955_s1  ;;  %v1604_v6 = vld [vmem:[#allocation5] sm:$0x3] }
0x1578   :  { %v1833_v8 = vpop.eup %1832 }
0x1579   :  { %1376 = vrot.lane.b32.xlu1 %v1833_v8, %s1955_s1  ;;  %v2431_v14 = vpop.permute.xlu0 %1428 }
0x157a   :  { %vm1430_vm9 = vcmp.eq.s32.totalorder %v2431_v14, 1 }
0x157d   :  { %1450 = vrot.lane.b32.xlu1 %v2397_v59, %s1962_s2 }
0x15e4   :  { %v1401_v54 = vpop.permute.xlu1 %1400 }
0x15e5   :  { %v1403_v57 = vmul.f32 %v1827_v33, %v1401_v54 }
0x15e7   :  { %v1438_v58 = vrot.slane %v1403_v57, %v2081_v49 }
0x15e9   :  { %1439 = vrot.lane.b32.xlu0 %v1438_v58, %s1952_s22 }
0x15eb   :  { %v1377_v61 = vpop.permute.xlu1 %1376 }
0x15ec   :  { %v1379_v9 = vmul.f32 %v1829_v38, %v1377_v61 }
0x15ed   :  { %1410 = vperm.xlu0 %1709, %v1408_v60  }
0x15ee   :  { %v1420_v12 = vrot.slane %v1379_v9, %v2081_v49 }
0x15ef   :  { %v1451_v51 = vpop.permute.xlu1 %1450 }
0x15f0   :  { %1421 = vrot.lane.b32.xlu1 %v1420_v12, %s1952_s22 }
0x15f4   :  { %1479 = vrot.lane.b32.xlu1 %v1478_v13, %s1962_s2 }
0x165b   :  { %v2434_v16 = vpop.permute.xlu0 %1439 }
0x165c   :  { %v1453_v17 = vsel %vm1430_vm9, %v2434_v16, %v1451_v51 }
0x165d   :  { %1455 = vrot.lane.b32.xlu0 %v1453_v17, %s1952_s22 }
0x1661   :  { %1482 = vrot.lane.b32.xlu0 %v2412_v46, %s1962_s2 }
0x1662   :  { %v2447_v20 = vpop.permute.xlu1 %1421 }
0x1665   :  { %1467 = vrot.lane.b32.xlu0 %v1466_v18, %s1962_s2 }
0x1666   :  { %v1480_v38 = vpop.permute.xlu1 %1479 }
0x166c   :  { %v2444_v2 = vpop.permute.xlu0 %1410 }
0x166d   :  { %vm1412_vm13 = vcmp.eq.s32.totalorder %v2444_v2, 1 }
0x166e   :  { %v1448_v62 = vsel %vm1412_vm13, %v2447_v20, %v2397_v59  ;;  %v1424_v14 = vsel %vm1412_vm13, %v2447_v20, 0.0 }
0x16cf   :  { %v1456_v21 = vpop.permute.xlu0 %1455 }
0x16d0   :  { %v1458_v23 = vsel %vm254_vm6, %v1448_v62, %v1456_v21  ;;  %v1602_v21 = vld [vmem:[#allocation5 + $0xe] sm:$0x3] }
0x16d1   :  { %v1491_v24 = vpack.c.bf16 %v1458_v23, %v1458_v23 }
0x16d3   :  { %1692 = vmatmul.mubr.msk.bf16.vlgmr.msra.gmra.mrb[12].mxu1 %vm105_vm7, %v1491_v24  ;;  %v1483_v59 = vpop.permute.xlu0 %1482  ;;  %vm1605_vm7 = vcmp.gt.f32.partialorder %v1604_v6, 0.0 }
0x16d4   :  { %v1485_v41 = vsel %vm1430_vm9, %v1480_v38, %v1483_v59  ;;  %v1624_v61 = vsel %vm1605_vm7, 1, %v1960_v0 }
0x16d7   :  { %v1468_v31 = vpop.permute.xlu0 %1467 }
0x16d8   :  { %v1470_v54 = vsel %vm1412_vm13, %v1468_v31, %v2412_v46 }
0x17a6   :  { %v1529_v28 = vpop.f32.mrb[12].mxu1 }
0x17a7   :  { %v1538_v29 = vadd.f32 %v1536_v26, %v1529_v28  ;;  %v1531_v19 = vpop.f32.mrb[13].mxu1 }
0x17a8   :  { %v1542_v33 = vadd.f32 %v1540_v27, %v1531_v19  ;;  %v1533_v35 = vpop.f32.mrb[14].mxu1 }
0x17a9   :  { %1834 = vtanh.f32 %v1538_v29  ;;  %v1534_v36 = vpop.f32.mrb[15].mxu1  ;;  %v1693_v30 = vmul.f32 -1.442695, %v1538_v29  ;;  %v1028_v35 = vsel %vm1016_vm12, %v2332_v45, 0.0 }
0x17aa   :  { %1836 = vtanh.f32 %v1542_v33  ;;  %v1694_v44 = vmul.f32 -1.442695, %v1542_v33  ;;  %v439_v33 = vsel %vm427_vm10, %v2140_v11, 0.0 }
0x17ac   :  { %1838 = vpow2.f32 %v1694_v44 }
0x17ad   :  { %1840 = vpow2.f32 %v1693_v30 }
0x17b3   :  { %v1835_v15 = vpop.eup %1834 }
0x17b4   :  { %v1837_v37 = vpop.eup %1836  ;;  %1563 = vrot.lane.b32.xlu0 %v1835_v15, %s1955_s1 }
0x17b5   :  { %1587 = vrot.lane.b32.xlu1 %v1837_v37, %s1955_s1 }
0x17b6   :  { %v1839_v47 = vpop.eup %1838 }
0x17b7   :  { %v1581_v48 = vadd.f32 1.0, %v1839_v47  ;;  %v1841_v50 = vpop.eup %1840 }
0x17b8   :  { %v1546_v3 = vadd.f32 1.0, %v1841_v50 }
0x17b9   :  { %1487 = vrot.lane.b32.xlu1 %v1485_v41, %s1952_s22  ;;  %1842 = vrcp.f32 %v1581_v48 }
0x17ba   :  { %1844 = vrcp.f32 %v1546_v3 }
0x17c3   :  { %v1843_v4 = vpop.eup %1842 }
0x17c4   :  { %v1845_v8 = vpop.eup %1844 }
0x1826   :  { %v1564_v5 = vpop.permute.xlu0 %1563 }
0x1827   :  { %v1588_v52 = vpop.permute.xlu1 %1587  ;;  %v1566_v57 = vmul.f32 %v1845_v8, %v1564_v5 }
0x1828   :  { %v1590_v43 = vmul.f32 %v1843_v4, %v1588_v52 }
0x182a   :  { %1592 = vrot.lane.b32.xlu1 %v1590_v43, %s1952_s22 }
0x182b   :  { %v1488_v55 = vpop.permute.xlu1 %1487 }
0x182c   :  { %v1490_v58 = vsel %vm254_vm6, %v1470_v54, %v1488_v55  ;;  %vm1603_vm6 = vcmp.gt.f32.partialorder %v1602_v21, 0.0 }
0x182d   :  { %v1557_v60 = vrot.slane %v1490_v58, %v2081_v49  ;;  %v1585_v9 = vmul.f32 %v1843_v4, %v1490_v58  ;;  %v1606_v24 = vsel %vm1603_vm6, 1, %v1960_v0 }
0x182e   :  { %1568 = vrot.lane.b32.xlu1 %v1566_v57, %s1952_s22 }
0x182f   :  { %1558 = vrot.lane.b32.xlu0 %v1557_v60, %s1952_s22 }
0x1832   :  { %1626 = vperm.xlu1 %1708, %v1624_v61  }
0x189c   :  { %v1593_v12 = vpop.permute.xlu1 %1592 }
0x189d   :  { %v1595_v13 = vadd.f32 %v1593_v12, %v1585_v9 }
0x189f   :  { %1846 = vtanh.f32 %v1595_v13 }
0x18a0   :  { %v1569_v17 = vpop.permute.xlu1 %1568 }
0x18a1   :  { %v1559_v51 = vpop.permute.xlu0 %1558 }
0x18a2   :  { %v1561_v46 = vmul.f32 %v1845_v8, %v1559_v51 }
0x18a4   :  { %v1571_v18 = vadd.f32 %v1569_v17, %v1561_v46 }
0x18a6   :  { %1848 = vtanh.f32 %v1571_v18 }
0x18a9   :  { %v1847_v62 = vpop.eup %1846 }
0x18aa   :  { %1598 = vrot.lane.b32.xlu0 %v1847_v62, %s1955_s1 }
0x18b0   :  { %v1849_v23 = vpop.eup %1848 }
0x18b1   :  { %1574 = vrot.lane.b32.xlu0 %v1849_v23, %s1955_s1  ;;  %v1627_v39 = vpop.permute.xlu1 %1626 }
0x18b2   :  { %vm1628_vm10 = vcmp.eq.s32.totalorder %v1627_v39, 1 }
0x18b5   :  { %1608 = vperm.xlu0 %1709, %v1606_v24  }
0x18b9   :  { %645 = vrot.lane.b32.xlu0 %v643_v25, %s1952_s22 }
0x191c   :  { %v1599_v26 = vpop.permute.xlu0 %1598 }
0x191d   :  { %v1601_v27 = vmul.f32 %v1843_v4, %v1599_v26 }
0x191f   :  { %v1636_v28 = vrot.slane %v1601_v27, %v2081_v49 }
0x1921   :  { %1637 = vrot.lane.b32.xlu1 %v1636_v28, %s1952_s22 }
0x1923   :  { %v1575_v29 = vpop.permute.xlu0 %1574 }
0x1924   :  { %v1577_v19 = vmul.f32 %v1845_v8, %v1575_v29 }
0x1925   :  { %441 = vrot.lane.b32.xlu1 %v439_v33, %s1952_s22 }
0x1926   :  { %v1618_v0 = vrot.slane %v1577_v19, %v2081_v49  ;;  %v1442_v49 = vsel %vm1430_vm9, %v2434_v16, 0.0 }
0x1928   :  { %1619 = vrot.lane.b32.xlu0 %v1618_v0, %s1952_s22 }
0x1929   :  { %849 = vrot.lane.b32.xlu1 %v847_v10, %s1952_s22 }
0x192c   :  { %1246 = vrot.lane.b32.xlu0 %v1244_v22, %s1952_s22 }
0x192d   :  { %1048 = vrot.lane.b32.xlu1 %v1046_v63, %s1952_s22 }
0x1931   :  { %1444 = vrot.lane.b32.xlu1 %v1442_v49, %s1952_s22 }
0x1934   :  { %v1609_v11 = vpop.permute.xlu0 %1608 }
0x1935   :  { %vm1610_vm14 = vcmp.eq.s32.totalorder %v1609_v11, 1 }
0x1938   :  { %v646_v32 = vpop.permute.xlu0 %645 }
0x1939   :  { %649 = vst.msk [vmem:[#allocation8 + $0xa] sm:$0x3] %vm252_vm5, %v646_v32 }
0x193a   :  { %1227 = vst.msk [vmem:[#allocation8 + $0xa] sm:$0x3] %vm228_vm3, %v1226_v34 }
0x1993   :  { %v1638_v42 = vpop.permute.xlu1 %1637 }
0x1994   :  { %v1640_v7 = vsel %vm1628_vm10, %v1638_v42, 0.0 }
0x1995   :  { %1642 = vrot.lane.b32.xlu0 %v1640_v7, %s1952_s22 }
0x1997   :  { %v442_v53 = vpop.permute.xlu1 %441 }
0x1998   :  { %445 = vst.msk [vmem:[#allocation8 + $0xc] sm:$0x3] %vm252_vm5, %v442_v53 }
0x1999   :  { %1425 = vst.msk [vmem:[#allocation8 + $0xc] sm:$0x3] %vm228_vm3, %v1424_v14 }
0x199a   :  { %v1620_v56 = vpop.permute.xlu0 %1619 }
0x199b   :  { %v1622_v40 = vsel %vm1610_vm14, %v1620_v56, 0.0  ;;  %v850_v16 = vpop.permute.xlu1 %849 }
0x199c   :  { %1623 = vst.msk [vmem:[#allocation8 + $0xe] sm:$0x3] %vm228_vm3, %v1622_v40 }
0x199d   :  { %853 = vst.msk [vmem:[#allocation8 + $0x8] sm:$0x3] %vm252_vm5, %v850_v16 }
0x199e   :  { %1029 = vst.msk [vmem:[#allocation8 + $0x8] sm:$0x3] %vm228_vm3, %v1028_v35  ;;  %v1247_v2 = vpop.permute.xlu0 %1246 }
0x199f   :  { %1249 = vst.msk [vmem:[#allocation8 + $0x4] sm:$0x3] %vm252_vm5, %v1247_v2  ;;  %v1049_v20 = vpop.permute.xlu1 %1048 }
0x19a0   :  { %1051 = vst.msk [vmem:[#allocation8 + $0x6] sm:$0x3] %vm252_vm5, %v1049_v20 }
0x19a3   :  { %v1445_v36 = vpop.permute.xlu1 %1444 }
0x19a4   :  { %1447 = vst.msk [vmem:[#allocation8 + $0x2] sm:$0x3] %vm252_vm5, %v1445_v36 }
0x1a07   :  { %v1643_v1 = vpop.permute.xlu0 %1642 }
0x1a08   :  { %1645 = vst.msk [vmem:[#allocation8] sm:$0x3] %vm252_vm5, %v1643_v1 }
0x1a09   :  { %1934 = shalt.err (!%p1931_p0)
}
0x1a0a   :  { %s1935_s5 = scalar_lea.hbm %s2539_s3, 256 }
0x1a0b   :  { %p1936_p1 = scmp.ne.s32.totalorder %s2539_s3, %s1935_s5  ;;  %p1939_p2 = scmp.lt.u32.totalorder %s1935_s5, %s2539_s3 }
0x1a0d   :  { %p1941_p3 = pnand %p1939_p2, %p1936_p1 }
0x1a0f   :  { %1944 = shalt.err (!%p1941_p3)
}
0x1a10   :  { %1657 = dma.vmem_to_hbm [thread:$0]  %s1652_s28, 256, %s2539_s3, [#allocation4], %s1952_s22, %s1952_s22, %s1953_s23  }
0x1a11   :  { %1949 = dma.done.wait [#allocation4], 256  }
0x1a12   :  { %1950 = vsyncadd [#allocation4], 4294967040 }
0x1a13   :  { %1661 = vsyncpa [#allocation3], 1 }
0x1a14   :  { %1662 = vsyncpa [#allocation6], 1 }
0x1a15   :  { %1663 = vsyncpa [#allocation4], 1 }

// kernel: pos_tagger_forward.7
= control target key start
LH: loop header
LB: loop body
LE: loop exit
PB: predicated region body
PF: predicated region fallthrough
CT: control target
= control target key end

     0   :  { %13 = vsyncpa [#allocation4], 0  ;;  %s6089_s0 = inlined_call_operand.hbm [shape: f32[8,2,64], index: 0, kind: input, shape index: {}]   ;;  %s6090_s1 = inlined_call_operand.hbm [shape: f32[64,8], index: 1, kind: input, shape index: {}]   ;;  %s6091_s2 = inlined_call_operand.hbm [shape: f32[1,8], index: 2, kind: input, shape index: {}]   ;;  %s6092_s3 = inlined_call_operand.hbm [shape: f32[1,8], index: 3, kind: input, shape index: {}]   ;;  %s6093_s4 = inlined_call_operand.hbm [shape: f32[1,8], index: 4, kind: input, shape index: {}]   ;;  %s6094_s5 = inlined_call_operand.hbm [shape: f32[8,8], index: 5, kind: input, shape index: {}]   ;;  %s6095_s6 = inlined_call_operand.hbm [shape: s32[8,2,8], index: 6, kind: output, shape index: {0}]   ;;  %s6096_s7 = inlined_call_operand.hbm [shape: f32[2,8], index: 7, kind: output, shape index: {1}]  }
   0x1   :  { %14 = vsyncpa [#allocation7], 0 }
   0x2   :  { %15 = vsyncpa [#allocation10], 0 }
   0x3   :  { %16 = vsyncpa [#allocation13], 0 }
   0x4   :  { %17 = vsyncpa [#allocation5], 0 }
   0x5   :  { %18 = vsyncpa [#allocation16], 0  ;;  %s4334_s24 = smov [#allocation6]   ;;  %s4146_s28 = scalar_lea.hbm %s6090_s1, 1024 }
   0x6   :  { %s36_s25 = sshll.u32 %s4334_s24, 4  ;;  %p4147_p0 = scmp.ne.s32.totalorder %s6090_s1, %s4146_s28  ;;  %s37_s25 = int_to_ptr.vmem [resolvable:$true] %s36_s25 }
   0x7   :  { %p4150_p1 = scmp.lt.u32.totalorder %s4146_s28, %s6090_s1 }
   0x9   :  { %p4152_p2 = pnand %p4150_p1, %p4147_p0 }
   0xb   :  { %4155 = shalt.err (!%p4152_p2)
}
   0xc   :  { %s4156_s10 = scalar_lea.vmem %s37_s25, 1024  ;;  %p4161_p4 = scmp.lt.s32.totalorder %s37_s25, %s37_s25 }
   0xd   :  { %p4157_p3 = scmp.ne.s32.totalorder %s37_s25, %s4156_s10  ;;  %p4162_p5 = scmp.lt.s32.totalorder %s4156_s10, %s4156_s10 }
   0xf   :  { %p4163_p6 = por %p4162_p5, %p4161_p4 }
  0x11   :  { %p4164_p7 = pnand %p4163_p6, %p4157_p3 }
  0x13   :  { %4167 = shalt.err (!%p4164_p7)
}
  0x14   :  { %s4335_s11 = smov 128   ;;  %s4336_s12 = smov 8  }
  0x15   :  { %42 = dma.hbm_to_vmem [thread:$0]  %s6090_s1, 1024, %s37_s25, [#allocation7], %s4335_s11, %s4335_s11, %s4336_s12  }
  0x16   :  { %s4337_s15 = smov [#allocation9]   ;;  %s4338_s17 = smov [#allocation3]  }
  0x17   :  { %s59_s16 = sshll.u32 %s4337_s15, 4  ;;  %s24_s18 = sshll.u32 %s4338_s17, 4  ;;  %s60_s16 = int_to_ptr.vmem [resolvable:$true] %s59_s16  ;;  %s25_s18 = int_to_ptr.vmem [resolvable:$true] %s24_s18 }
  0x18   :  { %s4168_s21 = scalar_lea.hbm %s6092_s3, 16 }
  0x19   :  { %p4169_p8 = scmp.ne.s32.totalorder %s6092_s3, %s4168_s21  ;;  %p4172_p9 = scmp.lt.u32.totalorder %s4168_s21, %s6092_s3 }
  0x1b   :  { %p4174_p10 = pnand %p4172_p9, %p4169_p8 }
  0x1d   :  { %4177 = shalt.err (!%p4174_p10)
}
  0x1e   :  { %s4178_s1 = scalar_lea.vmem %s60_s16, 16  ;;  %s4182_s25 = scalar_lea.vmem %s60_s16, 32 }
  0x1f   :  { %p4179_p11 = scmp.ne.s32.totalorder %s60_s16, %s4178_s1  ;;  %p4183_p12 = scmp.lt.s32.totalorder %s60_s16, %s60_s16 }
  0x20   :  { %p4184_p13 = scmp.lt.s32.totalorder %s4182_s25, %s4178_s1 }
  0x22   :  { %p4185_p0 = por %p4184_p13, %p4183_p12 }
  0x24   :  { %p4186_p1 = pnand %p4185_p0, %p4179_p11 }
  0x26   :  { %4189 = shalt.err (!%p4186_p1)
}
  0x27   :  { %62 = dma.hbm_to_vmem [thread:$0]  %s6092_s3, 16, %s60_s16, [#allocation10]  }
  0x28   :  { %s4190_s8 = scalar_lea.hbm %s6089_s0, 256 }
  0x29   :  { %p4191_p2 = scmp.ne.s32.totalorder %s6089_s0, %s4190_s8  ;;  %p4194_p3 = scmp.lt.u32.totalorder %s4190_s8, %s6089_s0 }
  0x2b   :  { %p4196_p4 = pnand %p4194_p3, %p4191_p2 }
  0x2d   :  { %4199 = shalt.err (!%p4196_p4)
}
  0x2e   :  { %s4200_s13 = scalar_lea.vmem %s25_s18, 256  ;;  %p4205_p6 = scmp.lt.s32.totalorder %s25_s18, %s25_s18 }
  0x2f   :  { %p4201_p5 = scmp.ne.s32.totalorder %s25_s18, %s4200_s13  ;;  %p4206_p7 = scmp.lt.s32.totalorder %s4200_s13, %s4200_s13 }
  0x31   :  { %p4207_p8 = por %p4206_p7, %p4205_p6 }
  0x33   :  { %p4208_p9 = pnand %p4207_p8, %p4201_p5 }
  0x35   :  { %4211 = shalt.err (!%p4208_p9)
}
  0x36   :  { %s4339_s3 = smov 32   ;;  %s4340_s14 = smov 2  }
  0x37   :  { %30 = dma.hbm_to_vmem [thread:$0]  %s6089_s0, 256, %s25_s18, [#allocation4], %s4339_s3, %s4339_s3, %s4340_s14  }
  0x38   :  { %s4341_s17 = smov [#allocation8]   ;;  %s4342_s20 = smov [#allocation11]  }
  0x39   :  { %s49_s19 = sshll.u32 %s4341_s17, 4  ;;  %s69_s21 = sshll.u32 %s4342_s20, 4  ;;  %s50_s19 = int_to_ptr.vmem [resolvable:$true] %s49_s19  ;;  %s70_s21 = int_to_ptr.vmem [resolvable:$true] %s69_s21 }
  0x3a   :  { %s4212_s24 = scalar_lea.hbm %s6091_s2, 16 }
  0x3b   :  { %p4213_p10 = scmp.ne.s32.totalorder %s6091_s2, %s4212_s24  ;;  %p4216_p11 = scmp.lt.u32.totalorder %s4212_s24, %s6091_s2 }
  0x3d   :  { %p4218_p12 = pnand %p4216_p11, %p4213_p10 }
  0x3f   :  { %4221 = shalt.err (!%p4218_p12)
}
  0x40   :  { %s4222_s0 = scalar_lea.vmem %s50_s19, 16  ;;  %s4226_s18 = scalar_lea.vmem %s50_s19, 32 }
  0x41   :  { %p4223_p13 = scmp.ne.s32.totalorder %s50_s19, %s4222_s0  ;;  %p4227_p0 = scmp.lt.s32.totalorder %s50_s19, %s50_s19 }
  0x42   :  { %p4228_p1 = scmp.lt.s32.totalorder %s4226_s18, %s4222_s0 }
  0x44   :  { %p4229_p2 = por %p4228_p1, %p4227_p0 }
  0x46   :  { %p4230_p3 = pnand %p4229_p2, %p4223_p13 }
  0x48   :  { %4233 = shalt.err (!%p4230_p3)
}
  0x49   :  { %52 = dma.hbm_to_vmem [thread:$0]  %s6091_s2, 16, %s50_s19, [#allocation7]  }
  0x4a   :  { %s4234_s9 = scalar_lea.hbm %s6093_s4, 16 }
  0x4b   :  { %p4235_p4 = scmp.ne.s32.totalorder %s6093_s4, %s4234_s9  ;;  %p4238_p5 = scmp.lt.u32.totalorder %s4234_s9, %s6093_s4 }
  0x4d   :  { %p4240_p6 = pnand %p4238_p5, %p4235_p4 }
  0x4f   :  { %4243 = shalt.err (!%p4240_p6)
}
  0x50   :  { %s4244_s15 = scalar_lea.vmem %s70_s21, 16  ;;  %s4248_s16 = scalar_lea.vmem %s70_s21, 32 }
  0x51   :  { %p4245_p7 = scmp.ne.s32.totalorder %s70_s21, %s4244_s15  ;;  %p4249_p8 = scmp.lt.s32.totalorder %s70_s21, %s70_s21 }
  0x52   :  { %p4250_p9 = scmp.lt.s32.totalorder %s4248_s16, %s4244_s15 }
  0x54   :  { %p4251_p10 = por %p4250_p9, %p4249_p8 }
  0x56   :  { %p4252_p11 = pnand %p4251_p10, %p4245_p7 }
  0x58   :  { %4255 = shalt.err (!%p4252_p11)
}
  0x59   :  { %72 = dma.hbm_to_vmem [thread:$0]  %s6093_s4, 16, %s70_s21, [#allocation10]  }
  0x5a   :  { %s4343_s19 = smov [#allocation12]   ;;  %s4256_s24 = scalar_lea.hbm %s6094_s5, 128 }
  0x5b   :  { %s79_s20 = sshll.u32 %s4343_s19, 4  ;;  %p4257_p12 = scmp.ne.s32.totalorder %s6094_s5, %s4256_s24  ;;  %s80_s20 = int_to_ptr.vmem [resolvable:$true] %s79_s20 }
  0x5c   :  { %p4260_p13 = scmp.lt.u32.totalorder %s4256_s24, %s6094_s5 }
  0x5e   :  { %p4262_p0 = pnand %p4260_p13, %p4257_p12 }
  0x60   :  { %4265 = shalt.err (!%p4262_p0)
}
  0x61   :  { %s4266_s0 = scalar_lea.vmem %s80_s20, 128  ;;  %p4271_p2 = scmp.lt.s32.totalorder %s80_s20, %s80_s20 }
  0x62   :  { %p4267_p1 = scmp.ne.s32.totalorder %s80_s20, %s4266_s0  ;;  %p4272_p3 = scmp.lt.s32.totalorder %s4266_s0, %s4266_s0 }
  0x64   :  { %p4273_p4 = por %p4272_p3, %p4271_p2 }
  0x66   :  { %p4274_p5 = pnand %p4273_p4, %p4267_p1 }
  0x68   :  { %4277 = shalt.err (!%p4274_p5)
}
  0x69   :  { %82 = dma.hbm_to_vmem [thread:$0]  %s6094_s5, 128, %s80_s20, [#allocation13]  }
  0x6a   :  { %4322 = dma.done.wait [#allocation4], 256  }
  0x6b   :  { %4323 = vsyncadd [#allocation4], 4294967040 }
  0x6c   :  { %4324 = dma.done.wait [#allocation7], 1040  }
  0x6d   :  { %4325 = vsyncadd [#allocation7], 4294966256 }
  0x6e   :  { %4326 = dma.done.wait [#allocation10], 32  }
  0x6f   :  { %4327 = vsyncadd [#allocation10], 4294967264 }
  0x70   :  { %4328 = dma.done.wait [#allocation13], 128  }
  0x71   :  { %4329 = vsyncadd [#allocation13], 4294967168  ;;  %v6097_v0 = vmov 0.0|0.0   ;;  %vm4345_vm0 = vmmov 0   ;;  %v6099_v1 = vmov 0.0   ;;  %v743_v2 = vlaneseq  ;;  %v101_v4 = vld [vmem:[#allocation6] sm:$0xff] }
  0x72   :  { %4041 = vmatprep.subr.bf16.mxu1 %v6097_v0  ;;  %3912 = vmatprep.mubr.msk.f32.mxu1 %vm4345_vm0, %v6099_v1  ;;  %v102_v5 = vld [vmem:[#allocation6 + $0x8] sm:$0xff]  ;;  %v103_v6 = vld [vmem:[#allocation6 + $0x10] sm:$0xff]  ;;  %v104_v9 = vld [vmem:[#allocation6 + $0x18] sm:$0xff]  ;;  %vm117_vm1 = vcmask 523264   ;;  %vm191_vm2 = vcmask 58368   ;;  %vm780_vm3 = vcmask 64512  }
  0x73   :  { %4029 = vmatprep.subr.bf16.mxu0 %v6097_v0  ;;  %3893 = vmatprep.mubr.msk.f32.mxu0 %vm4345_vm0, %v6099_v1  ;;  %v4473_v3 = vshrl.u32 %v743_v2, 7  ;;  %v4478_v8 = vpack.c.bf16 %v102_v5, %v101_v4  ;;  %v4481_v10 = vpack.c.bf16 %v104_v9, %v103_v6  ;;  %v4484_v11 = vld [vmem:[#allocation12] sm:$0xff]  ;;  %v107_v16 = vld [vmem:[#allocation6 + $0x30] sm:$0xff]  ;;  %v108_v17 = vld [vmem:[#allocation6 + $0x38] sm:$0xff]  ;;  %v4347_v43 = vmov 1966171168  }
  0x74   :  { %v105_v12 = vld [vmem:[#allocation6 + $0x20] sm:$0xff]  ;;  %v106_v13 = vld [vmem:[#allocation6 + $0x28] sm:$0xff]  ;;  %v4497_v18 = vpack.c.bf16 %v108_v17, %v107_v16  ;;  %v194_v19 = vld [vmem:[#allocation3 + $0x2] sm:$0x3]  ;;  %v747_v44 = vunpack.c.l.s4 %v4347_v43  ;;  %v4348_v61 = vmov 0   ;;  %vm829_vm6 = vcmask 1041409  }
  0x75   :  { %v4476_v7 = vsub.s32 0, %v4473_v3  ;;  %4043 = vmatpush3.bf16.msra.mxu1 %v4478_v8  ;;  %4031 = vmatpush3.bf16.msra.mxu0 %v4478_v8  ;;  %v4491_v15 = vpack.c.bf16 %v106_v13, %v105_v12  ;;  %v110_v20 = vld [vmem:[#allocation3] sm:$0x3]  ;;  %v4529_v21 = vsub.s32 1, %v4473_v3  ;;  %v4534_v23 = vsub.s32 2, %v4473_v3  ;;  %s4349_s5 = smov [#allocation14]  }
  0x76   :  { %4044 = vmatprep.subr.bf16.mxu1 %v6097_v0  ;;  %4032 = vmatprep.subr.bf16.mxu0 %v6097_v0  ;;  %v4537_v24 = vsub.s32 3, %v4473_v3  ;;  %v4544_v27 = vsub.s32 4, %v4473_v3  ;;  %v4547_v28 = vsub.s32 5, %v4473_v3  ;;  %v4553_v31 = vld [vmem:[#allocation8] ss:$0 sm:$0xff]  ;;  %v4567_v39 = vsub.s32 7, %v4473_v3 }
  0x77   :  { %v857_v14 = vrot.slane %v4484_v11, %v4476_v7  ;;  %v864_v22 = vrot.slane %v4484_v11, %v4529_v21  ;;  %v871_v25 = vrot.slane %v4484_v11, %v4534_v23  ;;  %v271_v32 = vld [vmem:[#allocation3 + $0x4] sm:$0x3]  ;;  %v748_v46 = vunpack.c.0.s8 %v747_v44  ;;  %v3803_v47 = vld [vmem:[#allocation9] ss:$0 sm:$0xff]  ;;  %4143 = vset.pattern.permute.xlu1 %v4348_v61  ;;  %732 = vst.msk [vmem:[#allocation14] sm:$0x3] %vm191_vm2, %v4348_v61 }
  0x78   :  { %v878_v26 = vrot.slane %v4484_v11, %v4537_v24  ;;  %v885_v29 = vrot.slane %v4484_v11, %v4544_v27  ;;  %v892_v30 = vrot.slane %v4484_v11, %v4547_v28  ;;  %v906_v45 = vrot.slane %v4484_v11, %v4567_v39  ;;  %4142 = vset.pattern.permute.xlu0 %v4348_v61  ;;  %v348_v4 = vld [vmem:[#allocation3 + $0x6] sm:$0x3]  ;;  %s3765_s18 = sshll.u32 %s4349_s5, 4  ;;  %s4350_s28 = smov [#allocation15]   ;;  %s3766_s18 = int_to_ptr.vmem [resolvable:$true] %s3765_s18 }
  0x79   :  { %859 = vbcast.lane.b32.xlu1 %v857_v14, 256  ;;  %4046 = vmatpush3.bf16.msra.mxu1 %v4481_v10  ;;  %v751_v50 = vsub.s32 %v748_v46, %v4473_v3  ;;  %v4592_v62 = vsub.s32 6, %v4473_v3  ;;  %vm1063_vm7 = vcmask 1042434   ;;  %vm1065_vm8 = vcmask 1043459   ;;  %s3778_s29 = sshll.u32 %s4350_s28, 4  ;;  %s4278_s30 = scalar_lea.vmem %s3766_s18, 256  ;;  %s3779_s29 = int_to_ptr.vmem [resolvable:$true] %s3778_s29 }
  0x7a   :  { %4034 = vmatpush3.bf16.msra.mxu0 %v4481_v10  ;;  %4047 = vmatprep.subr.bf16.mxu1 %v6097_v0  ;;  %vm1067_vm9 = vcmask 1044484   ;;  %vm1069_vm10 = vcmask 1045509   ;;  %vm1071_vm11 = vcmask 1046534   ;;  %vm1073_vm12 = vcmask 1047559   ;;  %p4279_p6 = scmp.ne.s32.totalorder %s3766_s18, %s4278_s30  ;;  %p4283_p7 = scmp.lt.s32.totalorder %s3766_s18, %s3766_s18 }
  0x7b   :  { %4035 = vmatprep.subr.bf16.mxu0 %v6097_v0  ;;  %873 = vbcast.lane.b32.xlu0 %v871_v25, 256  ;;  %v899_v63 = vrot.slane %v4484_v11, %v4592_v62  ;;  %p4284_p8 = scmp.lt.s32.totalorder %s4278_s30, %s4278_s30 }
  0x7d   :  { %4049 = vmatpush3.bf16.msra.mxu1 %v4491_v15  ;;  %866 = vbcast.lane.b32.xlu1 %v864_v22, 256  ;;  %p4285_p9 = por %p4284_p8, %p4283_p7 }
  0x7e   :  { %4037 = vmatpush3.bf16.msra.mxu0 %v4491_v15  ;;  %4050 = vmatprep.subr.bf16.mxu1 %v6097_v0 }
  0x7f   :  { %4038 = vmatprep.subr.bf16.mxu0 %v6097_v0  ;;  %887 = vbcast.lane.b32.xlu0 %v885_v29, 256  ;;  %p4286_p10 = pnand %p4285_p9, %p4279_p6 }
  0x81   :  { %4052 = vmatpush3.bf16.msra.mxu1 %v4497_v18  ;;  %880 = vbcast.lane.b32.xlu1 %v878_v26, 256 }
  0x82   :  { %4040 = vmatpush3.bf16.msra.mxu0 %v4497_v18  ;;  %4065 = vmatprep.subr.bf16.mxu1 %v6097_v0 }
  0x83   :  { %4053 = vmatprep.subr.bf16.mxu0 %v6097_v0 }
  0x84   :  { %3913 = vmatmul.mubr.msk.f32.vlgmr.msra.gmra.mrb[0].mxu1 %vm117_vm1, %v194_v19 }
  0x85   :  { %3894 = vmatmul.mubr.msk.f32.vlgmr.msra.gmra.mrb[0].mxu0 %vm117_vm1, %v110_v20  ;;  %4067 = vmatpush3.bf16.msra.mxu1 %v4478_v8 }
  0x86   :  { %4055 = vmatpush3.bf16.msra.mxu0 %v4478_v8  ;;  %3931 = vmatprep.mubr.msk.f32.mxu0 %vm4345_vm0, %v6099_v1 }
  0x87   :  { %4056 = vmatprep.subr.bf16.mxu0 %v6097_v0  ;;  %4068 = vmatprep.subr.bf16.mxu1 %v6097_v0 }
  0x88   :  { %3950 = vmatprep.mubr.msk.f32.mxu1 %vm4345_vm0, %v6099_v1  ;;  %894 = vbcast.lane.b32.xlu1 %v892_v30, 256 }
  0x89   :  { %4070 = vmatpush3.bf16.msra.mxu1 %v4481_v10 }
  0x8a   :  { %4058 = vmatpush3.bf16.msra.mxu0 %v4481_v10  ;;  %4071 = vmatprep.subr.bf16.mxu1 %v6097_v0 }
  0x8b   :  { %4059 = vmatprep.subr.bf16.mxu0 %v6097_v0 }
  0x8d   :  { %4073 = vmatpush3.bf16.msra.mxu1 %v4491_v15 }
  0x8e   :  { %4061 = vmatpush3.bf16.msra.mxu0 %v4491_v15  ;;  %4074 = vmatprep.subr.bf16.mxu1 %v6097_v0 }
  0x8f   :  { %4062 = vmatprep.subr.bf16.mxu0 %v6097_v0 }
  0x91   :  { %4076 = vmatpush3.bf16.msra.mxu1 %v4497_v18 }
  0x92   :  { %4064 = vmatpush3.bf16.msra.mxu0 %v4497_v18  ;;  %4089 = vmatprep.subr.bf16.mxu1 %v6097_v0 }
  0x93   :  { %4077 = vmatprep.subr.bf16.mxu0 %v6097_v0 }
  0x94   :  { %3951 = vmatmul.mubr.msk.f32.vlgmr.msra.gmra.mrb[2].mxu1 %vm117_vm1, %v348_v4 }
  0x95   :  { %3932 = vmatmul.mubr.msk.f32.vlgmr.msra.gmra.mrb[2].mxu0 %vm117_vm1, %v271_v32  ;;  %4091 = vmatpush3.bf16.msra.mxu1 %v4478_v8 }
  0x96   :  { %4079 = vmatpush3.bf16.msra.mxu0 %v4478_v8  ;;  %3969 = vmatprep.mubr.msk.f32.mxu0 %vm4345_vm0, %v6099_v1 }
  0x97   :  { %4080 = vmatprep.subr.bf16.mxu0 %v6097_v0  ;;  %3988 = vmatprep.mubr.msk.f32.mxu1 %vm4345_vm0, %v6099_v1 }
  0x98   :  { %4092 = vmatprep.subr.bf16.mxu1 %v6097_v0 }
  0x99   :  { %4094 = vmatpush3.bf16.msra.mxu1 %v4481_v10 }
  0x9a   :  { %4082 = vmatpush3.bf16.msra.mxu0 %v4481_v10  ;;  %4095 = vmatprep.subr.bf16.mxu1 %v6097_v0 }
  0x9b   :  { %4083 = vmatprep.subr.bf16.mxu0 %v6097_v0 }
  0x9d   :  { %4097 = vmatpush3.bf16.msra.mxu1 %v4491_v15 }
  0x9e   :  { %4085 = vmatpush3.bf16.msra.mxu0 %v4491_v15  ;;  %4098 = vmatprep.subr.bf16.mxu1 %v6097_v0 }
  0x9f   :  { %4086 = vmatprep.subr.bf16.mxu0 %v6097_v0 }
  0xa1   :  { %4100 = vmatpush3.bf16.msra.mxu1 %v4497_v18 }
  0xa2   :  { %4088 = vmatpush3.bf16.msra.mxu0 %v4497_v18  ;;  %4113 = vmatprep.subr.bf16.mxu1 %v6097_v0 }
  0xa3   :  { %4101 = vmatprep.subr.bf16.mxu0 %v6097_v0 }
  0xeb   :  { %v4607_v5 = vpop.permute.xlu1 %859 }
  0xed   :  { %v4609_v6 = vpop.permute.xlu0 %873 }
  0xef   :  { %v4611_v9 = vpop.permute.xlu1 %866 }
  0xf3   :  { %v4615_v12 = vpop.permute.xlu1 %880 }
  0xfa   :  { %v4617_v17 = vpop.permute.xlu1 %894 }
 0x157   :  { %v264_v33 = vpop.f32.mrb[0].mxu1 }
 0x158   :  { %v187_v34 = vpop.f32.mrb[0].mxu0  ;;  %v265_v35 = vadd.f32 %v4553_v31, %v264_v33  ;;  %v3914_v36 = vpop.f32.mrb[1].mxu1 }
 0x159   :  { %v188_v37 = vadd.f32 %v4553_v31, %v187_v34  ;;  %v3895_v38 = vpop.f32.mrb[1].mxu0 }
 0x15a   :  { %269 = vst.msk [vmem:[#allocation2 + $0x2] sm:$0x3] %vm191_vm2, %v265_v35 }
 0x15b   :  { %192 = vst.msk [vmem:[#allocation2] sm:$0x3] %vm191_vm2, %v188_v37 }
 0x161   :  { %v833_v40 = vld [vmem:[#allocation2 + $0x2] sm:$0x3] }
 0x162   :  { %v845_v41 = vrot.slane %v833_v40, %v4529_v21  ;;  %v838_v42 = vrot.slane %v833_v40, %v4476_v7  ;;  %v734_v48 = vld [vmem:[#allocation2] sm:$0x3] }
 0x163   :  { %v741_v49 = vadd.f32 %v3803_v47, %v734_v48 }
 0x164   :  { %847 = vbcast.lane.b32.xlu1 %v845_v41, 256  ;;  %840 = vbcast.lane.b32.xlu0 %v838_v42, 256 }
 0x165   :  { %v752_v51 = vrot.slane %v741_v49, %v751_v50 }
 0x167   :  { %v760_v52 = vrot.slane %v752_v51, %v751_v50  ;;  %v753_v53 = vcombine.high %v752_v51, %v752_v51 }
 0x168   :  { %908 = vbcast.lane.b32.xlu1 %v906_v45, 256  ;;  %v341_v47 = vpop.f32.mrb[2].mxu0 }
 0x169   :  { %v771_v54 = vrot.slane %v760_v52, %v4476_v7  ;;  %v767_v55 = vrot.slane %v753_v53, %v751_v50  ;;  %v342_v48 = vadd.f32 %v4553_v31, %v341_v47  ;;  %v3933_v49 = vpop.f32.mrb[3].mxu0  ;;  %v744_v50 = vand.u32 127, %v743_v2 }
 0x16b   :  { %v4580_v56 = vadd.f32 %v771_v54, %v4484_v11  ;;  %v775_v57 = vrot.slane %v767_v55, %v4476_v7  ;;  %346 = vst.msk [vmem:[#allocation2 + $0x4] sm:$0x3] %vm191_vm2, %v342_v48 }
 0x16d   :  { %v781_v58 = vsel %vm780_vm3, %v4580_v56, -inf  ;;  %v4586_v59 = vadd.f32 %v775_v57, %v4484_v11  ;;  %v4613_v11 = vpop.permute.xlu0 %887 }
 0x16f   :  { %v784_v60 = vsel %vm780_vm3, %v4586_v59, -inf }
 0x183   :  { %782 = vmax.xlane.f32.xlu0 %v781_v58 }
 0x187   :  { %785 = vmax.xlane.f32.xlu0 %v784_v60 }
 0x19d   :  { %901 = vbcast.lane.b32.xlu0 %v899_v63, 256 }
 0x1d6   :  { %v841_v13 = vpop.permute.xlu0 %840  ;;  %v848_v29 = vpop.permute.xlu1 %847 }
 0x1da   :  { %v4641_v33 = vpop.permute.xlu1 %908 }
 0x210   :  { %v783_v14 = vpop.xlane.xlu0 %782 }
 0x211   :  { %v851_v16 = vadd.f32 %v841_v13, %v783_v14  ;;  %vm787_vm5 = vcmp.eq.f32.partialorder %v4580_v56, %v783_v14  ;;  %v4707_v56 = vsub.s32 %v744_v50, %v4473_v3 }
 0x212   :  { %v789_v52 = vsel %vm787_vm5, %v744_v50, 8 }
 0x213   :  { %v4620_v19 = vadd.f32 %v4611_v9, %v851_v16  ;;  %v4623_v20 = vadd.f32 %v4607_v5, %v851_v16  ;;  %v4628_v25 = vadd.f32 %v4609_v6, %v851_v16  ;;  %v4631_v26 = vadd.f32 %v4615_v12, %v851_v16 }
 0x214   :  { %v786_v22 = vpop.xlane.xlu0 %785  ;;  %v4636_v30 = vadd.f32 %v4613_v11, %v851_v16  ;;  %v4639_v32 = vadd.f32 %v4617_v17, %v851_v16  ;;  %v4648_v36 = vadd.f32 %v4641_v33, %v851_v16  ;;  %v4696_v54 = vsel %vm780_vm3, %v789_v52, 2147483647 }
 0x215   :  { %954 = vperm.xlu1 %4143, %v4620_v19   ;;  %951 = vperm.xlu0 %4142, %v4623_v20   ;;  %v852_v35 = vadd.f32 %v848_v29, %v786_v22  ;;  %vm788_vm4 = vcmp.eq.f32.partialorder %v4586_v59, %v786_v22  ;;  %v793_v57 = vshra.s32 %v4696_v54, 16 }
 0x216   :  { %v790_v51 = vsel %vm788_vm4, %v744_v50, 8 }
 0x217   :  { %v4656_v38 = vadd.f32 %v4611_v9, %v852_v35  ;;  %v4659_v40 = vadd.f32 %v4607_v5, %v852_v35  ;;  %v4664_v41 = vadd.f32 %v4615_v12, %v852_v35  ;;  %v4667_v42 = vadd.f32 %v4609_v6, %v852_v35 }
 0x218   :  { %v4643_v34 = vpop.permute.xlu0 %901  ;;  %v4672_v43 = vadd.f32 %v4617_v17, %v852_v35  ;;  %v4675_v44 = vadd.f32 %v4613_v11, %v852_v35  ;;  %v4680_v45 = vadd.f32 %v4641_v33, %v852_v35  ;;  %v4693_v53 = vsel %vm780_vm3, %v790_v51, 2147483647 }
 0x219   :  { %957 = vperm.xlu1 %4143, %v4628_v25   ;;  %960 = vperm.xlu0 %4142, %v4631_v26   ;;  %v4651_v37 = vadd.f32 %v4643_v34, %v851_v16  ;;  %v4683_v46 = vadd.f32 %v4643_v34, %v852_v35  ;;  %v808_v55 = vshra.s32 %v4693_v53, 16  ;;  %v4702_v58 = vcvt.s32.f32 %v793_v57 }
 0x21b   :  { %v4700_v2 = vcvt.s32.f32 %v808_v55 }
 0x21d   :  { %963 = vperm.xlu1 %4143, %v4636_v30   ;;  %966 = vperm.xlu0 %4142, %v4639_v32  }
 0x221   :  { %972 = vperm.xlu0 %4142, %v4648_v36   ;;  %969 = vperm.xlu1 %4143, %v4651_v37  }
 0x225   :  { %978 = vperm.xlu0 %4142, %v4656_v38   ;;  %975 = vperm.xlu1 %4143, %v4659_v40  }
 0x229   :  { %984 = vperm.xlu0 %4142, %v4664_v41   ;;  %981 = vperm.xlu1 %4143, %v4667_v42  }
 0x22d   :  { %990 = vperm.xlu0 %4142, %v4672_v43   ;;  %987 = vperm.xlu1 %4143, %v4675_v44  }
 0x231   :  { %996 = vperm.xlu0 %4142, %v4680_v45   ;;  %993 = vperm.xlu1 %4143, %v4683_v46  }
 0x235   :  { %1189 = vbcast.lane.b32.xlu0 %v744_v50, 256 }
 0x254   :  { %811 = vmin.xlane.f32.xlu0 %v4700_v2 }
 0x255   :  { %796 = vmin.xlane.f32.xlu1 %v4702_v58 }
 0x294   :  { %v955_v59 = vpop.permute.xlu1 %954  ;;  %v952_v60 = vpop.permute.xlu0 %951 }
 0x295   :  { %v1005_v61 = vrot.slane %v955_v59, %v4707_v56  ;;  %v1001_v63 = vrot.slane %v952_v60, %v4707_v56 }
 0x297   :  { %v1062_v16 = vsel %vm829_vm6, %v1005_v61, %v1001_v63 }
 0x298   :  { %v958_v4 = vpop.permute.xlu1 %957  ;;  %v961_v13 = vpop.permute.xlu0 %960 }
 0x299   :  { %v1009_v14 = vrot.slane %v958_v4, %v4707_v56  ;;  %v1013_v22 = vrot.slane %v961_v13, %v4707_v56 }
 0x29b   :  { %v1064_v29 = vsel %vm1063_vm7, %v1009_v14, %v1062_v16 }
 0x29c   :  { %v964_v3 = vpop.permute.xlu1 %963  ;;  %v967_v35 = vpop.permute.xlu0 %966  ;;  %v1066_v48 = vsel %vm1065_vm8, %v1013_v22, %v1064_v29 }
 0x29d   :  { %v1017_v47 = vrot.slane %v964_v3, %v4707_v56  ;;  %v1021_v49 = vrot.slane %v967_v35, %v4707_v56 }
 0x29f   :  { %v1068_v50 = vsel %vm1067_vm9, %v1017_v47, %v1066_v48 }
 0x2a0   :  { %v970_v51 = vpop.permute.xlu1 %969  ;;  %v973_v52 = vpop.permute.xlu0 %972  ;;  %v1070_v59 = vsel %vm1069_vm10, %v1021_v49, %v1068_v50 }
 0x2a1   :  { %v1025_v55 = vrot.slane %v970_v51, %v4707_v56  ;;  %v1029_v57 = vrot.slane %v973_v52, %v4707_v56 }
 0x2a3   :  { %v1072_v60 = vsel %vm1071_vm11, %v1025_v55, %v1070_v59 }
 0x2a4   :  { %v976_v61 = vpop.permute.xlu1 %975  ;;  %v979_v63 = vpop.permute.xlu0 %978  ;;  %v1074_v4 = vsel %vm1073_vm12, %v1029_v57, %v1072_v60 }
 0x2a5   :  { %v1084_v13 = vsel %vm780_vm3, %v1074_v4, -inf  ;;  %v1033_v14 = vrot.slane %v976_v61, %v4707_v56  ;;  %v1037_v16 = vrot.slane %v979_v63, %v4707_v56  ;;  %v1374_v61 = vld [vmem:[#allocation2 + $0x4] sm:$0x3] }
 0x2a6   :  { %1085 = vmax.xlane.f32.xlu1 %v1084_v13 }
 0x2a7   :  { %v1075_v35 = vsel %vm829_vm6, %v1037_v16, %v1033_v14  ;;  %v1386_v16 = vrot.slane %v1374_v61, %v4529_v21 }
 0x2a8   :  { %v982_v22 = vpop.permute.xlu1 %981  ;;  %v985_v29 = vpop.permute.xlu0 %984 }
 0x2a9   :  { %v1041_v3 = vrot.slane %v982_v22, %v4707_v56  ;;  %v1045_v47 = vrot.slane %v985_v29, %v4707_v56 }
 0x2ab   :  { %v1076_v48 = vsel %vm1063_vm7, %v1041_v3, %v1075_v35  ;;  %v418_v3 = vpop.f32.mrb[2].mxu1 }
 0x2ac   :  { %v988_v49 = vpop.permute.xlu1 %987  ;;  %v991_v50 = vpop.permute.xlu0 %990  ;;  %v1077_v52 = vsel %vm1065_vm8, %v1045_v47, %v1076_v48  ;;  %v419_v35 = vadd.f32 %v4553_v31, %v418_v3  ;;  %v1379_v48 = vrot.slane %v1374_v61, %v4476_v7 }
 0x2ad   :  { %v1049_v51 = vrot.slane %v988_v49, %v4707_v56  ;;  %v1053_v55 = vrot.slane %v991_v50, %v4707_v56  ;;  %v3952_v47 = vpop.f32.mrb[3].mxu1  ;;  %v792_v50 = vand.u32 65535, %v4696_v54 }
 0x2ae   :  { %423 = vst.msk [vmem:[#allocation2 + $0x6] sm:$0x3] %vm191_vm2, %v419_v35 }
 0x2af   :  { %v1078_v57 = vsel %vm1067_vm9, %v1049_v51, %v1077_v52 }
 0x2b0   :  { %v994_v59 = vpop.permute.xlu1 %993  ;;  %v997_v60 = vpop.permute.xlu0 %996  ;;  %v1079_v13 = vsel %vm1069_vm10, %v1053_v55, %v1078_v57  ;;  %v794_v55 = vcvt.s32.f32 %v792_v50  ;;  %v807_v57 = vand.u32 65535, %v4693_v53 }
 0x2b1   :  { %v1057_v63 = vrot.slane %v994_v59, %v4707_v56  ;;  %v1061_v4 = vrot.slane %v997_v60, %v4707_v56 }
 0x2b2   :  { %v809_v60 = vcvt.s32.f32 %v807_v57 }
 0x2b3   :  { %v1080_v14 = vsel %vm1071_vm11, %v1057_v63, %v1079_v13 }
 0x2b4   :  { %v1081_v22 = vsel %vm1073_vm12, %v1061_v4, %v1080_v14  ;;  %v4745_v49 = vpop.permute.xlu0 %1189 }
 0x2b5   :  { %v1087_v29 = vsel %vm780_vm3, %v1081_v22, -inf }
 0x2b6   :  { %1088 = vmax.xlane.f32.xlu0 %v1087_v29 }
 0x2b7   :  { %1388 = vbcast.lane.b32.xlu1 %v1386_v16, 256 }
 0x2cc   :  { %1381 = vbcast.lane.b32.xlu0 %v1379_v48, 256  ;;  %v1841_v48 = vld [vmem:[#allocation2 + $0x6] sm:$0x3] }
 0x2e1   :  { %v4748_v51 = vpop.xlane.xlu0 %811 }
 0x2e2   :  { %v4750_v52 = vpop.xlane.xlu1 %796  ;;  %vm813_vm14 = vcmp.eq.f32.partialorder %v4700_v2, %v4748_v51 }
 0x2e3   :  { %vm798_vm13 = vcmp.eq.f32.partialorder %v4702_v58, %v4750_v52  ;;  %v814_v61 = vsel %vm813_vm14, %v809_v60, inf }
 0x2e4   :  { %v799_v59 = vsel %vm798_vm13, %v794_v55, inf  ;;  %v1846_v55 = vrot.slane %v1841_v48, %v4476_v7 }
 0x2e5   :  { %800 = vmin.xlane.f32.xlu1 %v799_v59 }
 0x2e9   :  { %815 = vmin.xlane.f32.xlu1 %v814_v61 }
 0x333   :  { %v1086_v63 = vpop.xlane.xlu1 %1085 }
 0x334   :  { %v1095_v54 = vrot.slane %v1086_v63, %v4476_v7  ;;  %v1103_v4 = vrot.slane %v1086_v63, %v4534_v23  ;;  %v1099_v13 = vrot.slane %v1086_v63, %v4529_v21  ;;  %v1111_v53 = vrot.slane %v1086_v63, %v4544_v27 }
 0x335   :  { %v1107_v14 = vrot.slane %v1086_v63, %v4537_v24  ;;  %v1119_v16 = vrot.slane %v1086_v63, %v4592_v62 }
 0x336   :  { %vm1172_vm15 = vcmp.eq.f32.partialorder %v4623_v20, %v1095_v54  ;;  %vm1174_vm4 = vcmp.eq.f32.partialorder %v4628_v25, %v1103_v4  ;;  %vm1173_vm5 = vcmp.eq.f32.partialorder %v4620_v19, %v1099_v13  ;;  %vm1176_vm13 = vcmp.eq.f32.partialorder %v4636_v30, %v1111_v53 }
 0x337   :  { %v1191_v58 = vsel %vm1172_vm15, %v4745_v49, 8  ;;  %v1193_v2 = vsel %vm1174_vm4, %v4745_v49, 8  ;;  %v1192_v22 = vsel %vm1173_vm5, %v4745_v49, 8  ;;  %v1195_v20 = vsel %vm1176_vm13, %v4745_v49, 8  ;;  %v1389_v53 = vpop.permute.xlu1 %1388 }
 0x338   :  { %1208 = vperm.xlu1 %4143, %v1191_v58   ;;  %1214 = vperm.xlu0 %4142, %v1193_v2   ;;  %vm1175_vm14 = vcmp.eq.f32.partialorder %v4631_v26, %v1107_v14  ;;  %vm1178_vm15 = vcmp.eq.f32.partialorder %v4651_v37, %v1119_v16  ;;  %v1115_v25 = vrot.slane %v1086_v63, %v4547_v28 }
 0x339   :  { %v1194_v29 = vsel %vm1175_vm14, %v4745_v49, 8  ;;  %v1197_v19 = vsel %vm1178_vm15, %v4745_v49, 8  ;;  %v1123_v30 = vrot.slane %v1086_v63, %v4567_v39 }
 0x33a   :  { %vm1177_vm4 = vcmp.eq.f32.partialorder %v4639_v32, %v1115_v25  ;;  %v1853_v25 = vrot.slane %v1841_v48, %v4529_v21 }
 0x33b   :  { %v1196_v35 = vsel %vm1177_vm4, %v4745_v49, 8  ;;  %vm1179_vm5 = vcmp.eq.f32.partialorder %v4648_v36, %v1123_v30 }
 0x33c   :  { %1211 = vperm.xlu1 %4143, %v1192_v22   ;;  %1220 = vperm.xlu0 %4142, %v1195_v20   ;;  %v1198_v37 = vsel %vm1179_vm5, %v4745_v49, 8 }
 0x340   :  { %1217 = vperm.xlu1 %4143, %v1194_v29   ;;  %1226 = vperm.xlu0 %4142, %v1197_v19  }
 0x343   :  { %v4778_v3 = vpop.xlane.xlu0 %1088 }
 0x344   :  { %1223 = vperm.xlu1 %4143, %v1196_v35   ;;  %v1131_v36 = vrot.slane %v4778_v3, %v4529_v21  ;;  %v1139_v59 = vrot.slane %v4778_v3, %v4537_v24  ;;  %v1155_v13 = vrot.slane %v4778_v3, %v4567_v39  ;;  %v1127_v22 = vrot.slane %v4778_v3, %v4476_v7 }
 0x345   :  { %v1135_v29 = vrot.slane %v4778_v3, %v4534_v23  ;;  %v1143_v35 = vrot.slane %v4778_v3, %v4544_v27 }
 0x346   :  { %vm1181_vm13 = vcmp.eq.f32.partialorder %v4656_v38, %v1131_v36  ;;  %vm1183_vm14 = vcmp.eq.f32.partialorder %v4664_v41, %v1139_v59  ;;  %v425_v38 = vld [vmem:[#allocation3 + $0x8] sm:$0x3]  ;;  %vm1187_vm4 = vcmp.eq.f32.partialorder %v4680_v45, %v1155_v13  ;;  %vm1180_vm5 = vcmp.eq.f32.partialorder %v4659_v40, %v1127_v22 }
 0x347   :  { %v1382_v26 = vpop.permute.xlu0 %1381  ;;  %v1200_v61 = vsel %vm1181_vm13, %v4745_v49, 8  ;;  %v1202_v4 = vsel %vm1183_vm14, %v4745_v49, 8  ;;  %3970 = vmatmul.mubr.msk.f32.vlgmr.msra.gmra.mrb[4].mxu0 %vm117_vm1, %v425_v38  ;;  %v1206_v14 = vsel %vm1187_vm4, %v4745_v49, 8  ;;  %v1199_v30 = vsel %vm1180_vm5, %v4745_v49, 8 }
 0x348   :  { %v1392_v47 = vadd.f32 %v1382_v26, %v1086_v63  ;;  %1229 = vperm.xlu1 %4143, %v1198_v37   ;;  %v1147_v63 = vrot.slane %v4778_v3, %v4547_v28  ;;  %4103 = vmatpush3.bf16.msra.mxu0 %v4478_v8  ;;  %vm1182_vm13 = vcmp.eq.f32.partialorder %v4667_v42, %v1135_v29 }
 0x349   :  { %4007 = vmatprep.mubr.msk.f32.mxu0 %vm4345_vm0, %v6099_v1  ;;  %4104 = vmatprep.subr.bf16.mxu0 %v6097_v0  ;;  %v1201_v40 = vsel %vm1182_vm13, %v4745_v49, 8  ;;  %vm1184_vm14 = vcmp.eq.f32.partialorder %v4675_v44, %v1143_v35  ;;  %v1151_v37 = vrot.slane %v4778_v3, %v4592_v62 }
 0x34a   :  { %v4784_v50 = vadd.f32 %v1392_v47, %v4611_v9  ;;  %v4787_v32 = vadd.f32 %v1392_v47, %v4607_v5  ;;  %v4795_v57 = vadd.f32 %v1392_v47, %v4609_v6  ;;  %v4802_v60 = vadd.f32 %v1392_v47, %v4615_v12 }
 0x34b   :  { %v4810_v54 = vadd.f32 %v1392_v47, %v4613_v11  ;;  %vm1185_vm15 = vcmp.eq.f32.partialorder %v4672_v43, %v1147_v63  ;;  %v4822_v41 = vadd.f32 %v1392_v47, %v4617_v17  ;;  %v1393_v43 = vadd.f32 %v1389_v53, %v4778_v3 }
 0x34c   :  { %1430 = vperm.xlu1 %4143, %v4784_v50   ;;  %1427 = vperm.xlu0 %4142, %v4787_v32   ;;  %v1204_v58 = vsel %vm1185_vm15, %v4745_v49, 8  ;;  %v4831_v2 = vadd.f32 %v1392_v47, %v4643_v34  ;;  %v4841_v45 = vadd.f32 %v1392_v47, %v4641_v33  ;;  %v803_v47 = vcvt.f32.s32 %v4750_v52 }
 0x34d   :  { %4106 = vmatpush3.bf16.msra.mxu0 %v4481_v10  ;;  %v4838_v16 = vadd.f32 %v1393_v43, %v4607_v5  ;;  %v4850_v20 = vadd.f32 %v1393_v43, %v4611_v9  ;;  %v4858_v19 = vadd.f32 %v1393_v43, %v4609_v6  ;;  %v4866_v26 = vadd.f32 %v1393_v43, %v4615_v12 }
 0x34e   :  { %4107 = vmatprep.subr.bf16.mxu0 %v6097_v0  ;;  %v4875_v42 = vadd.f32 %v1393_v43, %v4613_v11  ;;  %v1203_v59 = vsel %vm1184_vm14, %v4745_v49, 8  ;;  %vm1186_vm15 = vcmp.eq.f32.partialorder %v4683_v46, %v1151_v37  ;;  %v804_v44 = vshll.u32 %v803_v47, 16 }
 0x34f   :  { %v4882_v3 = vadd.f32 %v1393_v43, %v4617_v17  ;;  %v4887_v13 = vadd.f32 %v1393_v43, %v4643_v34 }
 0x350   :  { %1848 = vbcast.lane.b32.xlu1 %v1846_v55, 256  ;;  %1433 = vperm.xlu0 %4142, %v4795_v57   ;;  %v818_v55 = vcvt.f32.s32 %v4748_v51 }
 0x351   :  { %4109 = vmatpush3.bf16.msra.mxu0 %v4491_v15 }
 0x352   :  { %4110 = vmatprep.subr.bf16.mxu0 %v6097_v0  ;;  %v819_v52 = vshll.u32 %v818_v55, 16 }
 0x354   :  { %1235 = vperm.xlu1 %4143, %v1200_v61   ;;  %1436 = vperm.xlu0 %4142, %v4802_v60  }
 0x355   :  { %4112 = vmatpush3.bf16.msra.mxu0 %v4497_v18 }
 0x358   :  { %1241 = vperm.xlu1 %4143, %v1202_v4   ;;  %1439 = vperm.xlu0 %4142, %v4810_v54   ;;  %v1205_v4 = vsel %vm1186_vm15, %v4745_v49, 8 }
 0x35c   :  { %1247 = vperm.xlu1 %4143, %v1204_v58   ;;  %1442 = vperm.xlu0 %4142, %v4822_v41  }
 0x360   :  { %1253 = vperm.xlu1 %4143, %v1206_v14   ;;  %1445 = vperm.xlu0 %4142, %v4831_v2   ;;  %v4895_v14 = vadd.f32 %v1393_v43, %v4641_v33 }
 0x362   :  { %6114 = vst [vmem:[#allocation23_spill] sm:$0xff] %v4895_v14 }
 0x364   :  { %1451 = vperm.xlu1 %4143, %v4838_v16   ;;  %1448 = vperm.xlu0 %4142, %v4841_v45  }
 0x368   :  { %1454 = vperm.xlu1 %4143, %v4850_v20   ;;  %1855 = vbcast.lane.b32.xlu0 %v1853_v25, 256 }
 0x36c   :  { %1457 = vperm.xlu1 %4143, %v4858_v19   ;;  %1232 = vperm.xlu0 %4142, %v1199_v30  }
 0x370   :  { %1460 = vperm.xlu1 %4143, %v4866_v26   ;;  %1238 = vperm.xlu0 %4142, %v1201_v40  }
 0x372   :  { %v801_v48 = vpop.xlane.xlu1 %800 }
 0x373   :  { %v802_v36 = vcvt.f32.s32 %v801_v48 }
 0x374   :  { %1463 = vperm.xlu1 %4143, %v4875_v42   ;;  %1244 = vperm.xlu0 %4142, %v1203_v59  }
 0x375   :  { %v805_v63 = vadd.s32 %v804_v44, %v802_v36 }
 0x376   :  { %v816_v61 = vpop.xlane.xlu1 %815 }
 0x377   :  { %v817_v38 = vcvt.f32.s32 %v816_v61  ;;  %v824_v53 = vrot.slane %v805_v63, %v4707_v56 }
 0x378   :  { %1466 = vperm.xlu1 %4143, %v4882_v3   ;;  %1250 = vperm.xlu0 %4142, %v1205_v4  }
 0x379   :  { %v820_v51 = vadd.s32 %v819_v52, %v817_v38 }
 0x37b   :  { %v828_v46 = vrot.slane %v820_v51, %v4707_v56 }
 0x37c   :  { %1469 = vperm.xlu1 %4143, %v4887_v13  }
 0x37d   :  { %v830_v58 = vsel %vm829_vm6, %v828_v46, %v824_v53 }
 0x37e   :  { %832 = vst.msk [vmem:[#allocation14 + $0x2] sm:$0x3] %vm191_vm2, %v830_v58 }
 0x380   :  { %1472 = vperm.xlu1 %4143, %v4895_v14  }
 0x3b7   :  { %v1209_v22 = vpop.permute.xlu1 %1208  ;;  %v1215_v25 = vpop.permute.xlu0 %1214 }
 0x3b8   :  { %v1258_v43 = vrot.slane %v1209_v22, %v4707_v56  ;;  %v1266_v4 = vrot.slane %v1215_v25, %v4707_v56 }
 0x3bb   :  { %v1212_v29 = vpop.permute.xlu1 %1211  ;;  %v1221_v35 = vpop.permute.xlu0 %1220 }
 0x3bc   :  { %v1262_v44 = vrot.slane %v1212_v29, %v4707_v56  ;;  %v1274_v29 = vrot.slane %v1221_v35, %v4707_v56 }
 0x3be   :  { %v1319_v63 = vsel %vm829_vm6, %v1262_v44, %v1258_v43 }
 0x3bf   :  { %v1218_v30 = vpop.permute.xlu1 %1217  ;;  %v1227_v37 = vpop.permute.xlu0 %1226  ;;  %v1320_v51 = vsel %vm1063_vm7, %v1266_v4, %v1319_v63 }
 0x3c0   :  { %v1270_v38 = vrot.slane %v1218_v30, %v4707_v56  ;;  %v1282_v63 = vrot.slane %v1227_v37, %v4707_v56 }
 0x3c2   :  { %v1321_v58 = vsel %vm1065_vm8, %v1270_v38, %v1320_v51 }
 0x3c3   :  { %v1224_v40 = vpop.permute.xlu1 %1223  ;;  %v1322_v22 = vsel %vm1067_vm9, %v1274_v29, %v1321_v58 }
 0x3c4   :  { %v1278_v0 = vrot.slane %v1224_v40, %v4707_v56 }
 0x3c6   :  { %v1323_v44 = vsel %vm1069_vm10, %v1278_v0, %v1322_v22 }
 0x3c7   :  { %v1230_v47 = vpop.permute.xlu1 %1229  ;;  %v1324_v58 = vsel %vm1071_vm11, %v1282_v63, %v1323_v44 }
 0x3c8   :  { %v1286_v30 = vrot.slane %v1230_v47, %v4707_v56 }
 0x3cb   :  { %v1431_v48 = vpop.permute.xlu1 %1430  ;;  %v1428_v55 = vpop.permute.xlu0 %1427 }
 0x3cc   :  { %v1481_v25 = vrot.slane %v1431_v48, %v4707_v56  ;;  %v1477_v43 = vrot.slane %v1428_v55, %v4707_v56  ;;  %v1325_v48 = vsel %vm1073_vm12, %v1286_v30, %v1324_v58 }
 0x3cd   :  { %v4927_v22 = vsel %vm780_vm3, %v1325_v48, 2147483647 }
 0x3ce   :  { %v1538_v0 = vsel %vm829_vm6, %v1481_v25, %v1477_v43  ;;  %v1335_v43 = vshra.s32 %v4927_v22, 16 }
 0x3cf   :  { %v4898_v36 = vpop.permute.xlu1 %1848  ;;  %v1434_v59 = vpop.permute.xlu0 %1433 }
 0x3d0   :  { %v1485_v38 = vrot.slane %v1434_v59, %v4707_v56 }
 0x3d2   :  { %v1539_v55 = vsel %vm1063_vm7, %v1485_v38, %v1538_v0 }
 0x3d3   :  { %v1236_v61 = vpop.permute.xlu1 %1235  ;;  %v1437_v52 = vpop.permute.xlu0 %1436 }
 0x3d4   :  { %v1489_v40 = vrot.slane %v1437_v52, %v4707_v56 }
 0x3d6   :  { %v1540_v59 = vsel %vm1065_vm8, %v1489_v40, %v1539_v55 }
 0x3d7   :  { %v1242_v53 = vpop.permute.xlu1 %1241  ;;  %v1440_v46 = vpop.permute.xlu0 %1439 }
 0x3d8   :  { %v1493_v35 = vrot.slane %v1440_v46, %v4707_v56 }
 0x3da   :  { %v1541_v52 = vsel %vm1067_vm9, %v1493_v35, %v1540_v59  ;;  %v4937_v35 = vcvt.s32.f32 %v1335_v43 }
 0x3db   :  { %v1248_v1 = vpop.permute.xlu1 %1247  ;;  %v1443_v14 = vpop.permute.xlu0 %1442 }
 0x3dc   :  { %v1497_v47 = vrot.slane %v1443_v14, %v4707_v56 }
 0x3de   :  { %v1542_v25 = vsel %vm1069_vm10, %v1497_v47, %v1541_v52  ;;  %v1294_v47 = vrot.slane %v1236_v61, %v4707_v56  ;;  %v1310_v61 = vrot.slane %v1248_v1, %v4707_v56 }
 0x3df   :  { %v1254_v4 = vpop.permute.xlu1 %1253  ;;  %v1446_v51 = vpop.permute.xlu0 %1445 }
 0x3e0   :  { %v1501_v37 = vrot.slane %v1446_v51, %v4707_v56 }
 0x3e2   :  { %v1543_v14 = vsel %vm1071_vm11, %v1501_v37, %v1542_v25 }
 0x3e3   :  { %v1452_v29 = vpop.permute.xlu1 %1451  ;;  %v1449_v46 = vpop.permute.xlu0 %1448 }
 0x3e4   :  { %v1505_v44 = vrot.slane %v1449_v46, %v4707_v56  ;;  %v1302_v46 = vrot.slane %v1242_v53, %v4707_v56 }
 0x3e6   :  { %v1544_v30 = vsel %vm1073_vm12, %v1505_v44, %v1543_v14 }
 0x3e7   :  { %v1455_v63 = vpop.permute.xlu1 %1454  ;;  %v4934_v38 = vpop.permute.xlu0 %1855  ;;  %v1554_v40 = vsel %vm780_vm3, %v1544_v30, -inf }
 0x3e8   :  { %1555 = vmax.xlane.f32.xlu0 %v1554_v40 }
 0x3eb   :  { %v1458_v51 = vpop.permute.xlu1 %1457  ;;  %v1233_v58 = vpop.permute.xlu0 %1232 }
 0x3ec   :  { %1338 = vmin.xlane.f32.xlu0 %v4937_v35  ;;  %v1290_v0 = vrot.slane %v1233_v58, %v4707_v56  ;;  %v1517_v53 = vrot.slane %v1458_v51, %v4707_v56 }
 0x3ee   :  { %v1326_v59 = vsel %vm829_vm6, %v1294_v47, %v1290_v0  ;;  %v1318_v47 = vrot.slane %v1254_v4, %v4707_v56 }
 0x3ef   :  { %v1461_v48 = vpop.permute.xlu1 %1460  ;;  %v1239_v55 = vpop.permute.xlu0 %1238 }
 0x3f0   :  { %v1298_v37 = vrot.slane %v1239_v55, %v4707_v56  ;;  %v1513_v55 = vrot.slane %v1455_v63, %v4707_v56 }
 0x3f2   :  { %v1327_v52 = vsel %vm1063_vm7, %v1298_v37, %v1326_v59  ;;  %v1509_v59 = vrot.slane %v1452_v29, %v4707_v56 }
 0x3f3   :  { %v1464_v44 = vpop.permute.xlu1 %1463  ;;  %v1245_v25 = vpop.permute.xlu0 %1244  ;;  %v1328_v30 = vsel %vm1065_vm8, %v1302_v46, %v1327_v52  ;;  %v1521_v52 = vrot.slane %v1461_v48, %v4707_v56 }
 0x3f4   :  { %v1306_v14 = vrot.slane %v1245_v25, %v4707_v56  ;;  %v1525_v1 = vrot.slane %v1464_v44, %v4707_v56  ;;  %v1545_v63 = vsel %vm829_vm6, %v1513_v55, %v1509_v59 }
 0x3f5   :  { %v1546_v51 = vsel %vm1063_vm7, %v1517_v53, %v1545_v63 }
 0x3f6   :  { %v1329_v43 = vsel %vm1067_vm9, %v1306_v14, %v1328_v30 }
 0x3f7   :  { %v1467_v40 = vpop.permute.xlu1 %1466  ;;  %v1251_v58 = vpop.permute.xlu0 %1250  ;;  %v1330_v37 = vsel %vm1069_vm10, %v1310_v61, %v1329_v43  ;;  %v1547_v43 = vsel %vm1065_vm8, %v1521_v52, %v1546_v51 }
 0x3f8   :  { %v1314_v0 = vrot.slane %v1251_v58, %v4707_v56  ;;  %v1529_v30 = vrot.slane %v1467_v40, %v4707_v56  ;;  %v1548_v44 = vsel %vm1067_vm9, %v1525_v1, %v1547_v43 }
 0x3fa   :  { %v1331_v46 = vsel %vm1071_vm11, %v1314_v0, %v1330_v37  ;;  %v1549_v40 = vsel %vm1069_vm10, %v1529_v30, %v1548_v44 }
 0x3fb   :  { %v1470_v25 = vpop.permute.xlu1 %1469  ;;  %v1332_v14 = vsel %vm1073_vm12, %v1318_v47, %v1331_v46 }
 0x3fc   :  { %v4963_v4 = vsel %vm780_vm3, %v1332_v14, 2147483647  ;;  %v1533_v29 = vrot.slane %v1470_v25, %v4707_v56 }
 0x3fd   :  { %v1350_v48 = vshra.s32 %v4963_v4, 16 }
 0x3fe   :  { %v1550_v0 = vsel %vm1071_vm11, %v1533_v29, %v1549_v40 }
 0x3ff   :  { %v1473_v61 = vpop.permute.xlu1 %1472  ;;  %v4970_v58 = vcvt.s32.f32 %v1350_v48 }
 0x400   :  { %v1537_v55 = vrot.slane %v1473_v61, %v4707_v56 }
 0x401   :  { %1353 = vmin.xlane.f32.xlu0 %v4970_v58 }
 0x402   :  { %v1551_v47 = vsel %vm1073_vm12, %v1537_v55, %v1550_v0 }
 0x403   :  { %v1557_v53 = vsel %vm780_vm3, %v1551_v47, -inf }
 0x404   :  { %1558 = vmax.xlane.f32.xlu1 %v1557_v53 }
 0x41a   :  { %v495_v37 = vpop.f32.mrb[4].mxu0 }
 0x41b   :  { %v496_v59 = vadd.f32 %v4553_v31, %v495_v37  ;;  %v3971_v52 = vpop.f32.mrb[5].mxu0 }
 0x41d   :  { %500 = vst.msk [vmem:[#allocation2 + $0x8] sm:$0x3] %vm191_vm2, %v496_v59 }
 0x475   :  { %v1556_v46 = vpop.xlane.xlu0 %1555 }
 0x476   :  { %v1569_v1 = vrot.slane %v1556_v46, %v4529_v21  ;;  %v1565_v25 = vrot.slane %v1556_v46, %v4476_v7  ;;  %v1577_v14 = vrot.slane %v1556_v46, %v4537_v24  ;;  %v1573_v63 = vrot.slane %v1556_v46, %v4534_v23 }
 0x477   :  { %v1585_v51 = vrot.slane %v1556_v46, %v4547_v28  ;;  %v1581_v29 = vrot.slane %v1556_v46, %v4544_v27  ;;  %v1589_v43 = vrot.slane %v1556_v46, %v4592_v62  ;;  %v1859_v44 = vadd.f32 %v4898_v36, %v1556_v46 }
 0x478   :  { %vm1643_vm4 = vcmp.eq.f32.partialorder %v4784_v50, %v1569_v1  ;;  %vm1642_vm5 = vcmp.eq.f32.partialorder %v4787_v32, %v1565_v25  ;;  %vm1645_vm13 = vcmp.eq.f32.partialorder %v4802_v60, %v1577_v14  ;;  %vm1644_vm14 = vcmp.eq.f32.partialorder %v4795_v57, %v1573_v63  ;;  %v502_v1 = vld [vmem:[#allocation3 + $0xa] sm:$0x3] }
 0x479   :  { %v1659_v30 = vsel %vm1643_vm4, %v4745_v49, 8  ;;  %v1658_v31 = vsel %vm1642_vm5, %v4745_v49, 8  ;;  %v1661_v48 = vsel %vm1645_vm13, %v4745_v49, 8  ;;  %v1660_v50 = vsel %vm1644_vm14, %v4745_v49, 8  ;;  %v5045_v25 = vpop.xlane.xlu0 %1338  ;;  %3989 = vmatmul.mubr.msk.f32.vlgmr.msra.gmra.mrb[4].mxu1 %vm117_vm1, %v502_v1 }
 0x47a   :  { %1678 = vperm.xlu1 %4143, %v1659_v30   ;;  %1675 = vperm.xlu0 %4142, %v1658_v31   ;;  %v1593_v32 = vrot.slane %v1556_v46, %v4567_v39  ;;  %vm1647_vm15 = vcmp.eq.f32.partialorder %v4822_v41, %v1585_v51  ;;  %vm1646_vm4 = vcmp.eq.f32.partialorder %v4810_v54, %v1581_v29  ;;  %v1334_v14 = vand.u32 65535, %v4927_v22 }
 0x47b   :  { %v1663_v60 = vsel %vm1647_vm15, %v4745_v49, 8  ;;  %v1662_v57 = vsel %vm1646_vm4, %v4745_v49, 8  ;;  %vm1648_vm13 = vcmp.eq.f32.partialorder %v4831_v2, %v1589_v43  ;;  %v5006_v54 = vadd.f32 %v1859_v44, %v4611_v9  ;;  %4115 = vmatpush3.bf16.msra.mxu1 %v4478_v8  ;;  %v2308_v8 = vld [vmem:[#allocation2 + $0x8] sm:$0x3] }
 0x47c   :  { %vm1649_vm5 = vcmp.eq.f32.partialorder %v4841_v45, %v1593_v32  ;;  %v1664_v41 = vsel %vm1648_vm13, %v4745_v49, 8  ;;  %v5009_v55 = vadd.f32 %v1859_v44, %v4607_v5  ;;  %v5014_v2 = vadd.f32 %v1859_v44, %v4609_v6 }
 0x47d   :  { %v1665_v61 = vsel %vm1649_vm5, %v4745_v49, 8  ;;  %v5018_v45 = vadd.f32 %v1859_v44, %v4615_v12  ;;  %v5024_v40 = vadd.f32 %v1859_v44, %v4613_v11  ;;  %v5030_v47 = vadd.f32 %v1859_v44, %v4617_v17 }
 0x47e   :  { %1684 = vperm.xlu1 %4143, %v1661_v48   ;;  %1681 = vperm.xlu0 %4142, %v1660_v50   ;;  %v6115_v63 = vmov 0.0   ;;  %vm1340_vm5 = vcmp.eq.f32.partialorder %v4937_v35, %v5045_v25  ;;  %v5060_v22 = vadd.f32 %v1859_v44, %v4643_v34  ;;  %v5066_v31 = vadd.f32 %v1859_v44, %v4641_v33 }
 0x47f   :  { %4026 = vmatprep.mubr.msk.f32.mxu1 %vm4345_vm0, %v6115_v63  ;;  %v2313_v35 = vrot.slane %v2308_v8, %v4476_v7  ;;  %v1349_v43 = vand.u32 65535, %v4963_v4 }
 0x482   :  { %1690 = vperm.xlu1 %4143, %v1663_v60   ;;  %1687 = vperm.xlu0 %4142, %v1662_v57   ;;  %v1351_v57 = vcvt.s32.f32 %v1349_v43 }
 0x486   :  { %1696 = vperm.xlu1 %4143, %v1665_v61   ;;  %1693 = vperm.xlu0 %4142, %v1664_v41  }
 0x48a   :  { %1897 = vperm.xlu1 %4143, %v5006_v54   ;;  %1894 = vperm.xlu0 %4142, %v5009_v55  }
 0x48e   :  { %1900 = vperm.xlu0 %4142, %v5014_v2   ;;  %v5101_v60 = vpop.xlane.xlu0 %1353 }
 0x491   :  { %v5021_v36 = vpop.xlane.xlu1 %1558 }
 0x492   :  { %1903 = vperm.xlu0 %4142, %v5018_v45   ;;  %v1597_v0 = vrot.slane %v5021_v36, %v4476_v7  ;;  %v1605_v53 = vrot.slane %v5021_v36, %v4534_v23  ;;  %v1613_v59 = vrot.slane %v5021_v36, %v4544_v27  ;;  %v1860_v46 = vadd.f32 %v4934_v38, %v5021_v36 }
 0x493   :  { %v1336_v38 = vcvt.s32.f32 %v1334_v14  ;;  %v1601_v51 = vrot.slane %v5021_v36, %v4529_v21 }
 0x494   :  { %vm1650_vm14 = vcmp.eq.f32.partialorder %v4838_v16, %v1597_v0  ;;  %vm1652_vm15 = vcmp.eq.f32.partialorder %v4858_v19, %v1605_v53  ;;  %vm1654_vm4 = vcmp.eq.f32.partialorder %v4875_v42, %v1613_v59  ;;  %v5050_v19 = vadd.f32 %v1860_v46, %v4607_v5  ;;  %v6119_v53 = vld [vmem:[#allocation23_spill] sm:$0xff] }
 0x495   :  { %v1666_v37 = vsel %vm1650_vm14, %v4745_v49, 8  ;;  %v1668_v52 = vsel %vm1652_vm15, %v4745_v49, 8  ;;  %v1670_v16 = vsel %vm1654_vm4, %v4745_v49, 8  ;;  %v6116_v42 = vmov 0.0|0.0  }
 0x496   :  { %1906 = vperm.xlu0 %4142, %v5024_v40   ;;  %4116 = vmatprep.subr.bf16.mxu1 %v6116_v42  ;;  %v1341_v30 = vsel %vm1340_vm5, %v1336_v38, inf  ;;  %vm1651_vm13 = vcmp.eq.f32.partialorder %v4850_v20, %v1601_v51  ;;  %v5090_v20 = vadd.f32 %v1860_v46, %v4611_v9  ;;  %v5094_v32 = vadd.f32 %v1860_v46, %v4609_v6 }
 0x497   :  { %4118 = vmatpush3.bf16.msra.mxu1 %v4481_v10  ;;  %v1621_v10 = vrot.slane %v5021_v36, %v4592_v62  ;;  %v1667_v48 = vsel %vm1651_vm13, %v4745_v49, 8  ;;  %vm1355_vm4 = vcmp.eq.f32.partialorder %v4970_v58, %v5101_v60  ;;  %v5111_v61 = vadd.f32 %v1860_v46, %v4617_v17 }
 0x498   :  { %4119 = vmatprep.subr.bf16.mxu1 %v6116_v42  ;;  %v1356_v44 = vsel %vm1355_vm4, %v1351_v57, inf  ;;  %v5115_v4 = vadd.f32 %v1860_v46, %v4643_v34  ;;  %v5119_v41 = vadd.f32 %v1860_v46, %v4641_v33  ;;  %v2320_v58 = vrot.slane %v2308_v8, %v4529_v21 }
 0x499   :  { %vm1656_vm0 = vcmp.eq.f32.partialorder %v4887_v13, %v1621_v10  ;;  %v1625_v0 = vrot.slane %v5021_v36, %v4567_v39 }
 0x49a   :  { %1909 = vperm.xlu0 %4142, %v5030_v47   ;;  %v1672_v29 = vsel %vm1656_vm0, %v4745_v49, 8  ;;  %6117 = vst [vmem:[#allocation24_spill] sm:$0xff] %v5115_v4  ;;  %6118 = vst [vmem:[#allocation25_spill] sm:$0xff] %v5119_v41 }
 0x49b   :  { %4121 = vmatpush3.bf16.msra.mxu1 %v4491_v15  ;;  %v1609_v15 = vrot.slane %v5021_v36, %v4537_v24  ;;  %vm1657_vm5 = vcmp.eq.f32.partialorder %v6119_v53, %v1625_v0 }
 0x49c   :  { %4122 = vmatprep.subr.bf16.mxu1 %v6116_v42 }
 0x49d   :  { %vm1653_vm14 = vcmp.eq.f32.partialorder %v4866_v26, %v1609_v15  ;;  %v5098_v26 = vadd.f32 %v1860_v46, %v4615_v12 }
 0x49e   :  { %1699 = vperm.xlu0 %4142, %v1666_v37   ;;  %v1669_v13 = vsel %vm1653_vm14, %v4745_v49, 8  ;;  %v1673_v37 = vsel %vm1657_vm5, %v4745_v49, 8 }
 0x49f   :  { %4124 = vmatpush3.bf16.msra.mxu1 %v4497_v18  ;;  %v1617_v18 = vrot.slane %v5021_v36, %v4547_v28 }
 0x4a1   :  { %vm1655_vm15 = vcmp.eq.f32.partialorder %v4882_v3, %v1617_v18  ;;  %v5105_v3 = vadd.f32 %v1860_v46, %v4613_v11 }
 0x4a2   :  { %1705 = vperm.xlu0 %4142, %v1668_v52   ;;  %v1671_v50 = vsel %vm1655_vm15, %v4745_v49, 8 }
 0x4a6   :  { %1711 = vperm.xlu0 %4142, %v1670_v16  }
 0x4aa   :  { %1918 = vperm.xlu0 %4142, %v5050_v19  }
 0x4ae   :  { %1912 = vperm.xlu0 %4142, %v5060_v22   ;;  %1342 = vmin.xlane.f32.xlu1 %v1341_v30 }
 0x4b2   :  { %1915 = vperm.xlu0 %4142, %v5066_v31  }
 0x4b6   :  { %2315 = vbcast.lane.b32.xlu0 %v2313_v35, 256 }
 0x4ba   :  { %1717 = vperm.xlu0 %4142, %v1672_v29  }
 0x4bf   :  { %1702 = vperm.xlu1 %4143, %v1667_v48  }
 0x4c3   :  { %1708 = vperm.xlu1 %4143, %v1669_v13  }
 0x4c7   :  { %1714 = vperm.xlu1 %4143, %v1671_v50  }
 0x4cb   :  { %1921 = vperm.xlu1 %4143, %v5090_v20  }
 0x4cf   :  { %1924 = vperm.xlu1 %4143, %v5094_v32  }
 0x4d3   :  { %1927 = vperm.xlu1 %4143, %v5098_v26  }
 0x4d7   :  { %1930 = vperm.xlu1 %4143, %v5105_v3  }
 0x4d9   :  { %1357 = vmin.xlane.f32.xlu0 %v1356_v44 }
 0x4db   :  { %1933 = vperm.xlu1 %4143, %v5111_v61  }
 0x4df   :  { %1936 = vperm.xlu1 %4143, %v5115_v4  }
 0x4e3   :  { %1939 = vperm.xlu1 %4143, %v5119_v41  }
 0x4e7   :  { %2322 = vbcast.lane.b32.xlu1 %v2320_v58, 256 }
 0x4eb   :  { %1720 = vperm.xlu1 %4143, %v1673_v37  }
 0x4f9   :  { %v1676_v59 = vpop.permute.xlu0 %1675  ;;  %v1679_v63 = vpop.permute.xlu1 %1678 }
 0x4fd   :  { %v1682_v52 = vpop.permute.xlu0 %1681  ;;  %v1685_v38 = vpop.permute.xlu1 %1684 }
 0x501   :  { %v1688_v16 = vpop.permute.xlu0 %1687  ;;  %v1691_v35 = vpop.permute.xlu1 %1690 }
 0x505   :  { %v1694_v1 = vpop.permute.xlu0 %1693  ;;  %v1697_v36 = vpop.permute.xlu1 %1696 }
 0x509   :  { %v1895_v14 = vpop.permute.xlu0 %1894  ;;  %v1898_v15 = vpop.permute.xlu1 %1897 }
 0x50a   :  { %v1948_v18 = vrot.slane %v1898_v15, %v4707_v56  ;;  %v1944_v13 = vrot.slane %v1895_v14, %v4707_v56 }
 0x50c   :  { %v2005_v58 = vsel %vm829_vm6, %v1948_v18, %v1944_v13 }
 0x50d   :  { %v1901_v46 = vpop.permute.xlu0 %1900 }
 0x50e   :  { %v1952_v50 = vrot.slane %v1901_v46, %v4707_v56 }
 0x510   :  { %v2006_v53 = vsel %vm1063_vm7, %v1952_v50, %v2005_v58 }
 0x511   :  { %v1904_v42 = vpop.permute.xlu0 %1903 }
 0x512   :  { %v1956_v43 = vrot.slane %v1904_v42, %v4707_v56 }
 0x514   :  { %v2007_v4 = vsel %vm1065_vm8, %v1956_v43, %v2006_v53 }
 0x515   :  { %v1907_v30 = vpop.permute.xlu0 %1906 }
 0x516   :  { %v1960_v57 = vrot.slane %v1907_v30, %v4707_v56 }
 0x518   :  { %v2008_v15 = vsel %vm1067_vm9, %v1960_v57, %v2007_v4  ;;  %v1729_v4 = vrot.slane %v1679_v63, %v4707_v56  ;;  %v1725_v57 = vrot.slane %v1676_v59, %v4707_v56  ;;  %v1749_v59 = vrot.slane %v1694_v1, %v4707_v56 }
 0x519   :  { %v1910_v8 = vpop.permute.xlu0 %1909 }
 0x51a   :  { %v1964_v0 = vrot.slane %v1910_v8, %v4707_v56 }
 0x51c   :  { %v2009_v46 = vsel %vm1069_vm10, %v1964_v0, %v2008_v15  ;;  %v1733_v0 = vrot.slane %v1682_v52, %v4707_v56  ;;  %v1737_v15 = vrot.slane %v1685_v38, %v4707_v56  ;;  %v1753_v52 = vrot.slane %v1697_v36, %v4707_v56 }
 0x51d   :  { %v5127_v10 = vpop.permute.xlu0 %1699 }
 0x51e   :  { %v1757_v36 = vrot.slane %v5127_v10, %v4707_v56 }
 0x521   :  { %v5129_v51 = vpop.permute.xlu0 %1705 }
 0x525   :  { %v5131_v29 = vpop.permute.xlu0 %1711 }
 0x529   :  { %v1919_v48 = vpop.permute.xlu0 %1918 }
 0x52d   :  { %v1913_v44 = vpop.permute.xlu0 %1912 }
 0x52e   :  { %v1968_v37 = vrot.slane %v1913_v44, %v4707_v56 }
 0x530   :  { %v2010_v30 = vsel %vm1071_vm11, %v1968_v37, %v2009_v46  ;;  %v1786_v37 = vsel %vm829_vm6, %v1729_v4, %v1725_v57 }
 0x531   :  { %v1916_v14 = vpop.permute.xlu0 %1915 }
 0x532   :  { %v1972_v42 = vrot.slane %v1916_v14, %v4707_v56  ;;  %v1741_v14 = vrot.slane %v1688_v16, %v4707_v56 }
 0x534   :  { %v2011_v41 = vsel %vm1073_vm12, %v1972_v42, %v2010_v30  ;;  %v1745_v42 = vrot.slane %v1691_v35, %v4707_v56  ;;  %v1976_v35 = vrot.slane %v1919_v48, %v4707_v56  ;;  %v1360_v48 = vcvt.f32.s32 %v5101_v60 }
 0x535   :  { %v2021_v18 = vsel %vm780_vm3, %v2011_v41, -inf  ;;  %v1787_v41 = vsel %vm1063_vm7, %v1733_v0, %v1786_v37  ;;  %v5164_v57 = vpop.permute.xlu0 %2315 }
 0x536   :  { %2022 = vmax.xlane.f32.xlu1 %v2021_v18  ;;  %v1788_v30 = vsel %vm1065_vm8, %v1737_v15, %v1787_v41 }
 0x537   :  { %v1789_v63 = vsel %vm1067_vm9, %v1741_v14, %v1788_v30 }
 0x538   :  { %v1790_v4 = vsel %vm1069_vm10, %v1745_v42, %v1789_v63 }
 0x539   :  { %v1791_v16 = vsel %vm1071_vm11, %v1749_v59, %v1790_v4  ;;  %v1718_v30 = vpop.permute.xlu0 %1717  ;;  %v1765_v59 = vrot.slane %v5129_v51, %v4707_v56 }
 0x53a   :  { %v1792_v42 = vsel %vm1073_vm12, %v1753_v52, %v1791_v16 }
 0x53b   :  { %v1343_v8 = vpop.xlane.xlu1 %1342  ;;  %v5189_v60 = vsel %vm780_vm3, %v1792_v42, 2147483647 }
 0x53f   :  { %v1703_v13 = vpop.permute.xlu1 %1702 }
 0x540   :  { %v1761_v37 = vrot.slane %v1703_v13, %v4707_v56 }
 0x543   :  { %v1709_v50 = vpop.permute.xlu1 %1708 }
 0x544   :  { %v1769_v63 = vrot.slane %v1709_v50, %v4707_v56 }
 0x547   :  { %v5149_v44 = vpop.permute.xlu1 %1714 }
 0x548   :  { %v1777_v51 = vrot.slane %v5149_v44, %v4707_v56 }
 0x54b   :  { %v1922_v43 = vpop.permute.xlu1 %1921 }
 0x54c   :  { %v1980_v38 = vrot.slane %v1922_v43, %v4707_v56 }
 0x54e   :  { %v2012_v14 = vsel %vm829_vm6, %v1980_v38, %v1976_v35 }
 0x54f   :  { %v1925_v58 = vpop.permute.xlu1 %1924 }
 0x550   :  { %v1984_v0 = vrot.slane %v1925_v58, %v4707_v56  ;;  %v1345_v58 = vcvt.f32.s32 %v5045_v25 }
 0x552   :  { %v2013_v13 = vsel %vm1063_vm7, %v1984_v0, %v2012_v14  ;;  %v1346_v16 = vshll.u32 %v1345_v58, 16  ;;  %v1361_v0 = vshll.u32 %v1360_v48, 16 }
 0x553   :  { %v1928_v53 = vpop.permute.xlu1 %1927 }
 0x554   :  { %v1988_v15 = vrot.slane %v1928_v53, %v4707_v56 }
 0x556   :  { %v2014_v10 = vsel %vm1065_vm8, %v1988_v15, %v2013_v13 }
 0x557   :  { %v1931_v46 = vpop.permute.xlu1 %1930 }
 0x558   :  { %v1992_v1 = vrot.slane %v1931_v46, %v4707_v56  ;;  %v1793_v46 = vsel %vm829_vm6, %v1761_v37, %v1757_v36 }
 0x559   :  { %v1794_v50 = vsel %vm1063_vm7, %v1765_v59, %v1793_v46 }
 0x55a   :  { %v2015_v52 = vsel %vm1067_vm9, %v1992_v1, %v2014_v10  ;;  %v1795_v37 = vsel %vm1065_vm8, %v1769_v63, %v1794_v50  ;;  %v1802_v1 = vshra.s32 %v5189_v60, 16 }
 0x55b   :  { %v1934_v18 = vpop.permute.xlu1 %1933 }
 0x55c   :  { %v1996_v43 = vrot.slane %v1934_v18, %v4707_v56  ;;  %v1344_v18 = vcvt.f32.s32 %v1343_v8  ;;  %v1804_v44 = vcvt.s32.f32 %v1802_v1 }
 0x55e   :  { %v2016_v4 = vsel %vm1069_vm10, %v1996_v43, %v2015_v52  ;;  %v1347_v36 = vadd.s32 %v1346_v16, %v1344_v18  ;;  %v5220_v16 = vld [vmem:[#allocation8] ss:$0 sm:$0xff] }
 0x55f   :  { %v1937_v41 = vpop.permute.xlu1 %1936 }
 0x560   :  { %v2000_v53 = vrot.slane %v1937_v41, %v4707_v56  ;;  %v1773_v41 = vrot.slane %v5131_v29, %v4707_v56  ;;  %v1366_v46 = vrot.slane %v1347_v36, %v4707_v56 }
 0x562   :  { %v2017_v35 = vsel %vm1071_vm11, %v2000_v53, %v2016_v4  ;;  %v1796_v58 = vsel %vm1067_vm9, %v1773_v41, %v1795_v37  ;;  %v1781_v53 = vrot.slane %v1718_v30, %v4707_v56 }
 0x563   :  { %v1940_v25 = vpop.permute.xlu1 %1939  ;;  %v1797_v13 = vsel %vm1069_vm10, %v1777_v51, %v1796_v58 }
 0x564   :  { %v2004_v38 = vrot.slane %v1940_v25, %v4707_v56  ;;  %v1798_v18 = vsel %vm1071_vm11, %v1781_v53, %v1797_v13  ;;  %v1801_v13 = vand.u32 65535, %v5189_v60 }
 0x566   :  { %v1358_v8 = vpop.xlane.xlu0 %1357  ;;  %v2018_v15 = vsel %vm1073_vm12, %v2004_v38, %v2017_v35  ;;  %v572_v38 = vpop.f32.mrb[4].mxu1 }
 0x567   :  { %v1359_v14 = vcvt.f32.s32 %v1358_v8  ;;  %v2323_v43 = vpop.permute.xlu1 %2322  ;;  %v2024_v42 = vsel %vm780_vm3, %v2018_v15, -inf  ;;  %v3990_v50 = vpop.f32.mrb[5].mxu1 }
 0x568   :  { %2025 = vmax.xlane.f32.xlu0 %v2024_v42 }
 0x569   :  { %v1362_v48 = vadd.s32 %v1361_v0, %v1359_v14  ;;  %v573_v0 = vadd.f32 %v5220_v16, %v572_v38 }
 0x56b   :  { %v1370_v63 = vrot.slane %v1362_v48, %v4707_v56  ;;  %v1721_v10 = vpop.permute.xlu1 %1720  ;;  %577 = vst.msk [vmem:[#allocation2 + $0xa] sm:$0x3] %vm191_vm2, %v573_v0 }
 0x56c   :  { %v1785_v29 = vrot.slane %v1721_v10, %v4707_v56  ;;  %1805 = vmin.xlane.f32.xlu0 %v1804_v44 }
 0x56d   :  { %v1371_v59 = vsel %vm829_vm6, %v1370_v63, %v1366_v46 }
 0x56e   :  { %1373 = vst.msk [vmem:[#allocation14 + $0x4] sm:$0x3] %vm191_vm2, %v1371_v59  ;;  %v1799_v52 = vsel %vm1073_vm12, %v1785_v29, %v1798_v18  ;;  %v1803_v29 = vcvt.s32.f32 %v1801_v13 }
 0x56f   :  { %v5214_v25 = vsel %vm780_vm3, %v1799_v52, 2147483647 }
 0x570   :  { %v1817_v30 = vshra.s32 %v5214_v25, 16 }
 0x572   :  { %v5217_v4 = vcvt.s32.f32 %v1817_v30  ;;  %v2775_v18 = vld [vmem:[#allocation2 + $0xa] sm:$0x3] }
 0x573   :  { %v2780_v30 = vrot.slane %v2775_v18, %v4476_v7 }
 0x574   :  { %1820 = vmin.xlane.f32.xlu0 %v5217_v4 }
 0x5c3   :  { %v5224_v35 = vpop.xlane.xlu1 %2022 }
 0x5c4   :  { %v2036_v37 = vrot.slane %v5224_v35, %v4529_v21  ;;  %v2032_v51 = vrot.slane %v5224_v35, %v4476_v7  ;;  %v2326_v8 = vadd.f32 %v5164_v57, %v5224_v35  ;;  %v2040_v46 = vrot.slane %v5224_v35, %v4534_v23 }
 0x5c5   :  { %v2048_v60 = vrot.slane %v5224_v35, %v4544_v27 }
 0x5c6   :  { %vm2110_vm0 = vcmp.eq.f32.partialorder %v5006_v54, %v2036_v37  ;;  %vm2109_vm13 = vcmp.eq.f32.partialorder %v5009_v55, %v2032_v51  ;;  %v5237_v41 = vadd.f32 %v2326_v8, %v4607_v5  ;;  %v5240_v36 = vadd.f32 %v2326_v8, %v4609_v6 }
 0x5c7   :  { %v2126_v15 = vsel %vm2110_vm0, %v4745_v49, 8  ;;  %v2125_v1 = vsel %vm2109_vm13, %v4745_v49, 8  ;;  %v5245_v54 = vadd.f32 %v2326_v8, %v4611_v9  ;;  %v5248_v55 = vadd.f32 %v2326_v8, %v4615_v12 }
 0x5c8   :  { %2145 = vperm.xlu1 %4143, %v2126_v15   ;;  %2142 = vperm.xlu0 %4142, %v2125_v1   ;;  %v5253_v57 = vadd.f32 %v2326_v8, %v4613_v11  ;;  %v5257_v14 = vadd.f32 %v2326_v8, %v4617_v17  ;;  %v5261_v42 = vadd.f32 %v2326_v8, %v4643_v34  ;;  %v1816_v15 = vand.u32 65535, %v5214_v25 }
 0x5c9   :  { %v5265_v58 = vadd.f32 %v2326_v8, %v4641_v33  ;;  %vm2111_vm15 = vcmp.eq.f32.partialorder %v5014_v2, %v2040_v46  ;;  %vm2113_vm4 = vcmp.eq.f32.partialorder %v5024_v40, %v2048_v60  ;;  %v2044_v51 = vrot.slane %v5224_v35, %v4537_v24 }
 0x5ca   :  { %v2129_v52 = vsel %vm2113_vm4, %v4745_v49, 8  ;;  %v1818_v13 = vcvt.s32.f32 %v1816_v15  ;;  %v2787_v60 = vrot.slane %v2775_v18, %v4529_v21  ;;  %v2052_v25 = vrot.slane %v5224_v35, %v4547_v28 }
 0x5cb   :  { %vm2112_vm0 = vcmp.eq.f32.partialorder %v5018_v45, %v2044_v51 }
 0x5cc   :  { %2361 = vperm.xlu1 %4143, %v5237_v41   ;;  %2367 = vperm.xlu0 %4142, %v5240_v36   ;;  %v2128_v46 = vsel %vm2112_vm0, %v4745_v49, 8 }
 0x5d0   :  { %2364 = vperm.xlu1 %4143, %v5245_v54   ;;  %2370 = vperm.xlu0 %4142, %v5248_v55  }
 0x5d4   :  { %2373 = vperm.xlu0 %4142, %v5253_v57  }
 0x5d8   :  { %2376 = vperm.xlu0 %4142, %v5257_v14  }
 0x5dc   :  { %2379 = vperm.xlu0 %4142, %v5261_v42  }
 0x5e0   :  { %2382 = vperm.xlu0 %4142, %v5265_v58  }
 0x5f5   :  { %v5268_v48 = vpop.xlane.xlu0 %2025 }
 0x5f6   :  { %v2327_v53 = vadd.f32 %v2323_v43, %v5268_v48  ;;  %v2127_v43 = vsel %vm2111_vm15, %v4745_v49, 8  ;;  %v2064_v45 = vrot.slane %v5268_v48, %v4476_v7 }
 0x5f8   :  { %v5275_v63 = vadd.f32 %v2327_v53, %v4607_v5  ;;  %v5293_v38 = vadd.f32 %v2327_v53, %v4611_v9  ;;  %v5297_v40 = vadd.f32 %v2327_v53, %v4609_v6  ;;  %v5301_v0 = vadd.f32 %v2327_v53, %v4615_v12 }
 0x5f9   :  { %v5277_v10 = vpop.xlane.xlu0 %1805  ;;  %v5309_v50 = vadd.f32 %v2327_v53, %v4617_v17  ;;  %v5313_v37 = vadd.f32 %v2327_v53, %v4643_v34  ;;  %v5322_v1 = vadd.f32 %v2327_v53, %v4641_v33  ;;  %vm2117_vm15 = vcmp.eq.f32.partialorder %v5050_v19, %v2064_v45 }
 0x5fa   :  { %2385 = vperm.xlu0 %4142, %v5275_v63   ;;  %vm1807_vm14 = vcmp.eq.f32.partialorder %v1804_v44, %v5277_v10  ;;  %v2056_v44 = vrot.slane %v5224_v35, %v4592_v62  ;;  %6120 = vst [vmem:[#allocation23_spill] sm:$0xff] %v5297_v40 }
 0x5fb   :  { %v1808_v59 = vsel %vm1807_vm14, %v1803_v29, inf  ;;  %6122 = vst [vmem:[#allocation27_spill] sm:$0xff] %v5313_v37  ;;  %vm2114_vm14 = vcmp.eq.f32.partialorder %v5030_v47, %v2052_v25 }
 0x5fc   :  { %1809 = vmin.xlane.f32.xlu1 %v1808_v59  ;;  %vm2115_vm5 = vcmp.eq.f32.partialorder %v5060_v22, %v2056_v44  ;;  %v5305_v22 = vadd.f32 %v2327_v53, %v4613_v11  ;;  %v2130_v53 = vsel %vm2114_vm14, %v4745_v49, 8  ;;  %v2133_v59 = vsel %vm2117_vm15, %v4745_v49, 8 }
 0x5fd   :  { %v2131_v2 = vsel %vm2115_vm5, %v4745_v49, 8 }
 0x5fe   :  { %2148 = vperm.xlu0 %4142, %v2127_v43   ;;  %6121 = vst [vmem:[#allocation26_spill] sm:$0xff] %v5305_v22  ;;  %v2080_v43 = vrot.slane %v5268_v48, %v4544_v27 }
 0x600   :  { %vm2121_vm5 = vcmp.eq.f32.partialorder %v5105_v3, %v2080_v43 }
 0x601   :  { %v5318_v8 = vpop.xlane.xlu0 %1820  ;;  %v2137_v18 = vsel %vm2121_vm5, %v4745_v49, 8 }
 0x602   :  { %2154 = vperm.xlu0 %4142, %v2129_v52   ;;  %vm1822_vm13 = vcmp.eq.f32.partialorder %v5217_v4, %v5318_v8  ;;  %v2072_v4 = vrot.slane %v5268_v48, %v4534_v23 }
 0x603   :  { %v1823_v29 = vsel %vm1822_vm13, %v1818_v13, inf }
 0x604   :  { %vm2119_vm4 = vcmp.eq.f32.partialorder %v5094_v32, %v2072_v4 }
 0x605   :  { %v2135_v47 = vsel %vm2119_vm4, %v4745_v49, 8 }
 0x606   :  { %2782 = vbcast.lane.b32.xlu0 %v2780_v30, 256  ;;  %v579_v30 = vld [vmem:[#allocation3 + $0xc] sm:$0x3] }
 0x607   :  { %4008 = vmatmul.mubr.msk.f32.vlgmr.msra.gmra.mrb[6].mxu0 %vm117_vm1, %v579_v30 }
 0x60a   :  { %2160 = vperm.xlu0 %4142, %v2131_v2  }
 0x60d   :  { %2388 = vperm.xlu1 %4143, %v5293_v38  }
 0x611   :  { %2391 = vperm.xlu1 %4143, %v5297_v40  }
 0x615   :  { %2394 = vperm.xlu1 %4143, %v5301_v0  }
 0x619   :  { %2397 = vperm.xlu1 %4143, %v5305_v22  }
 0x61d   :  { %2400 = vperm.xlu1 %4143, %v5309_v50  }
 0x621   :  { %2403 = vperm.xlu1 %4143, %v5313_v37  }
 0x625   :  { %2406 = vperm.xlu1 %4143, %v5322_v1  }
 0x629   :  { %2151 = vperm.xlu1 %4143, %v2128_v46   ;;  %1824 = vmin.xlane.f32.xlu0 %v1823_v29 }
 0x62d   :  { %2789 = vbcast.lane.b32.xlu1 %v2787_v60, 256 }
 0x631   :  { %2157 = vperm.xlu1 %4143, %v2130_v53  }
 0x63f   :  { %2166 = vperm.xlu0 %4142, %v2133_v59  }
 0x643   :  { %2172 = vperm.xlu0 %4142, %v2135_v47  }
 0x647   :  { %v5346_v52 = vpop.permute.xlu1 %2145  ;;  %2178 = vperm.xlu0 %4142, %v2137_v18   ;;  %v5348_v19 = vpop.permute.xlu0 %2142 }
 0x64b   :  { %v2362_v44 = vpop.permute.xlu1 %2361  ;;  %v2368_v32 = vpop.permute.xlu0 %2367 }
 0x64c   :  { %v2411_v46 = vrot.slane %v2362_v44, %v4707_v56  ;;  %v2419_v29 = vrot.slane %v2368_v32, %v4707_v56 }
 0x64f   :  { %v2365_v2 = vpop.permute.xlu1 %2364  ;;  %v2371_v51 = vpop.permute.xlu0 %2370 }
 0x650   :  { %v2415_v15 = vrot.slane %v2365_v2, %v4707_v56  ;;  %v2423_v53 = vrot.slane %v2371_v51, %v4707_v56 }
 0x652   :  { %v2472_v3 = vsel %vm829_vm6, %v2415_v15, %v2411_v46  ;;  %v2068_v46 = vrot.slane %v5268_v48, %v4529_v21 }
 0x653   :  { %v2374_v13 = vpop.permute.xlu0 %2373  ;;  %v2473_v25 = vsel %vm1063_vm7, %v2419_v29, %v2472_v3  ;;  %v2076_v29 = vrot.slane %v5268_v48, %v4537_v24 }
 0x654   :  { %v2427_v45 = vrot.slane %v2374_v13, %v4707_v56  ;;  %v2474_v59 = vsel %vm1065_vm8, %v2423_v53, %v2473_v25  ;;  %v2060_v13 = vrot.slane %v5224_v35, %v4567_v39  ;;  %vm2118_vm13 = vcmp.eq.f32.partialorder %v5090_v20, %v2068_v46  ;;  %v6123_v53 = vld [vmem:[#allocation25_spill] sm:$0xff] }
 0x655   :  { %vm2120_vm14 = vcmp.eq.f32.partialorder %v5098_v26, %v2076_v29  ;;  %v2084_v35 = vrot.slane %v5268_v48, %v4547_v28  ;;  %v2092_v25 = vrot.slane %v5268_v48, %v4567_v39 }
 0x656   :  { %v2475_v18 = vsel %vm1067_vm9, %v2427_v45, %v2474_v59  ;;  %vm2116_vm0 = vcmp.eq.f32.partialorder %v5066_v31, %v2060_v13  ;;  %v2136_v31 = vsel %vm2120_vm14, %v4745_v49, 8 }
 0x657   :  { %v2377_v60 = vpop.permute.xlu0 %2376  ;;  %v2132_v3 = vsel %vm2116_vm0, %v4745_v49, 8  ;;  %vm2122_vm15 = vcmp.eq.f32.partialorder %v5111_v61, %v2084_v35  ;;  %vm2124_vm4 = vcmp.eq.f32.partialorder %v6123_v53, %v2092_v25 }
 0x658   :  { %v2431_v43 = vrot.slane %v2377_v60, %v4707_v56  ;;  %v2134_v60 = vsel %vm2118_vm13, %v4745_v49, 8  ;;  %v2138_v20 = vsel %vm2122_vm15, %v4745_v49, 8  ;;  %v2140_v45 = vsel %vm2124_vm4, %v4745_v49, 8 }
 0x65a   :  { %v2476_v44 = vsel %vm1069_vm10, %v2431_v43, %v2475_v18 }
 0x65b   :  { %v2380_v4 = vpop.permute.xlu0 %2379 }
 0x65c   :  { %v2435_v47 = vrot.slane %v2380_v4, %v4707_v56 }
 0x65e   :  { %v2477_v2 = vsel %vm1071_vm11, %v2435_v47, %v2476_v44 }
 0x65f   :  { %v2383_v30 = vpop.permute.xlu0 %2382 }
 0x660   :  { %v2439_v32 = vrot.slane %v2383_v30, %v4707_v56 }
 0x662   :  { %v2478_v51 = vsel %vm1073_vm12, %v2439_v32, %v2477_v2 }
 0x663   :  { %v2488_v15 = vsel %vm780_vm3, %v2478_v51, -inf }
 0x664   :  { %2489 = vmax.xlane.f32.xlu1 %v2488_v15 }
 0x675   :  { %2163 = vperm.xlu1 %4143, %v2132_v3  }
 0x679   :  { %2169 = vperm.xlu1 %4143, %v2134_v60   ;;  %v2386_v18 = vpop.permute.xlu0 %2385 }
 0x67a   :  { %v2443_v32 = vrot.slane %v2386_v18, %v4707_v56  ;;  %v1812_v18 = vcvt.f32.s32 %v5277_v10 }
 0x67d   :  { %2175 = vperm.xlu1 %4143, %v2136_v31   ;;  %v5390_v2 = vpop.permute.xlu0 %2148 }
 0x681   :  { %2181 = vperm.xlu1 %4143, %v2138_v20   ;;  %v5400_v20 = vpop.permute.xlu0 %2154 }
 0x685   :  { %2187 = vperm.xlu1 %4143, %v2140_v45  }
 0x689   :  { %v1810_v26 = vpop.xlane.xlu1 %1809 }
 0x68d   :  { %v2389_v4 = vpop.permute.xlu1 %2388 }
 0x68e   :  { %v2447_v61 = vrot.slane %v2389_v4, %v4707_v56 }
 0x690   :  { %v2479_v46 = vsel %vm829_vm6, %v2447_v61, %v2443_v32  ;;  %v1827_v61 = vcvt.f32.s32 %v5318_v8  ;;  %v1813_v32 = vshll.u32 %v1812_v18, 16 }
 0x691   :  { %v2392_v59 = vpop.permute.xlu1 %2391 }
 0x692   :  { %v2451_v44 = vrot.slane %v2392_v59, %v4707_v56 }
 0x694   :  { %v2480_v29 = vsel %vm1063_vm7, %v2451_v44, %v2479_v46  ;;  %v1811_v44 = vcvt.f32.s32 %v1810_v26 }
 0x695   :  { %v2395_v43 = vpop.permute.xlu1 %2394 }
 0x696   :  { %v2455_v51 = vrot.slane %v2395_v43, %v4707_v56 }
 0x698   :  { %v2481_v35 = vsel %vm1065_vm8, %v2455_v51, %v2480_v29 }
 0x699   :  { %v2398_v47 = vpop.permute.xlu1 %2397 }
 0x69a   :  { %v2459_v15 = vrot.slane %v2398_v47, %v4707_v56  ;;  %v2783_v47 = vpop.permute.xlu0 %2782 }
 0x69c   :  { %v2482_v31 = vsel %vm1067_vm9, %v2459_v15, %v2481_v35  ;;  %v1828_v15 = vshll.u32 %v1827_v61, 16 }
 0x69d   :  { %v2401_v30 = vpop.permute.xlu1 %2400 }
 0x69e   :  { %v2463_v3 = vrot.slane %v2401_v30, %v4707_v56  ;;  %v5408_v30 = vpop.permute.xlu0 %2160 }
 0x6a0   :  { %v2483_v53 = vsel %vm1069_vm10, %v2463_v3, %v2482_v31  ;;  %v2088_v3 = vrot.slane %v5268_v48, %v4592_v62  ;;  %v6124_v31 = vld [vmem:[#allocation24_spill] sm:$0xff] }
 0x6a1   :  { %v2404_v13 = vpop.permute.xlu1 %2403 }
 0x6a2   :  { %v2467_v60 = vrot.slane %v2404_v13, %v4707_v56  ;;  %v1814_v13 = vadd.s32 %v1813_v32, %v1811_v44  ;;  %vm2123_vm5 = vcmp.eq.f32.partialorder %v6124_v31, %v2088_v3 }
 0x6a3   :  { %v2139_v8 = vsel %vm2123_vm5, %v4745_v49, 8 }
 0x6a4   :  { %v2484_v4 = vsel %vm1071_vm11, %v2467_v60, %v2483_v53  ;;  %v1833_v60 = vrot.slane %v1814_v13, %v4707_v56 }
 0x6a5   :  { %v2407_v25 = vpop.permute.xlu1 %2406 }
 0x6a6   :  { %v2471_v45 = vrot.slane %v2407_v25, %v4707_v56 }
 0x6a8   :  { %v2485_v59 = vsel %vm1073_vm12, %v2471_v45, %v2484_v4 }
 0x6a9   :  { %v2491_v43 = vsel %vm780_vm3, %v2485_v59, -inf  ;;  %v2152_v26 = vpop.permute.xlu1 %2151 }
 0x6aa   :  { %2492 = vmax.xlane.f32.xlu0 %v2491_v43 }
 0x6ad   :  { %v2790_v25 = vpop.permute.xlu1 %2789 }
 0x6b1   :  { %v2158_v53 = vpop.permute.xlu1 %2157 }
 0x6b6   :  { %v1825_v51 = vpop.xlane.xlu0 %1824 }
 0x6b7   :  { %v1826_v46 = vcvt.f32.s32 %v1825_v51 }
 0x6b9   :  { %v1829_v29 = vadd.s32 %v1828_v15, %v1826_v46 }
 0x6bb   :  { %v1837_v35 = vrot.slane %v1829_v29, %v4707_v56 }
 0x6bd   :  { %v1838_v10 = vsel %vm829_vm6, %v1837_v35, %v1833_v60 }
 0x6be   :  { %1840 = vst.msk [vmem:[#allocation14 + $0x6] sm:$0x3] %vm191_vm2, %v1838_v10  ;;  %v2167_v46 = vpop.permute.xlu0 %2166 }
 0x6c0   :  { %2184 = vperm.xlu0 %4142, %v2139_v8  }
 0x6c2   :  { %v2173_v3 = vpop.permute.xlu0 %2172 }
 0x6c6   :  { %v2179_v29 = vpop.permute.xlu0 %2178 }
 0x6da   :  { %v649_v51 = vpop.f32.mrb[6].mxu0 }
 0x6db   :  { %v650_v15 = vadd.f32 %v5220_v16, %v649_v51  ;;  %v4009_v13 = vpop.f32.mrb[7].mxu0  ;;  %v2196_v51 = vrot.slane %v5346_v52, %v4707_v56  ;;  %v2224_v52 = vrot.slane %v2167_v46, %v4707_v56 }
 0x6dd   :  { %654 = vst.msk [vmem:[#allocation2 + $0xc] sm:$0x3] %vm191_vm2, %v650_v15  ;;  %v2200_v15 = vrot.slane %v5390_v2, %v4707_v56 }
 0x6f1   :  { %v5419_v45 = vpop.xlane.xlu1 %2489 }
 0x6f2   :  { %v2793_v48 = vadd.f32 %v2783_v47, %v5419_v45 }
 0x6f4   :  { %v5423_v4 = vadd.f32 %v2793_v48, %v4611_v9  ;;  %v5426_v59 = vadd.f32 %v2793_v48, %v4607_v5  ;;  %v5431_v43 = vadd.f32 %v2793_v48, %v4609_v6  ;;  %v5435_v18 = vadd.f32 %v2793_v48, %v4615_v12 }
 0x6f5   :  { %v5439_v47 = vadd.f32 %v2793_v48, %v4613_v11  ;;  %v5443_v61 = vadd.f32 %v2793_v48, %v4617_v17  ;;  %v5447_v44 = vadd.f32 %v2793_v48, %v4643_v34  ;;  %v5451_v32 = vadd.f32 %v2793_v48, %v4641_v33  ;;  %v2164_v60 = vpop.permute.xlu1 %2163 }
 0x6f6   :  { %2831 = vperm.xlu1 %4143, %v5423_v4   ;;  %2828 = vperm.xlu0 %4142, %v5426_v59   ;;  %6125 = vst [vmem:[#allocation25_spill] sm:$0xff] %v5431_v43 }
 0x6f7   :  { %6126 = vst [vmem:[#allocation24_spill] sm:$0xff] %v5443_v61  ;;  %6127 = vst [vmem:[#allocation28_spill] sm:$0xff] %v5447_v44 }
 0x6f8   :  { %6128 = vst [vmem:[#allocation29_spill] sm:$0xff] %v5451_v32 }
 0x6f9   :  { %v2170_v48 = vpop.permute.xlu1 %2169 }
 0x6fa   :  { %2834 = vperm.xlu0 %4142, %v5431_v43   ;;  %v2228_v37 = vrot.slane %v2170_v48, %v4707_v56  ;;  %v2208_v48 = vrot.slane %v5400_v20, %v4707_v56 }
 0x6fc   :  { %v2260_v40 = vsel %vm829_vm6, %v2228_v37, %v2224_v52 }
 0x6fd   :  { %v2176_v13 = vpop.permute.xlu1 %2175 }
 0x6fe   :  { %2837 = vperm.xlu0 %4142, %v5435_v18  }
 0x702   :  { %2840 = vperm.xlu0 %4142, %v5439_v47  }
 0x706   :  { %2843 = vperm.xlu0 %4142, %v5443_v61   ;;  %v2212_v61 = vrot.slane %v2158_v53, %v4707_v56  ;;  %v2220_v53 = vrot.slane %v2164_v60, %v4707_v56 }
 0x70a   :  { %2846 = vperm.xlu0 %4142, %v5447_v44  }
 0x70e   :  { %2849 = vperm.xlu0 %4142, %v5451_v32   ;;  %v2204_v32 = vrot.slane %v2152_v26, %v4707_v56  ;;  %v2236_v26 = vrot.slane %v2176_v13, %v4707_v56  ;;  %v2240_v13 = vrot.slane %v2179_v29, %v4707_v56 }
 0x737   :  { %v5456_v35 = vpop.xlane.xlu0 %2492 }
 0x738   :  { %v2794_v31 = vadd.f32 %v2790_v25, %v5456_v35  ;;  %v2192_v25 = vrot.slane %v5348_v19, %v4707_v56 }
 0x73a   :  { %v5460_v10 = vadd.f32 %v2794_v31, %v4611_v9  ;;  %v5463_v8 = vadd.f32 %v2794_v31, %v4607_v5  ;;  %v5468_v16 = vadd.f32 %v2794_v31, %v4609_v6  ;;  %v5478_v43 = vadd.f32 %v2794_v31, %v4615_v12 }
 0x73b   :  { %v2253_v44 = vsel %vm829_vm6, %v2196_v51, %v2192_v25  ;;  %v5487_v19 = vadd.f32 %v2794_v31, %v4613_v11  ;;  %v2232_v51 = vrot.slane %v2173_v3, %v4707_v56  ;;  %v2182_v25 = vpop.permute.xlu1 %2181  ;;  %v2216_v3 = vrot.slane %v5408_v30, %v4707_v56 }
 0x73c   :  { %2855 = vperm.xlu1 %4143, %v5460_v10   ;;  %2852 = vperm.xlu0 %4142, %v5463_v8   ;;  %v2254_v22 = vsel %vm1063_vm7, %v2200_v15, %v2253_v44  ;;  %v2244_v20 = vrot.slane %v2182_v25, %v4707_v56  ;;  %v5514_v60 = vadd.f32 %v2794_v31, %v4643_v34 }
 0x73d   :  { %v2255_v2 = vsel %vm1065_vm8, %v2204_v32, %v2254_v22  ;;  %v2261_v15 = vsel %vm1063_vm7, %v2232_v51, %v2260_v40  ;;  %v5500_v22 = vadd.f32 %v2794_v31, %v4617_v17  ;;  %v5522_v51 = vadd.f32 %v2794_v31, %v4641_v33 }
 0x73e   :  { %v2256_v46 = vsel %vm1067_vm9, %v2208_v48, %v2255_v2  ;;  %v2262_v32 = vsel %vm1065_vm8, %v2236_v26, %v2261_v15  ;;  %6130 = vst [vmem:[#allocation31_spill] sm:$0xff] %v5514_v60 }
 0x73f   :  { %v2185_v44 = vpop.permute.xlu0 %2184  ;;  %6129 = vst [vmem:[#allocation30_spill] sm:$0xff] %v5500_v22  ;;  %v2257_v37 = vsel %vm1069_vm10, %v2212_v61, %v2256_v46  ;;  %v2263_v2 = vsel %vm1067_vm9, %v2240_v13, %v2262_v32  ;;  %v2188_v61 = vpop.permute.xlu1 %2187  ;;  %6131 = vst [vmem:[#allocation32_spill] sm:$0xff] %v5522_v51 }
 0x740   :  { %2858 = vperm.xlu1 %4143, %v5468_v16   ;;  %v2248_v52 = vrot.slane %v2185_v44, %v4707_v56  ;;  %v2258_v40 = vsel %vm1071_vm11, %v2216_v3, %v2257_v37  ;;  %v2264_v48 = vsel %vm1069_vm10, %v2244_v20, %v2263_v2  ;;  %v2252_v29 = vrot.slane %v2188_v61, %v4707_v56 }
 0x741   :  { %v2259_v26 = vsel %vm1073_vm12, %v2220_v53, %v2258_v40 }
 0x742   :  { %v2265_v30 = vsel %vm1071_vm11, %v2248_v52, %v2264_v48  ;;  %v2267_v25 = vsel %vm780_vm3, %v2259_v26, 2147483647 }
 0x743   :  { %v2266_v44 = vsel %vm1073_vm12, %v2252_v29, %v2265_v30  ;;  %v2269_v46 = vshra.s32 %v2267_v25, 16 }
 0x744   :  { %2861 = vperm.xlu1 %4143, %v5478_v43   ;;  %v2282_v15 = vsel %vm780_vm3, %v2266_v44, 2147483647 }
 0x745   :  { %v2271_v37 = vcvt.s32.f32 %v2269_v46  ;;  %v2284_v53 = vshra.s32 %v2282_v15, 16 }
 0x747   :  { %v2286_v32 = vcvt.s32.f32 %v2284_v53 }
 0x748   :  { %2864 = vperm.xlu1 %4143, %v5487_v19  }
 0x74c   :  { %2867 = vperm.xlu1 %4143, %v5500_v22  }
 0x750   :  { %2870 = vperm.xlu1 %4143, %v5514_v60  }
 0x754   :  { %2873 = vperm.xlu1 %4143, %v5522_v51  }
 0x75b   :  { %2272 = vmin.xlane.f32.xlu0 %v2271_v37 }
 0x75f   :  { %2287 = vmin.xlane.f32.xlu0 %v2286_v32 }
 0x775   :  { %v2829_v20 = vpop.permute.xlu0 %2828  ;;  %v2832_v31 = vpop.permute.xlu1 %2831 }
 0x776   :  { %v2882_v2 = vrot.slane %v2832_v31, %v4707_v56  ;;  %v2878_v61 = vrot.slane %v2829_v20, %v4707_v56 }
 0x778   :  { %v2939_v44 = vsel %vm829_vm6, %v2882_v2, %v2878_v61 }
 0x779   :  { %v2835_v3 = vpop.permute.xlu0 %2834 }
 0x77a   :  { %v2886_v26 = vrot.slane %v2835_v3, %v4707_v56 }
 0x77c   :  { %v2940_v53 = vsel %vm1063_vm7, %v2886_v26, %v2939_v44 }
 0x77d   :  { %v2838_v13 = vpop.permute.xlu0 %2837 }
 0x77e   :  { %v2890_v48 = vrot.slane %v2838_v13, %v4707_v56 }
 0x780   :  { %v2941_v60 = vsel %vm1065_vm8, %v2890_v48, %v2940_v53  ;;  %v2268_v48 = vand.u32 65535, %v2267_v25  ;;  %v2499_v25 = vrot.slane %v5419_v45, %v4476_v7 }
 0x781   :  { %v2841_v52 = vpop.permute.xlu0 %2840 }
 0x782   :  { %v2894_v30 = vrot.slane %v2841_v52, %v4707_v56  ;;  %vm2576_vm14 = vcmp.eq.f32.partialorder %v5237_v41, %v2499_v25 }
 0x784   :  { %v2942_v31 = vsel %vm1067_vm9, %v2894_v30, %v2941_v60  ;;  %v2270_v60 = vcvt.s32.f32 %v2268_v48  ;;  %v2283_v30 = vand.u32 65535, %v2282_v15  ;;  %v2592_v15 = vsel %vm2576_vm14, %v4745_v49, 8 }
 0x785   :  { %v2844_v40 = vpop.permute.xlu0 %2843 }
 0x786   :  { %v2898_v46 = vrot.slane %v2844_v40, %v4707_v56  ;;  %v3242_v40 = vld [vmem:[#allocation2 + $0xc] sm:$0x3] }
 0x787   :  { %v3247_v61 = vrot.slane %v3242_v40, %v4476_v7 }
 0x788   :  { %v2943_v3 = vsel %vm1069_vm10, %v2898_v46, %v2942_v31  ;;  %v2285_v46 = vcvt.s32.f32 %v2283_v30 }
 0x789   :  { %v2847_v29 = vpop.permute.xlu0 %2846 }
 0x78a   :  { %v2902_v51 = vrot.slane %v2847_v29, %v4707_v56 }
 0x78c   :  { %v2944_v52 = vsel %vm1071_vm11, %v2902_v51, %v2943_v3 }
 0x78d   :  { %v2850_v20 = vpop.permute.xlu0 %2849 }
 0x78e   :  { %v2906_v13 = vrot.slane %v2850_v20, %v4707_v56  ;;  %v3254_v20 = vrot.slane %v3242_v40, %v4529_v21 }
 0x790   :  { %v2945_v22 = vsel %vm1073_vm12, %v2906_v13, %v2944_v52 }
 0x791   :  { %v2955_v2 = vsel %vm780_vm3, %v2945_v22, -inf }
 0x792   :  { %2956 = vmax.xlane.f32.xlu1 %v2955_v2 }
 0x7a3   :  { %3249 = vbcast.lane.b32.xlu1 %v3247_v61, 256 }
 0x7bb   :  { %v2853_v26 = vpop.permute.xlu0 %2852  ;;  %v2856_v53 = vpop.permute.xlu1 %2855 }
 0x7bc   :  { %v2910_v2 = vrot.slane %v2853_v26, %v4707_v56 }
 0x7bf   :  { %v2859_v31 = vpop.permute.xlu1 %2858 }
 0x7c0   :  { %v2918_v61 = vrot.slane %v2859_v31, %v4707_v56 }
 0x7c3   :  { %v2862_v3 = vpop.permute.xlu1 %2861 }
 0x7c4   :  { %v2922_v40 = vrot.slane %v2862_v3, %v4707_v56 }
 0x7e8   :  { %v5545_v29 = vpop.xlane.xlu0 %2272 }
 0x7e9   :  { %vm2274_vm0 = vcmp.eq.f32.partialorder %v2271_v37, %v5545_v29  ;;  %v2865_v37 = vpop.permute.xlu1 %2864 }
 0x7ea   :  { %v2275_v44 = vsel %vm2274_vm0, %v2270_v60, inf  ;;  %v2926_v48 = vrot.slane %v2865_v37, %v4707_v56  ;;  %v2507_v37 = vrot.slane %v5419_v45, %v4534_v23 }
 0x7eb   :  { %2276 = vmin.xlane.f32.xlu0 %v2275_v44 }
 0x7ec   :  { %v5548_v51 = vpop.xlane.xlu0 %2287  ;;  %vm2578_vm4 = vcmp.eq.f32.partialorder %v5240_v36, %v2507_v37 }
 0x7ed   :  { %vm2289_vm13 = vcmp.eq.f32.partialorder %v2286_v32, %v5548_v51  ;;  %v2868_v13 = vpop.permute.xlu1 %2867  ;;  %v2914_v32 = vrot.slane %v2856_v53, %v4707_v56 }
 0x7ee   :  { %v2290_v22 = vsel %vm2289_vm13, %v2285_v46, inf  ;;  %v2930_v41 = vrot.slane %v2868_v13, %v4707_v56 }
 0x7ef   :  { %2291 = vmin.xlane.f32.xlu1 %v2290_v22  ;;  %v2946_v30 = vsel %vm829_vm6, %v2914_v32, %v2910_v2  ;;  %v2511_v32 = vrot.slane %v5419_v45, %v4537_v24 }
 0x7f0   :  { %v2947_v44 = vsel %vm1063_vm7, %v2918_v61, %v2946_v30  ;;  %v2594_v61 = vsel %vm2578_vm4, %v4745_v49, 8 }
 0x7f1   :  { %v2871_v52 = vpop.permute.xlu1 %2870  ;;  %v2948_v22 = vsel %vm1065_vm8, %v2922_v40, %v2947_v44  ;;  %vm2579_vm5 = vcmp.eq.f32.partialorder %v5248_v55, %v2511_v32 }
 0x7f2   :  { %v2934_v46 = vrot.slane %v2871_v52, %v4707_v56  ;;  %v2949_v26 = vsel %vm1067_vm9, %v2926_v48, %v2948_v22  ;;  %v2595_v40 = vsel %vm2579_vm5, %v4745_v49, 8 }
 0x7f3   :  { %v2950_v31 = vsel %vm1069_vm10, %v2930_v41, %v2949_v26 }
 0x7f5   :  { %v2874_v60 = vpop.permute.xlu1 %2873 }
 0x7f6   :  { %v2938_v53 = vrot.slane %v2874_v60, %v4707_v56 }
 0x801   :  { %3256 = vbcast.lane.b32.xlu0 %v3254_v20, 256  ;;  %v2951_v20 = vsel %vm1071_vm11, %v2934_v46, %v2950_v31  ;;  %v2279_v46 = vcvt.f32.s32 %v5545_v29 }
 0x802   :  { %v2952_v25 = vsel %vm1073_vm12, %v2938_v53, %v2951_v20  ;;  %v2294_v53 = vcvt.f32.s32 %v5548_v51 }
 0x803   :  { %v2958_v3 = vsel %vm780_vm3, %v2952_v25, -inf  ;;  %v2280_v31 = vshll.u32 %v2279_v46, 16  ;;  %v2519_v46 = vrot.slane %v5419_v45, %v4547_v28 }
 0x804   :  { %v2295_v25 = vshll.u32 %v2294_v53, 16 }
 0x805   :  { %2609 = vperm.xlu0 %4142, %v2592_v15   ;;  %v2503_v15 = vrot.slane %v5419_v45, %v4529_v21  ;;  %vm2581_vm0 = vcmp.eq.f32.partialorder %v5257_v14, %v2519_v46  ;;  %v656_v46 = vld [vmem:[#allocation3 + $0xe] sm:$0x3] }
 0x806   :  { %4027 = vmatmul.mubr.msk.f32.vlgmr.msra.gmra.mrb[6].mxu1 %vm117_vm1, %v656_v46 }
 0x807   :  { %vm2577_vm15 = vcmp.eq.f32.partialorder %v5245_v54, %v2503_v15 }
 0x808   :  { %v2593_v52 = vsel %vm2577_vm15, %v4745_v49, 8 }
 0x81f   :  { %v5577_v13 = vpop.xlane.xlu1 %2956 }
 0x823   :  { %v3250_v2 = vpop.permute.xlu1 %3249 }
 0x824   :  { %2959 = vmax.xlane.f32.xlu0 %v2958_v3  ;;  %v3260_v54 = vadd.f32 %v3250_v2, %v5577_v13 }
 0x826   :  { %v5588_v48 = vadd.f32 %v3260_v54, %v4607_v5  ;;  %v5592_v36 = vadd.f32 %v3260_v54, %v4611_v9  ;;  %v5596_v60 = vadd.f32 %v3260_v54, %v4609_v6  ;;  %v5600_v55 = vadd.f32 %v3260_v54, %v4615_v12 }
 0x827   :  { %v5604_v30 = vadd.f32 %v3260_v54, %v4613_v11  ;;  %v5608_v41 = vadd.f32 %v3260_v54, %v4617_v17  ;;  %v5612_v44 = vadd.f32 %v3260_v54, %v4643_v34 }
 0x83a   :  { %2612 = vperm.xlu0 %4142, %v2593_v52  }
 0x83e   :  { %2615 = vperm.xlu0 %4142, %v2594_v61  }
 0x842   :  { %2618 = vperm.xlu0 %4142, %v2595_v40  }
 0x846   :  { %3295 = vperm.xlu0 %4142, %v5588_v48  }
 0x84a   :  { %3298 = vperm.xlu0 %4142, %v5592_v36  }
 0x84e   :  { %3301 = vperm.xlu0 %4142, %v5596_v60  }
 0x852   :  { %3304 = vperm.xlu0 %4142, %v5600_v55  }
 0x856   :  { %3307 = vperm.xlu0 %4142, %v5604_v30  }
 0x85a   :  { %3310 = vperm.xlu0 %4142, %v5608_v41  }
 0x85e   :  { %3313 = vperm.xlu0 %4142, %v5612_v44  }
 0x878   :  { %v2277_v22 = vpop.xlane.xlu0 %2276 }
 0x879   :  { %v2278_v26 = vcvt.f32.s32 %v2277_v22 }
 0x87b   :  { %v2281_v3 = vadd.s32 %v2280_v31, %v2278_v26  ;;  %v2531_v26 = vrot.slane %v5456_v35, %v4476_v7 }
 0x87c   :  { %v2292_v20 = vpop.xlane.xlu1 %2291  ;;  %v3257_v61 = vpop.permute.xlu0 %3256 }
 0x87d   :  { %v2293_v15 = vcvt.f32.s32 %v2292_v20  ;;  %v2300_v52 = vrot.slane %v2281_v3, %v4707_v56  ;;  %vm2584_vm13 = vcmp.eq.f32.partialorder %v5275_v63, %v2531_v26  ;;  %v5661_v63 = vadd.f32 %v3260_v54, %v4641_v33 }
 0x87e   :  { %v2527_v54 = vrot.slane %v5419_v45, %v4567_v39 }
 0x87f   :  { %v2296_v37 = vadd.s32 %v2295_v25, %v2293_v15  ;;  %v2597_v25 = vsel %vm2581_vm0, %v4745_v49, 8  ;;  %v2600_v15 = vsel %vm2584_vm13, %v4745_v49, 8 }
 0x880   :  { %vm2583_vm0 = vcmp.eq.f32.partialorder %v5265_v58, %v2527_v54 }
 0x881   :  { %v2304_v32 = vrot.slane %v2296_v37, %v4707_v56  ;;  %v2543_v37 = vrot.slane %v5456_v35, %v4537_v24 }
 0x883   :  { %v2305_v2 = vsel %vm829_vm6, %v2304_v32, %v2300_v52  ;;  %v2515_v52 = vrot.slane %v5419_v45, %v4544_v27  ;;  %vm2587_vm15 = vcmp.eq.f32.partialorder %v5301_v0, %v2543_v37 }
 0x884   :  { %2307 = vst.msk [vmem:[#allocation14 + $0x8] sm:$0x3] %vm191_vm2, %v2305_v2  ;;  %v2610_v29 = vpop.permute.xlu0 %2609 }
 0x885   :  { %vm2580_vm4 = vcmp.eq.f32.partialorder %v5253_v57, %v2515_v52 }
 0x886   :  { %v2596_v2 = vsel %vm2580_vm4, %v4745_v49, 8 }
 0x8b1   :  { %v5621_v40 = vpop.xlane.xlu0 %2959 }
 0x8b2   :  { %v3261_v51 = vadd.f32 %v3257_v61, %v5621_v40 }
 0x8b4   :  { %v5627_v22 = vadd.f32 %v3261_v51, %v4611_v9  ;;  %v5630_v53 = vadd.f32 %v3261_v51, %v4607_v5  ;;  %v5638_v31 = vadd.f32 %v3261_v51, %v4609_v6  ;;  %v2535_v9 = vrot.slane %v5456_v35, %v4529_v21 }
 0x8b5   :  { %v2659_v5 = vrot.slane %v2610_v29, %v4707_v56  ;;  %v5651_v6 = vadd.f32 %v3261_v51, %v4615_v12  ;;  %v2523_v12 = vrot.slane %v5419_v45, %v4592_v62  ;;  %v5675_v61 = vadd.f32 %v3261_v51, %v4613_v11 }
 0x8b6   :  { %3322 = vperm.xlu1 %4143, %v5627_v22   ;;  %3319 = vperm.xlu0 %4142, %v5630_v53   ;;  %6132 = vst [vmem:[#allocation33_spill] sm:$0xff] %v5638_v31  ;;  %vm2585_vm14 = vcmp.eq.f32.partialorder %v5293_v38, %v2535_v9  ;;  %v2603_v38 = vsel %vm2587_vm15, %v4745_v49, 8  ;;  %v5681_v57 = vadd.f32 %v3261_v51, %v4617_v17  ;;  %v2599_v29 = vsel %vm2583_vm0, %v4745_v49, 8 }
 0x8b7   :  { %v2601_v32 = vsel %vm2585_vm14, %v4745_v49, 8  ;;  %vm2582_vm5 = vcmp.eq.f32.partialorder %v5261_v42, %v2523_v12  ;;  %v5686_v42 = vadd.f32 %v3261_v51, %v4643_v34  ;;  %v2551_v11 = vrot.slane %v5456_v35, %v4547_v28 }
 0x8b8   :  { %v2598_v0 = vsel %vm2582_vm5, %v4745_v49, 8  ;;  %v5692_v45 = vadd.f32 %v3261_v51, %v4641_v33  ;;  %v2559_v17 = vrot.slane %v5456_v35, %v4567_v39 }
 0x8b9   :  { %v2613_v20 = vpop.permute.xlu0 %2612  ;;  %vm2589_vm13 = vcmp.eq.f32.partialorder %v5309_v50, %v2551_v11 }
 0x8ba   :  { %v2663_v3 = vrot.slane %v2613_v20, %v4707_v56  ;;  %2624 = vperm.xlu1 %4143, %v2597_v25   ;;  %3325 = vperm.xlu0 %4142, %v5638_v31   ;;  %v2605_v58 = vsel %vm2589_vm13, %v4745_v49, 8  ;;  %vm2591_vm14 = vcmp.eq.f32.partialorder %v5322_v1, %v2559_v17 }
 0x8bb   :  { %v2607_v34 = vsel %vm2591_vm14, %v4745_v49, 8 }
 0x8bc   :  { %v5648_v14 = vsel %vm829_vm6, %v2663_v3, %v2659_v5 }
 0x8bd   :  { %v2616_v33 = vpop.permute.xlu0 %2615 }
 0x8be   :  { %2633 = vperm.xlu1 %4143, %v2600_v15   ;;  %3328 = vperm.xlu0 %4142, %v5651_v6  }
 0x8c1   :  { %v2619_v51 = vpop.permute.xlu0 %2618 }
 0x8c2   :  { %2636 = vperm.xlu1 %4143, %v2601_v32   ;;  %3316 = vperm.xlu0 %4142, %v5661_v63  }
 0x8c5   :  { %v3296_v26 = vpop.permute.xlu0 %3295 }
 0x8c6   :  { %2642 = vperm.xlu1 %4143, %v2603_v38   ;;  %2621 = vperm.xlu0 %4142, %v2596_v2   ;;  %v3345_v38 = vrot.slane %v3296_v26, %v4707_v56 }
 0x8c9   :  { %v3299_v20 = vpop.permute.xlu0 %3298 }
 0x8ca   :  { %3331 = vperm.xlu1 %4143, %v5675_v61   ;;  %2627 = vperm.xlu0 %4142, %v2598_v0   ;;  %v3349_v1 = vrot.slane %v3299_v20, %v4707_v56 }
 0x8cc   :  { %v3406_v11 = vsel %vm829_vm6, %v3349_v1, %v3345_v38 }
 0x8cd   :  { %v3302_v25 = vpop.permute.xlu0 %3301 }
 0x8ce   :  { %3334 = vperm.xlu1 %4143, %v5681_v57   ;;  %2630 = vperm.xlu0 %4142, %v2599_v29   ;;  %v3353_v12 = vrot.slane %v3302_v25, %v4707_v56 }
 0x8d1   :  { %v3305_v50 = vpop.permute.xlu0 %3304 }
 0x8d2   :  { %3337 = vperm.xlu1 %4143, %v5686_v42   ;;  %v3357_v2 = vrot.slane %v3305_v50, %v4707_v56 }
 0x8d5   :  { %v3308_v9 = vpop.permute.xlu0 %3307 }
 0x8d6   :  { %3340 = vperm.xlu1 %4143, %v5692_v45   ;;  %v3361_v54 = vrot.slane %v3308_v9, %v4707_v56 }
 0x8d9   :  { %v3311_v5 = vpop.permute.xlu0 %3310 }
 0x8da   :  { %2648 = vperm.xlu1 %4143, %v2605_v58   ;;  %v3365_v17 = vrot.slane %v3311_v5, %v4707_v56  ;;  %v3407_v58 = vsel %vm1063_vm7, %v3353_v12, %v3406_v11  ;;  %v2667_v11 = vrot.slane %v2616_v33, %v4707_v56 }
 0x8db   :  { %v3408_v46 = vsel %vm1065_vm8, %v3357_v2, %v3407_v58 }
 0x8dc   :  { %v3409_v20 = vsel %vm1067_vm9, %v3361_v54, %v3408_v46 }
 0x8dd   :  { %v3314_v3 = vpop.permute.xlu0 %3313  ;;  %v3410_v50 = vsel %vm1069_vm10, %v3365_v17, %v3409_v20 }
 0x8de   :  { %2654 = vperm.xlu1 %4143, %v2607_v34   ;;  %v3369_v34 = vrot.slane %v3314_v3, %v4707_v56 }
 0x8e0   :  { %v3411_v5 = vsel %vm1071_vm11, %v3369_v34, %v3410_v50  ;;  %v2721_v34 = vsel %vm1063_vm7, %v2667_v11, %v5648_v14  ;;  %v2966_v14 = vrot.slane %v5577_v13, %v4476_v7 }
 0x8e2   :  { %vm3043_vm1 = vcmp.eq.f32.partialorder %v5426_v59, %v2966_v14 }
 0x935   :  { %v3320_v15 = vpop.permute.xlu0 %3319  ;;  %v3323_v37 = vpop.permute.xlu1 %3322 }
 0x936   :  { %v3381_v33 = vrot.slane %v3323_v37, %v4707_v56 }
 0x939   :  { %v3326_v52 = vpop.permute.xlu0 %3325  ;;  %v2625_v32 = vpop.permute.xlu1 %2624 }
 0x93d   :  { %v3329_v0 = vpop.permute.xlu0 %3328  ;;  %v2634_v29 = vpop.permute.xlu1 %2633 }
 0x93e   :  { %v2691_v9 = vrot.slane %v2634_v29, %v4707_v56  ;;  %v2671_v29 = vrot.slane %v2619_v51, %v4707_v56  ;;  %v2679_v51 = vrot.slane %v2625_v32, %v4707_v56 }
 0x940   :  { %v2722_v20 = vsel %vm1065_vm8, %v2671_v29, %v2721_v34 }
 0x941   :  { %v3317_v25 = vpop.permute.xlu0 %3316  ;;  %v2637_v26 = vpop.permute.xlu1 %2636 }
 0x942   :  { %v3373_v31 = vrot.slane %v3317_v25, %v4707_v56  ;;  %v2695_v1 = vrot.slane %v2637_v26, %v4707_v56 }
 0x944   :  { %v5719_v12 = vsel %vm829_vm6, %v2695_v1, %v2691_v9  ;;  %v3412_v3 = vsel %vm1073_vm12, %v3373_v31, %v3411_v5  ;;  %v3377_v9 = vrot.slane %v3320_v15, %v4707_v56  ;;  %v3385_v5 = vrot.slane %v3326_v52, %v4707_v56 }
 0x945   :  { %v2622_v38 = vpop.permute.xlu0 %2621  ;;  %v5722_v2 = vpop.permute.xlu1 %2642  ;;  %v3422_v54 = vsel %vm780_vm3, %v3412_v3, -inf  ;;  %v3389_v3 = vrot.slane %v3329_v0, %v4707_v56  ;;  %v2970_v0 = vrot.slane %v5577_v13, %v4529_v21 }
 0x946   :  { %3423 = vmax.xlane.f32.xlu1 %v3422_v54  ;;  %v2675_v17 = vrot.slane %v2622_v38, %v4707_v56  ;;  %v3413_v37 = vsel %vm829_vm6, %v3381_v33, %v3377_v9 }
 0x947   :  { %v3414_v52 = vsel %vm1063_vm7, %v3385_v5, %v3413_v37  ;;  %vm3044_vm15 = vcmp.eq.f32.partialorder %v5423_v4, %v2970_v0  ;;  %v3002_v5 = vrot.slane %v5621_v40, %v4529_v21  ;;  %v2990_v0 = vrot.slane %v5577_v13, %v4592_v62 }
 0x948   :  { %v2723_v31 = vsel %vm1067_vm9, %v2675_v17, %v2722_v20 }
 0x949   :  { %v2628_v58 = vpop.permute.xlu0 %2627  ;;  %v3332_v46 = vpop.permute.xlu1 %3331  ;;  %v2724_v38 = vsel %vm1069_vm10, %v2679_v51, %v2723_v31  ;;  %vm3052_vm5 = vcmp.eq.f32.partialorder %v5460_v10, %v3002_v5 }
 0x94a   :  { %v2683_v25 = vrot.slane %v2628_v58, %v4707_v56  ;;  %v3393_v11 = vrot.slane %v3332_v46, %v4707_v56  ;;  %v3415_v58 = vsel %vm1065_vm8, %v3389_v3, %v3414_v52  ;;  %v3006_v3 = vrot.slane %v5621_v40, %v4534_v23 }
 0x94c   :  { %v2725_v54 = vsel %vm1071_vm11, %v2683_v25, %v2724_v38  ;;  %v3416_v46 = vsel %vm1067_vm9, %v3393_v11, %v3415_v58  ;;  %v3068_v38 = vsel %vm3052_vm5, %v4745_v49, 8  ;;  %vm3053_vm0 = vcmp.eq.f32.partialorder %v5468_v16, %v3006_v3  ;;  %v6140_v3 = vld [vmem:[#allocation30_spill] sm:$0xff] }
 0x94d   :  { %v2631_v26 = vpop.permute.xlu0 %2630  ;;  %v3335_v50 = vpop.permute.xlu1 %3334  ;;  %v3010_v11 = vrot.slane %v5621_v40, %v4537_v24  ;;  %v2539_v16 = vrot.slane %v5456_v35, %v4534_v23  ;;  %v2555_v58 = vrot.slane %v5456_v35, %v4592_v62 }
 0x94e   :  { %v2687_v1 = vrot.slane %v2631_v26, %v4707_v56  ;;  %v3397_v29 = vrot.slane %v3335_v50, %v4707_v56  ;;  %v3059_v26 = vsel %vm3043_vm1, %v4745_v49, 8  ;;  %v2998_v50 = vrot.slane %v5621_v40, %v4476_v7 }
 0x94f   :  { %vm3054_vm14 = vcmp.eq.f32.partialorder %v5478_v43, %v3010_v11  ;;  %v3026_v11 = vrot.slane %v5621_v40, %v4567_v39 }
 0x950   :  { %v2726_v32 = vsel %vm1073_vm12, %v2687_v1, %v2725_v54  ;;  %v3417_v31 = vsel %vm1069_vm10, %v3397_v29, %v3416_v46  ;;  %v3060_v1 = vsel %vm3044_vm15, %v4745_v49, 8  ;;  %vm3051_vm4 = vcmp.eq.f32.partialorder %v5463_v8, %v2998_v50 }
 0x951   :  { %v3338_v15 = vpop.permute.xlu1 %3337  ;;  %v5755_v20 = vsel %vm780_vm3, %v2726_v32, 2147483647  ;;  %v3067_v4 = vsel %vm3051_vm4, %v4745_v49, 8  ;;  %v2978_v8 = vrot.slane %v5577_v13, %v4537_v24  ;;  %v3069_v54 = vsel %vm3053_vm0, %v4745_v49, 8  ;;  %v6133_v32 = vld [vmem:[#allocation23_spill] sm:$0xff] }
 0x952   :  { %v3401_v17 = vrot.slane %v3338_v15, %v4707_v56  ;;  %v2736_v33 = vshra.s32 %v5755_v20, 16  ;;  %v2982_v15 = vrot.slane %v5577_v13, %v4544_v27  ;;  %v3070_v37 = vsel %vm3054_vm14, %v4745_v49, 8 }
 0x953   :  { %vm3046_vm13 = vcmp.eq.f32.partialorder %v5435_v18, %v2978_v8  ;;  %v2986_v18 = vrot.slane %v5577_v13, %v4547_v28  ;;  %vm2586_vm15 = vcmp.eq.f32.partialorder %v6133_v32, %v2539_v16  ;;  %v2547_v29 = vrot.slane %v5456_v35, %v4544_v27  ;;  %v726_v16 = vpop.f32.mrb[6].mxu1 }
 0x954   :  { %v3418_v59 = vsel %vm1071_vm11, %v3401_v17, %v3417_v31  ;;  %v5771_v14 = vcvt.s32.f32 %v2736_v33  ;;  %v3062_v10 = vsel %vm3046_vm13, %v4745_v49, 8  ;;  %vm3047_vm1 = vcmp.eq.f32.partialorder %v5439_v47, %v2982_v15  ;;  %v6134_v17 = vld [vmem:[#allocation24_spill] sm:$0xff]  ;;  %v6135_v47 = vld [vmem:[#allocation26_spill] sm:$0xff]  ;;  %v6139_v33 = vld [vmem:[#allocation25_spill] sm:$0xff]  ;;  %v4028_v32 = vpop.f32.mrb[7].mxu1 }
 0x955   :  { %v3341_v34 = vpop.permute.xlu1 %3340  ;;  %v3063_v43 = vsel %vm3047_vm1, %v4745_v49, 8  ;;  %v2602_v52 = vsel %vm2586_vm15, %v4745_v49, 8  ;;  %vm3048_vm4 = vcmp.eq.f32.partialorder %v6134_v17, %v2986_v18  ;;  %vm2588_vm5 = vcmp.eq.f32.partialorder %v6135_v47, %v2547_v29  ;;  %v6136_v31 = vld [vmem:[#allocation28_spill] sm:$0xff] }
 0x956   :  { %v3405_v25 = vrot.slane %v3341_v34, %v4707_v56  ;;  %v3064_v46 = vsel %vm3048_vm4, %v4745_v49, 8  ;;  %v2604_v34 = vsel %vm2588_vm5, %v4745_v49, 8  ;;  %vm3049_vm0 = vcmp.eq.f32.partialorder %v6136_v31, %v2990_v0 }
 0x957   :  { %3076 = vperm.xlu1 %4143, %v3059_v26   ;;  %v6137_v26 = vld [vmem:[#allocation27_spill] sm:$0xff]  ;;  %v3065_v50 = vsel %vm3049_vm0, %v4745_v49, 8 }
 0x958   :  { %v3419_v9 = vsel %vm1073_vm12, %v3405_v25, %v3418_v59  ;;  %v2994_v25 = vrot.slane %v5577_v13, %v4567_v39  ;;  %vm2590_vm13 = vcmp.eq.f32.partialorder %v6137_v26, %v2555_v58  ;;  %v2974_v59 = vrot.slane %v5577_v13, %v4534_v23 }
 0x959   :  { %v3425_v51 = vsel %vm780_vm3, %v3419_v9, -inf  ;;  %v2606_v35 = vsel %vm2590_vm13, %v4745_v49, 8  ;;  %v6138_v9 = vld [vmem:[#allocation29_spill] sm:$0xff]  ;;  %v3018_v13 = vrot.slane %v5621_v40, %v4547_v28  ;;  %v5838_v29 = vpop.permute.xlu1 %2648 }
 0x95a   :  { %3426 = vmax.xlane.f32.xlu0 %v3425_v51  ;;  %vm3050_vm14 = vcmp.eq.f32.partialorder %v6138_v9, %v2994_v25  ;;  %vm3045_vm1 = vcmp.eq.f32.partialorder %v6139_v33, %v2974_v59  ;;  %v3014_v51 = vrot.slane %v5621_v40, %v4544_v27 }
 0x95b   :  { %3079 = vperm.xlu1 %4143, %v3060_v1   ;;  %v3066_v1 = vsel %vm3050_vm14, %v4745_v49, 8  ;;  %v3061_v5 = vsel %vm3045_vm1, %v4745_v49, 8  ;;  %vm3056_vm4 = vcmp.eq.f32.partialorder %v6140_v3, %v3018_v13 }
 0x95c   :  { %vm3055_vm15 = vcmp.eq.f32.partialorder %v5487_v19, %v3014_v51  ;;  %v3072_v8 = vsel %vm3056_vm4, %v4745_v49, 8  ;;  %v2735_v51 = vand.u32 65535, %v5755_v20 }
 0x95e   :  { %2739 = vmin.xlane.f32.xlu0 %v5771_v14 }
 0x95f   :  { %3100 = vperm.xlu1 %4143, %v3067_v4   ;;  %v3071_v4 = vsel %vm3055_vm15, %v4745_v49, 8 }
 0x963   :  { %3103 = vperm.xlu1 %4143, %v3068_v38   ;;  %v3022_v38 = vrot.slane %v5621_v40, %v4592_v62 }
 0x967   :  { %3106 = vperm.xlu1 %4143, %v3069_v54   ;;  %v6141_v54 = vld [vmem:[#allocation31_spill] sm:$0xff] }
 0x968   :  { %vm3057_vm5 = vcmp.eq.f32.partialorder %v6141_v54, %v3022_v38 }
 0x969   :  { %v3073_v19 = vsel %vm3057_vm5, %v4745_v49, 8 }
 0x96b   :  { %3085 = vperm.xlu1 %4143, %v3062_v10   ;;  %v6142_v10 = vld [vmem:[#allocation32_spill] sm:$0xff] }
 0x96c   :  { %vm3058_vm0 = vcmp.eq.f32.partialorder %v6142_v10, %v3026_v11 }
 0x96d   :  { %v3074_v15 = vsel %vm3058_vm0, %v4745_v49, 8 }
 0x96f   :  { %3109 = vperm.xlu1 %4143, %v3070_v37   ;;  %v4145_v37 = vld [vmem:[#allocation8] ss:$0 sm:$0xff] }
 0x970   :  { %v727_v18 = vadd.f32 %v4145_v37, %v726_v16 }
 0x972   :  { %731 = vst.msk [vmem:[#allocation2 + $0xe] sm:$0x3] %vm191_vm2, %v727_v18 }
 0x973   :  { %3088 = vperm.xlu1 %4143, %v3063_v43   ;;  %v5840_v43 = vpop.permute.xlu1 %2654 }
 0x974   :  { %2639 = vperm.xlu0 %4142, %v2602_v52  }
 0x977   :  { %3091 = vperm.xlu1 %4143, %v3064_v46  }
 0x978   :  { %2645 = vperm.xlu0 %4142, %v2604_v34  }
 0x97b   :  { %3094 = vperm.xlu1 %4143, %v3065_v50  }
 0x97c   :  { %2651 = vperm.xlu0 %4142, %v2606_v35  }
 0x97f   :  { %3097 = vperm.xlu1 %4143, %v3066_v1  }
 0x980   :  { %3082 = vperm.xlu0 %4142, %v3061_v5  }
 0x984   :  { %3112 = vperm.xlu0 %4142, %v3071_v4  }
 0x988   :  { %3115 = vperm.xlu0 %4142, %v3072_v8  }
 0x98c   :  { %3118 = vperm.xlu0 %4142, %v3073_v19  }
 0x990   :  { %3121 = vperm.xlu0 %4142, %v3074_v15  }
 0x9d3   :  { %v5842_v52 = vpop.xlane.xlu1 %3423 }
 0x9d4   :  { %v3433_v40 = vrot.slane %v5842_v52, %v4476_v7  ;;  %v3437_v17 = vrot.slane %v5842_v52, %v4529_v21  ;;  %v3441_v58 = vrot.slane %v5842_v52, %v4534_v23 }
 0x9d6   :  { %vm3510_vm13 = vcmp.eq.f32.partialorder %v5588_v48, %v3433_v40  ;;  %vm3511_vm14 = vcmp.eq.f32.partialorder %v5592_v36, %v3437_v17  ;;  %vm3512_vm1 = vcmp.eq.f32.partialorder %v5596_v60, %v3441_v58  ;;  %v3445_v48 = vrot.slane %v5842_v52, %v4537_v24  ;;  %v6143_v40 = vld [vmem:[#allocation33_spill] sm:$0xff] }
 0x9d7   :  { %v5849_v0 = vpop.permute.xlu1 %3076  ;;  %v3526_v47 = vsel %vm3510_vm13, %v4745_v49, 8  ;;  %v3527_v34 = vsel %vm3511_vm14, %v4745_v49, 8  ;;  %v3528_v25 = vsel %vm3512_vm1, %v4745_v49, 8  ;;  %v3449_v36 = vrot.slane %v5842_v52, %v4544_v27 }
 0x9d8   :  { %3543 = vperm.xlu1 %4143, %v3526_v47   ;;  %vm3513_vm15 = vcmp.eq.f32.partialorder %v5600_v55, %v3445_v48  ;;  %v3453_v60 = vrot.slane %v5842_v52, %v4547_v28  ;;  %v3457_v55 = vrot.slane %v5842_v52, %v4592_v62 }
 0x9d9   :  { %v3529_v59 = vsel %vm3513_vm15, %v4745_v49, 8  ;;  %vm3514_vm4 = vcmp.eq.f32.partialorder %v5604_v30, %v3449_v36 }
 0x9da   :  { %v3530_v9 = vsel %vm3514_vm4, %v4745_v49, 8  ;;  %vm3515_vm5 = vcmp.eq.f32.partialorder %v5608_v41, %v3453_v60  ;;  %vm3516_vm13 = vcmp.eq.f32.partialorder %v5612_v44, %v3457_v55 }
 0x9db   :  { %v5855_v46 = vpop.permute.xlu1 %3079  ;;  %v3531_v13 = vsel %vm3515_vm5, %v4745_v49, 8  ;;  %v3532_v4 = vsel %vm3516_vm13, %v4745_v49, 8 }
 0x9dc   :  { %3546 = vperm.xlu1 %4143, %v3527_v34  }
 0x9df   :  { %v5861_v31 = vpop.permute.xlu1 %3100 }
 0x9e0   :  { %3549 = vperm.xlu1 %4143, %v3528_v25  }
 0x9e3   :  { %v5867_v26 = vpop.permute.xlu1 %3103 }
 0x9e4   :  { %3552 = vperm.xlu1 %4143, %v3529_v59   ;;  %v3162_v55 = vrot.slane %v5867_v26, %v4707_v56 }
 0x9e7   :  { %v5873_v50 = vpop.xlane.xlu0 %3426  ;;  %v5875_v35 = vpop.permute.xlu1 %3106 }
 0x9e8   :  { %3555 = vperm.xlu1 %4143, %v3530_v9   ;;  %v3477_v33 = vrot.slane %v5873_v50, %v4537_v24  ;;  %v3481_v30 = vrot.slane %v5873_v50, %v4544_v27  ;;  %v3461_v24 = vrot.slane %v5842_v52, %v4567_v39  ;;  %v3485_v27 = vrot.slane %v5873_v50, %v4547_v28 }
 0x9e9   :  { %v3469_v54 = vrot.slane %v5873_v50, %v4529_v21 }
 0x9ea   :  { %vm3521_vm0 = vcmp.eq.f32.partialorder %v5651_v6, %v3477_v33  ;;  %vm3522_vm1 = vcmp.eq.f32.partialorder %v5675_v61, %v3481_v30  ;;  %v2737_v6 = vcvt.s32.f32 %v2735_v51  ;;  %vm3517_vm15 = vcmp.eq.f32.partialorder %v5661_v63, %v3461_v24 }
 0x9eb   :  { %v5887_v1 = vpop.xlane.xlu0 %2739  ;;  %v3537_v5 = vsel %vm3521_vm0, %v4745_v49, 8  ;;  %v3086_v41 = vpop.permute.xlu1 %3085  ;;  %v3538_v20 = vsel %vm3522_vm1, %v4745_v49, 8  ;;  %vm3523_vm4 = vcmp.eq.f32.partialorder %v5681_v57, %v3485_v27  ;;  %v3465_v61 = vrot.slane %v5873_v50, %v4476_v7 }
 0x9ec   :  { %vm2741_vm14 = vcmp.eq.f32.partialorder %v5771_v14, %v5887_v1  ;;  %3576 = vperm.xlu0 %4142, %v3537_v5   ;;  %3558 = vperm.xlu1 %4143, %v3531_v13   ;;  %v3489_v14 = vrot.slane %v5873_v50, %v4592_v62  ;;  %v3539_v38 = vsel %vm3523_vm4, %v4745_v49, 8  ;;  %v3533_v8 = vsel %vm3517_vm15, %v4745_v49, 8 }
 0x9ed   :  { %v5902_v44 = vsel %vm2741_vm14, %v2737_v6, inf  ;;  %v3493_v63 = vrot.slane %v5873_v50, %v4567_v39  ;;  %vm3518_vm0 = vcmp.eq.f32.partialorder %v5630_v53, %v3465_v61  ;;  %v2703_v62 = vrot.slane %v5722_v2, %v4707_v56 }
 0x9ee   :  { %vm3524_vm5 = vcmp.eq.f32.partialorder %v5686_v42, %v3489_v14  ;;  %v3534_v15 = vsel %vm3518_vm0, %v4745_v49, 8  ;;  %vm3519_vm14 = vcmp.eq.f32.partialorder %v5627_v22, %v3469_v54  ;;  %v3473_v53 = vrot.slane %v5873_v50, %v4534_v23 }
 0x9ef   :  { %v5909_v28 = vpop.permute.xlu1 %3109  ;;  %v3540_v10 = vsel %vm3524_vm5, %v4745_v49, 8  ;;  %vm3525_vm13 = vcmp.eq.f32.partialorder %v5692_v45, %v3493_v63  ;;  %v3535_v32 = vsel %vm3519_vm14, %v4745_v49, 8  ;;  %v3130_v22 = vrot.slane %v5855_v46, %v4707_v56 }
 0x9f0   :  { %3579 = vperm.xlu0 %4142, %v3538_v20   ;;  %3561 = vperm.xlu1 %4143, %v3532_v4   ;;  %v3541_v45 = vsel %vm3525_vm13, %v4745_v49, 8  ;;  %vm3520_vm1 = vcmp.eq.f32.partialorder %v6143_v40, %v3473_v53  ;;  %v3138_v48 = vrot.slane %v3086_v41, %v4707_v56  ;;  %v3166_v30 = vrot.slane %v5875_v35, %v4707_v56 }
 0x9f1   :  { %v3536_v47 = vsel %vm3520_vm1, %v4745_v49, 8  ;;  %v3158_v13 = vrot.slane %v5861_v31, %v4707_v56  ;;  %v3170_v24 = vrot.slane %v5909_v28, %v4707_v56 }
 0x9f3   :  { %v2640_v3 = vpop.permute.xlu0 %2639  ;;  %v3089_v16 = vpop.permute.xlu1 %3088  ;;  %v3194_v26 = vsel %vm829_vm6, %v3162_v55, %v3158_v13 }
 0x9f4   :  { %v2699_v57 = vrot.slane %v2640_v3, %v4707_v56  ;;  %3582 = vperm.xlu0 %4142, %v3539_v38   ;;  %3564 = vperm.xlu1 %4143, %v3533_v8   ;;  %v3142_v46 = vrot.slane %v3089_v16, %v4707_v56  ;;  %v3195_v4 = vsel %vm1063_vm7, %v3166_v30, %v3194_v26 }
 0x9f5   :  { %v3196_v31 = vsel %vm1065_vm8, %v3170_v24, %v3195_v4 }
 0x9f6   :  { %v2728_v11 = vsel %vm1063_vm7, %v2699_v57, %v5719_v12  ;;  %v2711_v12 = vrot.slane %v5838_v29, %v4707_v56  ;;  %v3126_v29 = vrot.slane %v5849_v0, %v4707_v56 }
 0x9f7   :  { %v2729_v19 = vsel %vm1065_vm8, %v2703_v62, %v2728_v11  ;;  %v2646_v39 = vpop.permute.xlu0 %2645  ;;  %v3092_v23 = vpop.permute.xlu1 %3091 }
 0x9f8   :  { %v2707_v42 = vrot.slane %v2646_v39, %v4707_v56  ;;  %3585 = vperm.xlu0 %4142, %v3540_v10   ;;  %3567 = vperm.xlu1 %4143, %v3534_v15   ;;  %v3187_v34 = vsel %vm829_vm6, %v3130_v22, %v3126_v29  ;;  %v3146_v9 = vrot.slane %v3092_v23, %v4707_v56 }
 0x9f9   :  { %v2719_v39 = vrot.slane %v5840_v43, %v4707_v56 }
 0x9fa   :  { %v2730_v2 = vsel %vm1067_vm9, %v2707_v42, %v2729_v19 }
 0x9fb   :  { %v2652_v37 = vpop.permute.xlu0 %2651  ;;  %v2731_v18 = vsel %vm1069_vm10, %v2711_v12, %v2730_v2  ;;  %v3095_v60 = vpop.permute.xlu1 %3094 }
 0x9fc   :  { %3588 = vperm.xlu0 %4142, %v3541_v45   ;;  %3570 = vperm.xlu1 %4143, %v3535_v32   ;;  %v3150_v51 = vrot.slane %v3095_v60, %v4707_v56  ;;  %v2715_v8 = vrot.slane %v2652_v37, %v4707_v56  ;;  %v3709_v37 = vld [vmem:[#allocation2 + $0xe] sm:$0x3] }
 0x9fe   :  { %v2732_v11 = vsel %vm1071_vm11, %v2715_v8, %v2731_v18  ;;  %v3721_v18 = vrot.slane %v3709_v37, %v4529_v21 }
 0x9ff   :  { %v3083_v17 = vpop.permute.xlu0 %3082  ;;  %v3098_v5 = vpop.permute.xlu1 %3097  ;;  %v2733_v15 = vsel %vm1073_vm12, %v2719_v39, %v2732_v11 }
 0xa00   :  { %v3134_v58 = vrot.slane %v3083_v17, %v4707_v56  ;;  %3573 = vperm.xlu1 %4143, %v3536_v47   ;;  %v3154_v20 = vrot.slane %v3098_v5, %v4707_v56  ;;  %v5993_v53 = vsel %vm780_vm3, %v2733_v15, 2147483647 }
 0xa01   :  { %v2751_v2 = vshra.s32 %v5993_v53, 16 }
 0xa02   :  { %v3188_v25 = vsel %vm1063_vm7, %v3134_v58, %v3187_v34 }
 0xa03   :  { %v3189_v36 = vsel %vm1065_vm8, %v3138_v48, %v3188_v25  ;;  %v3113_v59 = vpop.permute.xlu0 %3112  ;;  %v5999_v43 = vcvt.s32.f32 %v2751_v2 }
 0xa04   :  { %v3190_v0 = vsel %vm1067_vm9, %v3142_v46, %v3189_v36  ;;  %v3174_v6 = vrot.slane %v3113_v59, %v4707_v56 }
 0xa05   :  { %v3191_v33 = vsel %vm1069_vm10, %v3146_v9, %v3190_v0 }
 0xa06   :  { %v3192_v27 = vsel %vm1071_vm11, %v3150_v51, %v3191_v33  ;;  %v3197_v3 = vsel %vm1067_vm9, %v3174_v6, %v3196_v31 }
 0xa07   :  { %v3116_v49 = vpop.permute.xlu0 %3115  ;;  %v3193_v61 = vsel %vm1073_vm12, %v3154_v20, %v3192_v27 }
 0xa08   :  { %v3178_v35 = vrot.slane %v3116_v49, %v4707_v56  ;;  %v5977_v57 = vsel %vm780_vm3, %v3193_v61, 2147483647 }
 0xa09   :  { %v3203_v19 = vshra.s32 %v5977_v57, 16 }
 0xa0a   :  { %v3198_v63 = vsel %vm1069_vm10, %v3178_v35, %v3197_v3 }
 0xa0b   :  { %v3119_v41 = vpop.permute.xlu0 %3118  ;;  %v5988_v16 = vcvt.s32.f32 %v3203_v19 }
 0xa0c   :  { %v3182_v14 = vrot.slane %v3119_v41, %v4707_v56 }
 0xa0e   :  { %v3199_v54 = vsel %vm1071_vm11, %v3182_v14, %v3198_v63 }
 0xa0f   :  { %v3122_v28 = vpop.permute.xlu0 %3121 }
 0xa10   :  { %v3186_v38 = vrot.slane %v3122_v28, %v4707_v56 }
 0xa12   :  { %v3200_v62 = vsel %vm1073_vm12, %v3186_v38, %v3199_v54 }
 0xa13   :  { %v5985_v10 = vsel %vm780_vm3, %v3200_v62, 2147483647 }
 0xa14   :  { %v3218_v42 = vshra.s32 %v5985_v10, 16 }
 0xa16   :  { %v5995_v12 = vcvt.s32.f32 %v3218_v42 }
 0xa1b   :  { %3206 = vmin.xlane.f32.xlu0 %v5988_v16 }
 0xa1f   :  { %3221 = vmin.xlane.f32.xlu0 %v5995_v12 }
 0xa24   :  { %2754 = vmin.xlane.f32.xlu1 %v5999_v43 }
 0xa35   :  { %3723 = vbcast.lane.b32.xlu1 %v3721_v18, 256 }
 0xa57   :  { %v3544_v45 = vpop.permute.xlu1 %3543 }
 0xa58   :  { %v3593_v34 = vrot.slane %v3544_v45, %v4707_v56 }
 0xa5b   :  { %v3547_v32 = vpop.permute.xlu1 %3546 }
 0xa5c   :  { %v3597_v47 = vrot.slane %v3547_v32, %v4707_v56  ;;  %v3714_v32 = vrot.slane %v3709_v37, %v4476_v7  ;;  %v3217_v7 = vand.u32 65535, %v5985_v10 }
 0xa5e   :  { %v3654_v21 = vsel %vm829_vm6, %v3597_v47, %v3593_v34  ;;  %v3202_v47 = vand.u32 65535, %v5977_v57 }
 0xa5f   :  { %v3550_v40 = vpop.permute.xlu1 %3549 }
 0xa60   :  { %v3601_v58 = vrot.slane %v3550_v40, %v4707_v56  ;;  %v3804_v40 = vld [vmem:[#allocation11] ss:$0 sm:$0xff] }
 0xa62   :  { %v3655_v60 = vsel %vm1063_vm7, %v3601_v58, %v3654_v21 }
 0xa63   :  { %v3553_v22 = vpop.permute.xlu1 %3552 }
 0xa64   :  { %v3605_v48 = vrot.slane %v3553_v22, %v4707_v56  ;;  %v2750_v22 = vand.u32 65535, %v5993_v53  ;;  %v3219_v53 = vcvt.s32.f32 %v3217_v7 }
 0xa66   :  { %v3656_v9 = vsel %vm1065_vm8, %v3605_v48, %v3655_v60  ;;  %v3204_v48 = vcvt.s32.f32 %v3202_v47 }
 0xa67   :  { %v3556_v23 = vpop.permute.xlu1 %3555 }
 0xa68   :  { %v3609_v25 = vrot.slane %v3556_v23, %v4707_v56 }
 0xa6a   :  { %v3657_v49 = vsel %vm1067_vm9, %v3609_v25, %v3656_v9 }
 0xa6b   :  { %v3577_v29 = vpop.permute.xlu0 %3576  ;;  %v3559_v17 = vpop.permute.xlu1 %3558 }
 0xa6c   :  { %v3613_v59 = vrot.slane %v3559_v17, %v4707_v56  ;;  %v3637_v61 = vrot.slane %v3577_v29, %v4707_v56  ;;  %v2752_v17 = vcvt.s32.f32 %v2750_v22 }
 0xa6e   :  { %v3658_v33 = vsel %vm1069_vm10, %v3613_v59, %v3657_v49 }
 0xa6f   :  { %v3562_v36 = vpop.permute.xlu1 %3561  ;;  %v3580_v46 = vpop.permute.xlu0 %3579 }
 0xa70   :  { %v3617_v0 = vrot.slane %v3562_v36, %v4707_v56  ;;  %v3641_v3 = vrot.slane %v3580_v46, %v4707_v56 }
 0xa72   :  { %v3659_v51 = vsel %vm1071_vm11, %v3617_v0, %v3658_v33 }
 0xa73   :  { %v3565_v55 = vpop.permute.xlu1 %3564  ;;  %v3583_v5 = vpop.permute.xlu0 %3582 }
 0xa74   :  { %v3621_v30 = vrot.slane %v3565_v55, %v4707_v56  ;;  %v3645_v63 = vrot.slane %v3583_v5, %v4707_v56 }
 0xa76   :  { %v3660_v13 = vsel %vm1073_vm12, %v3621_v30, %v3659_v51 }
 0xa77   :  { %v3568_v24 = vpop.permute.xlu1 %3567  ;;  %v3668_v41 = vsel %vm780_vm3, %v3660_v13, 2147483647  ;;  %v3586_v20 = vpop.permute.xlu0 %3585 }
 0xa78   :  { %v3670_v27 = vshra.s32 %v3668_v41, 16  ;;  %v3625_v4 = vrot.slane %v3568_v24, %v4707_v56  ;;  %v3649_v62 = vrot.slane %v3586_v20, %v4707_v56  ;;  %v3669_v57 = vand.u32 65535, %v3668_v41 }
 0xa7a   :  { %v3672_v6 = vcvt.s32.f32 %v3670_v27 }
 0xa7b   :  { %v3571_v26 = vpop.permute.xlu1 %3570  ;;  %v3589_v38 = vpop.permute.xlu0 %3588 }
 0xa7c   :  { %3673 = vmin.xlane.f32.xlu0 %v3672_v6  ;;  %v3629_v35 = vrot.slane %v3571_v26, %v4707_v56  ;;  %v3653_v19 = vrot.slane %v3589_v38, %v4707_v56 }
 0xa7e   :  { %v3661_v28 = vsel %vm829_vm6, %v3629_v35, %v3625_v4 }
 0xa7f   :  { %v3574_v14 = vpop.permute.xlu1 %3573 }
 0xa80   :  { %v3633_v31 = vrot.slane %v3574_v14, %v4707_v56 }
 0xa82   :  { %v3662_v8 = vsel %vm1063_vm7, %v3633_v31, %v3661_v28 }
 0xa83   :  { %v3663_v54 = vsel %vm1065_vm8, %v3637_v61, %v3662_v8 }
 0xa84   :  { %v3664_v11 = vsel %vm1067_vm9, %v3641_v3, %v3663_v54 }
 0xa85   :  { %v3665_v39 = vsel %vm1069_vm10, %v3645_v63, %v3664_v11 }
 0xa86   :  { %v3666_v15 = vsel %vm1071_vm11, %v3649_v62, %v3665_v39 }
 0xa87   :  { %v3667_v42 = vsel %vm1073_vm12, %v3653_v19, %v3666_v15 }
 0xa88   :  { %v3683_v2 = vsel %vm780_vm3, %v3667_v42, 2147483647 }
 0xa89   :  { %v3685_v18 = vshra.s32 %v3683_v2, 16  ;;  %v3684_v59 = vand.u32 65535, %v3683_v2 }
 0xa8b   :  { %v3687_v45 = vcvt.s32.f32 %v3685_v18  ;;  %v3686_v10 = vcvt.s32.f32 %v3684_v59 }
 0xa8d   :  { %3688 = vmin.xlane.f32.xlu1 %v3687_v45 }
 0xa92   :  { %3716 = vbcast.lane.b32.xlu0 %v3714_v32, 256 }
 0xa9e   :  { %3736 = vbcast.lane.b32.xlu1 %v3804_v40, 256 }
 0xaa8   :  { %v3207_v23 = vpop.xlane.xlu0 %3206 }
 0xaa9   :  { %vm3208_vm3 = vcmp.eq.f32.partialorder %v5988_v16, %v3207_v23  ;;  %v3213_v30 = vcvt.f32.s32 %v3207_v23 }
 0xaaa   :  { %v3209_v37 = vsel %vm3208_vm3, %v3204_v48, inf }
 0xaab   :  { %v3214_v24 = vshll.u32 %v3213_v30, 16 }
 0xaac   :  { %v3222_v34 = vpop.xlane.xlu0 %3221 }
 0xaad   :  { %vm3223_vm8 = vcmp.eq.f32.partialorder %v5995_v12, %v3222_v34  ;;  %v3228_v5 = vcvt.f32.s32 %v3222_v34 }
 0xaae   :  { %v3224_v25 = vsel %vm3223_vm8, %v3219_v53, inf }
 0xaaf   :  { %v3229_v27 = vshll.u32 %v3228_v5, 16 }
 0xab1   :  { %v2755_v29 = vpop.xlane.xlu1 %2754 }
 0xab2   :  { %vm2756_vm7 = vcmp.eq.f32.partialorder %v5999_v43, %v2755_v29  ;;  %v3671_v43 = vcvt.s32.f32 %v3669_v57 }
 0xab3   :  { %v2757_v58 = vsel %vm2756_vm7, %v2752_v17, inf }
 0xab4   :  { %2758 = vmin.xlane.f32.xlu0 %v2757_v58 }
 0xab5   :  { %v3724_v16 = vpop.permute.xlu1 %3723 }
 0xab8   :  { %3210 = vmin.xlane.f32.xlu0 %v3209_v37 }
 0xabc   :  { %3225 = vmin.xlane.f32.xlu0 %v3224_v25 }
 0xac2   :  { %2743 = vmin.xlane.f32.xlu1 %v5902_v44  ;;  %v3728_v44 = vadd.f32 %v3724_v16, %v5873_v50 }
 0xb09   :  { %v3674_v36 = vpop.xlane.xlu0 %3673 }
 0xb0a   :  { %vm3675_vm9 = vcmp.eq.f32.partialorder %v3672_v6, %v3674_v36  ;;  %v2761_v6 = vcvt.f32.s32 %v2755_v29  ;;  %v3680_v19 = vcvt.f32.s32 %v3674_v36 }
 0xb0b   :  { %v3676_v21 = vsel %vm3675_vm9, %v3671_v43, inf }
 0xb0c   :  { %3677 = vmin.xlane.f32.xlu1 %v3676_v21  ;;  %v2762_v14 = vshll.u32 %v2761_v6, 16  ;;  %v3681_v42 = vshll.u32 %v3680_v19, 16 }
 0xb0d   :  { %v3717_v46 = vpop.permute.xlu0 %3716 }
 0xb0e   :  { %v3727_v12 = vadd.f32 %v3717_v46, %v5842_v52  ;;  %v2746_v52 = vcvt.f32.s32 %v5887_v1 }
 0xb10   :  { %v2747_v28 = vshll.u32 %v2746_v52, 16 }
 0xb1a   :  { %v3689_v60 = vpop.xlane.xlu1 %3688 }
 0xb1b   :  { %vm3690_vm10 = vcmp.eq.f32.partialorder %v3687_v45, %v3689_v60  ;;  %v3695_v39 = vcvt.f32.s32 %v3689_v60 }
 0xb1c   :  { %v3691_v0 = vsel %vm3690_vm10, %v3686_v10, inf }
 0xb1d   :  { %3692 = vmin.xlane.f32.xlu0 %v3691_v0  ;;  %v3696_v18 = vshll.u32 %v3695_v39, 16 }
 0xb1e   :  { %v3737_v9 = vpop.permute.xlu1 %3736 }
 0xb1f   :  { %v3739_v49 = vadd.f32 %v3737_v9, %v3727_v12  ;;  %v3740_v55 = vadd.f32 %v3737_v9, %v3728_v44 }
 0xb21   :  { %3744 = vperm.xlu1 %4143, %v3739_v49  }
 0xb33   :  { %3747 = vperm.xlu0 %4142, %v3740_v55  }
 0xb41   :  { %v2759_v33 = vpop.xlane.xlu0 %2758 }
 0xb42   :  { %v2760_v35 = vcvt.f32.s32 %v2759_v33 }
 0xb44   :  { %v2763_v3 = vadd.s32 %v2762_v14, %v2760_v35 }
 0xb45   :  { %v3211_v51 = vpop.xlane.xlu0 %3210 }
 0xb46   :  { %v3212_v13 = vcvt.f32.s32 %v3211_v51  ;;  %v2771_v54 = vrot.slane %v2763_v3, %v4707_v56 }
 0xb48   :  { %v3215_v26 = vadd.s32 %v3214_v24, %v3212_v13 }
 0xb49   :  { %v3226_v41 = vpop.xlane.xlu0 %3225 }
 0xb4a   :  { %v3227_v20 = vcvt.f32.s32 %v3226_v41  ;;  %v3234_v50 = vrot.slane %v3215_v26, %v4707_v56 }
 0xb4c   :  { %v3230_v4 = vadd.s32 %v3229_v27, %v3227_v20 }
 0xb4e   :  { %v3238_v31 = vrot.slane %v3230_v4, %v4707_v56 }
 0xb4f   :  { %v2744_v61 = vpop.xlane.xlu1 %2743 }
 0xb50   :  { %v3239_v38 = vsel %vm829_vm6, %v3238_v31, %v3234_v50  ;;  %v2745_v8 = vcvt.f32.s32 %v2744_v61 }
 0xb51   :  { %3241 = vst.msk [vmem:[#allocation14 + $0xc] sm:$0x3] %vm191_vm2, %v3239_v38 }
 0xb52   :  { %v2748_v63 = vadd.s32 %v2747_v28, %v2745_v8 }
 0xb54   :  { %v2767_v1 = vrot.slane %v2748_v63, %v4707_v56 }
 0xb56   :  { %v2772_v62 = vsel %vm829_vm6, %v2771_v54, %v2767_v1 }
 0xb57   :  { %2774 = vst.msk [vmem:[#allocation14 + $0xa] sm:$0x3] %vm191_vm2, %v2772_v62 }
 0xb99   :  { %v3678_v11 = vpop.xlane.xlu1 %3677 }
 0xb9a   :  { %v3679_v15 = vcvt.f32.s32 %v3678_v11 }
 0xb9c   :  { %v3682_v45 = vadd.s32 %v3681_v42, %v3679_v15 }
 0xb9e   :  { %v3701_v22 = vrot.slane %v3682_v45, %v4707_v56 }
 0xba0   :  { %v3745_v29 = vpop.permute.xlu1 %3744 }
 0xba1   :  { %v3752_v58 = vrot.slane %v3745_v29, %v4707_v56 }
 0xbaa   :  { %v3693_v2 = vpop.xlane.xlu0 %3692 }
 0xbab   :  { %v3694_v32 = vcvt.f32.s32 %v3693_v2 }
 0xbad   :  { %v3697_v40 = vadd.s32 %v3696_v18, %v3694_v32 }
 0xbaf   :  { %v3705_v23 = vrot.slane %v3697_v40, %v4707_v56 }
 0xbb1   :  { %v3706_v17 = vsel %vm829_vm6, %v3705_v23, %v3701_v22 }
 0xbb2   :  { %3708 = vst.msk [vmem:[#allocation14 + $0xe] sm:$0x3] %vm191_vm2, %v3706_v17  ;;  %v3748_v47 = vpop.permute.xlu0 %3747 }
 0xbb3   :  { %v3756_v34 = vrot.slane %v3748_v47, %v4707_v56 }
 0xbb4   :  { %4289 = shalt.err (!%p4286_p10)
}
 0xbb5   :  { %s4290_s10 = scalar_lea.hbm %s6095_s6, 256 }
 0xbb6   :  { %p4291_p11 = scmp.ne.s32.totalorder %s6095_s6, %s4290_s10  ;;  %p4294_p12 = scmp.lt.u32.totalorder %s4290_s10, %s6095_s6 }
 0xbb8   :  { %p4296_p13 = pnand %p4294_p12, %p4291_p11 }
 0xbba   :  { %4299 = shalt.err (!%p4296_p13)
}
 0xbbb   :  { %3771 = dma.vmem_to_hbm [thread:$0]  %s3766_s18, 256, %s6095_s6, [#allocation5], %s4339_s3, %s4339_s3, %s4340_s14   ;;  %v3757_v56 = vsel %vm829_vm6, %v3756_v34, %v3752_v58 }
 0xbbc   :  { %3759 = vst.msk [vmem:[#allocation15] sm:$0x3] %vm191_vm2, %v3757_v56  ;;  %s4300_s17 = scalar_lea.vmem %s3779_s29, 32  ;;  %p4305_p1 = scmp.lt.s32.totalorder %s3779_s29, %s3779_s29 }
 0xbbd   :  { %p4301_p0 = scmp.ne.s32.totalorder %s3779_s29, %s4300_s17  ;;  %p4306_p2 = scmp.lt.s32.totalorder %s4300_s17, %s4300_s17 }
 0xbbf   :  { %p4307_p3 = por %p4306_p2, %p4305_p1 }
 0xbc1   :  { %p4308_p4 = pnand %p4307_p3, %p4301_p0 }
 0xbc3   :  { %4311 = shalt.err (!%p4308_p4)
}
 0xbc4   :  { %s4312_s22 = scalar_lea.hbm %s6096_s7, 32 }
 0xbc5   :  { %p4313_p5 = scmp.ne.s32.totalorder %s6096_s7, %s4312_s22  ;;  %p4316_p6 = scmp.lt.u32.totalorder %s4312_s22, %s6096_s7 }
 0xbc7   :  { %p4318_p7 = pnand %p4316_p6, %p4313_p5 }
 0xbc9   :  { %4321 = shalt.err (!%p4318_p7)
}
 0xbca   :  { %3781 = dma.vmem_to_hbm [thread:$0]  %s3779_s29, 32, %s6096_s7, [#allocation16]  }
 0xbcb   :  { %4330 = dma.done.wait [#allocation5], 256  }
 0xbcc   :  { %4331 = vsyncadd [#allocation5], 4294967040 }
 0xbcd   :  { %4332 = dma.done.wait [#allocation16], 32  }
 0xbce   :  { %4333 = vsyncadd [#allocation16], 4294967264 }
 0xbcf   :  { %3788 = vsyncpa [#allocation4], 1 }
 0xbd0   :  { %3789 = vsyncpa [#allocation7], 1 }
 0xbd1   :  { %3790 = vsyncpa [#allocation10], 1 }
 0xbd2   :  { %3791 = vsyncpa [#allocation13], 1 }
 0xbd3   :  { %3792 = vsyncpa [#allocation5], 1 }
 0xbd4   :  { %3793 = vsyncpa [#allocation16], 1 }

</bundles_post_ra>
